<compile_context>
chip_gen: v5e
topology: v5e:2x2
jax: 0.10.0
libtpu: 0.0.40
codegen_flags: <defaults>
</compile_context>

<pallas_src>
import functools

import jax
import jax.numpy as jnp
from jax.experimental import pallas as pl
from jax.experimental.pallas import tpu as pltpu

CP = 128                        # padded channel width (lane-dense outputs)
VMEM_LIMIT = 32 * 1024 * 1024   # explicit scoped-VMEM cap; safe on v5e/v6e/v7x


def _pick_tile(n, target):
    """Largest divisor of n that is <= target and a multiple of 8 (or n)."""
    for t in range(min(n, target), 0, -1):
        if n % t == 0 and (t % 8 == 0 or t == n):
            return t
    return n


# --------------------------- conv1: im2col matmul ---------------------------

def _matmul_bias_relu_kernel(p_ref, w_ref, b_ref, o_ref):
    # o = relu(p @ w + b); bf16 MXU operands, f32 accumulation + epilogue.
    acc = jnp.dot(p_ref[...], w_ref[...], preferred_element_type=jnp.float32)
    o_ref[...] = jnp.maximum(acc + b_ref[...], 0.0).astype(o_ref.dtype)


def conv5x5_stride2(x_bhwc, w_kcp, b_cp):
    """First conv (Cin=5, 5x5, stride 2, pad 2) via im2col + M-tiled matmul.

    x: (B, H, W, 5) bf16  ->  (B, Ho, Wo, CP) float32 (16 real channels).
    """
    B, H, W, C = x_bhwc.shape
    k, stride, pad = 5, 2, 2
    xp = jnp.pad(x_bhwc, ((0, 0), (pad, pad), (pad, pad), (0, 0)))
    Ho = (H + 2 * pad - k) // stride + 1
    Wo = (W + 2 * pad - k) // stride + 1
    cols = []
    for kh in range(k):
        for kw in range(k):
            cols.append(xp[:, kh:kh + stride * Ho:stride,
                           kw:kw + stride * Wo:stride, :])
    patches = jnp.stack(cols, axis=3)                   # (B, Ho, Wo, k*k, C)
    patches = patches.reshape(B * Ho * Wo, k * k * C)   # K order = (kh, kw, c)
    K = k * k * C
    Kp = w_kcp.shape[0]                                 # K padded to 128-mult
    patches = jnp.pad(patches, ((0, 0), (0, Kp - K)))
    M = B * Ho * Wo
    TM = _pick_tile(M, 256)                             # modest tile: v7x VMEM

    out = pl.pallas_call(
        _matmul_bias_relu_kernel,
        grid=(M // TM,),
        in_specs=[
            pl.BlockSpec((TM, Kp), lambda i: (i, 0)),
            pl.BlockSpec((Kp, CP), lambda i: (0, 0)),   # VMEM-resident weight
            pl.BlockSpec((1, CP), lambda i: (0, 0)),    # VMEM-resident bias
        ],
        out_specs=pl.BlockSpec((TM, CP), lambda i: (i, 0)),
        out_shape=jax.ShapeDtypeStruct((M, CP), jnp.float32),
        compiler_params=pltpu.CompilerParams(
            dimension_semantics=("parallel",),
            vmem_limit_bytes=VMEM_LIMIT),
        cost_estimate=pl.CostEstimate(
            flops=2 * M * Kp * CP,
            transcendentals=0,
            bytes_accessed=M * Kp * 2 + Kp * CP * 2 + CP * 4 + M * CP * 4),
    )(patches, w_kcp, b_cp)
    return out.reshape(B, Ho, Wo, CP)


# --------------- conv2/conv3: shifted-slab conv (no HBM im2col) ---------------

def _conv5x5_shift_kernel(x_ref, w_ref, b_ref, o_ref, *, Wp, L):
    # x_ref: (1, Hp*Wp + guard, CP) f32 -- one spatially-padded image, flattened.
    # w_ref: (25, CP, CP) bf16, b_ref: (1, CP) f32, o_ref: (1, L, CP).
    # conv = sum over the 25 taps of a contiguous shifted slab @ W[tap];
    # im2col rows are formed from VMEM, never written to HBM.
    acc = jnp.zeros((L, CP), jnp.float32)
    for kh in range(5):
        for kw in range(5):
            off = kh * Wp + kw
            slab = x_ref[0, off:off + L, :].astype(jnp.bfloat16)
            acc = acc + jnp.dot(slab, w_ref[kh * 5 + kw],
                                preferred_element_type=jnp.float32)
    o_ref[0] = jnp.maximum(acc + b_ref[...], 0.0).astype(o_ref.dtype)


def conv5x5_stride1(x_bhwc, w_25cc, b_cp, out_dtype=jnp.float32):
    """5x5, stride 1, pad 2 conv + ReLU. (B, H, W, CP) -> (B, H, W, CP)."""
    B, H, W, C = x_bhwc.shape
    assert C == CP
    Ho, Wo = H, W
    Hp, Wp = H + 4, W + 4
    xp = jnp.pad(x_bhwc, ((0, 0), (2, 2), (2, 2), (0, 0)))
    xflat = xp.reshape(B, Hp * Wp, CP)
    guard = Wp - Wo                      # keep the last shifted slab in-bounds
    xflat = jnp.pad(xflat, ((0, 0), (0, guard), (0, 0)))
    Nrows = Hp * Wp + guard
    L = Ho * Wp                          # slab rows; only w < Wo cols are valid

    # TODO(synk): for very large spatial sizes, add an output-row-tile grid
    # axis (halo'd input blocks) instead of one whole image per grid step.
    kernel = functools.partial(_conv5x5_shift_kernel, Wp=Wp, L=L)
    out = pl.pallas_call(
        kernel,
        grid=(B,),
        in_specs=[
            pl.BlockSpec((1, Nrows, CP), lambda b: (b, 0, 0)),
            pl.BlockSpec((25, CP, CP), lambda b: (0, 0, 0)),  # resident weight
            pl.BlockSpec((1, CP), lambda b: (0, 0)),          # resident bias
        ],
        out_specs=pl.BlockSpec((1, L, CP), lambda b: (b, 0, 0)),
        out_shape=jax.ShapeDtypeStruct((B, L, CP), out_dtype),
        compiler_params=pltpu.CompilerParams(
            dimension_semantics=("parallel",),
            vmem_limit_bytes=VMEM_LIMIT),
        cost_estimate=pl.CostEstimate(
            flops=2 * B * L * CP * CP * 25,
            transcendentals=0,
            bytes_accessed=B * Nrows * CP * 4 + 25 * CP * CP * 2 + CP * 4
            + B * L * CP * jnp.dtype(out_dtype).itemsize),
    )(xflat, w_25cc, b_cp)
    # rows are (h * Wp + w); keep only the valid columns w < Wo.
    return out.reshape(B, Ho, Wp, CP)[:, :, :Wo, :]


# ------------- fused 1x1 convs + global spatial max (tail kernel) -------------

def _tail_kernel(x_ref, w4_ref, b4_ref, w5_ref, b5_ref, o_ref):
    t = pl.program_id(1)
    x = x_ref[0]                                                  # (THW, CP) bf16
    h = jnp.dot(x, w4_ref[...], preferred_element_type=jnp.float32)
    h = jnp.maximum(h + b4_ref[...], 0.0).astype(jnp.bfloat16)
    h = jnp.dot(h, w5_ref[...], preferred_element_type=jnp.float32)
    h = jnp.maximum(h + b5_ref[...], 0.0)                         # (THW, CP) f32
    tile_max = jnp.max(h, axis=0, keepdims=True)                  # (1, CP)

    @pl.when(t == 0)
    def _():
        o_ref[0] = tile_max

    @pl.when(t > 0)
    def _():
        o_ref[0] = jnp.maximum(o_ref[0], tile_max)


def fused_1x1_convs_and_max(h_bhwc, w4, b4, w5, b5):
    """relu(relu(h @ W4 + b4) @ W5 + b5), then max over spatial -> (B, CP)."""
    B, H, W, C = h_bhwc.shape
    assert C == CP
    HW = H * W
    x = h_bhwc.reshape(B, HW, CP)
    THW = _pick_tile(HW, 512)

    out = pl.pallas_call(
        _tail_kernel,
        grid=(B, HW // THW),
        in_specs=[
            pl.BlockSpec((1, THW, CP), lambda b, t: (b, t, 0)),
            pl.BlockSpec((CP, CP), lambda b, t: (0, 0)),
            pl.BlockSpec((1, CP), lambda b, t: (0, 0)),
            pl.BlockSpec((CP, CP), lambda b, t: (0, 0)),
            pl.BlockSpec((1, CP), lambda b, t: (0, 0)),
        ],
        out_specs=pl.BlockSpec((1, 1, CP), lambda b, t: (b, 0, 0)),
        out_shape=jax.ShapeDtypeStruct((B, 1, CP), jnp.float32),
        compiler_params=pltpu.CompilerParams(
            dimension_semantics=("parallel", "arbitrary"),
            vmem_limit_bytes=VMEM_LIMIT),
        cost_estimate=pl.CostEstimate(
            flops=4 * B * HW * CP * CP,
            transcendentals=0,
            bytes_accessed=B * HW * CP * 2 + 2 * CP * CP * 2 + 2 * CP * 4
            + B * CP * 4),
    )(x, w4, b4, w5, b5)
    return out[:, 0, :]


# ----------------------------- parameter prep -------------------------------

def _prep_conv1_params(w_oihw, b):
    Cout, Cin, k, _ = w_oihw.shape
    w = jnp.transpose(w_oihw, (2, 3, 1, 0)).reshape(k * k * Cin, Cout)
    K = k * k * Cin
    Kp = ((K + 127) // 128) * 128
    w = jnp.pad(w, ((0, Kp - K), (0, CP - Cout))).astype(jnp.bfloat16)
    bp = jnp.pad(b, (0, CP - Cout)).reshape(1, CP).astype(jnp.float32)
    return w, bp


def _prep_conv5x5_params(w_oihw, b):
    Cout, Cin, k, _ = w_oihw.shape
    w = jnp.transpose(w_oihw, (2, 3, 1, 0))                 # (kh, kw, Cin, Cout)
    w = jnp.pad(w, ((0, 0), (0, 0), (0, CP - Cin), (0, CP - Cout)))
    w = w.reshape(k * k, CP, CP).astype(jnp.bfloat16)
    bp = jnp.pad(b, (0, CP - Cout)).reshape(1, CP).astype(jnp.float32)
    return w, bp


def _prep_1x1_params(w_oihw, b):
    Cout, Cin = w_oihw.shape[0], w_oihw.shape[1]
    w = w_oihw.reshape(Cout, Cin).T                          # (Cin, Cout)
    w = jnp.pad(w, ((0, CP - Cin), (0, CP - Cout))).astype(jnp.bfloat16)
    bp = jnp.pad(b, (0, CP - Cout)).reshape(1, CP).astype(jnp.float32)
    return w, bp


def make_pos_nhwc(size):
    col = jnp.tile(jnp.arange(size, dtype=jnp.float32)[None, :], (size, 1))
    row = col.T
    return jnp.stack([col, row], axis=-1)[None] / size       # (1, S, S, 2)


def init_params(key):
    """Deterministic synthetic parameters matching SharedNet's conv shapes."""
    shapes = [
        (16, 5, 5, 5),    # Conv2d(3+2, 16, 5, stride=2, padding=2)
        (32, 16, 5, 5),   # Conv2d(16, 32, 5, padding=2)
        (64, 32, 5, 5),   # Conv2d(32, 64, 5, padding=2)
        (64, 64, 1, 1),   # Conv2d(64, 64, 1)
        (64, 64, 1, 1),   # Conv2d(64, 64, 1)
    ]
    params = []
    for shp in shapes:
        key, kw_, kb_ = jax.random.split(key, 3)
        fan_in = shp[1] * shp[2] * shp[3]
        scale = 1.0 / jnp.sqrt(jnp.float32(fan_in))
        w = jax.random.uniform(kw_, shp, jnp.float32, -scale, scale)
        b = jax.random.uniform(kb_, (shp[0],), jnp.float32, -scale, scale)
        params.append((w, b))
    return params


# --------------------------------- forward ----------------------------------

@functools.partial(jax.jit, static_argnums=(2,))
def shared_net_forward(x_nchw, params, size):
    B = x_nchw.shape[0]
    x = jnp.transpose(x_nchw, (0, 2, 3, 1))                  # one NCHW->NHWC
    pos = jnp.broadcast_to(make_pos_nhwc(size), (B, size, size, 2))
    h = jnp.concatenate([x, pos], axis=-1).astype(jnp.bfloat16)   # (B, S, S, 5)

    (w1, b1), (w2, b2), (w3, b3), (w4, b4), (w5, b5) = params
    w1p, b1p = _prep_conv1_params(w1, b1)
    w2p, b2p = _prep_conv5x5_params(w2, b2)
    w3p, b3p = _prep_conv5x5_params(w3, b3)
    w4p, b4p = _prep_1x1_params(w4, b4)
    w5p, b5p = _prep_1x1_params(w5, b5)

    h = conv5x5_stride2(h, w1p, b1p)                         # (B, S/2, S/2, CP)
    h = conv5x5_stride1(h, w2p, b2p, out_dtype=jnp.float32)  # 32 real channels
    h = conv5x5_stride1(h, w3p, b3p, out_dtype=jnp.bfloat16) # 64 real channels
    out = fused_1x1_convs_and_max(h, w4p, b4p, w5p, b5p)     # (B, CP) f32
    return out[:, :w5.shape[0]]                              # real channels


@functools.partial(jax.jit, static_argnums=(2,))
def shared_net_reference(x_nchw, params, size):
    """Pure-JAX f32 reference of the PyTorch module (validation only)."""
    B = x_nchw.shape[0]
    x = jnp.transpose(x_nchw, (0, 2, 3, 1))
    pos = jnp.broadcast_to(make_pos_nhwc(size), (B, size, size, 2))
    h = jnp.concatenate([x, pos], axis=-1)
    strides = [2, 1, 1, 1, 1]
    pads = [2, 2, 2, 0, 0]
    for (w, b), s, p in zip(params, strides, pads):
        wh = jnp.transpose(w, (2, 3, 1, 0))                  # HWIO
        h = jax.lax.conv_general_dilated(
            h, wh, window_strides=(s, s), padding=[(p, p), (p, p)],
            dimension_numbers=("NHWC", "HWIO", "NHWC"))
        h = jnp.maximum(h + b[None, None, None, :], 0.0)
    return jnp.max(h, axis=(1, 2))


if __name__ == "__main__":
    size = 16
    batch = 2
    key = jax.random.PRNGKey(0)
    k_x, k_p = jax.random.split(key)
    x = jax.random.uniform(k_x, (batch, 3, size, size), jnp.float32)
    params = init_params(k_p)

    out = jax.block_until_ready(shared_net_forward(x, params, size))
    assert out.shape == (batch, 64), out.shape
    assert out.dtype == jnp.float32

    ref = jax.block_until_ready(shared_net_reference(x, params, size))
    err = float(jnp.max(jnp.abs(out - ref)))
    assert err < 5e-2, f"max |err| vs f32 reference too large: {err}"

    print("KERNEL_OK")
</pallas_src>

<mosaic_0001>
module attributes {stable_mosaic.version = 11 : i64} {
  func.func @_matmul_bias_relu_kernel(%arg0: i32, %arg1: memref<128x128xbf16, #tpu.memory_space<vmem>>, %arg2: memref<128x128xbf16, #tpu.memory_space<vmem>>, %arg3: memref<1x128xf32, #tpu.memory_space<vmem>>, %arg4: memref<128x128xf32, #tpu.memory_space<vmem>>) attributes {dimension_semantics = [#tpu.dimension_semantics<parallel>], iteration_bounds = array<i64: 1>, scalar_prefetch = 0 : i64, scratch_operands = 0 : i64, tpu.core_type = #tpu.core_type<tc>, window_params = [{transform_indices = @transform_0, window_bounds = array<i64: 128, 128>}, {pipeline_mode = #tpu.pipeline_mode<synchronous>, transform_indices = @transform_1, window_bounds = array<i64: 128, 128>}, {pipeline_mode = #tpu.pipeline_mode<synchronous>, transform_indices = @transform_2, window_bounds = array<i64: 1, 128>}, {transform_indices = @transform_3, window_bounds = array<i64: 128, 128>}]} {
    %c0 = arith.constant 0 : index
    %c0_0 = arith.constant 0 : index
    %0 = vector.load %arg1[%c0, %c0_0] : memref<128x128xbf16, #tpu.memory_space<vmem>>, vector<128x128xbf16>
    %c0_1 = arith.constant 0 : index
    %c0_2 = arith.constant 0 : index
    %1 = vector.load %arg2[%c0_1, %c0_2] : memref<128x128xbf16, #tpu.memory_space<vmem>>, vector<128x128xbf16>
    %cst = arith.constant dense<0.000000e+00> : vector<128x128xf32>
    %2 = tpu.matmul %0, %1, %cst {dimension_numbers = #tpu.dot_dimension_numbers<[1], [0], [0], [1], [0, 0, 1, 1], [], []>} : vector<128x128xbf16>, vector<128x128xbf16>, vector<128x128xf32> -> vector<128x128xf32>
    %c0_3 = arith.constant 0 : index
    %c0_4 = arith.constant 0 : index
    %3 = vector.load %arg3[%c0_3, %c0_4] : memref<1x128xf32, #tpu.memory_space<vmem>>, vector<1x128xf32>
    %4 = vector.broadcast %3 : vector<1x128xf32> to vector<128x128xf32>
    %5 = arith.addf %2, %4 : vector<128x128xf32>
    %cst_5 = arith.constant 0.000000e+00 : f32
    %6 = vector.broadcast %cst_5 : f32 to vector<128x128xf32>
    %7 = arith.maximumf %5, %6 : vector<128x128xf32>
    %c0_6 = arith.constant 0 : index
    %c0_7 = arith.constant 0 : index
    %8 = vector.load %arg4[%c0_6, %c0_7] : memref<128x128xf32, #tpu.memory_space<vmem>>, vector<128x128xf32>
    tpu.vector_store %arg4[%c0_6, %c0_7], %7 {strides = array<i32>} : memref<128x128xf32, #tpu.memory_space<vmem>>, vector<128x128xf32>,
    return
  }
  func.func @transform_0(%arg0: i32) -> (i32, i32) {
    %c0_i32 = arith.constant 0 : i32
    %c0_i32_0 = arith.constant 0 : i32
    return %arg0, %c0_i32 : i32, i32
  }
  func.func @transform_1(%arg0: i32) -> (i32, i32) {
    %c0_i32 = arith.constant 0 : i32
    %c0_i32_0 = arith.constant 0 : i32
    %c0_i32_1 = arith.constant 0 : i32
    return %c0_i32, %c0_i32_0 : i32, i32
  }
  func.func @transform_2(%arg0: i32) -> (i32, i32) {
    %c0_i32 = arith.constant 0 : i32
    %c0_i32_0 = arith.constant 0 : i32
    %c0_i32_1 = arith.constant 0 : i32
    return %c0_i32, %c0_i32_0 : i32, i32
  }
  func.func @transform_3(%arg0: i32) -> (i32, i32) {
    %c0_i32 = arith.constant 0 : i32
    %c0_i32_0 = arith.constant 0 : i32
    return %arg0, %c0_i32 : i32, i32
  }
}

module attributes {stable_mosaic.version = 11 : i64} {
  func.func @_conv5x5_shift_kernel(%arg0: i32, %arg1: memref<1x148x128xf32, #tpu.memory_space<vmem>>, %arg2: memref<25x128x128xbf16, #tpu.memory_space<vmem>>, %arg3: memref<1x128xf32, #tpu.memory_space<vmem>>, %arg4: memref<1x96x128xf32, #tpu.memory_space<vmem>>) attributes {dimension_semantics = [#tpu.dimension_semantics<parallel>], iteration_bounds = array<i64: 2>, scalar_prefetch = 0 : i64, scratch_operands = 0 : i64, tpu.core_type = #tpu.core_type<tc>, window_params = [{transform_indices = @transform_0, window_bounds = array<i64: 1, 148, 128>}, {pipeline_mode = #tpu.pipeline_mode<synchronous>, transform_indices = @transform_1, window_bounds = array<i64: 25, 128, 128>}, {pipeline_mode = #tpu.pipeline_mode<synchronous>, transform_indices = @transform_2, window_bounds = array<i64: 1, 128>}, {transform_indices = @transform_3, window_bounds = array<i64: 1, 96, 128>}]} {
    %cst = arith.constant 0.000000e+00 : f32
    %0 = vector.broadcast %cst : f32 to vector<96x128xf32>
    %c0 = arith.constant 0 : index
    %c0_0 = arith.constant 0 : index
    %c0_1 = arith.constant 0 : index
    %1 = vector.load %arg1[%c0, %c0_0, %c0_1] : memref<1x148x128xf32, #tpu.memory_space<vmem>>, vector<1x96x128xf32>
    %2 = vector.shape_cast %1 : vector<1x96x128xf32> to vector<96x128xf32>
    %3 = arith.truncf %2 : vector<96x128xf32> to vector<96x128xbf16>
    %c0_2 = arith.constant 0 : index
    %c0_3 = arith.constant 0 : index
    %c0_4 = arith.constant 0 : index
    %4 = vector.load %arg2[%c0_2, %c0_3, %c0_4] : memref<25x128x128xbf16, #tpu.memory_space<vmem>>, vector<1x128x128xbf16>
    %5 = vector.shape_cast %4 : vector<1x128x128xbf16> to vector<128x128xbf16>
    %cst_5 = arith.constant dense<0.000000e+00> : vector<96x128xf32>
    %6 = tpu.matmul %3, %5, %cst_5 {dimension_numbers = #tpu.dot_dimension_numbers<[1], [0], [0], [1], [0, 0, 1, 1], [], []>} : vector<96x128xbf16>, vector<128x128xbf16>, vector<96x128xf32> -> vector<96x128xf32>
    %7 = arith.addf %0, %6 : vector<96x128xf32>
    %c0_6 = arith.constant 0 : index
    %c1 = arith.constant 1 : index
    %c0_7 = arith.constant 0 : index
    %8 = vector.load %arg1[%c0_6, %c1, %c0_7] : memref<1x148x128xf32, #tpu.memory_space<vmem>>, vector<1x96x128xf32>
    %9 = vector.shape_cast %8 : vector<1x96x128xf32> to vector<96x128xf32>
    %10 = arith.truncf %9 : vector<96x128xf32> to vector<96x128xbf16>
    %c1_8 = arith.constant 1 : index
    %c0_9 = arith.constant 0 : index
    %c0_10 = arith.constant 0 : index
    %11 = vector.load %arg2[%c1_8, %c0_9, %c0_10] : memref<25x128x128xbf16, #tpu.memory_space<vmem>>, vector<1x128x128xbf16>
    %12 = vector.shape_cast %11 : vector<1x128x128xbf16> to vector<128x128xbf16>
    %cst_11 = arith.constant dense<0.000000e+00> : vector<96x128xf32>
    %13 = tpu.matmul %10, %12, %cst_11 {dimension_numbers = #tpu.dot_dimension_numbers<[1], [0], [0], [1], [0, 0, 1, 1], [], []>} : vector<96x128xbf16>, vector<128x128xbf16>, vector<96x128xf32> -> vector<96x128xf32>
    %14 = arith.addf %7, %13 : vector<96x128xf32>
    %c0_12 = arith.constant 0 : index
    %c2 = arith.constant 2 : index
    %c0_13 = arith.constant 0 : index
    %15 = vector.load %arg1[%c0_12, %c2, %c0_13] : memref<1x148x128xf32, #tpu.memory_space<vmem>>, vector<1x96x128xf32>
    %16 = vector.shape_cast %15 : vector<1x96x128xf32> to vector<96x128xf32>
    %17 = arith.truncf %16 : vector<96x128xf32> to vector<96x128xbf16>
    %c2_14 = arith.constant 2 : index
    %c0_15 = arith.constant 0 : index
    %c0_16 = arith.constant 0 : index
    %18 = vector.load %arg2[%c2_14, %c0_15, %c0_16] : memref<25x128x128xbf16, #tpu.memory_space<vmem>>, vector<1x128x128xbf16>
    %19 = vector.shape_cast %18 : vector<1x128x128xbf16> to vector<128x128xbf16>
    %cst_17 = arith.constant dense<0.000000e+00> : vector<96x128xf32>
    %20 = tpu.matmul %17, %19, %cst_17 {dimension_numbers = #tpu.dot_dimension_numbers<[1], [0], [0], [1], [0, 0, 1, 1], [], []>} : vector<96x128xbf16>, vector<128x128xbf16>, vector<96x128xf32> -> vector<96x128xf32>
    %21 = arith.addf %14, %20 : vector<96x128xf32>
    %c0_18 = arith.constant 0 : index
    %c3 = arith.constant 3 : index
    %c0_19 = arith.constant 0 : index
    %22 = vector.load %arg1[%c0_18, %c3, %c0_19] : memref<1x148x128xf32, #tpu.memory_space<vmem>>, vector<1x96x128xf32>
    %23 = vector.shape_cast %22 : vector<1x96x128xf32> to vector<96x128xf32>
    %24 = arith.truncf %23 : vector<96x128xf32> to vector<96x128xbf16>
    %c3_20 = arith.constant 3 : index
    %c0_21 = arith.constant 0 : index
    %c0_22 = arith.constant 0 : index
    %25 = vector.load %arg2[%c3_20, %c0_21, %c0_22] : memref<25x128x128xbf16, #tpu.memory_space<vmem>>, vector<1x128x128xbf16>
    %26 = vector.shape_cast %25 : vector<1x128x128xbf16> to vector<128x128xbf16>
    %cst_23 = arith.constant dense<0.000000e+00> : vector<96x128xf32>
    %27 = tpu.matmul %24, %26, %cst_23 {dimension_numbers = #tpu.dot_dimension_numbers<[1], [0], [0], [1], [0, 0, 1, 1], [], []>} : vector<96x128xbf16>, vector<128x128xbf16>, vector<96x128xf32> -> vector<96x128xf32>
    %28 = arith.addf %21, %27 : vector<96x128xf32>
    %c0_24 = arith.constant 0 : index
    %c4 = arith.constant 4 : index
    %c0_25 = arith.constant 0 : index
    %29 = vector.load %arg1[%c0_24, %c4, %c0_25] : memref<1x148x128xf32, #tpu.memory_space<vmem>>, vector<1x96x128xf32>
    %30 = vector.shape_cast %29 : vector<1x96x128xf32> to vector<96x128xf32>
    %31 = arith.truncf %30 : vector<96x128xf32> to vector<96x128xbf16>
    %c4_26 = arith.constant 4 : index
    %c0_27 = arith.constant 0 : index
    %c0_28 = arith.constant 0 : index
    %32 = vector.load %arg2[%c4_26, %c0_27, %c0_28] : memref<25x128x128xbf16, #tpu.memory_space<vmem>>, vector<1x128x128xbf16>
    %33 = vector.shape_cast %32 : vector<1x128x128xbf16> to vector<128x128xbf16>
    %cst_29 = arith.constant dense<0.000000e+00> : vector<96x128xf32>
    %34 = tpu.matmul %31, %33, %cst_29 {dimension_numbers = #tpu.dot_dimension_numbers<[1], [0], [0], [1], [0, 0, 1, 1], [], []>} : vector<96x128xbf16>, vector<128x128xbf16>, vector<96x128xf32> -> vector<96x128xf32>
    %35 = arith.addf %28, %34 : vector<96x128xf32>
    %c0_30 = arith.constant 0 : index
    %c12 = arith.constant 12 : index
    %c0_31 = arith.constant 0 : index
    %36 = vector.load %arg1[%c0_30, %c12, %c0_31] : memref<1x148x128xf32, #tpu.memory_space<vmem>>, vector<1x96x128xf32>
    %37 = vector.shape_cast %36 : vector<1x96x128xf32> to vector<96x128xf32>
    %38 = arith.truncf %37 : vector<96x128xf32> to vector<96x128xbf16>
    %c5 = arith.constant 5 : index
    %c0_32 = arith.constant 0 : index
    %c0_33 = arith.constant 0 : index
    %39 = vector.load %arg2[%c5, %c0_32, %c0_33] : memref<25x128x128xbf16, #tpu.memory_space<vmem>>, vector<1x128x128xbf16>
    %40 = vector.shape_cast %39 : vector<1x128x128xbf16> to vector<128x128xbf16>
    %cst_34 = arith.constant dense<0.000000e+00> : vector<96x128xf32>
    %41 = tpu.matmul %38, %40, %cst_34 {dimension_numbers = #tpu.dot_dimension_numbers<[1], [0], [0], [1], [0, 0, 1, 1], [], []>} : vector<96x128xbf16>, vector<128x128xbf16>, vector<96x128xf32> -> vector<96x128xf32>
    %42 = arith.addf %35, %41 : vector<96x128xf32>
    %c0_35 = arith.constant 0 : index
    %c13 = arith.constant 13 : index
    %c0_36 = arith.constant 0 : index
    %43 = vector.load %arg1[%c0_35, %c13, %c0_36] : memref<1x148x128xf32, #tpu.memory_space<vmem>>, vector<1x96x128xf32>
    %44 = vector.shape_cast %43 : vector<1x96x128xf32> to vector<96x128xf32>
    %45 = arith.truncf %44 : vector<96x128xf32> to vector<96x128xbf16>
    %c6 = arith.constant 6 : index
    %c0_37 = arith.constant 0 : index
    %c0_38 = arith.constant 0 : index
    %46 = vector.load %arg2[%c6, %c0_37, %c0_38] : memref<25x128x128xbf16, #tpu.memory_space<vmem>>, vector<1x128x128xbf16>
    %47 = vector.shape_cast %46 : vector<1x128x128xbf16> to vector<128x128xbf16>
    %cst_39 = arith.constant dense<0.000000e+00> : vector<96x128xf32>
    %48 = tpu.matmul %45, %47, %cst_39 {dimension_numbers = #tpu.dot_dimension_numbers<[1], [0], [0], [1], [0, 0, 1, 1], [], []>} : vector<96x128xbf16>, vector<128x128xbf16>, vector<96x128xf32> -> vector<96x128xf32>
    %49 = arith.addf %42, %48 : vector<96x128xf32>
    %c0_40 = arith.constant 0 : index
    %c14 = arith.constant 14 : index
    %c0_41 = arith.constant 0 : index
    %50 = vector.load %arg1[%c0_40, %c14, %c0_41] : memref<1x148x128xf32, #tpu.memory_space<vmem>>, vector<1x96x128xf32>
    %51 = vector.shape_cast %50 : vector<1x96x128xf32> to vector<96x128xf32>
    %52 = arith.truncf %51 : vector<96x128xf32> to vector<96x128xbf16>
    %c7 = arith.constant 7 : index
    %c0_42 = arith.constant 0 : index
    %c0_43 = arith.constant 0 : index
    %53 = vector.load %arg2[%c7, %c0_42, %c0_43] : memref<25x128x128xbf16, #tpu.memory_space<vmem>>, vector<1x128x128xbf16>
    %54 = vector.shape_cast %53 : vector<1x128x128xbf16> to vector<128x128xbf16>
    %cst_44 = arith.constant dense<0.000000e+00> : vector<96x128xf32>
    %55 = tpu.matmul %52, %54, %cst_44 {dimension_numbers = #tpu.dot_dimension_numbers<[1], [0], [0], [1], [0, 0, 1, 1], [], []>} : vector<96x128xbf16>, vector<128x128xbf16>, vector<96x128xf32> -> vector<96x128xf32>
    %56 = arith.addf %49, %55 : vector<96x128xf32>
    %c0_45 = arith.constant 0 : index
    %c15 = arith.constant 15 : index
    %c0_46 = arith.constant 0 : index
    %57 = vector.load %arg1[%c0_45, %c15, %c0_46] : memref<1x148x128xf32, #tpu.memory_space<vmem>>, vector<1x96x128xf32>
    %58 = vector.shape_cast %57 : vector<1x96x128xf32> to vector<96x128xf32>
    %59 = arith.truncf %58 : vector<96x128xf32> to vector<96x128xbf16>
    %c8 = arith.constant 8 : index
    %c0_47 = arith.constant 0 : index
    %c0_48 = arith.constant 0 : index
    %60 = vector.load %arg2[%c8, %c0_47, %c0_48] : memref<25x128x128xbf16, #tpu.memory_space<vmem>>, vector<1x128x128xbf16>
    %61 = vector.shape_cast %60 : vector<1x128x128xbf16> to vector<128x128xbf16>
    %cst_49 = arith.constant dense<0.000000e+00> : vector<96x128xf32>
    %62 = tpu.matmul %59, %61, %cst_49 {dimension_numbers = #tpu.dot_dimension_numbers<[1], [0], [0], [1], [0, 0, 1, 1], [], []>} : vector<96x128xbf16>, vector<128x128xbf16>, vector<96x128xf32> -> vector<96x128xf32>
    %63 = arith.addf %56, %62 : vector<96x128xf32>
    %c0_50 = arith.constant 0 : index
    %c16 = arith.constant 16 : index
    %c0_51 = arith.constant 0 : index
    %64 = vector.load %arg1[%c0_50, %c16, %c0_51] : memref<1x148x128xf32, #tpu.memory_space<vmem>>, vector<1x96x128xf32>
    %65 = vector.shape_cast %64 : vector<1x96x128xf32> to vector<96x128xf32>
    %66 = arith.truncf %65 : vector<96x128xf32> to vector<96x128xbf16>
    %c9 = arith.constant 9 : index
    %c0_52 = arith.constant 0 : index
    %c0_53 = arith.constant 0 : index
    %67 = vector.load %arg2[%c9, %c0_52, %c0_53] : memref<25x128x128xbf16, #tpu.memory_space<vmem>>, vector<1x128x128xbf16>
    %68 = vector.shape_cast %67 : vector<1x128x128xbf16> to vector<128x128xbf16>
    %cst_54 = arith.constant dense<0.000000e+00> : vector<96x128xf32>
    %69 = tpu.matmul %66, %68, %cst_54 {dimension_numbers = #tpu.dot_dimension_numbers<[1], [0], [0], [1], [0, 0, 1, 1], [], []>} : vector<96x128xbf16>, vector<128x128xbf16>, vector<96x128xf32> -> vector<96x128xf32>
    %70 = arith.addf %63, %69 : vector<96x128xf32>
    %c0_55 = arith.constant 0 : index
    %c24 = arith.constant 24 : index
    %c0_56 = arith.constant 0 : index
    %71 = vector.load %arg1[%c0_55, %c24, %c0_56] : memref<1x148x128xf32, #tpu.memory_space<vmem>>, vector<1x96x128xf32>
    %72 = vector.shape_cast %71 : vector<1x96x128xf32> to vector<96x128xf32>
    %73 = arith.truncf %72 : vector<96x128xf32> to vector<96x128xbf16>
    %c10 = arith.constant 10 : index
    %c0_57 = arith.constant 0 : index
    %c0_58 = arith.constant 0 : index
    %74 = vector.load %arg2[%c10, %c0_57, %c0_58] : memref<25x128x128xbf16, #tpu.memory_space<vmem>>, vector<1x128x128xbf16>
    %75 = vector.shape_cast %74 : vector<1x128x128xbf16> to vector<128x128xbf16>
    %cst_59 = arith.constant dense<0.000000e+00> : vector<96x128xf32>
    %76 = tpu.matmul %73, %75, %cst_59 {dimension_numbers = #tpu.dot_dimension_numbers<[1], [0], [0], [1], [0, 0, 1, 1], [], []>} : vector<96x128xbf16>, vector<128x128xbf16>, vector<96x128xf32> -> vector<96x128xf32>
    %77 = arith.addf %70, %76 : vector<96x128xf32>
    %c0_60 = arith.constant 0 : index
    %c25 = arith.constant 25 : index
    %c0_61 = arith.constant 0 : index
    %78 = vector.load %arg1[%c0_60, %c25, %c0_61] : memref<1x148x128xf32, #tpu.memory_space<vmem>>, vector<1x96x128xf32>
    %79 = vector.shape_cast %78 : vector<1x96x128xf32> to vector<96x128xf32>
    %80 = arith.truncf %79 : vector<96x128xf32> to vector<96x128xbf16>
    %c11 = arith.constant 11 : index
    %c0_62 = arith.constant 0 : index
    %c0_63 = arith.constant 0 : index
    %81 = vector.load %arg2[%c11, %c0_62, %c0_63] : memref<25x128x128xbf16, #tpu.memory_space<vmem>>, vector<1x128x128xbf16>
    %82 = vector.shape_cast %81 : vector<1x128x128xbf16> to vector<128x128xbf16>
    %cst_64 = arith.constant dense<0.000000e+00> : vector<96x128xf32>
    %83 = tpu.matmul %80, %82, %cst_64 {dimension_numbers = #tpu.dot_dimension_numbers<[1], [0], [0], [1], [0, 0, 1, 1], [], []>} : vector<96x128xbf16>, vector<128x128xbf16>, vector<96x128xf32> -> vector<96x128xf32>
    %84 = arith.addf %77, %83 : vector<96x128xf32>
    %c0_65 = arith.constant 0 : index
    %c26 = arith.constant 26 : index
    %c0_66 = arith.constant 0 : index
    %85 = vector.load %arg1[%c0_65, %c26, %c0_66] : memref<1x148x128xf32, #tpu.memory_space<vmem>>, vector<1x96x128xf32>
    %86 = vector.shape_cast %85 : vector<1x96x128xf32> to vector<96x128xf32>
    %87 = arith.truncf %86 : vector<96x128xf32> to vector<96x128xbf16>
    %c12_67 = arith.constant 12 : index
    %c0_68 = arith.constant 0 : index
    %c0_69 = arith.constant 0 : index
    %88 = vector.load %arg2[%c12_67, %c0_68, %c0_69] : memref<25x128x128xbf16, #tpu.memory_space<vmem>>, vector<1x128x128xbf16>
    %89 = vector.shape_cast %88 : vector<1x128x128xbf16> to vector<128x128xbf16>
    %cst_70 = arith.constant dense<0.000000e+00> : vector<96x128xf32>
    %90 = tpu.matmul %87, %89, %cst_70 {dimension_numbers = #tpu.dot_dimension_numbers<[1], [0], [0], [1], [0, 0, 1, 1], [], []>} : vector<96x128xbf16>, vector<128x128xbf16>, vector<96x128xf32> -> vector<96x128xf32>
    %91 = arith.addf %84, %90 : vector<96x128xf32>
    %c0_71 = arith.constant 0 : index
    %c27 = arith.constant 27 : index
    %c0_72 = arith.constant 0 : index
    %92 = vector.load %arg1[%c0_71, %c27, %c0_72] : memref<1x148x128xf32, #tpu.memory_space<vmem>>, vector<1x96x128xf32>
    %93 = vector.shape_cast %92 : vector<1x96x128xf32> to vector<96x128xf32>
    %94 = arith.truncf %93 : vector<96x128xf32> to vector<96x128xbf16>
    %c13_73 = arith.constant 13 : index
    %c0_74 = arith.constant 0 : index
    %c0_75 = arith.constant 0 : index
    %95 = vector.load %arg2[%c13_73, %c0_74, %c0_75] : memref<25x128x128xbf16, #tpu.memory_space<vmem>>, vector<1x128x128xbf16>
    %96 = vector.shape_cast %95 : vector<1x128x128xbf16> to vector<128x128xbf16>
    %cst_76 = arith.constant dense<0.000000e+00> : vector<96x128xf32>
    %97 = tpu.matmul %94, %96, %cst_76 {dimension_numbers = #tpu.dot_dimension_numbers<[1], [0], [0], [1], [0, 0, 1, 1], [], []>} : vector<96x128xbf16>, vector<128x128xbf16>, vector<96x128xf32> -> vector<96x128xf32>
    %98 = arith.addf %91, %97 : vector<96x128xf32>
    %c0_77 = arith.constant 0 : index
    %c28 = arith.constant 28 : index
    %c0_78 = arith.constant 0 : index
    %99 = vector.load %arg1[%c0_77, %c28, %c0_78] : memref<1x148x128xf32, #tpu.memory_space<vmem>>, vector<1x96x128xf32>
    %100 = vector.shape_cast %99 : vector<1x96x128xf32> to vector<96x128xf32>
    %101 = arith.truncf %100 : vector<96x128xf32> to vector<96x128xbf16>
    %c14_79 = arith.constant 14 : index
    %c0_80 = arith.constant 0 : index
    %c0_81 = arith.constant 0 : index
    %102 = vector.load %arg2[%c14_79, %c0_80, %c0_81] : memref<25x128x128xbf16, #tpu.memory_space<vmem>>, vector<1x128x128xbf16>
    %103 = vector.shape_cast %102 : vector<1x128x128xbf16> to vector<128x128xbf16>
    %cst_82 = arith.constant dense<0.000000e+00> : vector<96x128xf32>
    %104 = tpu.matmul %101, %103, %cst_82 {dimension_numbers = #tpu.dot_dimension_numbers<[1], [0], [0], [1], [0, 0, 1, 1], [], []>} : vector<96x128xbf16>, vector<128x128xbf16>, vector<96x128xf32> -> vector<96x128xf32>
    %105 = arith.addf %98, %104 : vector<96x128xf32>
    %c0_83 = arith.constant 0 : index
    %c36 = arith.constant 36 : index
    %c0_84 = arith.constant 0 : index
    %106 = vector.load %arg1[%c0_83, %c36, %c0_84] : memref<1x148x128xf32, #tpu.memory_space<vmem>>, vector<1x96x128xf32>
    %107 = vector.shape_cast %106 : vector<1x96x128xf32> to vector<96x128xf32>
    %108 = arith.truncf %107 : vector<96x128xf32> to vector<96x128xbf16>
    %c15_85 = arith.constant 15 : index
    %c0_86 = arith.constant 0 : index
    %c0_87 = arith.constant 0 : index
    %109 = vector.load %arg2[%c15_85, %c0_86, %c0_87] : memref<25x128x128xbf16, #tpu.memory_space<vmem>>, vector<1x128x128xbf16>
    %110 = vector.shape_cast %109 : vector<1x128x128xbf16> to vector<128x128xbf16>
    %cst_88 = arith.constant dense<0.000000e+00> : vector<96x128xf32>
    %111 = tpu.matmul %108, %110, %cst_88 {dimension_numbers = #tpu.dot_dimension_numbers<[1], [0], [0], [1], [0, 0, 1, 1], [], []>} : vector<96x128xbf16>, vector<128x128xbf16>, vector<96x128xf32> -> vector<96x128xf32>
    %112 = arith.addf %105, %111 : vector<96x128xf32>
    %c0_89 = arith.constant 0 : index
    %c37 = arith.constant 37 : index
    %c0_90 = arith.constant 0 : index
    %113 = vector.load %arg1[%c0_89, %c37, %c0_90] : memref<1x148x128xf32, #tpu.memory_space<vmem>>, vector<1x96x128xf32>
    %114 = vector.shape_cast %113 : vector<1x96x128xf32> to vector<96x128xf32>
    %115 = arith.truncf %114 : vector<96x128xf32> to vector<96x128xbf16>
    %c16_91 = arith.constant 16 : index
    %c0_92 = arith.constant 0 : index
    %c0_93 = arith.constant 0 : index
    %116 = vector.load %arg2[%c16_91, %c0_92, %c0_93] : memref<25x128x128xbf16, #tpu.memory_space<vmem>>, vector<1x128x128xbf16>
    %117 = vector.shape_cast %116 : vector<1x128x128xbf16> to vector<128x128xbf16>
    %cst_94 = arith.constant dense<0.000000e+00> : vector<96x128xf32>
    %118 = tpu.matmul %115, %117, %cst_94 {dimension_numbers = #tpu.dot_dimension_numbers<[1], [0], [0], [1], [0, 0, 1, 1], [], []>} : vector<96x128xbf16>, vector<128x128xbf16>, vector<96x128xf32> -> vector<96x128xf32>
    %119 = arith.addf %112, %118 : vector<96x128xf32>
    %c0_95 = arith.constant 0 : index
    %c38 = arith.constant 38 : index
    %c0_96 = arith.constant 0 : index
    %120 = vector.load %arg1[%c0_95, %c38, %c0_96] : memref<1x148x128xf32, #tpu.memory_space<vmem>>, vector<1x96x128xf32>
    %121 = vector.shape_cast %120 : vector<1x96x128xf32> to vector<96x128xf32>
    %122 = arith.truncf %121 : vector<96x128xf32> to vector<96x128xbf16>
    %c17 = arith.constant 17 : index
    %c0_97 = arith.constant 0 : index
    %c0_98 = arith.constant 0 : index
    %123 = vector.load %arg2[%c17, %c0_97, %c0_98] : memref<25x128x128xbf16, #tpu.memory_space<vmem>>, vector<1x128x128xbf16>
    %124 = vector.shape_cast %123 : vector<1x128x128xbf16> to vector<128x128xbf16>
    %cst_99 = arith.constant dense<0.000000e+00> : vector<96x128xf32>
    %125 = tpu.matmul %122, %124, %cst_99 {dimension_numbers = #tpu.dot_dimension_numbers<[1], [0], [0], [1], [0, 0, 1, 1], [], []>} : vector<96x128xbf16>, vector<128x128xbf16>, vector<96x128xf32> -> vector<96x128xf32>
    %126 = arith.addf %119, %125 : vector<96x128xf32>
    %c0_100 = arith.constant 0 : index
    %c39 = arith.constant 39 : index
    %c0_101 = arith.constant 0 : index
    %127 = vector.load %arg1[%c0_100, %c39, %c0_101] : memref<1x148x128xf32, #tpu.memory_space<vmem>>, vector<1x96x128xf32>
    %128 = vector.shape_cast %127 : vector<1x96x128xf32> to vector<96x128xf32>
    %129 = arith.truncf %128 : vector<96x128xf32> to vector<96x128xbf16>
    %c18 = arith.constant 18 : index
    %c0_102 = arith.constant 0 : index
    %c0_103 = arith.constant 0 : index
    %130 = vector.load %arg2[%c18, %c0_102, %c0_103] : memref<25x128x128xbf16, #tpu.memory_space<vmem>>, vector<1x128x128xbf16>
    %131 = vector.shape_cast %130 : vector<1x128x128xbf16> to vector<128x128xbf16>
    %cst_104 = arith.constant dense<0.000000e+00> : vector<96x128xf32>
    %132 = tpu.matmul %129, %131, %cst_104 {dimension_numbers = #tpu.dot_dimension_numbers<[1], [0], [0], [1], [0, 0, 1, 1], [], []>} : vector<96x128xbf16>, vector<128x128xbf16>, vector<96x128xf32> -> vector<96x128xf32>
    %133 = arith.addf %126, %132 : vector<96x128xf32>
    %c0_105 = arith.constant 0 : index
    %c40 = arith.constant 40 : index
    %c0_106 = arith.constant 0 : index
    %134 = vector.load %arg1[%c0_105, %c40, %c0_106] : memref<1x148x128xf32, #tpu.memory_space<vmem>>, vector<1x96x128xf32>
    %135 = vector.shape_cast %134 : vector<1x96x128xf32> to vector<96x128xf32>
    %136 = arith.truncf %135 : vector<96x128xf32> to vector<96x128xbf16>
    %c19 = arith.constant 19 : index
    %c0_107 = arith.constant 0 : index
    %c0_108 = arith.constant 0 : index
    %137 = vector.load %arg2[%c19, %c0_107, %c0_108] : memref<25x128x128xbf16, #tpu.memory_space<vmem>>, vector<1x128x128xbf16>
    %138 = vector.shape_cast %137 : vector<1x128x128xbf16> to vector<128x128xbf16>
    %cst_109 = arith.constant dense<0.000000e+00> : vector<96x128xf32>
    %139 = tpu.matmul %136, %138, %cst_109 {dimension_numbers = #tpu.dot_dimension_numbers<[1], [0], [0], [1], [0, 0, 1, 1], [], []>} : vector<96x128xbf16>, vector<128x128xbf16>, vector<96x128xf32> -> vector<96x128xf32>
    %140 = arith.addf %133, %139 : vector<96x128xf32>
    %c0_110 = arith.constant 0 : index
    %c48 = arith.constant 48 : index
    %c0_111 = arith.constant 0 : index
    %141 = vector.load %arg1[%c0_110, %c48, %c0_111] : memref<1x148x128xf32, #tpu.memory_space<vmem>>, vector<1x96x128xf32>
    %142 = vector.shape_cast %141 : vector<1x96x128xf32> to vector<96x128xf32>
    %143 = arith.truncf %142 : vector<96x128xf32> to vector<96x128xbf16>
    %c20 = arith.constant 20 : index
    %c0_112 = arith.constant 0 : index
    %c0_113 = arith.constant 0 : index
    %144 = vector.load %arg2[%c20, %c0_112, %c0_113] : memref<25x128x128xbf16, #tpu.memory_space<vmem>>, vector<1x128x128xbf16>
    %145 = vector.shape_cast %144 : vector<1x128x128xbf16> to vector<128x128xbf16>
    %cst_114 = arith.constant dense<0.000000e+00> : vector<96x128xf32>
    %146 = tpu.matmul %143, %145, %cst_114 {dimension_numbers = #tpu.dot_dimension_numbers<[1], [0], [0], [1], [0, 0, 1, 1], [], []>} : vector<96x128xbf16>, vector<128x128xbf16>, vector<96x128xf32> -> vector<96x128xf32>
    %147 = arith.addf %140, %146 : vector<96x128xf32>
    %c0_115 = arith.constant 0 : index
    %c49 = arith.constant 49 : index
    %c0_116 = arith.constant 0 : index
    %148 = vector.load %arg1[%c0_115, %c49, %c0_116] : memref<1x148x128xf32, #tpu.memory_space<vmem>>, vector<1x96x128xf32>
    %149 = vector.shape_cast %148 : vector<1x96x128xf32> to vector<96x128xf32>
    %150 = arith.truncf %149 : vector<96x128xf32> to vector<96x128xbf16>
    %c21 = arith.constant 21 : index
    %c0_117 = arith.constant 0 : index
    %c0_118 = arith.constant 0 : index
    %151 = vector.load %arg2[%c21, %c0_117, %c0_118] : memref<25x128x128xbf16, #tpu.memory_space<vmem>>, vector<1x128x128xbf16>
    %152 = vector.shape_cast %151 : vector<1x128x128xbf16> to vector<128x128xbf16>
    %cst_119 = arith.constant dense<0.000000e+00> : vector<96x128xf32>
    %153 = tpu.matmul %150, %152, %cst_119 {dimension_numbers = #tpu.dot_dimension_numbers<[1], [0], [0], [1], [0, 0, 1, 1], [], []>} : vector<96x128xbf16>, vector<128x128xbf16>, vector<96x128xf32> -> vector<96x128xf32>
    %154 = arith.addf %147, %153 : vector<96x128xf32>
    %c0_120 = arith.constant 0 : index
    %c50 = arith.constant 50 : index
    %c0_121 = arith.constant 0 : index
    %155 = vector.load %arg1[%c0_120, %c50, %c0_121] : memref<1x148x128xf32, #tpu.memory_space<vmem>>, vector<1x96x128xf32>
    %156 = vector.shape_cast %155 : vector<1x96x128xf32> to vector<96x128xf32>
    %157 = arith.truncf %156 : vector<96x128xf32> to vector<96x128xbf16>
    %c22 = arith.constant 22 : index
    %c0_122 = arith.constant 0 : index
    %c0_123 = arith.constant 0 : index
    %158 = vector.load %arg2[%c22, %c0_122, %c0_123] : memref<25x128x128xbf16, #tpu.memory_space<vmem>>, vector<1x128x128xbf16>
    %159 = vector.shape_cast %158 : vector<1x128x128xbf16> to vector<128x128xbf16>
    %cst_124 = arith.constant dense<0.000000e+00> : vector<96x128xf32>
    %160 = tpu.matmul %157, %159, %cst_124 {dimension_numbers = #tpu.dot_dimension_numbers<[1], [0], [0], [1], [0, 0, 1, 1], [], []>} : vector<96x128xbf16>, vector<128x128xbf16>, vector<96x128xf32> -> vector<96x128xf32>
    %161 = arith.addf %154, %160 : vector<96x128xf32>
    %c0_125 = arith.constant 0 : index
    %c51 = arith.constant 51 : index
    %c0_126 = arith.constant 0 : index
    %162 = vector.load %arg1[%c0_125, %c51, %c0_126] : memref<1x148x128xf32, #tpu.memory_space<vmem>>, vector<1x96x128xf32>
    %163 = vector.shape_cast %162 : vector<1x96x128xf32> to vector<96x128xf32>
    %164 = arith.truncf %163 : vector<96x128xf32> to vector<96x128xbf16>
    %c23 = arith.constant 23 : index
    %c0_127 = arith.constant 0 : index
    %c0_128 = arith.constant 0 : index
    %165 = vector.load %arg2[%c23, %c0_127, %c0_128] : memref<25x128x128xbf16, #tpu.memory_space<vmem>>, vector<1x128x128xbf16>
    %166 = vector.shape_cast %165 : vector<1x128x128xbf16> to vector<128x128xbf16>
    %cst_129 = arith.constant dense<0.000000e+00> : vector<96x128xf32>
    %167 = tpu.matmul %164, %166, %cst_129 {dimension_numbers = #tpu.dot_dimension_numbers<[1], [0], [0], [1], [0, 0, 1, 1], [], []>} : vector<96x128xbf16>, vector<128x128xbf16>, vector<96x128xf32> -> vector<96x128xf32>
    %168 = arith.addf %161, %167 : vector<96x128xf32>
    %c0_130 = arith.constant 0 : index
    %c52 = arith.constant 52 : index
    %c0_131 = arith.constant 0 : index
    %169 = vector.load %arg1[%c0_130, %c52, %c0_131] : memref<1x148x128xf32, #tpu.memory_space<vmem>>, vector<1x96x128xf32>
    %170 = vector.shape_cast %169 : vector<1x96x128xf32> to vector<96x128xf32>
    %171 = arith.truncf %170 : vector<96x128xf32> to vector<96x128xbf16>
    %c24_132 = arith.constant 24 : index
    %c0_133 = arith.constant 0 : index
    %c0_134 = arith.constant 0 : index
    %172 = vector.load %arg2[%c24_132, %c0_133, %c0_134] : memref<25x128x128xbf16, #tpu.memory_space<vmem>>, vector<1x128x128xbf16>
    %173 = vector.shape_cast %172 : vector<1x128x128xbf16> to vector<128x128xbf16>
    %cst_135 = arith.constant dense<0.000000e+00> : vector<96x128xf32>
    %174 = tpu.matmul %171, %173, %cst_135 {dimension_numbers = #tpu.dot_dimension_numbers<[1], [0], [0], [1], [0, 0, 1, 1], [], []>} : vector<96x128xbf16>, vector<128x128xbf16>, vector<96x128xf32> -> vector<96x128xf32>
    %175 = arith.addf %168, %174 : vector<96x128xf32>
    %c0_136 = arith.constant 0 : index
    %c0_137 = arith.constant 0 : index
    %176 = vector.load %arg3[%c0_136, %c0_137] : memref<1x128xf32, #tpu.memory_space<vmem>>, vector<1x128xf32>
    %177 = vector.broadcast %176 : vector<1x128xf32> to vector<96x128xf32>
    %178 = arith.addf %175, %177 : vector<96x128xf32>
    %cst_138 = arith.constant 0.000000e+00 : f32
    %179 = vector.broadcast %cst_138 : f32 to vector<96x128xf32>
    %180 = arith.maximumf %178, %179 : vector<96x128xf32>
    %c0_139 = arith.constant 0 : index
    %c0_140 = arith.constant 0 : index
    %c0_141 = arith.constant 0 : index
    %181 = vector.load %arg4[%c0_139, %c0_140, %c0_141] : memref<1x96x128xf32, #tpu.memory_space<vmem>>, vector<1x96x128xf32>
    %182 = vector.shape_cast %181 : vector<1x96x128xf32> to vector<96x128xf32>
    %183 = vector.shape_cast %180 : vector<96x128xf32> to vector<1x96x128xf32>
    tpu.vector_store %arg4[%c0_139, %c0_140, %c0_141], %183 {strides = array<i32>} : memref<1x96x128xf32, #tpu.memory_space<vmem>>, vector<1x96x128xf32>,
    return
  }
  func.func @transform_0(%arg0: i32) -> (i32, i32, i32) {
    %c0_i32 = arith.constant 0 : i32
    %c0_i32_0 = arith.constant 0 : i32
    %c0_i32_1 = arith.constant 0 : i32
    return %arg0, %c0_i32, %c0_i32_0 : i32, i32, i32
  }
  func.func @transform_1(%arg0: i32) -> (i32, i32, i32) {
    %c0_i32 = arith.constant 0 : i32
    %c0_i32_0 = arith.constant 0 : i32
    %c0_i32_1 = arith.constant 0 : i32
    %c0_i32_2 = arith.constant 0 : i32
    return %c0_i32, %c0_i32_0, %c0_i32_1 : i32, i32, i32
  }
  func.func @transform_2(%arg0: i32) -> (i32, i32) {
    %c0_i32 = arith.constant 0 : i32
    %c0_i32_0 = arith.constant 0 : i32
    %c0_i32_1 = arith.constant 0 : i32
    return %c0_i32, %c0_i32_0 : i32, i32
  }
  func.func @transform_3(%arg0: i32) -> (i32, i32, i32) {
    %c0_i32 = arith.constant 0 : i32
    %c0_i32_0 = arith.constant 0 : i32
    %c0_i32_1 = arith.constant 0 : i32
    return %arg0, %c0_i32, %c0_i32_0 : i32, i32, i32
  }
}

module attributes {stable_mosaic.version = 11 : i64} {
  func.func @_conv5x5_shift_kernel(%arg0: i32, %arg1: memref<1x148x128xf32, #tpu.memory_space<vmem>>, %arg2: memref<25x128x128xbf16, #tpu.memory_space<vmem>>, %arg3: memref<1x128xf32, #tpu.memory_space<vmem>>, %arg4: memref<1x96x128xbf16, #tpu.memory_space<vmem>>) attributes {dimension_semantics = [#tpu.dimension_semantics<parallel>], iteration_bounds = array<i64: 2>, scalar_prefetch = 0 : i64, scratch_operands = 0 : i64, tpu.core_type = #tpu.core_type<tc>, window_params = [{transform_indices = @transform_0, window_bounds = array<i64: 1, 148, 128>}, {pipeline_mode = #tpu.pipeline_mode<synchronous>, transform_indices = @transform_1, window_bounds = array<i64: 25, 128, 128>}, {pipeline_mode = #tpu.pipeline_mode<synchronous>, transform_indices = @transform_2, window_bounds = array<i64: 1, 128>}, {transform_indices = @transform_3, window_bounds = array<i64: 1, 96, 128>}]} {
    %cst = arith.constant 0.000000e+00 : f32
    %0 = vector.broadcast %cst : f32 to vector<96x128xf32>
    %c0 = arith.constant 0 : index
    %c0_0 = arith.constant 0 : index
    %c0_1 = arith.constant 0 : index
    %1 = vector.load %arg1[%c0, %c0_0, %c0_1] : memref<1x148x128xf32, #tpu.memory_space<vmem>>, vector<1x96x128xf32>
    %2 = vector.shape_cast %1 : vector<1x96x128xf32> to vector<96x128xf32>
    %3 = arith.truncf %2 : vector<96x128xf32> to vector<96x128xbf16>
    %c0_2 = arith.constant 0 : index
    %c0_3 = arith.constant 0 : index
    %c0_4 = arith.constant 0 : index
    %4 = vector.load %arg2[%c0_2, %c0_3, %c0_4] : memref<25x128x128xbf16, #tpu.memory_space<vmem>>, vector<1x128x128xbf16>
    %5 = vector.shape_cast %4 : vector<1x128x128xbf16> to vector<128x128xbf16>
    %cst_5 = arith.constant dense<0.000000e+00> : vector<96x128xf32>
    %6 = tpu.matmul %3, %5, %cst_5 {dimension_numbers = #tpu.dot_dimension_numbers<[1], [0], [0], [1], [0, 0, 1, 1], [], []>} : vector<96x128xbf16>, vector<128x128xbf16>, vector<96x128xf32> -> vector<96x128xf32>
    %7 = arith.addf %0, %6 : vector<96x128xf32>
    %c0_6 = arith.constant 0 : index
    %c1 = arith.constant 1 : index
    %c0_7 = arith.constant 0 : index
    %8 = vector.load %arg1[%c0_6, %c1, %c0_7] : memref<1x148x128xf32, #tpu.memory_space<vmem>>, vector<1x96x128xf32>
    %9 = vector.shape_cast %8 : vector<1x96x128xf32> to vector<96x128xf32>
    %10 = arith.truncf %9 : vector<96x128xf32> to vector<96x128xbf16>
    %c1_8 = arith.constant 1 : index
    %c0_9 = arith.constant 0 : index
    %c0_10 = arith.constant 0 : index
    %11 = vector.load %arg2[%c1_8, %c0_9, %c0_10] : memref<25x128x128xbf16, #tpu.memory_space<vmem>>, vector<1x128x128xbf16>
    %12 = vector.shape_cast %11 : vector<1x128x128xbf16> to vector<128x128xbf16>
    %cst_11 = arith.constant dense<0.000000e+00> : vector<96x128xf32>
    %13 = tpu.matmul %10, %12, %cst_11 {dimension_numbers = #tpu.dot_dimension_numbers<[1], [0], [0], [1], [0, 0, 1, 1], [], []>} : vector<96x128xbf16>, vector<128x128xbf16>, vector<96x128xf32> -> vector<96x128xf32>
    %14 = arith.addf %7, %13 : vector<96x128xf32>
    %c0_12 = arith.constant 0 : index
    %c2 = arith.constant 2 : index
    %c0_13 = arith.constant 0 : index
    %15 = vector.load %arg1[%c0_12, %c2, %c0_13] : memref<1x148x128xf32, #tpu.memory_space<vmem>>, vector<1x96x128xf32>
    %16 = vector.shape_cast %15 : vector<1x96x128xf32> to vector<96x128xf32>
    %17 = arith.truncf %16 : vector<96x128xf32> to vector<96x128xbf16>
    %c2_14 = arith.constant 2 : index
    %c0_15 = arith.constant 0 : index
    %c0_16 = arith.constant 0 : index
    %18 = vector.load %arg2[%c2_14, %c0_15, %c0_16] : memref<25x128x128xbf16, #tpu.memory_space<vmem>>, vector<1x128x128xbf16>
    %19 = vector.shape_cast %18 : vector<1x128x128xbf16> to vector<128x128xbf16>
    %cst_17 = arith.constant dense<0.000000e+00> : vector<96x128xf32>
    %20 = tpu.matmul %17, %19, %cst_17 {dimension_numbers = #tpu.dot_dimension_numbers<[1], [0], [0], [1], [0, 0, 1, 1], [], []>} : vector<96x128xbf16>, vector<128x128xbf16>, vector<96x128xf32> -> vector<96x128xf32>
    %21 = arith.addf %14, %20 : vector<96x128xf32>
    %c0_18 = arith.constant 0 : index
    %c3 = arith.constant 3 : index
    %c0_19 = arith.constant 0 : index
    %22 = vector.load %arg1[%c0_18, %c3, %c0_19] : memref<1x148x128xf32, #tpu.memory_space<vmem>>, vector<1x96x128xf32>
    %23 = vector.shape_cast %22 : vector<1x96x128xf32> to vector<96x128xf32>
    %24 = arith.truncf %23 : vector<96x128xf32> to vector<96x128xbf16>
    %c3_20 = arith.constant 3 : index
    %c0_21 = arith.constant 0 : index
    %c0_22 = arith.constant 0 : index
    %25 = vector.load %arg2[%c3_20, %c0_21, %c0_22] : memref<25x128x128xbf16, #tpu.memory_space<vmem>>, vector<1x128x128xbf16>
    %26 = vector.shape_cast %25 : vector<1x128x128xbf16> to vector<128x128xbf16>
    %cst_23 = arith.constant dense<0.000000e+00> : vector<96x128xf32>
    %27 = tpu.matmul %24, %26, %cst_23 {dimension_numbers = #tpu.dot_dimension_numbers<[1], [0], [0], [1], [0, 0, 1, 1], [], []>} : vector<96x128xbf16>, vector<128x128xbf16>, vector<96x128xf32> -> vector<96x128xf32>
    %28 = arith.addf %21, %27 : vector<96x128xf32>
    %c0_24 = arith.constant 0 : index
    %c4 = arith.constant 4 : index
    %c0_25 = arith.constant 0 : index
    %29 = vector.load %arg1[%c0_24, %c4, %c0_25] : memref<1x148x128xf32, #tpu.memory_space<vmem>>, vector<1x96x128xf32>
    %30 = vector.shape_cast %29 : vector<1x96x128xf32> to vector<96x128xf32>
    %31 = arith.truncf %30 : vector<96x128xf32> to vector<96x128xbf16>
    %c4_26 = arith.constant 4 : index
    %c0_27 = arith.constant 0 : index
    %c0_28 = arith.constant 0 : index
    %32 = vector.load %arg2[%c4_26, %c0_27, %c0_28] : memref<25x128x128xbf16, #tpu.memory_space<vmem>>, vector<1x128x128xbf16>
    %33 = vector.shape_cast %32 : vector<1x128x128xbf16> to vector<128x128xbf16>
    %cst_29 = arith.constant dense<0.000000e+00> : vector<96x128xf32>
    %34 = tpu.matmul %31, %33, %cst_29 {dimension_numbers = #tpu.dot_dimension_numbers<[1], [0], [0], [1], [0, 0, 1, 1], [], []>} : vector<96x128xbf16>, vector<128x128xbf16>, vector<96x128xf32> -> vector<96x128xf32>
    %35 = arith.addf %28, %34 : vector<96x128xf32>
    %c0_30 = arith.constant 0 : index
    %c12 = arith.constant 12 : index
    %c0_31 = arith.constant 0 : index
    %36 = vector.load %arg1[%c0_30, %c12, %c0_31] : memref<1x148x128xf32, #tpu.memory_space<vmem>>, vector<1x96x128xf32>
    %37 = vector.shape_cast %36 : vector<1x96x128xf32> to vector<96x128xf32>
    %38 = arith.truncf %37 : vector<96x128xf32> to vector<96x128xbf16>
    %c5 = arith.constant 5 : index
    %c0_32 = arith.constant 0 : index
    %c0_33 = arith.constant 0 : index
    %39 = vector.load %arg2[%c5, %c0_32, %c0_33] : memref<25x128x128xbf16, #tpu.memory_space<vmem>>, vector<1x128x128xbf16>
    %40 = vector.shape_cast %39 : vector<1x128x128xbf16> to vector<128x128xbf16>
    %cst_34 = arith.constant dense<0.000000e+00> : vector<96x128xf32>
    %41 = tpu.matmul %38, %40, %cst_34 {dimension_numbers = #tpu.dot_dimension_numbers<[1], [0], [0], [1], [0, 0, 1, 1], [], []>} : vector<96x128xbf16>, vector<128x128xbf16>, vector<96x128xf32> -> vector<96x128xf32>
    %42 = arith.addf %35, %41 : vector<96x128xf32>
    %c0_35 = arith.constant 0 : index
    %c13 = arith.constant 13 : index
    %c0_36 = arith.constant 0 : index
    %43 = vector.load %arg1[%c0_35, %c13, %c0_36] : memref<1x148x128xf32, #tpu.memory_space<vmem>>, vector<1x96x128xf32>
    %44 = vector.shape_cast %43 : vector<1x96x128xf32> to vector<96x128xf32>
    %45 = arith.truncf %44 : vector<96x128xf32> to vector<96x128xbf16>
    %c6 = arith.constant 6 : index
    %c0_37 = arith.constant 0 : index
    %c0_38 = arith.constant 0 : index
    %46 = vector.load %arg2[%c6, %c0_37, %c0_38] : memref<25x128x128xbf16, #tpu.memory_space<vmem>>, vector<1x128x128xbf16>
    %47 = vector.shape_cast %46 : vector<1x128x128xbf16> to vector<128x128xbf16>
    %cst_39 = arith.constant dense<0.000000e+00> : vector<96x128xf32>
    %48 = tpu.matmul %45, %47, %cst_39 {dimension_numbers = #tpu.dot_dimension_numbers<[1], [0], [0], [1], [0, 0, 1, 1], [], []>} : vector<96x128xbf16>, vector<128x128xbf16>, vector<96x128xf32> -> vector<96x128xf32>
    %49 = arith.addf %42, %48 : vector<96x128xf32>
    %c0_40 = arith.constant 0 : index
    %c14 = arith.constant 14 : index
    %c0_41 = arith.constant 0 : index
    %50 = vector.load %arg1[%c0_40, %c14, %c0_41] : memref<1x148x128xf32, #tpu.memory_space<vmem>>, vector<1x96x128xf32>
    %51 = vector.shape_cast %50 : vector<1x96x128xf32> to vector<96x128xf32>
    %52 = arith.truncf %51 : vector<96x128xf32> to vector<96x128xbf16>
    %c7 = arith.constant 7 : index
    %c0_42 = arith.constant 0 : index
    %c0_43 = arith.constant 0 : index
    %53 = vector.load %arg2[%c7, %c0_42, %c0_43] : memref<25x128x128xbf16, #tpu.memory_space<vmem>>, vector<1x128x128xbf16>
    %54 = vector.shape_cast %53 : vector<1x128x128xbf16> to vector<128x128xbf16>
    %cst_44 = arith.constant dense<0.000000e+00> : vector<96x128xf32>
    %55 = tpu.matmul %52, %54, %cst_44 {dimension_numbers = #tpu.dot_dimension_numbers<[1], [0], [0], [1], [0, 0, 1, 1], [], []>} : vector<96x128xbf16>, vector<128x128xbf16>, vector<96x128xf32> -> vector<96x128xf32>
    %56 = arith.addf %49, %55 : vector<96x128xf32>
    %c0_45 = arith.constant 0 : index
    %c15 = arith.constant 15 : index
    %c0_46 = arith.constant 0 : index
    %57 = vector.load %arg1[%c0_45, %c15, %c0_46] : memref<1x148x128xf32, #tpu.memory_space<vmem>>, vector<1x96x128xf32>
    %58 = vector.shape_cast %57 : vector<1x96x128xf32> to vector<96x128xf32>
    %59 = arith.truncf %58 : vector<96x128xf32> to vector<96x128xbf16>
    %c8 = arith.constant 8 : index
    %c0_47 = arith.constant 0 : index
    %c0_48 = arith.constant 0 : index
    %60 = vector.load %arg2[%c8, %c0_47, %c0_48] : memref<25x128x128xbf16, #tpu.memory_space<vmem>>, vector<1x128x128xbf16>
    %61 = vector.shape_cast %60 : vector<1x128x128xbf16> to vector<128x128xbf16>
    %cst_49 = arith.constant dense<0.000000e+00> : vector<96x128xf32>
    %62 = tpu.matmul %59, %61, %cst_49 {dimension_numbers = #tpu.dot_dimension_numbers<[1], [0], [0], [1], [0, 0, 1, 1], [], []>} : vector<96x128xbf16>, vector<128x128xbf16>, vector<96x128xf32> -> vector<96x128xf32>
    %63 = arith.addf %56, %62 : vector<96x128xf32>
    %c0_50 = arith.constant 0 : index
    %c16 = arith.constant 16 : index
    %c0_51 = arith.constant 0 : index
    %64 = vector.load %arg1[%c0_50, %c16, %c0_51] : memref<1x148x128xf32, #tpu.memory_space<vmem>>, vector<1x96x128xf32>
    %65 = vector.shape_cast %64 : vector<1x96x128xf32> to vector<96x128xf32>
    %66 = arith.truncf %65 : vector<96x128xf32> to vector<96x128xbf16>
    %c9 = arith.constant 9 : index
    %c0_52 = arith.constant 0 : index
    %c0_53 = arith.constant 0 : index
    %67 = vector.load %arg2[%c9, %c0_52, %c0_53] : memref<25x128x128xbf16, #tpu.memory_space<vmem>>, vector<1x128x128xbf16>
    %68 = vector.shape_cast %67 : vector<1x128x128xbf16> to vector<128x128xbf16>
    %cst_54 = arith.constant dense<0.000000e+00> : vector<96x128xf32>
    %69 = tpu.matmul %66, %68, %cst_54 {dimension_numbers = #tpu.dot_dimension_numbers<[1], [0], [0], [1], [0, 0, 1, 1], [], []>} : vector<96x128xbf16>, vector<128x128xbf16>, vector<96x128xf32> -> vector<96x128xf32>
    %70 = arith.addf %63, %69 : vector<96x128xf32>
    %c0_55 = arith.constant 0 : index
    %c24 = arith.constant 24 : index
    %c0_56 = arith.constant 0 : index
    %71 = vector.load %arg1[%c0_55, %c24, %c0_56] : memref<1x148x128xf32, #tpu.memory_space<vmem>>, vector<1x96x128xf32>
    %72 = vector.shape_cast %71 : vector<1x96x128xf32> to vector<96x128xf32>
    %73 = arith.truncf %72 : vector<96x128xf32> to vector<96x128xbf16>
    %c10 = arith.constant 10 : index
    %c0_57 = arith.constant 0 : index
    %c0_58 = arith.constant 0 : index
    %74 = vector.load %arg2[%c10, %c0_57, %c0_58] : memref<25x128x128xbf16, #tpu.memory_space<vmem>>, vector<1x128x128xbf16>
    %75 = vector.shape_cast %74 : vector<1x128x128xbf16> to vector<128x128xbf16>
    %cst_59 = arith.constant dense<0.000000e+00> : vector<96x128xf32>
    %76 = tpu.matmul %73, %75, %cst_59 {dimension_numbers = #tpu.dot_dimension_numbers<[1], [0], [0], [1], [0, 0, 1, 1], [], []>} : vector<96x128xbf16>, vector<128x128xbf16>, vector<96x128xf32> -> vector<96x128xf32>
    %77 = arith.addf %70, %76 : vector<96x128xf32>
    %c0_60 = arith.constant 0 : index
    %c25 = arith.constant 25 : index
    %c0_61 = arith.constant 0 : index
    %78 = vector.load %arg1[%c0_60, %c25, %c0_61] : memref<1x148x128xf32, #tpu.memory_space<vmem>>, vector<1x96x128xf32>
    %79 = vector.shape_cast %78 : vector<1x96x128xf32> to vector<96x128xf32>
    %80 = arith.truncf %79 : vector<96x128xf32> to vector<96x128xbf16>
    %c11 = arith.constant 11 : index
    %c0_62 = arith.constant 0 : index
    %c0_63 = arith.constant 0 : index
    %81 = vector.load %arg2[%c11, %c0_62, %c0_63] : memref<25x128x128xbf16, #tpu.memory_space<vmem>>, vector<1x128x128xbf16>
    %82 = vector.shape_cast %81 : vector<1x128x128xbf16> to vector<128x128xbf16>
    %cst_64 = arith.constant dense<0.000000e+00> : vector<96x128xf32>
    %83 = tpu.matmul %80, %82, %cst_64 {dimension_numbers = #tpu.dot_dimension_numbers<[1], [0], [0], [1], [0, 0, 1, 1], [], []>} : vector<96x128xbf16>, vector<128x128xbf16>, vector<96x128xf32> -> vector<96x128xf32>
    %84 = arith.addf %77, %83 : vector<96x128xf32>
    %c0_65 = arith.constant 0 : index
    %c26 = arith.constant 26 : index
    %c0_66 = arith.constant 0 : index
    %85 = vector.load %arg1[%c0_65, %c26, %c0_66] : memref<1x148x128xf32, #tpu.memory_space<vmem>>, vector<1x96x128xf32>
    %86 = vector.shape_cast %85 : vector<1x96x128xf32> to vector<96x128xf32>
    %87 = arith.truncf %86 : vector<96x128xf32> to vector<96x128xbf16>
    %c12_67 = arith.constant 12 : index
    %c0_68 = arith.constant 0 : index
    %c0_69 = arith.constant 0 : index
    %88 = vector.load %arg2[%c12_67, %c0_68, %c0_69] : memref<25x128x128xbf16, #tpu.memory_space<vmem>>, vector<1x128x128xbf16>
    %89 = vector.shape_cast %88 : vector<1x128x128xbf16> to vector<128x128xbf16>
    %cst_70 = arith.constant dense<0.000000e+00> : vector<96x128xf32>
    %90 = tpu.matmul %87, %89, %cst_70 {dimension_numbers = #tpu.dot_dimension_numbers<[1], [0], [0], [1], [0, 0, 1, 1], [], []>} : vector<96x128xbf16>, vector<128x128xbf16>, vector<96x128xf32> -> vector<96x128xf32>
    %91 = arith.addf %84, %90 : vector<96x128xf32>
    %c0_71 = arith.constant 0 : index
    %c27 = arith.constant 27 : index
    %c0_72 = arith.constant 0 : index
    %92 = vector.load %arg1[%c0_71, %c27, %c0_72] : memref<1x148x128xf32, #tpu.memory_space<vmem>>, vector<1x96x128xf32>
    %93 = vector.shape_cast %92 : vector<1x96x128xf32> to vector<96x128xf32>
    %94 = arith.truncf %93 : vector<96x128xf32> to vector<96x128xbf16>
    %c13_73 = arith.constant 13 : index
    %c0_74 = arith.constant 0 : index
    %c0_75 = arith.constant 0 : index
    %95 = vector.load %arg2[%c13_73, %c0_74, %c0_75] : memref<25x128x128xbf16, #tpu.memory_space<vmem>>, vector<1x128x128xbf16>
    %96 = vector.shape_cast %95 : vector<1x128x128xbf16> to vector<128x128xbf16>
    %cst_76 = arith.constant dense<0.000000e+00> : vector<96x128xf32>
    %97 = tpu.matmul %94, %96, %cst_76 {dimension_numbers = #tpu.dot_dimension_numbers<[1], [0], [0], [1], [0, 0, 1, 1], [], []>} : vector<96x128xbf16>, vector<128x128xbf16>, vector<96x128xf32> -> vector<96x128xf32>
    %98 = arith.addf %91, %97 : vector<96x128xf32>
    %c0_77 = arith.constant 0 : index
    %c28 = arith.constant 28 : index
    %c0_78 = arith.constant 0 : index
    %99 = vector.load %arg1[%c0_77, %c28, %c0_78] : memref<1x148x128xf32, #tpu.memory_space<vmem>>, vector<1x96x128xf32>
    %100 = vector.shape_cast %99 : vector<1x96x128xf32> to vector<96x128xf32>
    %101 = arith.truncf %100 : vector<96x128xf32> to vector<96x128xbf16>
    %c14_79 = arith.constant 14 : index
    %c0_80 = arith.constant 0 : index
    %c0_81 = arith.constant 0 : index
    %102 = vector.load %arg2[%c14_79, %c0_80, %c0_81] : memref<25x128x128xbf16, #tpu.memory_space<vmem>>, vector<1x128x128xbf16>
    %103 = vector.shape_cast %102 : vector<1x128x128xbf16> to vector<128x128xbf16>
    %cst_82 = arith.constant dense<0.000000e+00> : vector<96x128xf32>
    %104 = tpu.matmul %101, %103, %cst_82 {dimension_numbers = #tpu.dot_dimension_numbers<[1], [0], [0], [1], [0, 0, 1, 1], [], []>} : vector<96x128xbf16>, vector<128x128xbf16>, vector<96x128xf32> -> vector<96x128xf32>
    %105 = arith.addf %98, %104 : vector<96x128xf32>
    %c0_83 = arith.constant 0 : index
    %c36 = arith.constant 36 : index
    %c0_84 = arith.constant 0 : index
    %106 = vector.load %arg1[%c0_83, %c36, %c0_84] : memref<1x148x128xf32, #tpu.memory_space<vmem>>, vector<1x96x128xf32>
    %107 = vector.shape_cast %106 : vector<1x96x128xf32> to vector<96x128xf32>
    %108 = arith.truncf %107 : vector<96x128xf32> to vector<96x128xbf16>
    %c15_85 = arith.constant 15 : index
    %c0_86 = arith.constant 0 : index
    %c0_87 = arith.constant 0 : index
    %109 = vector.load %arg2[%c15_85, %c0_86, %c0_87] : memref<25x128x128xbf16, #tpu.memory_space<vmem>>, vector<1x128x128xbf16>
    %110 = vector.shape_cast %109 : vector<1x128x128xbf16> to vector<128x128xbf16>
    %cst_88 = arith.constant dense<0.000000e+00> : vector<96x128xf32>
    %111 = tpu.matmul %108, %110, %cst_88 {dimension_numbers = #tpu.dot_dimension_numbers<[1], [0], [0], [1], [0, 0, 1, 1], [], []>} : vector<96x128xbf16>, vector<128x128xbf16>, vector<96x128xf32> -> vector<96x128xf32>
    %112 = arith.addf %105, %111 : vector<96x128xf32>
    %c0_89 = arith.constant 0 : index
    %c37 = arith.constant 37 : index
    %c0_90 = arith.constant 0 : index
    %113 = vector.load %arg1[%c0_89, %c37, %c0_90] : memref<1x148x128xf32, #tpu.memory_space<vmem>>, vector<1x96x128xf32>
    %114 = vector.shape_cast %113 : vector<1x96x128xf32> to vector<96x128xf32>
    %115 = arith.truncf %114 : vector<96x128xf32> to vector<96x128xbf16>
    %c16_91 = arith.constant 16 : index
    %c0_92 = arith.constant 0 : index
    %c0_93 = arith.constant 0 : index
    %116 = vector.load %arg2[%c16_91, %c0_92, %c0_93] : memref<25x128x128xbf16, #tpu.memory_space<vmem>>, vector<1x128x128xbf16>
    %117 = vector.shape_cast %116 : vector<1x128x128xbf16> to vector<128x128xbf16>
    %cst_94 = arith.constant dense<0.000000e+00> : vector<96x128xf32>
    %118 = tpu.matmul %115, %117, %cst_94 {dimension_numbers = #tpu.dot_dimension_numbers<[1], [0], [0], [1], [0, 0, 1, 1], [], []>} : vector<96x128xbf16>, vector<128x128xbf16>, vector<96x128xf32> -> vector<96x128xf32>
    %119 = arith.addf %112, %118 : vector<96x128xf32>
    %c0_95 = arith.constant 0 : index
    %c38 = arith.constant 38 : index
    %c0_96 = arith.constant 0 : index
    %120 = vector.load %arg1[%c0_95, %c38, %c0_96] : memref<1x148x128xf32, #tpu.memory_space<vmem>>, vector<1x96x128xf32>
    %121 = vector.shape_cast %120 : vector<1x96x128xf32> to vector<96x128xf32>
    %122 = arith.truncf %121 : vector<96x128xf32> to vector<96x128xbf16>
    %c17 = arith.constant 17 : index
    %c0_97 = arith.constant 0 : index
    %c0_98 = arith.constant 0 : index
    %123 = vector.load %arg2[%c17, %c0_97, %c0_98] : memref<25x128x128xbf16, #tpu.memory_space<vmem>>, vector<1x128x128xbf16>
    %124 = vector.shape_cast %123 : vector<1x128x128xbf16> to vector<128x128xbf16>
    %cst_99 = arith.constant dense<0.000000e+00> : vector<96x128xf32>
    %125 = tpu.matmul %122, %124, %cst_99 {dimension_numbers = #tpu.dot_dimension_numbers<[1], [0], [0], [1], [0, 0, 1, 1], [], []>} : vector<96x128xbf16>, vector<128x128xbf16>, vector<96x128xf32> -> vector<96x128xf32>
    %126 = arith.addf %119, %125 : vector<96x128xf32>
    %c0_100 = arith.constant 0 : index
    %c39 = arith.constant 39 : index
    %c0_101 = arith.constant 0 : index
    %127 = vector.load %arg1[%c0_100, %c39, %c0_101] : memref<1x148x128xf32, #tpu.memory_space<vmem>>, vector<1x96x128xf32>
    %128 = vector.shape_cast %127 : vector<1x96x128xf32> to vector<96x128xf32>
    %129 = arith.truncf %128 : vector<96x128xf32> to vector<96x128xbf16>
    %c18 = arith.constant 18 : index
    %c0_102 = arith.constant 0 : index
    %c0_103 = arith.constant 0 : index
    %130 = vector.load %arg2[%c18, %c0_102, %c0_103] : memref<25x128x128xbf16, #tpu.memory_space<vmem>>, vector<1x128x128xbf16>
    %131 = vector.shape_cast %130 : vector<1x128x128xbf16> to vector<128x128xbf16>
    %cst_104 = arith.constant dense<0.000000e+00> : vector<96x128xf32>
    %132 = tpu.matmul %129, %131, %cst_104 {dimension_numbers = #tpu.dot_dimension_numbers<[1], [0], [0], [1], [0, 0, 1, 1], [], []>} : vector<96x128xbf16>, vector<128x128xbf16>, vector<96x128xf32> -> vector<96x128xf32>
    %133 = arith.addf %126, %132 : vector<96x128xf32>
    %c0_105 = arith.constant 0 : index
    %c40 = arith.constant 40 : index
    %c0_106 = arith.constant 0 : index
    %134 = vector.load %arg1[%c0_105, %c40, %c0_106] : memref<1x148x128xf32, #tpu.memory_space<vmem>>, vector<1x96x128xf32>
    %135 = vector.shape_cast %134 : vector<1x96x128xf32> to vector<96x128xf32>
    %136 = arith.truncf %135 : vector<96x128xf32> to vector<96x128xbf16>
    %c19 = arith.constant 19 : index
    %c0_107 = arith.constant 0 : index
    %c0_108 = arith.constant 0 : index
    %137 = vector.load %arg2[%c19, %c0_107, %c0_108] : memref<25x128x128xbf16, #tpu.memory_space<vmem>>, vector<1x128x128xbf16>
    %138 = vector.shape_cast %137 : vector<1x128x128xbf16> to vector<128x128xbf16>
    %cst_109 = arith.constant dense<0.000000e+00> : vector<96x128xf32>
    %139 = tpu.matmul %136, %138, %cst_109 {dimension_numbers = #tpu.dot_dimension_numbers<[1], [0], [0], [1], [0, 0, 1, 1], [], []>} : vector<96x128xbf16>, vector<128x128xbf16>, vector<96x128xf32> -> vector<96x128xf32>
    %140 = arith.addf %133, %139 : vector<96x128xf32>
    %c0_110 = arith.constant 0 : index
    %c48 = arith.constant 48 : index
    %c0_111 = arith.constant 0 : index
    %141 = vector.load %arg1[%c0_110, %c48, %c0_111] : memref<1x148x128xf32, #tpu.memory_space<vmem>>, vector<1x96x128xf32>
    %142 = vector.shape_cast %141 : vector<1x96x128xf32> to vector<96x128xf32>
    %143 = arith.truncf %142 : vector<96x128xf32> to vector<96x128xbf16>
    %c20 = arith.constant 20 : index
    %c0_112 = arith.constant 0 : index
    %c0_113 = arith.constant 0 : index
    %144 = vector.load %arg2[%c20, %c0_112, %c0_113] : memref<25x128x128xbf16, #tpu.memory_space<vmem>>, vector<1x128x128xbf16>
    %145 = vector.shape_cast %144 : vector<1x128x128xbf16> to vector<128x128xbf16>
    %cst_114 = arith.constant dense<0.000000e+00> : vector<96x128xf32>
    %146 = tpu.matmul %143, %145, %cst_114 {dimension_numbers = #tpu.dot_dimension_numbers<[1], [0], [0], [1], [0, 0, 1, 1], [], []>} : vector<96x128xbf16>, vector<128x128xbf16>, vector<96x128xf32> -> vector<96x128xf32>
    %147 = arith.addf %140, %146 : vector<96x128xf32>
    %c0_115 = arith.constant 0 : index
    %c49 = arith.constant 49 : index
    %c0_116 = arith.constant 0 : index
    %148 = vector.load %arg1[%c0_115, %c49, %c0_116] : memref<1x148x128xf32, #tpu.memory_space<vmem>>, vector<1x96x128xf32>
    %149 = vector.shape_cast %148 : vector<1x96x128xf32> to vector<96x128xf32>
    %150 = arith.truncf %149 : vector<96x128xf32> to vector<96x128xbf16>
    %c21 = arith.constant 21 : index
    %c0_117 = arith.constant 0 : index
    %c0_118 = arith.constant 0 : index
    %151 = vector.load %arg2[%c21, %c0_117, %c0_118] : memref<25x128x128xbf16, #tpu.memory_space<vmem>>, vector<1x128x128xbf16>
    %152 = vector.shape_cast %151 : vector<1x128x128xbf16> to vector<128x128xbf16>
    %cst_119 = arith.constant dense<0.000000e+00> : vector<96x128xf32>
    %153 = tpu.matmul %150, %152, %cst_119 {dimension_numbers = #tpu.dot_dimension_numbers<[1], [0], [0], [1], [0, 0, 1, 1], [], []>} : vector<96x128xbf16>, vector<128x128xbf16>, vector<96x128xf32> -> vector<96x128xf32>
    %154 = arith.addf %147, %153 : vector<96x128xf32>
    %c0_120 = arith.constant 0 : index
    %c50 = arith.constant 50 : index
    %c0_121 = arith.constant 0 : index
    %155 = vector.load %arg1[%c0_120, %c50, %c0_121] : memref<1x148x128xf32, #tpu.memory_space<vmem>>, vector<1x96x128xf32>
    %156 = vector.shape_cast %155 : vector<1x96x128xf32> to vector<96x128xf32>
    %157 = arith.truncf %156 : vector<96x128xf32> to vector<96x128xbf16>
    %c22 = arith.constant 22 : index
    %c0_122 = arith.constant 0 : index
    %c0_123 = arith.constant 0 : index
    %158 = vector.load %arg2[%c22, %c0_122, %c0_123] : memref<25x128x128xbf16, #tpu.memory_space<vmem>>, vector<1x128x128xbf16>
    %159 = vector.shape_cast %158 : vector<1x128x128xbf16> to vector<128x128xbf16>
    %cst_124 = arith.constant dense<0.000000e+00> : vector<96x128xf32>
    %160 = tpu.matmul %157, %159, %cst_124 {dimension_numbers = #tpu.dot_dimension_numbers<[1], [0], [0], [1], [0, 0, 1, 1], [], []>} : vector<96x128xbf16>, vector<128x128xbf16>, vector<96x128xf32> -> vector<96x128xf32>
    %161 = arith.addf %154, %160 : vector<96x128xf32>
    %c0_125 = arith.constant 0 : index
    %c51 = arith.constant 51 : index
    %c0_126 = arith.constant 0 : index
    %162 = vector.load %arg1[%c0_125, %c51, %c0_126] : memref<1x148x128xf32, #tpu.memory_space<vmem>>, vector<1x96x128xf32>
    %163 = vector.shape_cast %162 : vector<1x96x128xf32> to vector<96x128xf32>
    %164 = arith.truncf %163 : vector<96x128xf32> to vector<96x128xbf16>
    %c23 = arith.constant 23 : index
    %c0_127 = arith.constant 0 : index
    %c0_128 = arith.constant 0 : index
    %165 = vector.load %arg2[%c23, %c0_127, %c0_128] : memref<25x128x128xbf16, #tpu.memory_space<vmem>>, vector<1x128x128xbf16>
    %166 = vector.shape_cast %165 : vector<1x128x128xbf16> to vector<128x128xbf16>
    %cst_129 = arith.constant dense<0.000000e+00> : vector<96x128xf32>
    %167 = tpu.matmul %164, %166, %cst_129 {dimension_numbers = #tpu.dot_dimension_numbers<[1], [0], [0], [1], [0, 0, 1, 1], [], []>} : vector<96x128xbf16>, vector<128x128xbf16>, vector<96x128xf32> -> vector<96x128xf32>
    %168 = arith.addf %161, %167 : vector<96x128xf32>
    %c0_130 = arith.constant 0 : index
    %c52 = arith.constant 52 : index
    %c0_131 = arith.constant 0 : index
    %169 = vector.load %arg1[%c0_130, %c52, %c0_131] : memref<1x148x128xf32, #tpu.memory_space<vmem>>, vector<1x96x128xf32>
    %170 = vector.shape_cast %169 : vector<1x96x128xf32> to vector<96x128xf32>
    %171 = arith.truncf %170 : vector<96x128xf32> to vector<96x128xbf16>
    %c24_132 = arith.constant 24 : index
    %c0_133 = arith.constant 0 : index
    %c0_134 = arith.constant 0 : index
    %172 = vector.load %arg2[%c24_132, %c0_133, %c0_134] : memref<25x128x128xbf16, #tpu.memory_space<vmem>>, vector<1x128x128xbf16>
    %173 = vector.shape_cast %172 : vector<1x128x128xbf16> to vector<128x128xbf16>
    %cst_135 = arith.constant dense<0.000000e+00> : vector<96x128xf32>
    %174 = tpu.matmul %171, %173, %cst_135 {dimension_numbers = #tpu.dot_dimension_numbers<[1], [0], [0], [1], [0, 0, 1, 1], [], []>} : vector<96x128xbf16>, vector<128x128xbf16>, vector<96x128xf32> -> vector<96x128xf32>
    %175 = arith.addf %168, %174 : vector<96x128xf32>
    %c0_136 = arith.constant 0 : index
    %c0_137 = arith.constant 0 : index
    %176 = vector.load %arg3[%c0_136, %c0_137] : memref<1x128xf32, #tpu.memory_space<vmem>>, vector<1x128xf32>
    %177 = vector.broadcast %176 : vector<1x128xf32> to vector<96x128xf32>
    %178 = arith.addf %175, %177 : vector<96x128xf32>
    %cst_138 = arith.constant 0.000000e+00 : f32
    %179 = vector.broadcast %cst_138 : f32 to vector<96x128xf32>
    %180 = arith.maximumf %178, %179 : vector<96x128xf32>
    %181 = arith.truncf %180 : vector<96x128xf32> to vector<96x128xbf16>
    %c0_139 = arith.constant 0 : index
    %c0_140 = arith.constant 0 : index
    %c0_141 = arith.constant 0 : index
    %182 = vector.load %arg4[%c0_139, %c0_140, %c0_141] : memref<1x96x128xbf16, #tpu.memory_space<vmem>>, vector<1x96x128xbf16>
    %183 = vector.shape_cast %182 : vector<1x96x128xbf16> to vector<96x128xbf16>
    %184 = vector.shape_cast %181 : vector<96x128xbf16> to vector<1x96x128xbf16>
    tpu.vector_store %arg4[%c0_139, %c0_140, %c0_141], %184 {strides = array<i32>} : memref<1x96x128xbf16, #tpu.memory_space<vmem>>, vector<1x96x128xbf16>,
    return
  }
  func.func @transform_0(%arg0: i32) -> (i32, i32, i32) {
    %c0_i32 = arith.constant 0 : i32
    %c0_i32_0 = arith.constant 0 : i32
    %c0_i32_1 = arith.constant 0 : i32
    return %arg0, %c0_i32, %c0_i32_0 : i32, i32, i32
  }
  func.func @transform_1(%arg0: i32) -> (i32, i32, i32) {
    %c0_i32 = arith.constant 0 : i32
    %c0_i32_0 = arith.constant 0 : i32
    %c0_i32_1 = arith.constant 0 : i32
    %c0_i32_2 = arith.constant 0 : i32
    return %c0_i32, %c0_i32_0, %c0_i32_1 : i32, i32, i32
  }
  func.func @transform_2(%arg0: i32) -> (i32, i32) {
    %c0_i32 = arith.constant 0 : i32
    %c0_i32_0 = arith.constant 0 : i32
    %c0_i32_1 = arith.constant 0 : i32
    return %c0_i32, %c0_i32_0 : i32, i32
  }
  func.func @transform_3(%arg0: i32) -> (i32, i32, i32) {
    %c0_i32 = arith.constant 0 : i32
    %c0_i32_0 = arith.constant 0 : i32
    %c0_i32_1 = arith.constant 0 : i32
    return %arg0, %c0_i32, %c0_i32_0 : i32, i32, i32
  }
}

module attributes {stable_mosaic.version = 11 : i64} {
  func.func @_tail_kernel(%arg0: i32, %arg1: i32, %arg2: memref<1x64x128xbf16, #tpu.memory_space<vmem>>, %arg3: memref<128x128xbf16, #tpu.memory_space<vmem>>, %arg4: memref<1x128xf32, #tpu.memory_space<vmem>>, %arg5: memref<128x128xbf16, #tpu.memory_space<vmem>>, %arg6: memref<1x128xf32, #tpu.memory_space<vmem>>, %arg7: memref<1x1x128xf32, #tpu.memory_space<vmem>>) attributes {dimension_semantics = [#tpu.dimension_semantics<parallel>, #tpu.dimension_semantics<arbitrary>], iteration_bounds = array<i64: 2, 1>, scalar_prefetch = 0 : i64, scratch_operands = 0 : i64, tpu.core_type = #tpu.core_type<tc>, window_params = [{transform_indices = @transform_0, window_bounds = array<i64: 1, 64, 128>}, {pipeline_mode = #tpu.pipeline_mode<synchronous>, transform_indices = @transform_1, window_bounds = array<i64: 128, 128>}, {pipeline_mode = #tpu.pipeline_mode<synchronous>, transform_indices = @transform_2, window_bounds = array<i64: 1, 128>}, {pipeline_mode = #tpu.pipeline_mode<synchronous>, transform_indices = @transform_3, window_bounds = array<i64: 128, 128>}, {pipeline_mode = #tpu.pipeline_mode<synchronous>, transform_indices = @transform_4, window_bounds = array<i64: 1, 128>}, {transform_indices = @transform_5, window_bounds = array<i64: 1, 1, 128>}]} {
    %c0 = arith.constant 0 : index
    %c0_0 = arith.constant 0 : index
    %c0_1 = arith.constant 0 : index
    %0 = vector.load %arg2[%c0, %c0_0, %c0_1] : memref<1x64x128xbf16, #tpu.memory_space<vmem>>, vector<1x64x128xbf16>
    %1 = vector.shape_cast %0 : vector<1x64x128xbf16> to vector<64x128xbf16>
    %c0_2 = arith.constant 0 : index
    %c0_3 = arith.constant 0 : index
    %2 = vector.load %arg3[%c0_2, %c0_3] : memref<128x128xbf16, #tpu.memory_space<vmem>>, vector<128x128xbf16>
    %cst = arith.constant dense<0.000000e+00> : vector<64x128xf32>
    %3 = tpu.matmul %1, %2, %cst {dimension_numbers = #tpu.dot_dimension_numbers<[1], [0], [0], [1], [0, 0, 1, 1], [], []>} : vector<64x128xbf16>, vector<128x128xbf16>, vector<64x128xf32> -> vector<64x128xf32>
    %c0_4 = arith.constant 0 : index
    %c0_5 = arith.constant 0 : index
    %4 = vector.load %arg4[%c0_4, %c0_5] : memref<1x128xf32, #tpu.memory_space<vmem>>, vector<1x128xf32>
    %5 = vector.broadcast %4 : vector<1x128xf32> to vector<64x128xf32>
    %6 = arith.addf %3, %5 : vector<64x128xf32>
    %cst_6 = arith.constant 0.000000e+00 : f32
    %7 = vector.broadcast %cst_6 : f32 to vector<64x128xf32>
    %8 = arith.maximumf %6, %7 : vector<64x128xf32>
    %9 = arith.truncf %8 : vector<64x128xf32> to vector<64x128xbf16>
    %c0_7 = arith.constant 0 : index
    %c0_8 = arith.constant 0 : index
    %10 = vector.load %arg5[%c0_7, %c0_8] : memref<128x128xbf16, #tpu.memory_space<vmem>>, vector<128x128xbf16>
    %cst_9 = arith.constant dense<0.000000e+00> : vector<64x128xf32>
    %11 = tpu.matmul %9, %10, %cst_9 {dimension_numbers = #tpu.dot_dimension_numbers<[1], [0], [0], [1], [0, 0, 1, 1], [], []>} : vector<64x128xbf16>, vector<128x128xbf16>, vector<64x128xf32> -> vector<64x128xf32>
    %c0_10 = arith.constant 0 : index
    %c0_11 = arith.constant 0 : index
    %12 = vector.load %arg6[%c0_10, %c0_11] : memref<1x128xf32, #tpu.memory_space<vmem>>, vector<1x128xf32>
    %13 = vector.broadcast %12 : vector<1x128xf32> to vector<64x128xf32>
    %14 = arith.addf %11, %13 : vector<64x128xf32>
    %cst_12 = arith.constant 0.000000e+00 : f32
    %15 = vector.broadcast %cst_12 : f32 to vector<64x128xf32>
    %16 = arith.maximumf %14, %15 : vector<64x128xf32>
    %cst_13 = arith.constant dense<0xFF800000> : vector<128xf32>
    %17 = vector.multi_reduction <maximumf>, %16, %cst_13 [0] : vector<64x128xf32> to vector<128xf32>
    %18 = vector.shape_cast %17 : vector<128xf32> to vector<1x128xf32>
    %c0_i32 = arith.constant 0 : i32
    %19 = arith.cmpi eq, %arg1, %c0_i32 : i32
    %20 = arith.extui %19 : i1 to i32
    %c0_i32_14 = arith.constant 0 : i32
    %21 = arith.cmpi ne, %20, %c0_i32_14 : i32
    scf.if %21 {
      %c0_17 = arith.constant 0 : index
      %c0_18 = arith.constant 0 : index
      %c0_19 = arith.constant 0 : index
      %25 = vector.load %arg7[%c0_17, %c0_18, %c0_19] : memref<1x1x128xf32, #tpu.memory_space<vmem>>, vector<1x1x128xf32>
      %26 = vector.shape_cast %25 : vector<1x1x128xf32> to vector<1x128xf32>
      %27 = vector.shape_cast %18 : vector<1x128xf32> to vector<1x1x128xf32>
      tpu.vector_store %arg7[%c0_17, %c0_18, %c0_19], %27 {strides = array<i32>} : memref<1x1x128xf32, #tpu.memory_space<vmem>>, vector<1x1x128xf32>,
    } else {
    }
    %c0_i32_15 = arith.constant 0 : i32
    %22 = arith.cmpi sgt, %arg1, %c0_i32_15 : i32
    %23 = arith.extui %22 : i1 to i32
    %c0_i32_16 = arith.constant 0 : i32
    %24 = arith.cmpi ne, %23, %c0_i32_16 : i32
    scf.if %24 {
      %c0_17 = arith.constant 0 : index
      %c0_18 = arith.constant 0 : index
      %c0_19 = arith.constant 0 : index
      %25 = vector.load %arg7[%c0_17, %c0_18, %c0_19] : memref<1x1x128xf32, #tpu.memory_space<vmem>>, vector<1x1x128xf32>
      %26 = vector.shape_cast %25 : vector<1x1x128xf32> to vector<1x128xf32>
      %27 = arith.maximumf %26, %18 : vector<1x128xf32>
      %c0_20 = arith.constant 0 : index
      %c0_21 = arith.constant 0 : index
      %c0_22 = arith.constant 0 : index
      %28 = vector.load %arg7[%c0_20, %c0_21, %c0_22] : memref<1x1x128xf32, #tpu.memory_space<vmem>>, vector<1x1x128xf32>
      %29 = vector.shape_cast %28 : vector<1x1x128xf32> to vector<1x128xf32>
      %30 = vector.shape_cast %27 : vector<1x128xf32> to vector<1x1x128xf32>
      tpu.vector_store %arg7[%c0_20, %c0_21, %c0_22], %30 {strides = array<i32>} : memref<1x1x128xf32, #tpu.memory_space<vmem>>, vector<1x1x128xf32>,
    } else {
    }
    return
  }
  func.func @transform_0(%arg0: i32, %arg1: i32) -> (i32, i32, i32) {
    %c0_i32 = arith.constant 0 : i32
    %c0_i32_0 = arith.constant 0 : i32
    return %arg0, %arg1, %c0_i32 : i32, i32, i32
  }
  func.func @transform_1(%arg0: i32, %arg1: i32) -> (i32, i32) {
    %c0_i32 = arith.constant 0 : i32
    %c0_i32_0 = arith.constant 0 : i32
    %c0_i32_1 = arith.constant 0 : i32
    return %c0_i32, %c0_i32_0 : i32, i32
  }
  func.func @transform_2(%arg0: i32, %arg1: i32) -> (i32, i32) {
    %c0_i32 = arith.constant 0 : i32
    %c0_i32_0 = arith.constant 0 : i32
    %c0_i32_1 = arith.constant 0 : i32
    return %c0_i32, %c0_i32_0 : i32, i32
  }
  func.func @transform_3(%arg0: i32, %arg1: i32) -> (i32, i32) {
    %c0_i32 = arith.constant 0 : i32
    %c0_i32_0 = arith.constant 0 : i32
    %c0_i32_1 = arith.constant 0 : i32
    return %c0_i32, %c0_i32_0 : i32, i32
  }
  func.func @transform_4(%arg0: i32, %arg1: i32) -> (i32, i32) {
    %c0_i32 = arith.constant 0 : i32
    %c0_i32_0 = arith.constant 0 : i32
    %c0_i32_1 = arith.constant 0 : i32
    return %c0_i32, %c0_i32_0 : i32, i32
  }
  func.func @transform_5(%arg0: i32, %arg1: i32) -> (i32, i32, i32) {
    %c0_i32 = arith.constant 0 : i32
    %c0_i32_0 = arith.constant 0 : i32
    %c0_i32_1 = arith.constant 0 : i32
    return %arg0, %c0_i32, %c0_i32_0 : i32, i32, i32
  }
}

</mosaic_0001>

<bundles_post_ra>
// kernel: shared_net_forward.4
= control target key start
LH: loop header
LB: loop body
LE: loop exit
PB: predicated region body
PF: predicated region fallthrough
CT: control target
= control target key end

     0   :  { %s455_s1 = inlined_call_operand.vmem [shape: bf16[128,128], index: 1, kind: input, shape index: {}]   ;;  %s456_s2 = inlined_call_operand.vmem [shape: f32[1,128], index: 2, kind: input, shape index: {}]   ;;  %s457_s0 = inlined_call_operand.vmem [shape: bf16[128,128], index: 0, kind: input, shape index: {}]   ;;  %s458_s3 = inlined_call_operand.vmem [shape: f32[128,128], index: 3, kind: output, shape index: {}]  }
   0x1   :  { %v310_v0 = vld [vmem:[%s455_s1 + $0x38] sm:$0xff]  ;;  %v309_v1 = vld [vmem:[%s455_s1 + $0x30] sm:$0xff]  ;;  %v308_v2 = vld [vmem:[%s455_s1 + $0x28] sm:$0xff] }
   0x2   :  { %146 = vmatpush.bf16.msra.mxu0 %v310_v0  ;;  %311 = vmatpush.bf16.msra.mxu1 %v310_v0  ;;  %v307_v3 = vld [vmem:[%s455_s1 + $0x20] sm:$0xff]  ;;  %v306_v4 = vld [vmem:[%s455_s1 + $0x18] sm:$0xff]  ;;  %v305_v5 = vld [vmem:[%s455_s1 + $0x10] sm:$0xff] }
   0x3   :  { %312 = vmatpush.bf16.msra.mxu2 %v310_v0  ;;  %313 = vmatpush.bf16.msra.mxu3 %v310_v0  ;;  %v304_v6 = vld [vmem:[%s455_s1 + $0x8] sm:$0xff]  ;;  %v303_v7 = vld [vmem:[%s455_s1] sm:$0xff]  ;;  %v297_v9 = vld [vmem:[%s457_s0 + $0x10] sm:$0xff] }
   0x4   :  { %v295_v8 = vld [vmem:[%s457_s0] sm:$0xff]  ;;  %v301_v11 = vld [vmem:[%s457_s0 + $0x30] sm:$0xff]  ;;  %v296_v12 = vld [vmem:[%s457_s0 + $0x8] sm:$0xff] }
   0x5   :  { %v299_v10 = vld [vmem:[%s457_s0 + $0x20] sm:$0xff]  ;;  %v298_v13 = vld [vmem:[%s457_s0 + $0x18] sm:$0xff]  ;;  %v300_v14 = vld [vmem:[%s457_s0 + $0x28] sm:$0xff] }
   0x6   :  { %147 = vmatpush.bf16.msra.mxu0 %v309_v1  ;;  %314 = vmatpush.bf16.msra.mxu1 %v309_v1  ;;  %v302_v15 = vld [vmem:[%s457_s0 + $0x38] sm:$0xff]  ;;  %v335_v16 = vld [vmem:[%s456_s2] ss:$0 sm:$0xff] }
   0x7   :  { %315 = vmatpush.bf16.msra.mxu2 %v309_v1  ;;  %316 = vmatpush.bf16.msra.mxu3 %v309_v1 }
   0xa   :  { %148 = vmatpush.bf16.msra.mxu0 %v308_v2  ;;  %317 = vmatpush.bf16.msra.mxu1 %v308_v2 }
   0xb   :  { %318 = vmatpush.bf16.msra.mxu2 %v308_v2  ;;  %319 = vmatpush.bf16.msra.mxu3 %v308_v2 }
   0xe   :  { %149 = vmatpush.bf16.msra.mxu0 %v307_v3  ;;  %320 = vmatpush.bf16.msra.mxu1 %v307_v3 }
   0xf   :  { %321 = vmatpush.bf16.msra.mxu2 %v307_v3  ;;  %322 = vmatpush.bf16.msra.mxu3 %v307_v3 }
  0x12   :  { %150 = vmatpush.bf16.msra.mxu0 %v306_v4  ;;  %323 = vmatpush.bf16.msra.mxu1 %v306_v4 }
  0x13   :  { %324 = vmatpush.bf16.msra.mxu2 %v306_v4  ;;  %325 = vmatpush.bf16.msra.mxu3 %v306_v4 }
  0x16   :  { %151 = vmatpush.bf16.msra.mxu0 %v305_v5  ;;  %326 = vmatpush.bf16.msra.mxu1 %v305_v5 }
  0x17   :  { %327 = vmatpush.bf16.msra.mxu2 %v305_v5  ;;  %328 = vmatpush.bf16.msra.mxu3 %v305_v5 }
  0x1a   :  { %152 = vmatpush.bf16.msra.mxu0 %v304_v6  ;;  %329 = vmatpush.bf16.msra.mxu1 %v304_v6 }
  0x1b   :  { %330 = vmatpush.bf16.msra.mxu2 %v304_v6  ;;  %331 = vmatpush.bf16.msra.mxu3 %v304_v6 }
  0x1e   :  { %153 = vmatpush.bf16.msra.mxu0 %v303_v7  ;;  %332 = vmatpush.bf16.msra.mxu1 %v303_v7 }
  0x1f   :  { %333 = vmatpush.bf16.msra.mxu2 %v303_v7  ;;  %334 = vmatpush.bf16.msra.mxu3 %v303_v7 }
  0x21   :  { %154 = vmatmul.bf16.vlgmr.msra.gmra.mxu0 %v295_v8  ;;  %164 = vmatmul.bf16.vlgmr.msra.gmra.mxu1 %v297_v9 }
  0x22   :  { %174 = vmatmul.bf16.vlgmr.msra.gmra.mxu2 %v299_v10  ;;  %184 = vmatmul.bf16.vlgmr.msra.gmra.mxu3 %v301_v11 }
  0x31   :  { %159 = vmatmul.bf16.gmra.mxu0 %v296_v12  ;;  %169 = vmatmul.bf16.gmra.mxu1 %v298_v13 }
  0x32   :  { %179 = vmatmul.bf16.gmra.mxu2 %v300_v14  ;;  %189 = vmatmul.bf16.gmra.mxu3 %v302_v15 }
  0x9e   :  { %v155_v17 = vpop.f32.mrf.mxu0  ;;  %v165_v18 = vpop.f32.mrf.mxu1 }
  0x9f   :  { %v156_v19 = vadd.f32 %v335_v16, %v155_v17  ;;  %v166_v20 = vadd.f32 %v335_v16, %v165_v18 }
  0xa1   :  { %v195_v21 = vmax.f32 %v156_v19, 0.0  ;;  %v199_v22 = vmax.f32 %v166_v20, 0.0 }
  0xa3   :  { %211 = vst [vmem:[%s458_s3] sm:$0xff] %v195_v21 }
  0xa4   :  { %215 = vst [vmem:[%s458_s3 + $0x20] sm:$0xff] %v199_v22 }
  0xa5   :  { %v175_v23 = vpop.f32.mrf.mxu2  ;;  %v185_v24 = vpop.f32.mrf.mxu3 }
  0xa6   :  { %v176_v25 = vadd.f32 %v335_v16, %v175_v23  ;;  %v186_v26 = vadd.f32 %v335_v16, %v185_v24  ;;  %v157_v27 = vpop.f32.mrf.mxu0  ;;  %v167_v28 = vpop.f32.mrf.mxu1 }
  0xa7   :  { %v158_v29 = vadd.f32 %v335_v16, %v157_v27  ;;  %v168_v30 = vadd.f32 %v335_v16, %v167_v28 }
  0xa8   :  { %v203_v31 = vmax.f32 %v176_v25, 0.0  ;;  %v207_v32 = vmax.f32 %v186_v26, 0.0 }
  0xa9   :  { %v196_v33 = vmax.f32 %v158_v29, 0.0  ;;  %v200_v34 = vmax.f32 %v168_v30, 0.0 }
  0xaa   :  { %219 = vst [vmem:[%s458_s3 + $0x40] sm:$0xff] %v203_v31 }
  0xab   :  { %223 = vst [vmem:[%s458_s3 + $0x60] sm:$0xff] %v207_v32 }
  0xac   :  { %212 = vst [vmem:[%s458_s3 + $0x8] sm:$0xff] %v196_v33 }
  0xad   :  { %216 = vst [vmem:[%s458_s3 + $0x28] sm:$0xff] %v200_v34  ;;  %v177_v35 = vpop.f32.mrf.mxu2  ;;  %v187_v36 = vpop.f32.mrf.mxu3 }
  0xae   :  { %v178_v37 = vadd.f32 %v335_v16, %v177_v35  ;;  %v188_v38 = vadd.f32 %v335_v16, %v187_v36  ;;  %v160_v39 = vpop.f32.mrf.mxu0  ;;  %v170_v40 = vpop.f32.mrf.mxu1 }
  0xaf   :  { %v161_v41 = vadd.f32 %v335_v16, %v160_v39  ;;  %v171_v42 = vadd.f32 %v335_v16, %v170_v40 }
  0xb0   :  { %v204_v43 = vmax.f32 %v178_v37, 0.0  ;;  %v208_v44 = vmax.f32 %v188_v38, 0.0 }
  0xb1   :  { %v197_v45 = vmax.f32 %v161_v41, 0.0  ;;  %v201_v46 = vmax.f32 %v171_v42, 0.0 }
  0xb2   :  { %220 = vst [vmem:[%s458_s3 + $0x48] sm:$0xff] %v204_v43 }
  0xb3   :  { %224 = vst [vmem:[%s458_s3 + $0x68] sm:$0xff] %v208_v44 }
  0xb4   :  { %213 = vst [vmem:[%s458_s3 + $0x10] sm:$0xff] %v197_v45 }
  0xb5   :  { %217 = vst [vmem:[%s458_s3 + $0x30] sm:$0xff] %v201_v46  ;;  %v180_v47 = vpop.f32.mrf.mxu2  ;;  %v190_v48 = vpop.f32.mrf.mxu3 }
  0xb6   :  { %v181_v49 = vadd.f32 %v335_v16, %v180_v47  ;;  %v191_v50 = vadd.f32 %v335_v16, %v190_v48  ;;  %v162_v51 = vpop.f32.mrf.mxu0  ;;  %v172_v52 = vpop.f32.mrf.mxu1 }
  0xb7   :  { %v163_v53 = vadd.f32 %v335_v16, %v162_v51  ;;  %v173_v54 = vadd.f32 %v335_v16, %v172_v52 }
  0xb8   :  { %v205_v55 = vmax.f32 %v181_v49, 0.0  ;;  %v209_v56 = vmax.f32 %v191_v50, 0.0 }
  0xb9   :  { %v198_v57 = vmax.f32 %v163_v53, 0.0  ;;  %v202_v58 = vmax.f32 %v173_v54, 0.0 }
  0xba   :  { %221 = vst [vmem:[%s458_s3 + $0x50] sm:$0xff] %v205_v55 }
  0xbb   :  { %225 = vst [vmem:[%s458_s3 + $0x70] sm:$0xff] %v209_v56 }
  0xbc   :  { %214 = vst [vmem:[%s458_s3 + $0x18] sm:$0xff] %v198_v57 }
  0xbd   :  { %218 = vst [vmem:[%s458_s3 + $0x38] sm:$0xff] %v202_v58  ;;  %v182_v59 = vpop.f32.mrf.mxu2  ;;  %v192_v60 = vpop.f32.mrf.mxu3 }
  0xbe   :  { %v183_v61 = vadd.f32 %v335_v16, %v182_v59  ;;  %v193_v62 = vadd.f32 %v335_v16, %v192_v60 }
  0xc0   :  { %v206_v63 = vmax.f32 %v183_v61, 0.0  ;;  %v210_v0 = vmax.f32 %v193_v62, 0.0 }
  0xc2   :  { %222 = vst [vmem:[%s458_s3 + $0x58] sm:$0xff] %v206_v63 }
  0xc3   :  { %226 = vst [vmem:[%s458_s3 + $0x78] sm:$0xff] %v210_v0 }

// kernel: shared_net_forward.7
= control target key start
LH: loop header
LB: loop body
LE: loop exit
PB: predicated region body
PF: predicated region fallthrough
CT: control target
= control target key end

     0   :  { %10 = vsyncpa [#allocation3], 0  ;;  %s1047_s0 = inlined_call_operand.vmem [shape: bf16[2,64,128], index: 0, kind: input, shape index: {}]   ;;  %s1048_s1 = inlined_call_operand.vmem [shape: bf16[128,128], index: 1, kind: input, shape index: {}]   ;;  %s1049_s2 = inlined_call_operand.vmem [shape: f32[1,128], index: 2, kind: input, shape index: {}]   ;;  %s1050_s3 = inlined_call_operand.vmem [shape: bf16[128,128], index: 3, kind: input, shape index: {}]   ;;  %s1051_s4 = inlined_call_operand.vmem [shape: f32[1,128], index: 4, kind: input, shape index: {}]   ;;  %s1052_s5 = inlined_call_operand.hbm [shape: f32[2,1,128], index: 5, kind: output, shape index: {}]  }
   0x1   :  { %12 = vsyncpa [#allocation3 + $0x1], 0  ;;  %s896_s18 = smov 0   ;;  %s898_s19 = smov 0  }
   0x2   :  { %s900_s20 = smov 0   ;;  %s902_s21 = smov 0  }
   0x3   :  { %s904_s22 = smov 0   ;;  %s906_s23 = smov 0  }
   0x4 LB: > { %s603_s24 = sadd.s32 4294967295, %s864_s23   ;;  %s604_s25 = sadd.s32 4294967294, %s864_s23   ;;  %s864_s23 = sphi %s906_s23, %s18_s23   ;;  %s860_s22 = sphi %s904_s22, %s1059_s22   ;;  %s856_s21 = sphi %s902_s21, %s1058_s21   ;;  %s852_s20 = sphi %s900_s20, %s1057_s20   ;;  %s848_s19 = sphi %s898_s19, %s1056_s19   ;;  %s844_s18 = sphi %s896_s18, %s1055_s18  }
   0x5   : > { %s30_s26 = sadd.s32 1, %s860_s22  ;;  %s149_s27 = sadd.s32 1, %s852_s20 }
   0x6   : > { %p32_p0 = scmp.ge.s32.totalorder %s30_s26, 2  ;;  %p159_p1 = scmp.ne.s32.totalorder %s852_s20, %s848_s19 }
   0x7   : > { %p160_p2 = scmp.eq.s32.totalorder %s603_s24, 1  ;;  %p165_p3 = scmp.ne.s32.totalorder %s848_s19, %s844_s18 }
   0x8   : > { %s1061_s26 = smov (%p32_p0, %s30_s26), 0  ;;  %p166_p5 = scmp.eq.s32.totalorder %s604_s25, 1 }
   0x9   : > { %p936_p4 = por %p160_p2, %p159_p1  ;;  %s146_s29 = ssub.s32 %s860_s22, %s1061_s26 }
   0xa   : > { %p607_p6 = scmp.ge.s32.totalorder %s864_s23, 1  ;;  %p147_p7 = scmp.eq.s32.totalorder %s146_s29, 0 }
   0xb   : > { %p943_p8 = por %p166_p5, %p165_p3  ;;  %p209_p9 = scmp.lt.s32.totalorder %s864_s23, 3 }
   0xc   : > { %s949_s6 = scalar_select %p147_p7, %s852_s20, %s149_s27  }
   0xd   : > { %p210_p10 = pnand %p607_p6, %p209_p9 }
   0xe   : > { %p241_p11 = scmp.lt.s32.totalorder (!%p210_p10), %s856_s21, 1 }
   0xf   : > { %213 = sbr.rel (%p210_p10) target bundleno = 379 (0x17b), region = 40 }
  0x14   : > { %v704_v0 = vld [vmem:[%s1048_s1 + $0x38] sm:$0xff]  ;;  %v703_v1 = vld [vmem:[%s1048_s1 + $0x30] sm:$0xff]  ;;  %v702_v2 = vld [vmem:[%s1048_s1 + $0x28] sm:$0xff]  ;;  %s242_s29 = scalar_select %p241_p11, %s856_s21, 1 }
  0x15   : > { %350 = vmatpush.bf16.msra.mxu0 %v704_v0  ;;  %713 = vmatpush.bf16.msra.mxu2 %v704_v0  ;;  %v701_v3 = vld [vmem:[%s1048_s1 + $0x20] sm:$0xff]  ;;  %v700_v4 = vld [vmem:[%s1048_s1 + $0x18] sm:$0xff]  ;;  %v699_v6 = vld [vmem:[%s1048_s1 + $0x10] sm:$0xff] }
  0x16   : > { %v712_v5 = vld [vmem:[%s1050_s3 + $0x38] sm:$0xff]  ;;  %v711_v7 = vld [vmem:[%s1050_s3 + $0x30] sm:$0xff]  ;;  %v698_v8 = vld [vmem:[%s1048_s1 + $0x8] sm:$0xff]  ;;  %s692_s11 = sshll.u32 %s242_s29, 5  ;;  %s530_s29 = scalar_lea.hbm %s1052_s5, %s856_s21 }
  0x17   : > { %459 = vmatpush.bf16.msra.mxu1 %v712_v5  ;;  %721 = vmatpush.bf16.msra.mxu3 %v712_v5  ;;  %v710_v9 = vld [vmem:[%s1050_s3 + $0x28] sm:$0xff]  ;;  %v697_v10 = vld [vmem:[%s1048_s1] sm:$0xff]  ;;  %s248_s24 = scalar_lea.vmem %s1047_s0, %s692_s11  ;;  %v708_v16 = vld [vmem:[%s1050_s3 + $0x18] sm:$0xff]  ;;  %s534_s9 = sshll.u32 %s530_s29, 4  ;;  %s535_s9 = int_to_ptr.hbm [resolvable:$true] %s534_s9 }
  0x18   : > { %v709_v11 = vld [vmem:[%s1050_s3 + $0x20] sm:$0xff]  ;;  %v695_v13 = vld [vmem:[%s248_s24 + $0x10] sm:$0xff]  ;;  %v694_v14 = vld [vmem:[%s248_s24 + $0x8] sm:$0xff]  ;;  %s800_s11 = sshra.s32 %s535_s9, 4  ;;  %s806_s21 = scalar_lea.hbm %s1052_s5, 2  ;;  %s801_s11 = int_to_ptr.hbm [resolvable:$true] %s800_s11 }
  0x19   : > { %351 = vmatpush.bf16.msra.mxu0 %v703_v1  ;;  %714 = vmatpush.bf16.msra.mxu2 %v703_v1  ;;  %v693_v12 = vld [vmem:[%s248_s24] sm:$0xff]  ;;  %v696_v15 = vld [vmem:[%s248_s24 + $0x18] sm:$0xff]  ;;  %v707_v17 = vld [vmem:[%s1050_s3 + $0x10] sm:$0xff]  ;;  %s238_s24 = sand.u32 1, %s848_s19   ;;  %s802_s12 = scalar_lea.hbm %s801_s11, 1 }
  0x1a   : > { %v706_v18 = vld [vmem:[%s1050_s3 + $0x8] sm:$0xff]  ;;  %v705_v19 = vld [vmem:[%s1050_s3] sm:$0xff]  ;;  %s239_s7 = scalar_lea.vmem [#allocation2], %s238_s24  ;;  %s522_s10 = scalar_lea.sflag [#allocation3], %s238_s24 }
  0x1b   : > { %460 = vmatpush.bf16.msra.mxu1 %v711_v7  ;;  %722 = vmatpush.bf16.msra.mxu3 %v711_v7  ;;  %v784_v21 = vld [vmem:[%s1049_s2] ss:$0 sm:$0xff]  ;;  %s532_s8 = sshll.u32 %s239_s7, 4  ;;  %p803_p12 = scmp.ne.s32.totalorder %s801_s11, %s802_s12  ;;  %s533_s8 = int_to_ptr.vmem [resolvable:$true] %s532_s8 }
  0x1c   : > { %v785_v55 = vld [vmem:[%s1051_s4] ss:$0 sm:$0xff]  ;;  %p807_p1 = scmp.lt.s32.totalorder %s801_s11, %s1052_s5  ;;  %p808_p2 = scmp.lt.s32.totalorder %s806_s21, %s802_s12 }
  0x1d   : > { %352 = vmatpush.bf16.msra.mxu0 %v702_v2  ;;  %715 = vmatpush.bf16.msra.mxu2 %v702_v2  ;;  %p804_p13 = pnand %p803_p12, %p936_p4 }
  0x1e   : > { %p809_p3 = por %p808_p2, %p807_p1 }
  0x1f   : > { %461 = vmatpush.bf16.msra.mxu1 %v710_v9  ;;  %723 = vmatpush.bf16.msra.mxu3 %v710_v9  ;;  %p805_p0 = pneg %p804_p13 }
  0x21   : > { %353 = vmatpush.bf16.msra.mxu0 %v701_v3  ;;  %716 = vmatpush.bf16.msra.mxu2 %v701_v3  ;;  %p810_p5 = pnand %p809_p3, %p805_p0 }
  0x23   : > { %462 = vmatpush.bf16.msra.mxu1 %v709_v11  ;;  %724 = vmatpush.bf16.msra.mxu3 %v709_v11 }
  0x25   : > { %354 = vmatpush.bf16.msra.mxu0 %v700_v4  ;;  %717 = vmatpush.bf16.msra.mxu2 %v700_v4 }
  0x27   : > { %463 = vmatpush.bf16.msra.mxu1 %v708_v16  ;;  %725 = vmatpush.bf16.msra.mxu3 %v708_v16 }
  0x29   : > { %355 = vmatpush.bf16.msra.mxu0 %v699_v6  ;;  %718 = vmatpush.bf16.msra.mxu2 %v699_v6 }
  0x2b   : > { %464 = vmatpush.bf16.msra.mxu1 %v707_v17  ;;  %726 = vmatpush.bf16.msra.mxu3 %v707_v17 }
  0x2d   : > { %356 = vmatpush.bf16.msra.mxu0 %v698_v8  ;;  %719 = vmatpush.bf16.msra.mxu2 %v698_v8 }
  0x2f   : > { %465 = vmatpush.bf16.msra.mxu1 %v706_v18  ;;  %727 = vmatpush.bf16.msra.mxu3 %v706_v18 }
  0x31   : > { %357 = vmatpush.bf16.msra.mxu0 %v697_v10  ;;  %720 = vmatpush.bf16.msra.mxu2 %v697_v10 }
  0x33   : > { %466 = vmatpush.bf16.msra.mxu1 %v705_v19  ;;  %728 = vmatpush.bf16.msra.mxu3 %v705_v19 }
  0x34   : > { %358 = vmatmul.bf16.vlgmr.msra.gmra.mxu0 %v693_v12  ;;  %368 = vmatmul.bf16.vlgmr.msra.gmra.mxu2 %v695_v13 }
  0x44   : > { %363 = vmatmul.bf16.gmra.mxu0 %v694_v14  ;;  %373 = vmatmul.bf16.gmra.mxu2 %v696_v15 }
  0xb1   : > { %v359_v20 = vpop.f32.mrf.mxu0 }
  0xb2   : > { %v360_v22 = vadd.f32 %v784_v21, %v359_v20 }
  0xb4   : > { %v379_v25 = vmax.f32 %v360_v22, 0.0 }
  0xb7   : > { %v369_v23 = vpop.f32.mrf.mxu2 }
  0xb8   : > { %v370_v28 = vadd.f32 %v784_v21, %v369_v23 }
  0xb9   : > { %v361_v24 = vpop.f32.mrf.mxu0 }
  0xba   : > { %v362_v26 = vadd.f32 %v784_v21, %v361_v24  ;;  %v383_v33 = vmax.f32 %v370_v28, 0.0 }
  0xbc   : > { %v380_v27 = vmax.f32 %v362_v26, 0.0 }
  0xbe   : > { %v387_v29 = vpack.c.bf16 %v380_v27, %v379_v25 }
  0xbf   : > { %v371_v30 = vpop.f32.mrf.mxu2 }
  0xc0   : > { %v372_v31 = vadd.f32 %v784_v21, %v371_v30  ;;  %467 = vmatmul.bf16.vlgmr.msra.gmra.mxu1 %v387_v29 }
  0xc1   : > { %v364_v32 = vpop.f32.mrf.mxu0 }
  0xc2   : > { %v384_v34 = vmax.f32 %v372_v31, 0.0  ;;  %v365_v36 = vadd.f32 %v784_v21, %v364_v32 }
  0xc4   : > { %v389_v35 = vpack.c.bf16 %v384_v34, %v383_v33  ;;  %v381_v39 = vmax.f32 %v365_v36, 0.0 }
  0xc6   : > { %477 = vmatmul.bf16.vlgmr.msra.gmra.mxu3 %v389_v35 }
  0xc7   : > { %v374_v37 = vpop.f32.mrf.mxu2 }
  0xc8   : > { %v375_v42 = vadd.f32 %v784_v21, %v374_v37 }
  0xc9   : > { %v366_v38 = vpop.f32.mrf.mxu0 }
  0xca   : > { %v367_v40 = vadd.f32 %v784_v21, %v366_v38  ;;  %v385_v46 = vmax.f32 %v375_v42, 0.0 }
  0xcc   : > { %v382_v41 = vmax.f32 %v367_v40, 0.0 }
  0xce   : > { %v388_v43 = vpack.c.bf16 %v382_v41, %v381_v39 }
  0xcf   : > { %v376_v44 = vpop.f32.mrf.mxu2 }
  0xd0   : > { %v377_v45 = vadd.f32 %v784_v21, %v376_v44  ;;  %472 = vmatmul.bf16.gmra.mxu1 %v388_v43 }
  0xd2   : > { %v386_v47 = vmax.f32 %v377_v45, 0.0 }
  0xd4   : > { %v390_v48 = vpack.c.bf16 %v386_v47, %v385_v46 }
  0xd6   : > { %482 = vmatmul.bf16.gmra.mxu3 %v390_v48 }
 0x13d   : > { %v468_v49 = vpop.f32.mrf.mxu1 }
 0x13e   : > { %v469_v61 = vadd.f32 %v785_v55, %v468_v49 }
 0x140   : > { %v488_v6 = vmax.f32 %v469_v61, 0.0 }
 0x145   : > { %v470_v50 = vpop.f32.mrf.mxu1 }
 0x146   : > { %v471_v58 = vadd.f32 %v785_v55, %v470_v50 }
 0x148   : > { %v489_v2 = vmax.f32 %v471_v58, 0.0 }
 0x149   : > { %v478_v51 = vpop.f32.mrf.mxu3 }
 0x14a   : > { %v479_v59 = vadd.f32 %v785_v55, %v478_v51 }
 0x14c   : > { %v492_v3 = vmax.f32 %v479_v59, 0.0 }
 0x14d   : > { %v473_v53 = vpop.f32.mrf.mxu1 }
 0x14e   : > { %v474_v62 = vadd.f32 %v785_v55, %v473_v53  ;;  %v496_v11 = vmax.f32 %v488_v6, %v492_v3 }
 0x150   : > { %v490_v7 = vmax.f32 %v474_v62, 0.0 }
 0x151   : > { %v480_v52 = vpop.f32.mrf.mxu3 }
 0x152   : > { %v481_v56 = vadd.f32 %v785_v55, %v480_v52 }
 0x154   : > { %v493_v63 = vmax.f32 %v481_v56, 0.0 }
 0x155   : > { %v475_v57 = vpop.f32.mrf.mxu1 }
 0x156   : > { %v476_v0 = vadd.f32 %v785_v55, %v475_v57  ;;  %v497_v8 = vmax.f32 %v489_v2, %v493_v63 }
 0x158   : > { %v491_v9 = vmax.f32 %v476_v0, 0.0  ;;  %v500_v14 = vmax.f32 %v496_v11, %v497_v8 }
 0x159   : > { %v483_v54 = vpop.f32.mrf.mxu3 }
 0x15a   : > { %v484_v60 = vadd.f32 %v785_v55, %v483_v54 }
 0x15c   : > { %v494_v4 = vmax.f32 %v484_v60, 0.0 }
 0x15e   : > { %v498_v12 = vmax.f32 %v490_v7, %v494_v4 }
 0x161   : > { %v485_v1 = vpop.f32.mrf.mxu3 }
 0x162   : > { %v486_v5 = vadd.f32 %v785_v55, %v485_v1 }
 0x164   : > { %v495_v10 = vmax.f32 %v486_v5, 0.0 }
 0x166   : > { %v499_v13 = vmax.f32 %v491_v9, %v495_v10 }
 0x168   : > { %v501_v15 = vmax.f32 %v498_v12, %v499_v13 }
 0x16a   : > { %v502_v16 = vmax.f32 %v500_v14, %v501_v15 }
 0x16c   : > { %v503_v17 = vrot.slane %v502_v16, 4 }
 0x16e   : > { %v504_v18 = vmax.f32 %v502_v16, %v503_v17 }
 0x170   : > { %v505_v19 = vrot.slane %v504_v18, 2 }
 0x172   : > { %v506_v20 = vmax.f32 %v504_v18, %v505_v19 }
 0x174   : > { %v507_v21 = vrot.slane %v506_v20, 1 }
 0x176   : > { %v508_v22 = vmax.f32 %v506_v20, %v507_v21 }
 0x178   : > { %513 = vst [vmem:[%s239_s7] sm:$0x1] %v508_v22 }
 0x179   : > { %813 = shalt.err (!%p810_p5)
}
 0x17a   : > { %729 = dma.vmem_to_hbm [thread:$0]  (%p936_p4), %s533_s8, 16, %s535_s9, %s522_s10  }
 0x17b PF: > { %p735_p6 = scmp.ge.s32.totalorder %s864_s23, 2  ;;  %s546_s17 = sand.u32 1, %s844_s18  }
 0x17c   : > { %s547_s24 = scalar_lea.sflag [#allocation3], %s546_s17 }
 0x17d   : > { %p732_p7 = pnand %p735_p6, %p943_p8 }
 0x17f   : > { %p733_p9 = pneg %p732_p7 }
 0x181   : > { %839 = dma.done.wait (%p733_p9), %s547_s24, 16  }
 0x182   : > { %841 = vsyncadd (%p733_p9), %s547_s24, 4294967280  ;;  %s18_s23 = sadd.s32 1, %s864_s23   ;;  %s1055_s18 = smov %s848_s19 }
 0x183   : > { %p15_p10 = scmp.ge.s32.totalorder %s18_s23, 4   ;;  %s1056_s19 = smov %s852_s20 }
 0x184   : > { %s1057_s20 = smov %s949_s6  ;;  %s1058_s21 = smov %s860_s22 }
 0x185   : > { %s1059_s22 = smov %s1061_s26  ;;  %17 = sbr.rel (!%p15_p10) target bundleno = 4 (0x4), region = 83 }
 0x18a   :  { %552 = vsyncpa [#allocation3], 1 }
 0x18b   :  { %554 = vsyncpa [#allocation3 + $0x1], 1 }

// kernel: shared_net_forward.5
= control target key start
LH: loop header
LB: loop body
LE: loop exit
PB: predicated region body
PF: predicated region fallthrough
CT: control target
= control target key end

     0   :  { %s5039_s12 = smov 0   ;;  %s6461_s0 = inlined_call_operand.vmem [shape: f32[2,148,128], index: 0, kind: input, shape index: {}]   ;;  %s6462_s1 = inlined_call_operand.vmem [shape: bf16[25,128,128], index: 1, kind: input, shape index: {}]   ;;  %s6463_s2 = inlined_call_operand.vmem [shape: f32[1,128], index: 2, kind: input, shape index: {}]   ;;  %s6464_s3 = inlined_call_operand.vmem [shape: f32[2,96,128], index: 3, kind: output, shape index: {}]  }
   0x1 LB: > { %s3591_s13 = sadd.s32 4294967295, %s5017_s12   ;;  %p3595_p0 = scmp.ge.s32.totalorder %s5017_s12, 1  ;;  %s5017_s12 = sphi %s5039_s12, %s13_s12  }
   0x2   : > { %p137_p1 = scmp.lt.s32.totalorder %s5017_s12, 3 }
   0x4   : > { %p138_p2 = pnand %p3595_p0, %p137_p1 }
   0x5   : > { %p161_p3 = scmp.lt.s32.totalorder (!%p138_p2), %s3591_s13, 1 }
   0x6   : > { %141 = sbr.rel (%p138_p2) target bundleno = 786 (0x312), region = 32 }
   0xb   : > { %v4799_v0 = vld [vmem:[%s6462_s1 + $0x78] sm:$0xff]  ;;  %v4798_v1 = vld [vmem:[%s6462_s1 + $0x70] sm:$0xff]  ;;  %v4797_v4 = vld [vmem:[%s6462_s1 + $0x68] sm:$0xff]  ;;  %s6466_s13 = smov (!%p161_p3, %s3591_s13), 1 }
   0xc   : > { %4984 = vmatpush.bf16.msra.mxu1 %v4799_v0  ;;  %4985 = vmatpush.bf16.msra.mxu2 %v4799_v0  ;;  %v4815_v2 = vld [vmem:[%s6462_s1 + $0xf8] sm:$0xff]  ;;  %v4814_v3 = vld [vmem:[%s6462_s1 + $0xf0] sm:$0xff]  ;;  %v4813_v5 = vld [vmem:[%s6462_s1 + $0xe8] sm:$0xff]  ;;  %s5000_s9 = smul.u32 152, %s6466_s13 }
   0xd   : > { %288 = vmatpush.bf16.msra.mxu0 %v4799_v0  ;;  %631 = vmatpush.bf16.msra.mxu3 %v4815_v2  ;;  %v4796_v6 = vld [vmem:[%s6462_s1 + $0x60] sm:$0xff]  ;;  %v4795_v8 = vld [vmem:[%s6462_s1 + $0x58] sm:$0xff]  ;;  %v4794_v10 = vld [vmem:[%s6462_s1 + $0x50] sm:$0xff]  ;;  %s5001_s7 = smul.u32 96, %s6466_s13 }
   0xe   : > { %v4812_v7 = vld [vmem:[%s6462_s1 + $0xe0] sm:$0xff]  ;;  %v4811_v9 = vld [vmem:[%s6462_s1 + $0xd8] sm:$0xff]  ;;  %v4810_v11 = vld [vmem:[%s6462_s1 + $0xd0] sm:$0xff]  ;;  %s5092_s18 = scalar_lea.vmem %s6461_s0, %s5000_s9 }
   0xf   : > { %v4793_v12 = vld [vmem:[%s6462_s1 + $0x48] sm:$0xff]  ;;  %v4792_v14 = vld [vmem:[%s6462_s1 + $0x40] sm:$0xff]  ;;  %v4807_v19 = vld [vmem:[%s6462_s1 + $0xb8] sm:$0xff]  ;;  %s6423_s10 = scalar_lea.vmem %s6464_s3, %s5001_s7 }
  0x10   : > { %4986 = vmatpush.bf16.msra.mxu1 %v4798_v1  ;;  %4987 = vmatpush.bf16.msra.mxu2 %v4798_v1  ;;  %v4809_v13 = vld [vmem:[%s6462_s1 + $0xc8] sm:$0xff]  ;;  %v4791_v22 = vld [vmem:[%s6462_s1 + $0x38] sm:$0xff]  ;;  %v4808_v27 = vld [vmem:[%s6462_s1 + $0xc0] sm:$0xff] }
  0x11   : > { %289 = vmatpush.bf16.msra.mxu0 %v4798_v1  ;;  %632 = vmatpush.bf16.msra.mxu3 %v4814_v3  ;;  %v209_v15 = vld [vmem:[%s5092_s18 + $0x21] sm:$0xff]  ;;  %v210_v16 = vld [vmem:[%s5092_s18 + $0x29] sm:$0xff]  ;;  %v4823_v23 = vld [vmem:[%s6462_s1 + $0x138] sm:$0xff] }
  0x12   : > { %v213_v17 = vld [vmem:[%s5092_s18 + $0x41] sm:$0xff]  ;;  %v214_v18 = vld [vmem:[%s5092_s18 + $0x49] sm:$0xff]  ;;  %v219_v24 = vpack.c.bf16 %v210_v16, %v209_v15  ;;  %v4847_v34 = vld [vmem:[%s6462_s1 + $0x1f8] sm:$0xff] }
  0x13   : > { %v205_v20 = vld [vmem:[%s5092_s18 + $0x1] sm:$0xff]  ;;  %v206_v21 = vld [vmem:[%s5092_s18 + $0x9] sm:$0xff]  ;;  %v221_v25 = vpack.c.bf16 %v214_v18, %v213_v17  ;;  %v211_v42 = vld [vmem:[%s5092_s18 + $0x31] sm:$0xff] }
  0x14   : > { %4988 = vmatpush.bf16.msra.mxu1 %v4797_v4  ;;  %4989 = vmatpush.bf16.msra.mxu2 %v4797_v4  ;;  %v217_v26 = vpack.c.bf16 %v206_v21, %v205_v20  ;;  %v548_v28 = vld [vmem:[%s5092_s18 + $0x3] sm:$0xff]  ;;  %v549_v29 = vld [vmem:[%s5092_s18 + $0xb] sm:$0xff]  ;;  %v212_v43 = vld [vmem:[%s5092_s18 + $0x39] sm:$0xff] }
  0x15   : > { %290 = vmatpush.bf16.msra.mxu0 %v4797_v4  ;;  %633 = vmatpush.bf16.msra.mxu3 %v4813_v5  ;;  %v4806_v30 = vld [vmem:[%s6462_s1 + $0xb0] sm:$0xff]  ;;  %v560_v33 = vpack.c.bf16 %v549_v29, %v548_v28  ;;  %v4805_v35 = vld [vmem:[%s6462_s1 + $0xa8] sm:$0xff]  ;;  %v4804_v39 = vld [vmem:[%s6462_s1 + $0xa0] sm:$0xff]  ;;  %v220_v51 = vpack.c.bf16 %v212_v43, %v211_v42 }
  0x16   : > { %v4790_v31 = vld [vmem:[%s6462_s1 + $0x30] sm:$0xff]  ;;  %v4789_v36 = vld [vmem:[%s6462_s1 + $0x28] sm:$0xff]  ;;  %v4788_v40 = vld [vmem:[%s6462_s1 + $0x20] sm:$0xff] }
  0x17   : > { %v4822_v32 = vld [vmem:[%s6462_s1 + $0x130] sm:$0xff]  ;;  %v4821_v37 = vld [vmem:[%s6462_s1 + $0x128] sm:$0xff]  ;;  %v4820_v41 = vld [vmem:[%s6462_s1 + $0x120] sm:$0xff] }
  0x18   : > { %4990 = vmatpush.bf16.msra.mxu1 %v4796_v6  ;;  %4991 = vmatpush.bf16.msra.mxu2 %v4796_v6  ;;  %v4846_v38 = vld [vmem:[%s6462_s1 + $0x1f0] sm:$0xff]  ;;  %v216_v45 = vld [vmem:[%s5092_s18 + $0x59] sm:$0xff]  ;;  %v4801_v60 = vld [vmem:[%s6462_s1 + $0x88] sm:$0xff] }
  0x19   : > { %291 = vmatpush.bf16.msra.mxu0 %v4796_v6  ;;  %634 = vmatpush.bf16.msra.mxu3 %v4812_v7  ;;  %v215_v44 = vld [vmem:[%s5092_s18 + $0x51] sm:$0xff]  ;;  %v208_v48 = vld [vmem:[%s5092_s18 + $0x19] sm:$0xff]  ;;  %v4845_v61 = vld [vmem:[%s6462_s1 + $0x1e8] sm:$0xff] }
  0x1a   : > { %v4803_v46 = vld [vmem:[%s6462_s1 + $0x98] sm:$0xff]  ;;  %v222_v52 = vpack.c.bf16 %v216_v45, %v215_v44  ;;  %v4802_v56 = vld [vmem:[%s6462_s1 + $0x90] sm:$0xff]  ;;  %v4785_v62 = vld [vmem:[%s6462_s1 + $0x8] sm:$0xff] }
  0x1b   : > { %v207_v47 = vld [vmem:[%s5092_s18 + $0x11] sm:$0xff]  ;;  %v551_v55 = vld [vmem:[%s5092_s18 + $0x1b] sm:$0xff]  ;;  %v4817_v63 = vld [vmem:[%s6462_s1 + $0x108] sm:$0xff] }
  0x1c   : > { %4992 = vmatpush.bf16.msra.mxu1 %v4795_v8  ;;  %4993 = vmatpush.bf16.msra.mxu2 %v4795_v8  ;;  %v4787_v49 = vld [vmem:[%s6462_s1 + $0x18] sm:$0xff]  ;;  %v218_v53 = vpack.c.bf16 %v208_v48, %v207_v47  ;;  %v4786_v57 = vld [vmem:[%s6462_s1 + $0x10] sm:$0xff]  ;;  %v4800_v0 = vld [vmem:[%s6462_s1 + $0x80] sm:$0xff] }
  0x1d   : > { %292 = vmatpush.bf16.msra.mxu0 %v4795_v8  ;;  %635 = vmatpush.bf16.msra.mxu3 %v4811_v9  ;;  %v4819_v50 = vld [vmem:[%s6462_s1 + $0x118] sm:$0xff]  ;;  %v4818_v58 = vld [vmem:[%s6462_s1 + $0x110] sm:$0xff]  ;;  %v4784_v1 = vld [vmem:[%s6462_s1] sm:$0xff] }
  0x1e   : > { %v550_v54 = vld [vmem:[%s5092_s18 + $0x13] sm:$0xff]  ;;  %v4816_v2 = vld [vmem:[%s6462_s1 + $0x100] sm:$0xff]  ;;  %v172_v4 = vld [vmem:[%s5092_s18 + $0x8] sm:$0xff] }
  0x1f   : > { %v561_v59 = vpack.c.bf16 %v551_v55, %v550_v54  ;;  %v171_v3 = vld [vmem:[%s5092_s18] sm:$0xff]  ;;  %v4839_v5 = vld [vmem:[%s6462_s1 + $0x1b8] sm:$0xff]  ;;  %v415_v8 = vld [vmem:[%s5092_s18 + $0xa] sm:$0xff] }
  0x20   : > { %4994 = vmatpush.bf16.msra.mxu1 %v4794_v10  ;;  %4995 = vmatpush.bf16.msra.mxu2 %v4794_v10  ;;  %v4831_v6 = vld [vmem:[%s6462_s1 + $0x178] sm:$0xff]  ;;  %v414_v7 = vld [vmem:[%s5092_s18 + $0x2] sm:$0xff]  ;;  %v4838_v15 = vld [vmem:[%s6462_s1 + $0x1b0] sm:$0xff] }
  0x21   : > { %293 = vmatpush.bf16.msra.mxu0 %v4794_v10  ;;  %636 = vmatpush.bf16.msra.mxu3 %v4810_v11  ;;  %v4855_v9 = vld [vmem:[%s6462_s1 + $0x238] sm:$0xff]  ;;  %v682_v10 = vld [vmem:[%s5092_s18 + $0x4] sm:$0xff]  ;;  %v5215_v11 = vld [vmem:[%s5092_s18 + $0xc] sm:$0xff] }
  0x22   : > { %v552_v16 = vld [vmem:[%s5092_s18 + $0x23] sm:$0xff]  ;;  %v553_v17 = vld [vmem:[%s5092_s18 + $0x2b] sm:$0xff]  ;;  %v5252_v29 = vld [vmem:[%s5092_s18 + $0x18] sm:$0xff] }
  0x23   : > { %v4830_v18 = vld [vmem:[%s6462_s1 + $0x170] sm:$0xff]  ;;  %v562_v20 = vpack.c.bf16 %v553_v17, %v552_v16  ;;  %v4837_v21 = vld [vmem:[%s6462_s1 + $0x1a8] sm:$0xff]  ;;  %v4827_v42 = vld [vmem:[%s6462_s1 + $0x158] sm:$0xff] }
  0x24   : > { %4996 = vmatpush.bf16.msra.mxu1 %v4793_v12  ;;  %4997 = vmatpush.bf16.msra.mxu2 %v4793_v12  ;;  %v173_v28 = vld [vmem:[%s5092_s18 + $0x10] sm:$0xff]  ;;  %v4851_v43 = vld [vmem:[%s6462_s1 + $0x218] sm:$0xff]  ;;  %v5295_v47 = vld [vmem:[%s5092_s18 + $0x28] sm:$0xff] }
  0x25   : > { %294 = vmatpush.bf16.msra.mxu0 %v4793_v12  ;;  %637 = vmatpush.bf16.msra.mxu3 %v4809_v13  ;;  %v183_v12 = vpack.c.bf16 %v172_v4, %v171_v3  ;;  %v426_v13 = vpack.c.bf16 %v415_v8, %v414_v7  ;;  %v4834_v44 = vld [vmem:[%s6462_s1 + $0x190] sm:$0xff]  ;;  %v5298_v48 = vld [vmem:[%s5092_s18 + $0x22] sm:$0xff] }
  0x26   : > { %v4842_v45 = vld [vmem:[%s6462_s1 + $0x1d0] sm:$0xff]  ;;  %v556_v55 = vld [vmem:[%s5092_s18 + $0x43] sm:$0xff] }
  0x27   : > { %v5344_v3 = vld [vmem:[%s5092_s18 + $0x34] sm:$0xff]  ;;  %v5347_v4 = vld [vmem:[%s5092_s18 + $0x3c] sm:$0xff]  ;;  %v180_v17 = vld [vmem:[%s5092_s18 + $0x48] sm:$0xff] }
  0x28   : > { %4998 = vmatpush.bf16.msra.mxu1 %v4792_v14  ;;  %4999 = vmatpush.bf16.msra.mxu2 %v4792_v14  ;;  %v697_v7 = vpack.c.bf16 %v5347_v4, %v5344_v3  ;;  %v558_v8 = vld [vmem:[%s5092_s18 + $0x53] sm:$0xff]  ;;  %v5368_v16 = vld [vmem:[%s5092_s18 + $0x40] sm:$0xff] }
  0x29   : > { %295 = vmatpush.bf16.msra.mxu0 %v4792_v14  ;;  %638 = vmatpush.bf16.msra.mxu3 %v4808_v27  ;;  %v694_v14 = vpack.c.bf16 %v5215_v11, %v682_v10  ;;  %v4852_v27 = vld [vmem:[%s6462_s1 + $0x220] sm:$0xff] }
  0x2b   : > { %306 = vmatmul.bf16.vlgmr.msra.gmra.mxu1 %v219_v24  ;;  %316 = vmatmul.bf16.vlgmr.msra.gmra.mxu2 %v221_v25  ;;  %v4853_v24 = vld [vmem:[%s6462_s1 + $0x228] sm:$0xff]  ;;  %v4836_v25 = vld [vmem:[%s6462_s1 + $0x1a0] sm:$0xff] }
  0x2c   : > { %497 = vmatpush.bf16.msrb.mxu2 %v4807_v19  ;;  %375 = vmatpush.bf16.msrb.mxu1 %v4791_v22  ;;  %v4854_v19 = vld [vmem:[%s6462_s1 + $0x230] sm:$0xff]  ;;  %v4844_v22 = vld [vmem:[%s6462_s1 + $0x1e0] sm:$0xff] }
  0x2d   : > { %765 = vmatpush.bf16.msrb.mxu0 %v4823_v23  ;;  %639 = vmatmul.bf16.vlgmr.msra.gmra.mxu3 %v560_v33  ;;  %v4829_v23 = vld [vmem:[%s6462_s1 + $0x168] sm:$0xff]  ;;  %v5262_v33 = vld [vmem:[%s5092_s18 + $0x1c] sm:$0xff] }
  0x2e   : > { %296 = vmatmul.bf16.vlgmr.msra.gmra.mxu0 %v217_v26  ;;  %1167 = vmatpush.bf16.msrb.mxu3 %v4847_v34  ;;  %v4828_v26 = vld [vmem:[%s6462_s1 + $0x160] sm:$0xff]  ;;  %v5265_v34 = vpack.c.bf16 %v5252_v29, %v173_v28 }
  0x30   : > { %498 = vmatpush.bf16.msrb.mxu2 %v4806_v30  ;;  %376 = vmatpush.bf16.msrb.mxu1 %v4790_v31  ;;  %v416_v30 = vld [vmem:[%s5092_s18 + $0x12] sm:$0xff]  ;;  %v5256_v31 = vld [vmem:[%s5092_s18 + $0x1a] sm:$0xff] }
  0x31   : > { %766 = vmatpush.bf16.msrb.mxu0 %v4822_v32  ;;  %v5259_v32 = vld [vmem:[%s5092_s18 + $0x14] sm:$0xff] }
  0x32   : > { %1168 = vmatpush.bf16.msrb.mxu3 %v4846_v38  ;;  %v555_v38 = vld [vmem:[%s5092_s18 + $0x3b] sm:$0xff] }
  0x34   : > { %499 = vmatpush.bf16.msrb.mxu2 %v4805_v35  ;;  %377 = vmatpush.bf16.msrb.mxu1 %v4789_v36  ;;  %v427_v35 = vpack.c.bf16 %v5256_v31, %v416_v30  ;;  %v695_v36 = vpack.c.bf16 %v5262_v33, %v5259_v32  ;;  %v4871_v30 = vld [vmem:[%s6462_s1 + $0x2b8] sm:$0xff] }
  0x35   : > { %767 = vmatpush.bf16.msrb.mxu0 %v4821_v37  ;;  %v554_v37 = vld [vmem:[%s5092_s18 + $0x33] sm:$0xff] }
  0x36   : > { %1169 = vmatpush.bf16.msrb.mxu3 %v4845_v61  ;;  %v4841_v61 = vld [vmem:[%s6462_s1 + $0x1c8] sm:$0xff] }
  0x38   : > { %500 = vmatpush.bf16.msrb.mxu2 %v4804_v39  ;;  %378 = vmatpush.bf16.msrb.mxu1 %v4788_v40  ;;  %v563_v39 = vpack.c.bf16 %v555_v38, %v554_v37  ;;  %v4835_v40 = vld [vmem:[%s6462_s1 + $0x198] sm:$0xff]  ;;  %v5403_v38 = vld [vmem:[%s5092_s18 + $0x50] sm:$0xff] }
  0x39   : > { %768 = vmatpush.bf16.msrb.mxu0 %v4820_v41  ;;  %v4843_v41 = vld [vmem:[%s6462_s1 + $0x1d8] sm:$0xff] }
  0x3a   : > { %1170 = vmatpush.bf16.msrb.mxu3 %v4844_v22  ;;  %v187_v22 = vpack.c.bf16 %v180_v17, %v5368_v16  ;;  %v4887_v37 = vld [vmem:[%s6462_s1 + $0x338] sm:$0xff] }
  0x3b   : > { %311 = vmatmul.bf16.gmra.mxu1 %v220_v51  ;;  %321 = vmatmul.bf16.gmra.mxu2 %v222_v52  ;;  %v5307_v51 = vld [vmem:[%s5092_s18 + $0x2c] sm:$0xff] }
  0x3c   : > { %501 = vmatpush.bf16.msrb.mxu2 %v4803_v46  ;;  %379 = vmatpush.bf16.msrb.mxu1 %v4787_v49  ;;  %v5292_v46 = vld [vmem:[%s5092_s18 + $0x20] sm:$0xff]  ;;  %v5301_v49 = vld [vmem:[%s5092_s18 + $0x2a] sm:$0xff] }
  0x3d   : > { %769 = vmatpush.bf16.msrb.mxu0 %v4819_v50  ;;  %644 = vmatmul.bf16.gmra.mxu3 %v561_v59  ;;  %v5304_v50 = vld [vmem:[%s5092_s18 + $0x24] sm:$0xff]  ;;  %v5311_v52 = vpack.c.bf16 %v5295_v47, %v5292_v46  ;;  %v4850_v59 = vld [vmem:[%s6462_s1 + $0x210] sm:$0xff] }
  0x3e   : > { %301 = vmatmul.bf16.gmra.mxu0 %v218_v53  ;;  %1171 = vmatpush.bf16.msrb.mxu3 %v4843_v41  ;;  %v428_v53 = vpack.c.bf16 %v5301_v49, %v5298_v48  ;;  %v696_v54 = vpack.c.bf16 %v5307_v51, %v5304_v50  ;;  %v425_v41 = vld [vmem:[%s5092_s18 + $0x5a] sm:$0xff] }
  0x40   : > { %502 = vmatpush.bf16.msrb.mxu2 %v4802_v56  ;;  %380 = vmatpush.bf16.msrb.mxu1 %v4786_v57  ;;  %v557_v56 = vld [vmem:[%s5092_s18 + $0x4b] sm:$0xff] }
  0x41   : > { %770 = vmatpush.bf16.msrb.mxu0 %v4818_v58  ;;  %v564_v57 = vpack.c.bf16 %v557_v56, %v556_v55  ;;  %v4826_v58 = vld [vmem:[%s6462_s1 + $0x150] sm:$0xff]  ;;  %v1086_v55 = vld [vmem:[%s5092_s18 + $0x1e] sm:$0xff]  ;;  %v1087_v56 = vld [vmem:[%s5092_s18 + $0x26] sm:$0xff] }
  0x42   : > { %1172 = vmatpush.bf16.msrb.mxu3 %v4842_v45 }
  0x44   : > { %503 = vmatpush.bf16.msrb.mxu2 %v4801_v60  ;;  %381 = vmatpush.bf16.msrb.mxu1 %v4785_v62  ;;  %v4833_v60 = vld [vmem:[%s6462_s1 + $0x188] sm:$0xff] }
  0x45   : > { %771 = vmatpush.bf16.msrb.mxu0 %v4817_v63  ;;  %v4825_v62 = vld [vmem:[%s6462_s1 + $0x148] sm:$0xff]  ;;  %v5336_v63 = vld [vmem:[%s5092_s18 + $0x30] sm:$0xff] }
  0x46   : > { %1173 = vmatpush.bf16.msrb.mxu3 %v4841_v61  ;;  %v4869_v61 = vld [vmem:[%s6462_s1 + $0x2a8] sm:$0xff] }
  0x48   : > { %504 = vmatpush.bf16.msrb.mxu2 %v4800_v0  ;;  %382 = vmatpush.bf16.msrb.mxu1 %v4784_v1  ;;  %v178_v0 = vld [vmem:[%s5092_s18 + $0x38] sm:$0xff] }
  0x49   : > { %772 = vmatpush.bf16.msrb.mxu0 %v4816_v2  ;;  %v5340_v1 = vld [vmem:[%s5092_s18 + $0x32] sm:$0xff]  ;;  %v421_v2 = vld [vmem:[%s5092_s18 + $0x3a] sm:$0xff] }
  0x4b   : > { %383 = vmatmul.bf16.vlgmr.msrb.gmra.mxu1 %v183_v12  ;;  %505 = vmatmul.bf16.vlgmr.msrb.gmra.mxu2 %v426_v13  ;;  %v4849_v12 = vld [vmem:[%s6462_s1 + $0x208] sm:$0xff]  ;;  %v4832_v13 = vld [vmem:[%s6462_s1 + $0x180] sm:$0xff] }
  0x4c   : > { %1033 = vmatpush.bf16.msra.mxu2 %v4839_v5  ;;  %899 = vmatpush.bf16.msra.mxu1 %v4831_v6  ;;  %v186_v5 = vpack.c.bf16 %v178_v0, %v5336_v63  ;;  %v429_v6 = vpack.c.bf16 %v421_v2, %v5340_v1  ;;  %v950_v0 = vld [vmem:[%s5092_s18 + $0xd] sm:$0xff]  ;;  %v951_v2 = vld [vmem:[%s5092_s18 + $0x15] sm:$0xff] }
  0x4d   : > { %1301 = vmatpush.bf16.msra.mxu0 %v4855_v9  ;;  %649 = vmatmul.bf16.gmra.mxu3 %v562_v20  ;;  %v559_v9 = vld [vmem:[%s5092_s18 + $0x5b] sm:$0xff]  ;;  %v5376_v20 = vld [vmem:[%s5092_s18 + $0x44] sm:$0xff] }
  0x4e   : > { %773 = vmatmul.bf16.vlgmr.msrb.gmra.mxu0 %v694_v14  ;;  %v565_v10 = vpack.c.bf16 %v559_v9, %v558_v8  ;;  %v4840_v14 = vld [vmem:[%s6462_s1 + $0x1c0] sm:$0xff]  ;;  %v828_v8 = vpack.c.bf16 %v5259_v32, %v5215_v11  ;;  %v962_v9 = vpack.c.bf16 %v951_v2, %v950_v0  ;;  %v4883_v0 = vld [vmem:[%s6462_s1 + $0x318] sm:$0xff]  ;;  %v954_v2 = vld [vmem:[%s5092_s18 + $0x2d] sm:$0xff] }
  0x4f   : > { %1174 = vmatpush.bf16.msrb.mxu3 %v4840_v14  ;;  %v1089_v14 = vld [vmem:[%s5092_s18 + $0x36] sm:$0xff] }
  0x50   : > { %1034 = vmatpush.bf16.msra.mxu2 %v4838_v15  ;;  %900 = vmatpush.bf16.msra.mxu1 %v4830_v18  ;;  %v4824_v15 = vld [vmem:[%s6462_s1 + $0x140] sm:$0xff] }
  0x51   : > { %1302 = vmatpush.bf16.msra.mxu0 %v4854_v19  ;;  %v5372_v18 = vld [vmem:[%s5092_s18 + $0x42] sm:$0xff]  ;;  %v423_v19 = vld [vmem:[%s5092_s18 + $0x4a] sm:$0xff] }
  0x54   : > { %1035 = vmatpush.bf16.msra.mxu2 %v4837_v21  ;;  %901 = vmatpush.bf16.msra.mxu1 %v4829_v23  ;;  %v5379_v21 = vld [vmem:[%s5092_s18 + $0x4c] sm:$0xff]  ;;  %v430_v23 = vpack.c.bf16 %v423_v19, %v5372_v18 }
  0x55   : > { %1303 = vmatpush.bf16.msra.mxu0 %v4853_v24  ;;  %v698_v24 = vpack.c.bf16 %v5379_v21, %v5376_v20  ;;  %v4885_v19 = vld [vmem:[%s6462_s1 + $0x328] sm:$0xff] }
  0x58   : > { %1036 = vmatpush.bf16.msra.mxu2 %v4836_v25  ;;  %902 = vmatpush.bf16.msra.mxu1 %v4828_v26  ;;  %v1084_v25 = vld [vmem:[%s5092_s18 + $0xe] sm:$0xff]  ;;  %v1085_v26 = vld [vmem:[%s5092_s18 + $0x16] sm:$0xff] }
  0x59   : > { %1304 = vmatpush.bf16.msra.mxu0 %v4852_v27  ;;  %v4848_v27 = vld [vmem:[%s6462_s1 + $0x200] sm:$0xff]  ;;  %v1096_v28 = vpack.c.bf16 %v1085_v26, %v1084_v25 }
  0x5a   : > { %v4860_v25 = vld [vmem:[%s6462_s1 + $0x260] sm:$0xff] }
  0x5b   : > { %388 = vmatmul.bf16.gmra.mxu1 %v5265_v34  ;;  %510 = vmatmul.bf16.gmra.mxu2 %v427_v35  ;;  %v4879_v35 = vld [vmem:[%s6462_s1 + $0x2f8] sm:$0xff] }
  0x5c   : > { %1037 = vmatpush.bf16.msra.mxu2 %v4835_v40  ;;  %903 = vmatpush.bf16.msra.mxu1 %v4827_v42  ;;  %v5407_v40 = vld [vmem:[%s5092_s18 + $0x52] sm:$0xff] }
  0x5d   : > { %654 = vmatmul.bf16.gmra.mxu3 %v563_v39  ;;  %1305 = vmatpush.bf16.msra.mxu0 %v4851_v43  ;;  %v182_v39 = vld [vmem:[%s5092_s18 + $0x58] sm:$0xff] }
  0x5e   : > { %778 = vmatmul.bf16.gmra.mxu0 %v695_v36  ;;  %1703 = vmatpush.bf16.msra.mxu3 %v4879_v35  ;;  %v4863_v36 = vld [vmem:[%s6462_s1 + $0x278] sm:$0xff]  ;;  %v188_v45 = vpack.c.bf16 %v182_v39, %v5403_v38  ;;  %v1221_v35 = vld [vmem:[%s5092_s18 + $0x27] sm:$0xff] }
  0x5f   : > { %v5411_v42 = vld [vmem:[%s5092_s18 + $0x54] sm:$0xff]  ;;  %v5414_v43 = vld [vmem:[%s5092_s18 + $0x5c] sm:$0xff] }
  0x60   : > { %1038 = vmatpush.bf16.msra.mxu2 %v4834_v44  ;;  %904 = vmatpush.bf16.msra.mxu1 %v4826_v58  ;;  %v4870_v44 = vld [vmem:[%s6462_s1 + $0x2b0] sm:$0xff]  ;;  %v1097_v58 = vpack.c.bf16 %v1087_v56, %v1086_v55  ;;  %v4884_v55 = vld [vmem:[%s6462_s1 + $0x320] sm:$0xff] }
  0x61   : > { %1306 = vmatpush.bf16.msra.mxu0 %v4850_v59  ;;  %v4862_v59 = vld [vmem:[%s6462_s1 + $0x270] sm:$0xff] }
  0x64   : > { %1039 = vmatpush.bf16.msra.mxu2 %v4833_v60  ;;  %905 = vmatpush.bf16.msra.mxu1 %v4825_v62  ;;  %v4886_v60 = vld [vmem:[%s6462_s1 + $0x330] sm:$0xff]  ;;  %v4877_v62 = vld [vmem:[%s6462_s1 + $0x2e8] sm:$0xff] }
  0x65   : > { %1307 = vmatpush.bf16.msra.mxu0 %v4849_v12 }
  0x68   : > { %1040 = vmatpush.bf16.msra.mxu2 %v4832_v13  ;;  %906 = vmatpush.bf16.msra.mxu1 %v4824_v15  ;;  %v1088_v13 = vld [vmem:[%s5092_s18 + $0x2e] sm:$0xff] }
  0x69   : > { %1308 = vmatpush.bf16.msra.mxu0 %v4848_v27  ;;  %v1098_v17 = vpack.c.bf16 %v1089_v14, %v1088_v13  ;;  %v952_v27 = vld [vmem:[%s5092_s18 + $0x1d] sm:$0xff] }
  0x6b   : > { %393 = vmatmul.bf16.gmra.mxu1 %v5311_v52  ;;  %515 = vmatmul.bf16.gmra.mxu2 %v428_v53  ;;  %v431_v53 = vpack.c.bf16 %v425_v41, %v5407_v40 }
  0x6c   : > { %1569 = vmatpush.bf16.msrb.mxu2 %v4871_v30  ;;  %1435 = vmatpush.bf16.msrb.mxu1 %v4863_v36  ;;  %v1220_v30 = vld [vmem:[%s5092_s18 + $0x1f] sm:$0xff] }
  0x6d   : > { %659 = vmatmul.bf16.gmra.mxu3 %v564_v57  ;;  %1837 = vmatpush.bf16.msrb.mxu0 %v4887_v37  ;;  %v4878_v57 = vld [vmem:[%s6462_s1 + $0x2f0] sm:$0xff]  ;;  %v829_v37 = vpack.c.bf16 %v5304_v50, %v5262_v33  ;;  %v4867_v33 = vld [vmem:[%s6462_s1 + $0x298] sm:$0xff] }
  0x6e   : > { %783 = vmatmul.bf16.gmra.mxu0 %v696_v54  ;;  %v699_v54 = vpack.c.bf16 %v5414_v43, %v5411_v42  ;;  %1704 = vmatpush.bf16.msra.mxu3 %v4878_v57  ;;  %v4875_v50 = vld [vmem:[%s6462_s1 + $0x2d8] sm:$0xff] }
  0x70   : > { %1570 = vmatpush.bf16.msrb.mxu2 %v4870_v44  ;;  %1436 = vmatpush.bf16.msrb.mxu1 %v4862_v59  ;;  %v1231_v44 = vpack.c.bf16 %v1221_v35, %v1220_v30 }
  0x71   : > { %1838 = vmatpush.bf16.msrb.mxu0 %v4886_v60 }
  0x72   : > { %1705 = vmatpush.bf16.msra.mxu3 %v4877_v62 }
  0x74   : > { %1571 = vmatpush.bf16.msrb.mxu2 %v4869_v61  ;;  %v4859_v61 = vld [vmem:[%s6462_s1 + $0x258] sm:$0xff] }
  0x75   : > { %1839 = vmatpush.bf16.msrb.mxu0 %v4885_v19  ;;  %v1093_v19 = vld [vmem:[%s5092_s18 + $0x56] sm:$0xff] }
  0x79   : > { %1840 = vmatpush.bf16.msrb.mxu0 %v4884_v55 }
  0x7b   : > { %398 = vmatmul.bf16.gmra.mxu1 %v186_v5  ;;  %520 = vmatmul.bf16.gmra.mxu2 %v429_v6  ;;  %v1218_v5 = vld [vmem:[%s5092_s18 + $0xf] sm:$0xff]  ;;  %v1219_v6 = vld [vmem:[%s5092_s18 + $0x17] sm:$0xff] }
  0x7c   : > { %v1230_v12 = vpack.c.bf16 %v1219_v6, %v1218_v5  ;;  %v955_v5 = vld [vmem:[%s5092_s18 + $0x35] sm:$0xff] }
  0x7d   : > { %664 = vmatmul.bf16.gmra.mxu3 %v565_v10  ;;  %1841 = vmatpush.bf16.msrb.mxu0 %v4883_v0  ;;  %v1222_v6 = vld [vmem:[%s5092_s18 + $0x2f] sm:$0xff] }
  0x7e   : > { %788 = vmatmul.bf16.gmra.mxu0 %v697_v7  ;;  %v4861_v7 = vld [vmem:[%s6462_s1 + $0x268] sm:$0xff] }
  0x7f   : > { %1437 = vmatpush.bf16.msrb.mxu1 %v4861_v7  ;;  %v1223_v7 = vld [vmem:[%s5092_s18 + $0x37] sm:$0xff] }
  0x80   : > { %v1232_v14 = vpack.c.bf16 %v1223_v7, %v1222_v6 }
  0x83   : > { %1438 = vmatpush.bf16.msrb.mxu1 %v4860_v25  ;;  %v4866_v25 = vld [vmem:[%s6462_s1 + $0x290] sm:$0xff] }
  0x87   : > { %1439 = vmatpush.bf16.msrb.mxu1 %v4859_v61  ;;  %v1225_v61 = vld [vmem:[%s5092_s18 + $0x47] sm:$0xff] }
  0x8b   : > { %403 = vmatmul.bf16.gmra.mxu1 %v187_v22  ;;  %525 = vmatmul.bf16.gmra.mxu2 %v430_v23  ;;  %v4868_v23 = vld [vmem:[%s6462_s1 + $0x2a0] sm:$0xff] }
  0x8c   : > { %1572 = vmatpush.bf16.msrb.mxu2 %v4868_v23 }
  0x8d   : > { %1175 = vmatmul.bf16.vlgmr.msrb.gmra.mxu3 %v1096_v28  ;;  %v953_v28 = vld [vmem:[%s5092_s18 + $0x25] sm:$0xff] }
  0x8e   : > { %793 = vmatmul.bf16.gmra.mxu0 %v698_v24  ;;  %v4876_v24 = vld [vmem:[%s6462_s1 + $0x2e0] sm:$0xff]  ;;  %v963_v39 = vpack.c.bf16 %v953_v28, %v952_v27  ;;  %v4874_v27 = vld [vmem:[%s6462_s1 + $0x2d0] sm:$0xff] }
  0x8f   : > { %1706 = vmatpush.bf16.msra.mxu3 %v4876_v24 }
  0x90   : > { %1573 = vmatpush.bf16.msrb.mxu2 %v4867_v33  ;;  %v957_v33 = vld [vmem:[%s5092_s18 + $0x45] sm:$0xff] }
  0x93   : > { %1707 = vmatpush.bf16.msra.mxu3 %v4875_v50  ;;  %v1224_v50 = vld [vmem:[%s5092_s18 + $0x3f] sm:$0xff] }
  0x94   : > { %1574 = vmatpush.bf16.msrb.mxu2 %v4866_v25 }
  0x97   : > { %1708 = vmatpush.bf16.msra.mxu3 %v4874_v27 }
  0x9b   : > { %408 = vmatmul.bf16.gmra.mxu1 %v188_v45  ;;  %530 = vmatmul.bf16.gmra.mxu2 %v431_v53  ;;  %v1090_v45 = vld [vmem:[%s5092_s18 + $0x3e] sm:$0xff]  ;;  %v1091_v53 = vld [vmem:[%s5092_s18 + $0x46] sm:$0xff] }
  0x9c   : > { %v1099_v57 = vpack.c.bf16 %v1091_v53, %v1090_v45  ;;  %v4882_v45 = vld [vmem:[%s6462_s1 + $0x310] sm:$0xff]  ;;  %v4865_v53 = vld [vmem:[%s6462_s1 + $0x288] sm:$0xff] }
  0x9d   : > { %1180 = vmatmul.bf16.gmra.mxu3 %v1097_v58  ;;  %1842 = vmatpush.bf16.msrb.mxu0 %v4882_v45  ;;  %v1226_v45 = vld [vmem:[%s5092_s18 + $0x4f] sm:$0xff] }
  0x9e   : > { %798 = vmatmul.bf16.gmra.mxu0 %v699_v54  ;;  %1575 = vmatpush.bf16.msrb.mxu2 %v4865_v53  ;;  %v1227_v53 = vld [vmem:[%s5092_s18 + $0x57] sm:$0xff] }
  0xa8   : > { %v5449_v10 = vpop.f32.mrf.mxu1 }
  0xab   : > { %v297_v15 = vpop.f32.mrf.mxu0  ;;  %907 = vmatmul.bf16.vlgmr.msra.gmra.mxu1 %v828_v8  ;;  %1041 = vmatmul.bf16.vlgmr.msra.gmra.mxu2 %v962_v9  ;;  %v830_v9 = vpack.c.bf16 %v5344_v3, %v5307_v51  ;;  %v4858_v3 = vld [vmem:[%s6462_s1 + $0x250] sm:$0xff] }
  0xac   : > { %1440 = vmatpush.bf16.msrb.mxu1 %v4858_v3 }
  0xad   : > { %1185 = vmatmul.bf16.gmra.mxu3 %v1098_v17  ;;  %v1092_v17 = vld [vmem:[%s5092_s18 + $0x4e] sm:$0xff] }
  0xae   : > { %1309 = vmatmul.bf16.vlgmr.msra.gmra.mxu0 %v1230_v12  ;;  %v5456_v11 = vpop.f32.mrf.mxu2  ;;  %v964_v12 = vpack.c.bf16 %v955_v5, %v954_v2  ;;  %v1100_v51 = vpack.c.bf16 %v1093_v19, %v1092_v17  ;;  %v831_v5 = vpack.c.bf16 %v5376_v20, %v5347_v4  ;;  %v4881_v20 = vld [vmem:[%s6462_s1 + $0x308] sm:$0xff] }
  0xaf   : > { %1843 = vmatpush.bf16.msrb.mxu0 %v4881_v20 }
  0xb0   : > { %v5458_v32 = vpop.f32.mrf.mxu1  ;;  %v5471_v26 = vpop.f32.mrf.mxu3 }
  0xb3   : > { %v5460_v22 = vpop.f32.mrf.mxu0 }
  0xb6   : > { %v5477_v36 = vpop.f32.mrf.mxu2 }
  0xb8   : > { %v5481_v41 = vpop.f32.mrf.mxu1  ;;  %v5490_v56 = vpop.f32.mrf.mxu3 }
  0xbb   : > { %v5485_v54 = vpop.f32.mrf.mxu0  ;;  %912 = vmatmul.bf16.gmra.mxu1 %v829_v37  ;;  %1046 = vmatmul.bf16.gmra.mxu2 %v963_v39 }
  0xbd   : > { %1190 = vmatmul.bf16.gmra.mxu3 %v1099_v57  ;;  %v4873_v57 = vld [vmem:[%s6462_s1 + $0x2c8] sm:$0xff] }
  0xbe   : > { %1314 = vmatmul.bf16.gmra.mxu0 %v1231_v44  ;;  %v5498_v58 = vpop.f32.mrf.mxu2  ;;  %1709 = vmatpush.bf16.msra.mxu3 %v4873_v57 }
  0xc0   : > { %v5500_v59 = vpop.f32.mrf.mxu1  ;;  %v5507_v62 = vpop.f32.mrf.mxu3 }
  0xc3   : > { %v5502_v60 = vpop.f32.mrf.mxu0 }
  0xc6   : > { %v5516_v8 = vpop.f32.mrf.mxu2 }
  0xc8   : > { %v384_v13 = vpop.f32.mrf.mxu1  ;;  %v5528_v28 = vpop.f32.mrf.mxu3 }
  0xc9   : > { %v385_v23 = vadd.f32 %v384_v13, %v297_v15  ;;  %v1095_v13 = vld [vmem:[%s5092_s18 + $0x66] sm:$0xff] }
  0xcb   : > { %v774_v24 = vpop.f32.mrf.mxu0  ;;  %917 = vmatmul.bf16.gmra.mxu1 %v830_v9  ;;  %1051 = vmatmul.bf16.gmra.mxu2 %v964_v12  ;;  %v1233_v9 = vpack.c.bf16 %v1225_v61, %v1224_v50  ;;  %v1094_v12 = vld [vmem:[%s5092_s18 + $0x5e] sm:$0xff] }
  0xcc   : > { %v1101_v25 = vpack.c.bf16 %v1095_v13, %v1094_v12 }
  0xcd   : > { %1195 = vmatmul.bf16.gmra.mxu3 %v1100_v51  ;;  %v4872_v51 = vld [vmem:[%s6462_s1 + $0x2c0] sm:$0xff] }
  0xce   : > { %1319 = vmatmul.bf16.gmra.mxu0 %v1232_v14  ;;  %v506_v15 = vpop.f32.mrf.mxu2  ;;  %1710 = vmatpush.bf16.msra.mxu3 %v4872_v51 }
  0xcf   : > { %v536_v30 = vadd.f32 %v506_v15, %v385_v23  ;;  %v4857_v23 = vld [vmem:[%s6462_s1 + $0x248] sm:$0xff] }
  0xd0   : > { %v386_v35 = vpop.f32.mrf.mxu1  ;;  %v5541_v55 = vpop.f32.mrf.mxu3  ;;  %1441 = vmatpush.bf16.msrb.mxu1 %v4857_v23 }
  0xd1   : > { %v670_v37 = vadd.f32 %v5471_v26, %v536_v30  ;;  %v387_v39 = vadd.f32 %v386_v35, %v5460_v22  ;;  %v956_v26 = vld [vmem:[%s5092_s18 + $0x3d] sm:$0xff] }
  0xd2   : > { %v965_v6 = vpack.c.bf16 %v957_v33, %v956_v26  ;;  %v4864_v35 = vld [vmem:[%s6462_s1 + $0x280] sm:$0xff]  ;;  %v832_v33 = vpack.c.bf16 %v5411_v42, %v5379_v21  ;;  %v4903_v42 = vld [vmem:[%s6462_s1 + $0x3b8] sm:$0xff] }
  0xd3   : > { %v776_v44 = vpop.f32.mrf.mxu0  ;;  %v5546_v22 = vadd.f32 %v774_v24, %v670_v37  ;;  %v4856_v37 = vld [vmem:[%s6462_s1 + $0x240] sm:$0xff]  ;;  %1576 = vmatpush.bf16.msrb.mxu2 %v4864_v35 }
  0xd4   : > { %1442 = vmatpush.bf16.msrb.mxu1 %v4856_v37 }
  0xd6   : > { %v508_v0 = vpop.f32.mrf.mxu2 }
  0xd7   : > { %v537_v2 = vadd.f32 %v508_v0, %v387_v39  ;;  %v1234_v0 = vpack.c.bf16 %v1227_v53, %v1226_v45  ;;  %2105 = vmatpush.bf16.msra.mxu2 %v4903_v42 }
  0xd8   : > { %v389_v7 = vpop.f32.mrf.mxu1  ;;  %v5561_v24 = vpop.f32.mrf.mxu3 }
  0xd9   : > { %v671_v14 = vadd.f32 %v5490_v56, %v537_v2  ;;  %v390_v17 = vadd.f32 %v389_v7, %v5485_v54  ;;  %v1620_v2 = vld [vmem:[%s5092_s18 + $0x19] sm:$0xff] }
  0xdb   : > { %v779_v19 = vpop.f32.mrf.mxu0  ;;  %922 = vmatmul.bf16.gmra.mxu1 %v831_v5  ;;  %1056 = vmatmul.bf16.gmra.mxu2 %v965_v6  ;;  %v5563_v4 = vadd.f32 %v776_v44, %v671_v14  ;;  %v1621_v5 = vld [vmem:[%s5092_s18 + $0x21] sm:$0xff] }
  0xdc   : > { %v4880_v6 = vld [vmem:[%s6462_s1 + $0x300] sm:$0xff]  ;;  %v1632_v21 = vpack.c.bf16 %v1621_v5, %v1620_v2  ;;  %v4910_v2 = vld [vmem:[%s6462_s1 + $0x3f0] sm:$0xff] }
  0xdd   : > { %1200 = vmatmul.bf16.gmra.mxu3 %v1101_v25  ;;  %1844 = vmatpush.bf16.msrb.mxu0 %v4880_v6 }
  0xde   : > { %1324 = vmatmul.bf16.gmra.mxu0 %v1233_v9  ;;  %v511_v56 = vpop.f32.mrf.mxu2 }
  0xdf   : > { %v538_v54 = vadd.f32 %v511_v56, %v390_v17  ;;  %v4895_v56 = vld [vmem:[%s6462_s1 + $0x378] sm:$0xff] }
  0xe0   : > { %v391_v27 = vpop.f32.mrf.mxu1  ;;  %v5579_v39 = vpop.f32.mrf.mxu3  ;;  %1971 = vmatpush.bf16.msra.mxu1 %v4895_v56  ;;  %v1766_v56 = vpack.c.bf16 %v5298_v48, %v5256_v31  ;;  %v4917_v31 = vld [vmem:[%s6462_s1 + $0x428] sm:$0xff] }
  0xe1   : > { %v672_v3 = vadd.f32 %v5507_v62, %v538_v54  ;;  %v392_v15 = vadd.f32 %v391_v27, %v5502_v60  ;;  %v958_v62 = vld [vmem:[%s5092_s18 + $0x4d] sm:$0xff]  ;;  %v959_v60 = vld [vmem:[%s5092_s18 + $0x55] sm:$0xff] }
  0xe2   : > { %v966_v50 = vpack.c.bf16 %v959_v60, %v958_v62  ;;  %v4919_v27 = vld [vmem:[%s6462_s1 + $0x438] sm:$0xff] }
  0xe3   : > { %v781_v30 = vpop.f32.mrf.mxu0  ;;  %v5581_v44 = vadd.f32 %v779_v19, %v672_v3  ;;  %v827_v3 = vld [vmem:[%s5092_s18 + $0x64] sm:$0xff]  ;;  %2373 = vmatpush.bf16.msra.mxu0 %v4919_v27  ;;  %v1624_v27 = vld [vmem:[%s5092_s18 + $0x39] sm:$0xff] }
  0xe4   : > { %v833_v62 = vpack.c.bf16 %v827_v3, %v5414_v43  ;;  %v1625_v3 = vld [vmem:[%s5092_s18 + $0x41] sm:$0xff] }
  0xe6   : > { %v513_v57 = vpop.f32.mrf.mxu2 }
  0xe7   : > { %v539_v26 = vadd.f32 %v513_v57, %v392_v15  ;;  %v961_v15 = vld [vmem:[%s5092_s18 + $0x65] sm:$0xff] }
  0xe8   : > { %v394_v61 = vpop.f32.mrf.mxu1  ;;  %v5596_v13 = vpop.f32.mrf.mxu3  ;;  %v1622_v57 = vld [vmem:[%s5092_s18 + $0x29] sm:$0xff] }
  0xe9   : > { %v673_v7 = vadd.f32 %v5528_v28, %v539_v26  ;;  %v395_v9 = vadd.f32 %v394_v61, %v5449_v10  ;;  %v4911_v28 = vld [vmem:[%s6462_s1 + $0x3f8] sm:$0xff] }
  0xea   : > { %2239 = vmatpush.bf16.msrb.mxu3 %v4911_v28  ;;  %v1623_v26 = vld [vmem:[%s5092_s18 + $0x31] sm:$0xff] }
  0xeb   : > { %v784_v12 = vpop.f32.mrf.mxu0  ;;  %927 = vmatmul.bf16.gmra.mxu1 %v832_v33  ;;  %1061 = vmatmul.bf16.gmra.mxu2 %v966_v50  ;;  %v5601_v14 = vadd.f32 %v781_v30, %v673_v7  ;;  %v1229_v30 = vld [vmem:[%s5092_s18 + $0x67] sm:$0xff]  ;;  %v1633_v43 = vpack.c.bf16 %v1623_v26, %v1622_v57  ;;  %v4918_v28 = vld [vmem:[%s6462_s1 + $0x430] sm:$0xff] }
  0xec   : > { %2374 = vmatpush.bf16.msra.mxu0 %v4918_v28  ;;  %v4891_v28 = vld [vmem:[%s6462_s1 + $0x358] sm:$0xff] }
  0xed   : > { %1711 = vmatmul.bf16.vlgmr.msra.gmra.mxu3 %v1632_v21 }
  0xee   : > { %1329 = vmatmul.bf16.gmra.mxu0 %v1234_v0  ;;  %v516_v10 = vpop.f32.mrf.mxu2  ;;  %v4902_v0 = vld [vmem:[%s6462_s1 + $0x3b0] sm:$0xff]  ;;  %2240 = vmatpush.bf16.msrb.mxu3 %v4910_v2 }
  0xef   : > { %v540_v17 = vadd.f32 %v516_v10, %v395_v9  ;;  %2106 = vmatpush.bf16.msra.mxu2 %v4902_v0  ;;  %v4901_v10 = vld [vmem:[%s6462_s1 + $0x3a8] sm:$0xff]  ;;  %v1767_v0 = vpack.c.bf16 %v5340_v1, %v5301_v49 }
  0xf0   : > { %v396_v19 = vpop.f32.mrf.mxu1  ;;  %v5611_v54 = vpop.f32.mrf.mxu3  ;;  %2375 = vmatpush.bf16.msra.mxu0 %v4917_v31  ;;  %v1626_v2 = vld [vmem:[%s5092_s18 + $0x49] sm:$0xff] }
  0xf1   : > { %v674_v23 = vadd.f32 %v5541_v55, %v540_v17  ;;  %v397_v25 = vadd.f32 %v396_v19, %v5458_v32  ;;  %v960_v55 = vld [vmem:[%s5092_s18 + $0x5d] sm:$0xff]  ;;  %v4909_v19 = vld [vmem:[%s6462_s1 + $0x3e8] sm:$0xff] }
  0xf2   : > { %v1228_v32 = vld [vmem:[%s5092_s18 + $0x5f] sm:$0xff]  ;;  %v967_v60 = vpack.c.bf16 %v961_v15, %v960_v55  ;;  %2241 = vmatpush.bf16.msrb.mxu3 %v4909_v19 }
  0xf3   : > { %v786_v20 = vpop.f32.mrf.mxu0  ;;  %v5616_v51 = vadd.f32 %v784_v12, %v674_v23  ;;  %v1235_v53 = vpack.c.bf16 %v1229_v30, %v1228_v32  ;;  %2107 = vmatpush.bf16.msra.mxu2 %v4901_v10  ;;  %v4893_v32 = vld [vmem:[%s6462_s1 + $0x368] sm:$0xff] }
  0xf6   : > { %v518_v35 = vpop.f32.mrf.mxu2 }
  0xf7   : > { %v541_v37 = vadd.f32 %v518_v35, %v397_v25  ;;  %v1498_v25 = vpack.c.bf16 %v5292_v46, %v5252_v29  ;;  %v1634_v35 = vpack.c.bf16 %v1625_v3, %v1624_v27 }
  0xf8   : > { %v399_v45 = vpop.f32.mrf.mxu1  ;;  %v5634_v5 = vpop.f32.mrf.mxu3 }
  0xf9   : > { %v675_v33 = vadd.f32 %v5561_v24, %v541_v37  ;;  %v400_v50 = vadd.f32 %v399_v45, %v5481_v41  ;;  %v4894_v24 = vld [vmem:[%s6462_s1 + $0x370] sm:$0xff]  ;;  %v4908_v45 = vld [vmem:[%s6462_s1 + $0x3e0] sm:$0xff] }
  0xfa   : > { %1972 = vmatpush.bf16.msra.mxu1 %v4894_v24  ;;  %2242 = vmatpush.bf16.msrb.mxu3 %v4908_v45 }
  0xfb   : > { %v789_v61 = vpop.f32.mrf.mxu0  ;;  %932 = vmatmul.bf16.gmra.mxu1 %v833_v62  ;;  %1066 = vmatmul.bf16.gmra.mxu2 %v967_v60  ;;  %v5639_v6 = vadd.f32 %v786_v20, %v675_v33  ;;  %v4900_v60 = vld [vmem:[%s6462_s1 + $0x3a0] sm:$0xff] }
  0xfc   : > { %2108 = vmatpush.bf16.msra.mxu2 %v4900_v60 }
  0xfd   : > { %1716 = vmatmul.bf16.gmra.mxu3 %v1633_v43  ;;  %v1627_v43 = vld [vmem:[%s5092_s18 + $0x51] sm:$0xff] }
  0xfe   : > { %1334 = vmatmul.bf16.gmra.mxu0 %v1235_v53  ;;  %v521_v41 = vpop.f32.mrf.mxu2  ;;  %1973 = vmatpush.bf16.msra.mxu1 %v4893_v32  ;;  %v1628_v32 = vld [vmem:[%s5092_s18 + $0x59] sm:$0xff] }
  0xff   : > { %v542_v7 = vadd.f32 %v521_v41, %v400_v50  ;;  %v1499_v50 = vpack.c.bf16 %v5336_v63, %v5295_v47  ;;  %v4899_v47 = vld [vmem:[%s6462_s1 + $0x398] sm:$0xff] }
 0x100   : > { %v401_v9 = vpop.f32.mrf.mxu1  ;;  %v5649_v17 = vpop.f32.mrf.mxu3  ;;  %v4907_v63 = vld [vmem:[%s6462_s1 + $0x3d8] sm:$0xff]  ;;  %2109 = vmatpush.bf16.msra.mxu2 %v4899_v47  ;;  %v1630_v47 = vld [vmem:[%s5092_s18 + $0x69] sm:$0xff] }
 0x101   : > { %v676_v12 = vadd.f32 %v5579_v39, %v542_v7  ;;  %v402_v21 = vadd.f32 %v401_v9, %v5500_v59  ;;  %v4916_v7 = vld [vmem:[%s6462_s1 + $0x420] sm:$0xff]  ;;  %2243 = vmatpush.bf16.msrb.mxu3 %v4907_v63  ;;  %v1631_v63 = vld [vmem:[%s5092_s18 + $0x71] sm:$0xff] }
 0x102   : > { %2376 = vmatpush.bf16.msra.mxu0 %v4916_v7 }
 0x103   : > { %v791_v42 = vpop.f32.mrf.mxu0  ;;  %v5654_v39 = vadd.f32 %v789_v61, %v676_v12 }
 0x106   : > { %v523_v59 = vpop.f32.mrf.mxu2 }
 0x107   : > { %v543_v23 = vadd.f32 %v523_v59, %v402_v21  ;;  %v1356_v59 = vld [vmem:[%s5092_s18 + $0x30] sm:$0xff] }
 0x108   : > { %v404_v20 = vpop.f32.mrf.mxu1  ;;  %v5666_v30 = vpop.f32.mrf.mxu3 }
 0x109   : > { %v677_v55 = vadd.f32 %v5596_v13, %v543_v23  ;;  %v405_v46 = vadd.f32 %v404_v20, %v5456_v11  ;;  %v4892_v11 = vld [vmem:[%s6462_s1 + $0x360] sm:$0xff]  ;;  %v1357_v23 = vld [vmem:[%s5092_s18 + $0x38] sm:$0xff] }
 0x10a   : > { %1974 = vmatpush.bf16.msra.mxu1 %v4892_v11  ;;  %v1366_v27 = vpack.c.bf16 %v1357_v23, %v1356_v59  ;;  %v1500_v3 = vpack.c.bf16 %v5368_v16, %v1357_v23 }
 0x10b   : > { %v794_v15 = vpop.f32.mrf.mxu0  ;;  %1443 = vmatmul.bf16.vlgmr.msrb.gmra.mxu1 %v5265_v34  ;;  %1577 = vmatmul.bf16.vlgmr.msrb.gmra.mxu2 %v1498_v25  ;;  %v5669_v29 = vadd.f32 %v791_v42, %v677_v55  ;;  %v1758_v25 = vld [vmem:[%s5092_s18 + $0x3a] sm:$0xff] }
 0x10d   : > { %1721 = vmatmul.bf16.gmra.mxu3 %v1634_v35  ;;  %v1629_v35 = vld [vmem:[%s5092_s18 + $0x61] sm:$0xff] }
 0x10e   : > { %1845 = vmatmul.bf16.vlgmr.msrb.gmra.mxu0 %v1766_v56  ;;  %v526_v48 = vpop.f32.mrf.mxu2  ;;  %1975 = vmatpush.bf16.msra.mxu1 %v4891_v28  ;;  %v1636_v16 = vpack.c.bf16 %v1629_v35, %v1628_v32 }
 0x10f   : > { %v544_v13 = vadd.f32 %v526_v48, %v405_v46 }
 0x110   : > { %v406_v37 = vpop.f32.mrf.mxu1  ;;  %v5685_v53 = vpop.f32.mrf.mxu3 }
 0x111   : > { %v678_v62 = vadd.f32 %v5611_v54, %v544_v13  ;;  %v407_v57 = vadd.f32 %v406_v37, %v5477_v36  ;;  %v1635_v36 = vpack.c.bf16 %v1627_v43, %v1626_v2  ;;  %v4906_v13 = vld [vmem:[%s6462_s1 + $0x3d0] sm:$0xff] }
 0x112   : > { %2244 = vmatpush.bf16.msrb.mxu3 %v4906_v13  ;;  %v5801_v13 = vld [vmem:[%s5092_s18 + $0x24] sm:$0xff] }
 0x113   : > { %v796_v34 = vpop.f32.mrf.mxu0  ;;  %v5687_v54 = vadd.f32 %v794_v15, %v678_v62  ;;  %v1768_v15 = vpack.c.bf16 %v5372_v18, %v1758_v25  ;;  %v4890_v18 = vld [vmem:[%s6462_s1 + $0x350] sm:$0xff]  ;;  %v4896_v25 = vld [vmem:[%s6462_s1 + $0x380] sm:$0xff] }
 0x114   : > { %1976 = vmatpush.bf16.msra.mxu1 %v4890_v18  ;;  %v4912_v18 = vld [vmem:[%s6462_s1 + $0x400] sm:$0xff] }
 0x116   : > { %v528_v26 = vpop.f32.mrf.mxu2 }
 0x117   : > { %v545_v33 = vadd.f32 %v528_v26, %v407_v57  ;;  %v4914_v57 = vld [vmem:[%s6462_s1 + $0x410] sm:$0xff]  ;;  %v4897_v26 = vld [vmem:[%s6462_s1 + $0x388] sm:$0xff] }
 0x118   : > { %v409_v61 = vpop.f32.mrf.mxu1  ;;  %v5700_v9 = vpop.f32.mrf.mxu3 }
 0x119   : > { %v679_v24 = vadd.f32 %v5634_v5, %v545_v33  ;;  %v410_v1 = vadd.f32 %v409_v61, %v5498_v58  ;;  %v4915_v58 = vld [vmem:[%s6462_s1 + $0x418] sm:$0xff]  ;;  %v1359_v61 = vld [vmem:[%s5092_s18 + $0x48] sm:$0xff] }
 0x11a   : > { %2377 = vmatpush.bf16.msra.mxu0 %v4915_v58  ;;  %v4904_v58 = vld [vmem:[%s6462_s1 + $0x3c0] sm:$0xff] }
 0x11b   : > { %v799_v41 = vpop.f32.mrf.mxu0  ;;  %1448 = vmatmul.bf16.gmra.mxu1 %v5311_v52  ;;  %1582 = vmatmul.bf16.gmra.mxu2 %v1499_v50  ;;  %v5706_v49 = vadd.f32 %v796_v34, %v679_v24  ;;  %v4905_v50 = vld [vmem:[%s6462_s1 + $0x3c8] sm:$0xff] }
 0x11c   : > { %2245 = vmatpush.bf16.msrb.mxu3 %v4905_v50 }
 0x11d   : > { %1726 = vmatmul.bf16.gmra.mxu3 %v1635_v36 }
 0x11e   : > { %1850 = vmatmul.bf16.gmra.mxu0 %v1767_v0  ;;  %v531_v52 = vpop.f32.mrf.mxu2  ;;  %v1760_v0 = vld [vmem:[%s5092_s18 + $0x4a] sm:$0xff] }
 0x11f   : > { %v546_v5 = vadd.f32 %v531_v52, %v410_v1  ;;  %2378 = vmatpush.bf16.msra.mxu0 %v4914_v57  ;;  %v1769_v36 = vpack.c.bf16 %v5407_v40, %v1760_v0  ;;  %v4913_v40 = vld [vmem:[%s6462_s1 + $0x408] sm:$0xff] }
 0x120   : > { %v411_v12 = vpop.f32.mrf.mxu1  ;;  %v5716_v10 = vpop.f32.mrf.mxu3  ;;  %2246 = vmatpush.bf16.msrb.mxu3 %v4904_v58  ;;  %v4934_v58 = vld [vmem:[%s6462_s1 + $0x4b0] sm:$0xff] }
 0x121   : > { %v680_v21 = vadd.f32 %v5649_v17, %v546_v5  ;;  %v412_v17 = vadd.f32 %v411_v12, %v5516_v8  ;;  %v4898_v8 = vld [vmem:[%s6462_s1 + $0x390] sm:$0xff]  ;;  %v4889_v12 = vld [vmem:[%s6462_s1 + $0x348] sm:$0xff] }
 0x122   : > { %2110 = vmatpush.bf16.msra.mxu2 %v4898_v8  ;;  %1977 = vmatpush.bf16.msra.mxu1 %v4889_v12 }
 0x123   : > { %v801_v42 = vpop.f32.mrf.mxu0  ;;  %v5721_v19 = vadd.f32 %v799_v41, %v680_v21  ;;  %v1501_v41 = vpack.c.bf16 %v5403_v38, %v1359_v61  ;;  %2379 = vmatpush.bf16.msra.mxu0 %v4913_v40  ;;  %v5843_v40 = vld [vmem:[%s5092_s18 + $0x3c] sm:$0xff] }
 0x126   : > { %v533_v20 = vpop.f32.mrf.mxu2  ;;  %2111 = vmatpush.bf16.msra.mxu2 %v4897_v26 }
 0x127   : > { %v547_v56 = vadd.f32 %v533_v20, %v412_v17  ;;  %v4888_v20 = vld [vmem:[%s6462_s1 + $0x340] sm:$0xff]  ;;  %2380 = vmatpush.bf16.msra.mxu0 %v4912_v18  ;;  %v2291_v18 = vld [vmem:[%s5092_s18 + $0x2d] sm:$0xff] }
 0x128   : > { %v908_v55 = vpop.f32.mrf.mxu1  ;;  %v5739_v37 = vpop.f32.mrf.mxu3  ;;  %1978 = vmatpush.bf16.msra.mxu1 %v4888_v20 }
 0x129   : > { %v681_v31 = vadd.f32 %v5666_v30, %v547_v56  ;;  %v938_v46 = vadd.f32 %v908_v55, %v5546_v22  ;;  %v1762_v55 = vld [vmem:[%s5092_s18 + $0x5a] sm:$0xff] }
 0x12a   : > { %2112 = vmatpush.bf16.msra.mxu2 %v4896_v25 }
 0x12b   : > { %v1310_v48 = vpop.f32.mrf.mxu0  ;;  %1453 = vmatmul.bf16.gmra.mxu1 %v1366_v27  ;;  %1587 = vmatmul.bf16.gmra.mxu2 %v1500_v3  ;;  %v5744_v30 = vadd.f32 %v801_v42, %v681_v31  ;;  %v1637_v42 = vpack.c.bf16 %v1631_v63, %v1630_v47  ;;  %v1495_v3 = vld [vmem:[%s5092_s18 + $0x60] sm:$0xff] }
 0x12d   : > { %1731 = vmatmul.bf16.gmra.mxu3 %v1636_v16  ;;  %v5804_v16 = vld [vmem:[%s5092_s18 + $0x2c] sm:$0xff] }
 0x12e   : > { %1855 = vmatmul.bf16.gmra.mxu0 %v1768_v15  ;;  %v1042_v22 = vpop.f32.mrf.mxu2  ;;  %v1763_v15 = vld [vmem:[%s5092_s18 + $0x62] sm:$0xff] }
 0x12f   : > { %v1072_v62 = vadd.f32 %v1042_v22, %v938_v46  ;;  %v1770_v8 = vpack.c.bf16 %v1763_v15, %v1762_v55  ;;  %v4950_v15 = vld [vmem:[%s6462_s1 + $0x530] sm:$0xff] }
 0x130   : > { %v910_v34 = vpop.f32.mrf.mxu1  ;;  %v5754_v33 = vpop.f32.mrf.mxu3 }
 0x131   : > { %v1206_v60 = vadd.f32 %v5685_v53, %v1072_v62  ;;  %v939_v45 = vadd.f32 %v910_v34, %v5563_v4  ;;  %v1358_v53 = vld [vmem:[%s5092_s18 + $0x40] sm:$0xff] }
 0x132   : > { %v1367_v24 = vpack.c.bf16 %v1359_v61, %v1358_v53 }
 0x133   : > { %v1312_v11 = vpop.f32.mrf.mxu0  ;;  %v5759_v4 = vadd.f32 %v1310_v48, %v1206_v60 }
 0x136   : > { %v1044_v2 = vpop.f32.mrf.mxu2 }
 0x137   : > { %v1073_v43 = vadd.f32 %v1044_v2, %v939_v45  ;;  %v2168_v45 = vpack.c.bf16 %v5804_v16, %v5801_v13  ;;  %v4927_v2 = vld [vmem:[%s6462_s1 + $0x478] sm:$0xff] }
 0x138   : > { %v913_v7 = vpop.f32.mrf.mxu1  ;;  %v5773_v21 = vpop.f32.mrf.mxu3  ;;  %2507 = vmatpush.bf16.msrb.mxu1 %v4927_v2 }
 0x139   : > { %v1207_v1 = vadd.f32 %v5700_v9, %v1073_v43  ;;  %v940_v52 = vadd.f32 %v913_v7, %v5581_v44  ;;  %v1363_v7 = vld [vmem:[%s5092_s18 + $0x68] sm:$0xff] }
 0x13b   : > { %v1315_v5 = vpop.f32.mrf.mxu0  ;;  %1458 = vmatmul.bf16.gmra.mxu1 %v1367_v24  ;;  %1592 = vmatmul.bf16.gmra.mxu2 %v1501_v41  ;;  %v5775_v38 = vadd.f32 %v1312_v11, %v1207_v1  ;;  %v4935_v11 = vld [vmem:[%s6462_s1 + $0x4b8] sm:$0xff]  ;;  %v1369_v1 = vpack.c.bf16 %v1363_v7, %v1495_v3 }
 0x13c   : > { %2641 = vmatpush.bf16.msrb.mxu2 %v4935_v11  ;;  %v4951_v24 = vld [vmem:[%s6462_s1 + $0x538] sm:$0xff] }
 0x13d   : > { %1736 = vmatmul.bf16.gmra.mxu3 %v1637_v42  ;;  %2909 = vmatpush.bf16.msrb.mxu0 %v4951_v24  ;;  %v5840_v42 = vld [vmem:[%s5092_s18 + $0x34] sm:$0xff] }
 0x13e   : > { %1860 = vmatmul.bf16.gmra.mxu0 %v1769_v36  ;;  %v1047_v9 = vpop.f32.mrf.mxu2  ;;  %v1765_v36 = vld [vmem:[%s5092_s18 + $0x72] sm:$0xff] }
 0x13f   : > { %v1074_v44 = vadd.f32 %v1047_v9, %v940_v52 }
 0x140   : > { %v915_v28 = vpop.f32.mrf.mxu1  ;;  %v5791_v56 = vpop.f32.mrf.mxu3  ;;  %2642 = vmatpush.bf16.msrb.mxu2 %v4934_v58 }
 0x141   : > { %v1208_v59 = vadd.f32 %v5716_v10, %v1074_v44  ;;  %v941_v23 = vadd.f32 %v915_v28, %v5601_v14  ;;  %v1360_v10 = vld [vmem:[%s5092_s18 + $0x50] sm:$0xff]  ;;  %v1361_v14 = vld [vmem:[%s5092_s18 + $0x58] sm:$0xff]  ;;  %2910 = vmatpush.bf16.msrb.mxu0 %v4950_v15  ;;  %v4948_v15 = vld [vmem:[%s6462_s1 + $0x520] sm:$0xff] }
 0x142   : > { %v1368_v31 = vpack.c.bf16 %v1361_v14, %v1360_v10  ;;  %v1502_v46 = vpack.c.bf16 %v1495_v3, %v1361_v14 }
 0x143   : > { %v1317_v17 = vpop.f32.mrf.mxu0  ;;  %v5793_v27 = vadd.f32 %v1315_v5, %v1208_v59  ;;  %v4942_v59 = vld [vmem:[%s6462_s1 + $0x4f0] sm:$0xff] }
 0x146   : > { %v1049_v32 = vpop.f32.mrf.mxu2 }
 0x147   : > { %v1075_v35 = vadd.f32 %v1049_v32, %v941_v23  ;;  %v4933_v32 = vld [vmem:[%s6462_s1 + $0x4a8] sm:$0xff] }
 0x148   : > { %v918_v48 = vpop.f32.mrf.mxu1  ;;  %v5811_v60 = vpop.f32.mrf.mxu3  ;;  %2643 = vmatpush.bf16.msrb.mxu2 %v4933_v32 }
 0x149   : > { %v1209_v22 = vadd.f32 %v5739_v37, %v1075_v35  ;;  %v942_v62 = vadd.f32 %v918_v48, %v5616_v51  ;;  %v4943_v51 = vld [vmem:[%s6462_s1 + $0x4f8] sm:$0xff] }
 0x14a   : > { %2775 = vmatpush.bf16.msra.mxu3 %v4943_v51  ;;  %v2022_v48 = vld [vmem:[%s5092_s18 + $0x1c] sm:$0xff] }
 0x14b   : > { %v1320_v34 = vpop.f32.mrf.mxu0  ;;  %1463 = vmatmul.bf16.gmra.mxu1 %v1368_v31  ;;  %1597 = vmatmul.bf16.gmra.mxu2 %v1502_v46  ;;  %v5818_v57 = vadd.f32 %v1317_v17, %v1209_v22  ;;  %v2169_v17 = vpack.c.bf16 %v5843_v40, %v5840_v42  ;;  %v4941_v31 = vld [vmem:[%s6462_s1 + $0x4e8] sm:$0xff] }
 0x14c   : > { %v1889_v46 = vld [vmem:[%s5092_s18 + $0x23] sm:$0xff] }
 0x14d   : > { %2247 = vmatmul.bf16.vlgmr.msrb.gmra.mxu3 %v2168_v45  ;;  %v2034_v45 = vpack.c.bf16 %v5801_v13, %v2022_v48 }
 0x14e   : > { %1865 = vmatmul.bf16.gmra.mxu0 %v1770_v8  ;;  %v1052_v37 = vpop.f32.mrf.mxu2  ;;  %2776 = vmatpush.bf16.msra.mxu3 %v4942_v59  ;;  %v2290_v8 = vld [vmem:[%s5092_s18 + $0x25] sm:$0xff] }
 0x14f   : > { %v1076_v26 = vadd.f32 %v1052_v37, %v942_v62  ;;  %v2302_v51 = vpack.c.bf16 %v2291_v18, %v2290_v8  ;;  %v5884_v37 = vld [vmem:[%s5092_s18 + $0x44] sm:$0xff] }
 0x150   : > { %v920_v50 = vpop.f32.mrf.mxu1  ;;  %v5828_v43 = vpop.f32.mrf.mxu3 }
 0x151   : > { %v1210_v53 = vadd.f32 %v5754_v33, %v1076_v26  ;;  %v943_v61 = vadd.f32 %v920_v50, %v5639_v6  ;;  %v1497_v33 = vld [vmem:[%s5092_s18 + $0x70] sm:$0xff] }
 0x152   : > { %v1764_v6 = vld [vmem:[%s5092_s18 + $0x6a] sm:$0xff]  ;;  %v1503_v52 = vpack.c.bf16 %v1497_v33, %v1363_v7  ;;  %2777 = vmatpush.bf16.msra.mxu3 %v4941_v31 }
 0x153   : > { %v1322_v0 = vpop.f32.mrf.mxu0  ;;  %v5833_v41 = vadd.f32 %v1320_v34, %v1210_v53  ;;  %v1771_v12 = vpack.c.bf16 %v1765_v36, %v1764_v6  ;;  %v5887_v26 = vld [vmem:[%s5092_s18 + $0x4c] sm:$0xff] }
 0x154   : > { %v2170_v13 = vpack.c.bf16 %v5887_v26, %v5884_v37 }
 0x156   : > { %v1054_v47 = vpop.f32.mrf.mxu2 }
 0x157   : > { %v1077_v63 = vadd.f32 %v1054_v47, %v943_v61 }
 0x158   : > { %v923_v5 = vpop.f32.mrf.mxu1  ;;  %v5853_v23 = vpop.f32.mrf.mxu3 }
 0x159   : > { %v1211_v9 = vadd.f32 %v5773_v21, %v1077_v63  ;;  %v944_v44 = vadd.f32 %v923_v5, %v5654_v39  ;;  %v4926_v39 = vld [vmem:[%s6462_s1 + $0x470] sm:$0xff]  ;;  %v4932_v63 = vld [vmem:[%s6462_s1 + $0x4a0] sm:$0xff] }
 0x15a   : > { %2508 = vmatpush.bf16.msrb.mxu1 %v4926_v39  ;;  %2644 = vmatpush.bf16.msrb.mxu2 %v4932_v63  ;;  %v4938_v63 = vld [vmem:[%s6462_s1 + $0x4d0] sm:$0xff] }
 0x15b   : > { %v1325_v28 = vpop.f32.mrf.mxu0  ;;  %1468 = vmatmul.bf16.gmra.mxu1 %v1369_v1  ;;  %1602 = vmatmul.bf16.gmra.mxu2 %v1503_v52  ;;  %v5860_v21 = vadd.f32 %v1322_v0, %v1211_v9  ;;  %v4925_v0 = vld [vmem:[%s6462_s1 + $0x468] sm:$0xff]  ;;  %v4940_v1 = vld [vmem:[%s6462_s1 + $0x4e0] sm:$0xff]  ;;  %v2292_v9 = vld [vmem:[%s5092_s18 + $0x35] sm:$0xff] }
 0x15c   : > { %v4924_v52 = vld [vmem:[%s6462_s1 + $0x460] sm:$0xff]  ;;  %2778 = vmatpush.bf16.msra.mxu3 %v4940_v1 }
 0x15d   : > { %2252 = vmatmul.bf16.gmra.mxu3 %v2169_v17  ;;  %v2035_v17 = vpack.c.bf16 %v5840_v42, %v5804_v16  ;;  %v4931_v42 = vld [vmem:[%s6462_s1 + $0x498] sm:$0xff] }
 0x15e   : > { %1870 = vmatmul.bf16.gmra.mxu0 %v1771_v12  ;;  %v1057_v25 = vpop.f32.mrf.mxu2  ;;  %2509 = vmatpush.bf16.msrb.mxu1 %v4925_v0  ;;  %v1891_v12 = vld [vmem:[%s5092_s18 + $0x33] sm:$0xff]  ;;  %v2036_v0 = vpack.c.bf16 %v5884_v37, %v5843_v40 }
 0x15f   : > { %v1078_v20 = vadd.f32 %v1057_v25, %v944_v44  ;;  %v2293_v44 = vld [vmem:[%s5092_s18 + $0x3d] sm:$0xff]  ;;  %2645 = vmatpush.bf16.msrb.mxu2 %v4931_v42 }
 0x160   : > { %v925_v10 = vpop.f32.mrf.mxu1  ;;  %v5870_v35 = vpop.f32.mrf.mxu3  ;;  %v2303_v25 = vpack.c.bf16 %v2293_v44, %v2292_v9 }
 0x161   : > { %v1212_v14 = vadd.f32 %v5791_v56, %v1078_v20  ;;  %v945_v3 = vadd.f32 %v925_v10, %v5669_v29  ;;  %v1888_v56 = vld [vmem:[%s5092_s18 + $0x1b] sm:$0xff] }
 0x162   : > { %v1900_v34 = vpack.c.bf16 %v1889_v46, %v1888_v56  ;;  %2510 = vmatpush.bf16.msrb.mxu1 %v4924_v52  ;;  %v5925_v20 = vld [vmem:[%s5092_s18 + $0x54] sm:$0xff]  ;;  %v5928_v10 = vld [vmem:[%s5092_s18 + $0x5c] sm:$0xff] }
 0x163   : > { %v1327_v55 = vpop.f32.mrf.mxu0  ;;  %v5875_v29 = vadd.f32 %v1325_v28, %v1212_v14  ;;  %v2171_v16 = vpack.c.bf16 %v5928_v10, %v5925_v20 }
 0x166   : > { %v1059_v22 = vpop.f32.mrf.mxu2 }
 0x167   : > { %v1079_v62 = vadd.f32 %v1059_v22, %v945_v3  ;;  %v4923_v22 = vld [vmem:[%s6462_s1 + $0x458] sm:$0xff] }
 0x168   : > { %v928_v11 = vpop.f32.mrf.mxu1  ;;  %v5894_v2 = vpop.f32.mrf.mxu3  ;;  %2511 = vmatpush.bf16.msrb.mxu1 %v4923_v22 }
 0x169   : > { %v1213_v50 = vadd.f32 %v5811_v60, %v1079_v62  ;;  %v946_v53 = vadd.f32 %v928_v11, %v5687_v54  ;;  %v4949_v54 = vld [vmem:[%s6462_s1 + $0x528] sm:$0xff]  ;;  %v1892_v11 = vld [vmem:[%s5092_s18 + $0x3b] sm:$0xff] }
 0x16a   : > { %2911 = vmatpush.bf16.msrb.mxu0 %v4949_v54 }
 0x16b   : > { %v1330_v61 = vpop.f32.mrf.mxu0  ;;  %1979 = vmatmul.bf16.vlgmr.msra.gmra.mxu1 %v1900_v34  ;;  %2113 = vmatmul.bf16.vlgmr.msra.gmra.mxu2 %v2034_v45  ;;  %v5898_v24 = vadd.f32 %v1327_v55, %v1213_v50  ;;  %v4947_v34 = vld [vmem:[%s6462_s1 + $0x518] sm:$0xff] }
 0x16d   : > { %2257 = vmatmul.bf16.gmra.mxu3 %v2170_v13 }
 0x16e   : > { %2381 = vmatmul.bf16.vlgmr.msra.gmra.mxu0 %v2302_v51  ;;  %v1062_v60 = vpop.f32.mrf.mxu2  ;;  %v2295_v51 = vld [vmem:[%s5092_s18 + $0x4d] sm:$0xff] }
 0x16f   : > { %v1080_v7 = vadd.f32 %v1062_v60, %v946_v53  ;;  %2912 = vmatpush.bf16.msrb.mxu0 %v4948_v15  ;;  %v5966_v60 = vld [vmem:[%s5092_s18 + $0x64] sm:$0xff] }
 0x170   : > { %v930_v33 = vpop.f32.mrf.mxu1  ;;  %v5914_v5 = vpop.f32.mrf.mxu3 }
 0x171   : > { %v1214_v6 = vadd.f32 %v5828_v43, %v1080_v7  ;;  %v947_v36 = vadd.f32 %v930_v33, %v5706_v49  ;;  %v1890_v43 = vld [vmem:[%s5092_s18 + $0x2b] sm:$0xff] }
 0x172   : > { %v1901_v59 = vpack.c.bf16 %v1891_v12, %v1890_v43  ;;  %v5969_v7 = vld [vmem:[%s5092_s18 + $0x6c] sm:$0xff] }
 0x173   : > { %v1332_v47 = vpop.f32.mrf.mxu0  ;;  %v5916_v49 = vadd.f32 %v1330_v61, %v1214_v6  ;;  %2913 = vmatpush.bf16.msrb.mxu0 %v4947_v34  ;;  %v2172_v37 = vpack.c.bf16 %v5969_v7, %v5966_v60 }
 0x176   : > { %v1064_v28 = vpop.f32.mrf.mxu2 }
 0x177   : > { %v1081_v58 = vadd.f32 %v1064_v28, %v947_v36  ;;  %v4946_v28 = vld [vmem:[%s6462_s1 + $0x510] sm:$0xff] }
 0x178   : > { %v933_v39 = vpop.f32.mrf.mxu1  ;;  %v5935_v32 = vpop.f32.mrf.mxu3  ;;  %2914 = vmatpush.bf16.msrb.mxu0 %v4946_v28 }
 0x179   : > { %v1215_v14 = vadd.f32 %v5853_v23, %v1081_v58  ;;  %v948_v3 = vadd.f32 %v933_v39, %v5721_v19  ;;  %v4939_v19 = vld [vmem:[%s6462_s1 + $0x4d8] sm:$0xff]  ;;  %v4929_v58 = vld [vmem:[%s6462_s1 + $0x488] sm:$0xff] }
 0x17a   : > { %2779 = vmatpush.bf16.msra.mxu3 %v4939_v19  ;;  %v1895_v39 = vld [vmem:[%s5092_s18 + $0x53] sm:$0xff] }
 0x17b   : > { %v1335_v55 = vpop.f32.mrf.mxu0  ;;  %1984 = vmatmul.bf16.gmra.mxu1 %v1901_v59  ;;  %2118 = vmatmul.bf16.gmra.mxu2 %v2035_v17  ;;  %v5942_v31 = vadd.f32 %v1332_v47, %v1215_v14  ;;  %v4930_v47 = vld [vmem:[%s6462_s1 + $0x490] sm:$0xff]  ;;  %v4937_v17 = vld [vmem:[%s6462_s1 + $0x4c8] sm:$0xff]  ;;  %v2297_v14 = vld [vmem:[%s5092_s18 + $0x5d] sm:$0xff] }
 0x17c   : > { %2646 = vmatpush.bf16.msrb.mxu2 %v4930_v47 }
 0x17d   : > { %2262 = vmatmul.bf16.gmra.mxu3 %v2171_v16  ;;  %v2037_v16 = vpack.c.bf16 %v5925_v20, %v5887_v26 }
 0x17e   : > { %2386 = vmatmul.bf16.gmra.mxu0 %v2303_v25  ;;  %v1067_v23 = vpop.f32.mrf.mxu2  ;;  %2780 = vmatpush.bf16.msra.mxu3 %v4938_v63  ;;  %v2296_v25 = vld [vmem:[%s5092_s18 + $0x55] sm:$0xff]  ;;  %v2038_v63 = vpack.c.bf16 %v5966_v60, %v5928_v10 }
 0x17f   : > { %v1082_v56 = vadd.f32 %v1067_v23, %v948_v3  ;;  %v2305_v19 = vpack.c.bf16 %v2297_v14, %v2296_v25  ;;  %v6013_v23 = vld [vmem:[%s5092_s18 + $0x74] sm:$0xff] }
 0x180   : > { %v935_v46 = vpop.f32.mrf.mxu1  ;;  %v5952_v62 = vpop.f32.mrf.mxu3  ;;  %2647 = vmatpush.bf16.msrb.mxu2 %v4929_v58  ;;  %v4967_v60 = vld [vmem:[%s6462_s1 + $0x5b8] sm:$0xff] }
 0x181   : > { %v1216_v48 = vadd.f32 %v5870_v35, %v1082_v56  ;;  %v949_v8 = vadd.f32 %v935_v46, %v5744_v30  ;;  %v1893_v35 = vld [vmem:[%s5092_s18 + $0x43] sm:$0xff] }
 0x182   : > { %v2294_v30 = vld [vmem:[%s5092_s18 + $0x45] sm:$0xff]  ;;  %v1902_v61 = vpack.c.bf16 %v1893_v35, %v1892_v11  ;;  %2781 = vmatpush.bf16.msra.mxu3 %v4937_v17  ;;  %v2167_v56 = vld [vmem:[%s5092_s18 + $0x7c] sm:$0xff] }
 0x183   : > { %v1337_v18 = vpop.f32.mrf.mxu0  ;;  %v5957_v45 = vadd.f32 %v1335_v55, %v1216_v48  ;;  %v2304_v54 = vpack.c.bf16 %v2295_v51, %v2294_v30  ;;  %v2173_v26 = vpack.c.bf16 %v2167_v56, %v6013_v23  ;;  %v4936_v35 = vld [vmem:[%s6462_s1 + $0x4c0] sm:$0xff] }
 0x184   : > { %v2301_v56 = vld [vmem:[%s5092_s18 + $0x7d] sm:$0xff] }
 0x186   : > { %v1069_v50 = vpop.f32.mrf.mxu2  ;;  %2782 = vmatpush.bf16.msra.mxu3 %v4936_v35 }
 0x187   : > { %v1083_v53 = vadd.f32 %v1069_v50, %v949_v8 }
 0x188   : > { %v1444_v13 = vpop.f32.mrf.mxu1  ;;  %v5979_v40 = vpop.f32.mrf.mxu3 }
 0x189   : > { %v1217_v33 = vadd.f32 %v5894_v2, %v1083_v53  ;;  %v1474_v6 = vadd.f32 %v1444_v13, %v5759_v4  ;;  %v4922_v4 = vld [vmem:[%s6462_s1 + $0x450] sm:$0xff]  ;;  %v4928_v53 = vld [vmem:[%s6462_s1 + $0x480] sm:$0xff] }
 0x18a   : > { %2512 = vmatpush.bf16.msrb.mxu1 %v4922_v4  ;;  %2648 = vmatpush.bf16.msrb.mxu2 %v4928_v53 }
 0x18b   : > { %v1846_v36 = vpop.f32.mrf.mxu0  ;;  %1989 = vmatmul.bf16.gmra.mxu1 %v1902_v61  ;;  %2123 = vmatmul.bf16.gmra.mxu2 %v2036_v0  ;;  %v5986_v2 = vadd.f32 %v1337_v18, %v1217_v33  ;;  %v4921_v18 = vld [vmem:[%s6462_s1 + $0x448] sm:$0xff]  ;;  %v4920_v61 = vld [vmem:[%s6462_s1 + $0x440] sm:$0xff] }
 0x18c   : > { %v2299_v33 = vld [vmem:[%s5092_s18 + $0x6d] sm:$0xff] }
 0x18d   : > { %2267 = vmatmul.bf16.gmra.mxu3 %v2172_v37 }
 0x18e   : > { %2391 = vmatmul.bf16.gmra.mxu0 %v2304_v54  ;;  %v1578_v1 = vpop.f32.mrf.mxu2  ;;  %2513 = vmatpush.bf16.msrb.mxu1 %v4921_v18  ;;  %v2298_v54 = vld [vmem:[%s5092_s18 + $0x65] sm:$0xff]  ;;  %v2039_v18 = vpack.c.bf16 %v6013_v23, %v5969_v7 }
 0x18f   : > { %v1608_v52 = vadd.f32 %v1578_v1, %v1474_v6  ;;  %v2306_v4 = vpack.c.bf16 %v2299_v33, %v2298_v54  ;;  %v2692_v1 = vld [vmem:[%s5092_s18 + $0x28] sm:$0xff]  ;;  %3177 = vmatpush.bf16.msra.mxu2 %v4967_v60 }
 0x190   : > { %v1446_v43 = vpop.f32.mrf.mxu1  ;;  %v5996_v59 = vpop.f32.mrf.mxu3 }
 0x191   : > { %v1742_v12 = vadd.f32 %v5914_v5, %v1608_v52  ;;  %v1475_v9 = vadd.f32 %v1446_v43, %v5775_v38  ;;  %v6004_v5 = vld [vmem:[%s5092_s18 + $0x4b] sm:$0xff]  ;;  %v4944_v43 = vld [vmem:[%s6462_s1 + $0x500] sm:$0xff] }
 0x192   : > { %v1903_v15 = vpack.c.bf16 %v1895_v39, %v6004_v5  ;;  %2514 = vmatpush.bf16.msrb.mxu1 %v4920_v61  ;;  %v6058_v52 = vld [vmem:[%s5092_s18 + $0x30] sm:$0xff] }
 0x193   : > { %v1848_v44 = vpop.f32.mrf.mxu0  ;;  %v6001_v38 = vadd.f32 %v1846_v36, %v1742_v12  ;;  %v2704_v10 = vpack.c.bf16 %v6058_v52, %v2692_v1  ;;  %v2424_v1 = vld [vmem:[%s5092_s18 + $0x26] sm:$0xff] }
 0x196   : > { %v1580_v3 = vpop.f32.mrf.mxu2 }
 0x197   : > { %v1609_v55 = vadd.f32 %v1580_v3, %v1475_v9 }
 0x198   : > { %v1449_v42 = vpop.f32.mrf.mxu1  ;;  %v6021_v22 = vpop.f32.mrf.mxu3 }
 0x199   : > { %v1743_v46 = vadd.f32 %v5935_v32, %v1609_v55  ;;  %v1476_v48 = vadd.f32 %v1449_v42, %v5793_v27  ;;  %v4945_v32 = vld [vmem:[%s6462_s1 + $0x508] sm:$0xff]  ;;  %v4959_v55 = vld [vmem:[%s6462_s1 + $0x578] sm:$0xff] }
 0x19a   : > { %2915 = vmatpush.bf16.msrb.mxu0 %v4945_v32  ;;  %3043 = vmatpush.bf16.msra.mxu1 %v4959_v55  ;;  %v2829_v55 = vld [vmem:[%s5092_s18 + $0x48] sm:$0xff] }
 0x19b   : > { %v1851_v8 = vpop.f32.mrf.mxu0  ;;  %1994 = vmatmul.bf16.gmra.mxu1 %v1903_v15  ;;  %2128 = vmatmul.bf16.gmra.mxu2 %v2037_v16  ;;  %v6024_v20 = vadd.f32 %v1848_v44, %v1743_v46  ;;  %v4983_v15 = vld [vmem:[%s6462_s1 + $0x638] sm:$0xff] }
 0x19d   : > { %2272 = vmatmul.bf16.gmra.mxu3 %v2173_v26 }
 0x19e   : > { %2396 = vmatmul.bf16.gmra.mxu0 %v2305_v19  ;;  %v1583_v27 = vpop.f32.mrf.mxu2  ;;  %v6089_v19 = vld [vmem:[%s5092_s18 + $0x6b] sm:$0xff] }
 0x19f   : > { %v1610_v34 = vadd.f32 %v1583_v27, %v1476_v48  ;;  %2916 = vmatpush.bf16.msrb.mxu0 %v4944_v43  ;;  %v6101_v27 = vld [vmem:[%s5092_s18 + $0x40] sm:$0xff] }
 0x1a0   : > { %v1451_v11 = vpop.f32.mrf.mxu1  ;;  %v6040_v0 = vpop.f32.mrf.mxu3  ;;  %v2558_v43 = vld [vmem:[%s5092_s18 + $0x27] sm:$0xff] }
 0x1a1   : > { %v1744_v30 = vadd.f32 %v5952_v62, %v1610_v34  ;;  %v1477_v51 = vadd.f32 %v1451_v11, %v5818_v57  ;;  %v6045_v62 = vld [vmem:[%s5092_s18 + $0x5b] sm:$0xff]  ;;  %v6048_v57 = vld [vmem:[%s5092_s18 + $0x63] sm:$0xff] }
 0x1a2   : > { %v1904_v47 = vpack.c.bf16 %v6048_v57, %v6045_v62 }
 0x1a3   : > { %v1853_v50 = vpop.f32.mrf.mxu0  ;;  %v6042_v13 = vadd.f32 %v1851_v8, %v1744_v30  ;;  %3445 = vmatpush.bf16.msra.mxu0 %v4983_v15  ;;  %v4966_v30 = vld [vmem:[%s6462_s1 + $0x5b0] sm:$0xff] }
 0x1a4   : > { %3178 = vmatpush.bf16.msra.mxu2 %v4966_v30  ;;  %v2560_v30 = vld [vmem:[%s5092_s18 + $0x37] sm:$0xff] }
 0x1a6   : > { %v1585_v6 = vpop.f32.mrf.mxu2 }
 0x1a7   : > { %v1611_v36 = vadd.f32 %v1585_v6, %v1477_v51  ;;  %v4974_v51 = vld [vmem:[%s6462_s1 + $0x5f0] sm:$0xff] }
 0x1a8   : > { %v1454_v37 = vpop.f32.mrf.mxu1  ;;  %v6065_v28 = vpop.f32.mrf.mxu3 }
 0x1a9   : > { %v1745_v12 = vadd.f32 %v5979_v40, %v1611_v36  ;;  %v1478_v9 = vadd.f32 %v1454_v37, %v5833_v41  ;;  %v4975_v40 = vld [vmem:[%s6462_s1 + $0x5f8] sm:$0xff] }
 0x1aa   : > { %3311 = vmatpush.bf16.msrb.mxu3 %v4975_v40 }
 0x1ab   : > { %v1856_v44 = vpop.f32.mrf.mxu0  ;;  %1999 = vmatmul.bf16.gmra.mxu1 %v1904_v47  ;;  %2133 = vmatmul.bf16.gmra.mxu2 %v2038_v63  ;;  %v6071_v58 = vadd.f32 %v1853_v50, %v1745_v12  ;;  %v2827_v50 = vld [vmem:[%s5092_s18 + $0x38] sm:$0xff]  ;;  %v4982_v47 = vld [vmem:[%s6462_s1 + $0x630] sm:$0xff]  ;;  %v4965_v63 = vld [vmem:[%s6462_s1 + $0x5a8] sm:$0xff] }
 0x1ac   : > { %v2705_v7 = vpack.c.bf16 %v6101_v27, %v2827_v50  ;;  %3446 = vmatpush.bf16.msra.mxu0 %v4982_v47  ;;  %3179 = vmatpush.bf16.msra.mxu2 %v4965_v63  ;;  %v2559_v12 = vld [vmem:[%s5092_s18 + $0x2f] sm:$0xff]  ;;  %v4980_v63 = vld [vmem:[%s6462_s1 + $0x620] sm:$0xff] }
 0x1ad   : > { %2783 = vmatmul.bf16.vlgmr.msra.gmra.mxu3 %v2704_v10  ;;  %v2570_v60 = vpack.c.bf16 %v2559_v12, %v2558_v43 }
 0x1ae   : > { %2401 = vmatmul.bf16.gmra.mxu0 %v2306_v4  ;;  %v1588_v41 = vpop.f32.mrf.mxu2  ;;  %3312 = vmatpush.bf16.msrb.mxu3 %v4974_v51  ;;  %v4973_v4 = vld [vmem:[%s6462_s1 + $0x5e8] sm:$0xff]  ;;  %v2561_v51 = vld [vmem:[%s5092_s18 + $0x3f] sm:$0xff] }
 0x1af   : > { %v1612_v17 = vadd.f32 %v1588_v41, %v1478_v9  ;;  %v2838_v41 = vpack.c.bf16 %v2827_v50, %v6058_v52 }
 0x1b0   : > { %v1456_v39 = vpop.f32.mrf.mxu1  ;;  %v6084_v16 = vpop.f32.mrf.mxu3 }
 0x1b1   : > { %v1746_v25 = vadd.f32 %v5996_v59, %v1612_v17  ;;  %v1479_v14 = vadd.f32 %v1456_v39, %v5860_v21  ;;  %v6092_v21 = vld [vmem:[%s5092_s18 + $0x73] sm:$0xff] }
 0x1b2   : > { %v2300_v59 = vld [vmem:[%s5092_s18 + $0x75] sm:$0xff]  ;;  %v1905_v8 = vpack.c.bf16 %v6092_v21, %v6089_v19  ;;  %3313 = vmatpush.bf16.msrb.mxu3 %v4973_v4 }
 0x1b3   : > { %v1858_v3 = vpop.f32.mrf.mxu0  ;;  %v6086_v42 = vadd.f32 %v1856_v44, %v1746_v25  ;;  %v2307_v32 = vpack.c.bf16 %v2301_v56, %v2300_v59  ;;  %v6141_v17 = vld [vmem:[%s5092_s18 + $0x50] sm:$0xff]  ;;  %v2831_v4 = vld [vmem:[%s5092_s18 + $0x58] sm:$0xff] }
 0x1b4   : > { %v2706_v59 = vpack.c.bf16 %v6141_v17, %v2829_v55 }
 0x1b6   : > { %v1590_v46 = vpop.f32.mrf.mxu2 }
 0x1b7   : > { %v1613_v48 = vadd.f32 %v1590_v46, %v1479_v14 }
 0x1b8   : > { %v1459_v26 = vpop.f32.mrf.mxu1  ;;  %v6112_v53 = vpop.f32.mrf.mxu3 }
 0x1b9   : > { %v1747_v34 = vadd.f32 %v6021_v22, %v1613_v48  ;;  %v1480_v11 = vadd.f32 %v1459_v26, %v5875_v29  ;;  %v4958_v29 = vld [vmem:[%s6462_s1 + $0x570] sm:$0xff]  ;;  %v4964_v26 = vld [vmem:[%s6462_s1 + $0x5a0] sm:$0xff] }
 0x1ba   : > { %3044 = vmatpush.bf16.msra.mxu1 %v4958_v29  ;;  %3180 = vmatpush.bf16.msra.mxu2 %v4964_v26 }
 0x1bb   : > { %v1861_v35 = vpop.f32.mrf.mxu0  ;;  %2004 = vmatmul.bf16.gmra.mxu1 %v1905_v8  ;;  %2138 = vmatmul.bf16.gmra.mxu2 %v2039_v18  ;;  %v6118_v23 = vadd.f32 %v1858_v3, %v1747_v34  ;;  %v4957_v3 = vld [vmem:[%s6462_s1 + $0x568] sm:$0xff]  ;;  %v4956_v34 = vld [vmem:[%s6462_s1 + $0x560] sm:$0xff] }
 0x1bd   : > { %2788 = vmatmul.bf16.gmra.mxu3 %v2705_v7 }
 0x1be   : > { %2406 = vmatmul.bf16.gmra.mxu0 %v2307_v32  ;;  %v1593_v22 = vpop.f32.mrf.mxu2  ;;  %3045 = vmatpush.bf16.msra.mxu1 %v4957_v3  ;;  %v4972_v32 = vld [vmem:[%s6462_s1 + $0x5e0] sm:$0xff]  ;;  %v2563_v3 = vld [vmem:[%s5092_s18 + $0x4f] sm:$0xff] }
 0x1bf   : > { %v1614_v61 = vadd.f32 %v1593_v22, %v1480_v11  ;;  %3314 = vmatpush.bf16.msrb.mxu3 %v4972_v32  ;;  %v2571_v22 = vpack.c.bf16 %v2561_v51, %v2560_v30  ;;  %v4962_v32 = vld [vmem:[%s6462_s1 + $0x590] sm:$0xff] }
 0x1c0   : > { %v1461_v54 = vpop.f32.mrf.mxu1  ;;  %v6128_v37 = vpop.f32.mrf.mxu3 }
 0x1c1   : > { %v1748_v33 = vadd.f32 %v6040_v0, %v1614_v61  ;;  %v1481_v6 = vadd.f32 %v1461_v54, %v5898_v24  ;;  %v2425_v0 = vld [vmem:[%s5092_s18 + $0x2e] sm:$0xff]  ;;  %v2839_v54 = vpack.c.bf16 %v2829_v55, %v6101_v27  ;;  %v4963_v27 = vld [vmem:[%s6462_s1 + $0x598] sm:$0xff] }
 0x1c2   : > { %v2436_v10 = vpack.c.bf16 %v2425_v0, %v2424_v1  ;;  %3046 = vmatpush.bf16.msra.mxu1 %v4956_v34  ;;  %3181 = vmatpush.bf16.msra.mxu2 %v4963_v27  ;;  %v4970_v34 = vld [vmem:[%s6462_s1 + $0x5d0] sm:$0xff] }
 0x1c3   : > { %v1863_v36 = vpop.f32.mrf.mxu0  ;;  %v6134_v24 = vadd.f32 %v1861_v35, %v1748_v33  ;;  %v2426_v35 = vld [vmem:[%s5092_s18 + $0x36] sm:$0xff]  ;;  %v6178_v33 = vld [vmem:[%s5092_s18 + $0x60] sm:$0xff] }
 0x1c4   : > { %v2707_v0 = vpack.c.bf16 %v6178_v33, %v2831_v4 }
 0x1c6   : > { %v1595_v9 = vpop.f32.mrf.mxu2  ;;  %3182 = vmatpush.bf16.msra.mxu2 %v4962_v32 }
 0x1c7   : > { %v1615_v44 = vadd.f32 %v1595_v9, %v1481_v6 }
 0x1c8   : > { %v1464_v40 = vpop.f32.mrf.mxu1  ;;  %v6149_v15 = vpop.f32.mrf.mxu3 }
 0x1c9   : > { %v1749_v39 = vadd.f32 %v6065_v28, %v1615_v44  ;;  %v1482_v25 = vadd.f32 %v1464_v40, %v5916_v49  ;;  %v4981_v49 = vld [vmem:[%s6462_s1 + $0x628] sm:$0xff]  ;;  %v4955_v40 = vld [vmem:[%s6462_s1 + $0x558] sm:$0xff] }
 0x1ca   : > { %3447 = vmatpush.bf16.msra.mxu0 %v4981_v49  ;;  %3047 = vmatpush.bf16.msra.mxu1 %v4955_v40 }
 0x1cb   : > { %v1866_v14 = vpop.f32.mrf.mxu0  ;;  %2515 = vmatmul.bf16.vlgmr.msrb.gmra.mxu1 %v2436_v10  ;;  %2649 = vmatmul.bf16.vlgmr.msrb.gmra.mxu2 %v2570_v60  ;;  %v6152_v56 = vadd.f32 %v1863_v36, %v1749_v39 }
 0x1cd   : > { %2793 = vmatmul.bf16.gmra.mxu3 %v2706_v59 }
 0x1ce   : > { %2917 = vmatmul.bf16.vlgmr.msrb.gmra.mxu0 %v2838_v41  ;;  %v1598_v52 = vpop.f32.mrf.mxu2  ;;  %v4979_v41 = vld [vmem:[%s6462_s1 + $0x618] sm:$0xff] }
 0x1cf   : > { %v1616_v28 = vadd.f32 %v1598_v52, %v1482_v25  ;;  %3448 = vmatpush.bf16.msra.mxu0 %v4980_v63  ;;  %v2428_v25 = vld [vmem:[%s5092_s18 + $0x46] sm:$0xff]  ;;  %v2564_v63 = vld [vmem:[%s5092_s18 + $0x57] sm:$0xff] }
 0x1d0   : > { %v1466_v46 = vpop.f32.mrf.mxu1  ;;  %v6168_v11 = vpop.f32.mrf.mxu3 }
 0x1d1   : > { %v1750_v48 = vadd.f32 %v6084_v16, %v1616_v28  ;;  %v1483_v8 = vadd.f32 %v1466_v46, %v5942_v31  ;;  %v2427_v16 = vld [vmem:[%s5092_s18 + $0x3e] sm:$0xff]  ;;  %v2840_v46 = vpack.c.bf16 %v2831_v4, %v6141_v17 }
 0x1d2   : > { %v2437_v29 = vpack.c.bf16 %v2427_v16, %v2426_v35  ;;  %v2833_v35 = vld [vmem:[%s5092_s18 + $0x68] sm:$0xff]  ;;  %v2565_v4 = vld [vmem:[%s5092_s18 + $0x5f] sm:$0xff] }
 0x1d3   : > { %v1868_v18 = vpop.f32.mrf.mxu0  ;;  %v6171_v31 = vadd.f32 %v1866_v14, %v1750_v48  ;;  %3449 = vmatpush.bf16.msra.mxu0 %v4979_v41  ;;  %v6215_v48 = vld [vmem:[%s5092_s18 + $0x70] sm:$0xff]  ;;  %v4953_v41 = vld [vmem:[%s6462_s1 + $0x548] sm:$0xff] }
 0x1d4   : > { %v2708_v17 = vpack.c.bf16 %v6215_v48, %v2833_v35 }
 0x1d6   : > { %v1600_v50 = vpop.f32.mrf.mxu2 }
 0x1d7   : > { %v1617_v7 = vadd.f32 %v1600_v50, %v1483_v8 }
 0x1d8   : > { %v1469_v61 = vpop.f32.mrf.mxu1  ;;  %v6186_v1 = vpop.f32.mrf.mxu3 }
 0x1d9   : > { %v1751_v6 = vadd.f32 %v6112_v53, %v1617_v7  ;;  %v1484_v36 = vadd.f32 %v1469_v61, %v5957_v45  ;;  %v4971_v45 = vld [vmem:[%s6462_s1 + $0x5d8] sm:$0xff]  ;;  %v4978_v61 = vld [vmem:[%s6462_s1 + $0x610] sm:$0xff] }
 0x1da   : > { %3315 = vmatpush.bf16.msrb.mxu3 %v4971_v45  ;;  %3450 = vmatpush.bf16.msra.mxu0 %v4978_v61 }
 0x1db   : > { %v1871_v47 = vpop.f32.mrf.mxu0  ;;  %2520 = vmatmul.bf16.gmra.mxu1 %v2437_v29  ;;  %2654 = vmatmul.bf16.gmra.mxu2 %v2571_v22  ;;  %v6192_v43 = vadd.f32 %v1868_v18, %v1751_v6 }
 0x1dd   : > { %2798 = vmatmul.bf16.gmra.mxu3 %v2707_v0 }
 0x1de   : > { %2922 = vmatmul.bf16.gmra.mxu0 %v2839_v54  ;;  %v1603_v53 = vpop.f32.mrf.mxu2  ;;  %3316 = vmatpush.bf16.msrb.mxu3 %v4970_v34  ;;  %v4961_v54 = vld [vmem:[%s6462_s1 + $0x588] sm:$0xff] }
 0x1df   : > { %v1618_v12 = vadd.f32 %v1603_v53, %v1484_v36  ;;  %v4969_v36 = vld [vmem:[%s6462_s1 + $0x5c8] sm:$0xff]  ;;  %3183 = vmatpush.bf16.msra.mxu2 %v4961_v54  ;;  %v2573_v53 = vpack.c.bf16 %v2565_v4, %v2564_v63 }
 0x1e0   : > { %v1471_v9 = vpop.f32.mrf.mxu1  ;;  %v6205_v39 = vpop.f32.mrf.mxu3  ;;  %v2567_v34 = vld [vmem:[%s5092_s18 + $0x6f] sm:$0xff] }
 0x1e1   : > { %v1752_v44 = vadd.f32 %v6128_v37, %v1618_v12  ;;  %v1485_v10 = vadd.f32 %v1471_v9, %v5986_v2  ;;  %v2429_v37 = vld [vmem:[%s5092_s18 + $0x4e] sm:$0xff]  ;;  %v2841_v9 = vpack.c.bf16 %v2833_v35, %v6178_v33 }
 0x1e2   : > { %v2562_v2 = vld [vmem:[%s5092_s18 + $0x47] sm:$0xff]  ;;  %v2438_v49 = vpack.c.bf16 %v2429_v37, %v2428_v25  ;;  %3317 = vmatpush.bf16.msrb.mxu3 %v4969_v36  ;;  %v2835_v25 = vld [vmem:[%s5092_s18 + $0x78] sm:$0xff] }
 0x1e3   : > { %v1873_v60 = vpop.f32.mrf.mxu0  ;;  %v6208_v14 = vadd.f32 %v1871_v47, %v1752_v44  ;;  %v2572_v52 = vpack.c.bf16 %v2563_v3, %v2562_v2  ;;  %v2430_v47 = vld [vmem:[%s5092_s18 + $0x56] sm:$0xff]  ;;  %v6255_v44 = vld [vmem:[%s5092_s18 + $0x80] sm:$0xff] }
 0x1e4   : > { %v2709_v2 = vpack.c.bf16 %v6255_v44, %v2835_v25 }
 0x1e6   : > { %v1605_v55 = vpop.f32.mrf.mxu2 }
 0x1e7   : > { %v1619_v59 = vadd.f32 %v1605_v55, %v1485_v10 }
 0x1e8   : > { %v1980_v28 = vpop.f32.mrf.mxu1  ;;  %v6226_v16 = vpop.f32.mrf.mxu3 }
 0x1e9   : > { %v1753_v8 = vadd.f32 %v6149_v15, %v1619_v59  ;;  %v2010_v18 = vadd.f32 %v1980_v28, %v6001_v38  ;;  %v4954_v38 = vld [vmem:[%s6462_s1 + $0x550] sm:$0xff]  ;;  %v4968_v59 = vld [vmem:[%s6462_s1 + $0x5c0] sm:$0xff] }
 0x1ea   : > { %3048 = vmatpush.bf16.msra.mxu1 %v4954_v38  ;;  %3318 = vmatpush.bf16.msrb.mxu3 %v4968_v59 }
 0x1eb   : > { %v2382_v26 = vpop.f32.mrf.mxu0  ;;  %2525 = vmatmul.bf16.gmra.mxu1 %v2438_v49  ;;  %2659 = vmatmul.bf16.gmra.mxu2 %v2572_v52  ;;  %v6232_v15 = vadd.f32 %v1873_v60, %v1753_v8  ;;  %v4952_v8 = vld [vmem:[%s6462_s1 + $0x540] sm:$0xff] }
 0x1ed   : > { %2803 = vmatmul.bf16.gmra.mxu3 %v2708_v17 }
 0x1ee   : > { %2927 = vmatmul.bf16.gmra.mxu0 %v2840_v46  ;;  %v2114_v30 = vpop.f32.mrf.mxu2  ;;  %3049 = vmatpush.bf16.msra.mxu1 %v4953_v41  ;;  %v4960_v46 = vld [vmem:[%s6462_s1 + $0x580] sm:$0xff] }
 0x1ef   : > { %v2144_v51 = vadd.f32 %v2114_v30, %v2010_v18  ;;  %3184 = vmatpush.bf16.msra.mxu2 %v4960_v46 }
 0x1f0   : > { %v1982_v50 = vpop.f32.mrf.mxu1  ;;  %v6242_v6 = vpop.f32.mrf.mxu3 }
 0x1f1   : > { %v2278_v7 = vadd.f32 %v6168_v11, %v2144_v51  ;;  %v2011_v29 = vadd.f32 %v1982_v50, %v6024_v20  ;;  %v2431_v11 = vld [vmem:[%s5092_s18 + $0x5e] sm:$0xff]  ;;  %v2842_v50 = vpack.c.bf16 %v2835_v25, %v6215_v48 }
 0x1f2   : > { %v2439_v45 = vpack.c.bf16 %v2431_v11, %v2430_v47  ;;  %3050 = vmatpush.bf16.msra.mxu1 %v4952_v8 }
 0x1f3   : > { %v2384_v22 = vpop.f32.mrf.mxu0  ;;  %v6248_v20 = vadd.f32 %v2382_v26, %v2278_v7  ;;  %v2432_v26 = vld [vmem:[%s5092_s18 + $0x66] sm:$0xff]  ;;  %v3228_v7 = vld [vmem:[%s5092_s18 + $0x33] sm:$0xff] }
 0x1f6   : > { %v2116_v0 = vpop.f32.mrf.mxu2 }
 0x1f7   : > { %v2145_v27 = vadd.f32 %v2116_v0, %v2011_v29  ;;  %v3229_v29 = vld [vmem:[%s5092_s18 + $0x3b] sm:$0xff] }
 0x1f8   : > { %v1985_v12 = vpop.f32.mrf.mxu1  ;;  %v6263_v37 = vpop.f32.mrf.mxu3  ;;  %v3240_v48 = vpack.c.bf16 %v3229_v29, %v3228_v7 }
 0x1f9   : > { %v2279_v10 = vadd.f32 %v6186_v1, %v2145_v27  ;;  %v2012_v60 = vadd.f32 %v1985_v12, %v6042_v13  ;;  %v4977_v13 = vld [vmem:[%s6462_s1 + $0x608] sm:$0xff] }
 0x1fa   : > { %3451 = vmatpush.bf16.msra.mxu0 %v4977_v13 }
 0x1fb   : > { %v2387_v40 = vpop.f32.mrf.mxu0  ;;  %2530 = vmatmul.bf16.gmra.mxu1 %v2439_v45  ;;  %2664 = vmatmul.bf16.gmra.mxu2 %v2573_v53  ;;  %v6266_v3 = vadd.f32 %v2384_v22, %v2279_v10  ;;  %v4976_v22 = vld [vmem:[%s6462_s1 + $0x600] sm:$0xff]  ;;  %v2434_v53 = vld [vmem:[%s5092_s18 + $0x76] sm:$0xff] }
 0x1fc   : > { %v2568_v10 = vld [vmem:[%s5092_s18 + $0x77] sm:$0xff] }
 0x1fd   : > { %2808 = vmatmul.bf16.gmra.mxu3 %v2709_v2 }
 0x1fe   : > { %2932 = vmatmul.bf16.gmra.mxu0 %v2841_v9  ;;  %v2119_v33 = vpop.f32.mrf.mxu2  ;;  %v2435_v9 = vld [vmem:[%s5092_s18 + $0x7e] sm:$0xff] }
 0x1ff   : > { %v2146_v1 = vadd.f32 %v2119_v33, %v2012_v60  ;;  %3452 = vmatpush.bf16.msra.mxu0 %v4976_v22  ;;  %v2569_v60 = vld [vmem:[%s5092_s18 + $0x7f] sm:$0xff]  ;;  %v2441_v2 = vpack.c.bf16 %v2435_v9, %v2434_v53 }
 0x200   : > { %v1987_v55 = vpop.f32.mrf.mxu1  ;;  %v2263_v18 = vpop.f32.mrf.mxu3  ;;  %v2575_v13 = vpack.c.bf16 %v2569_v60, %v2568_v10  ;;  %v2962_v9 = vld [vmem:[%s5092_s18 + $0x41] sm:$0xff]  ;;  %v2963_v60 = vld [vmem:[%s5092_s18 + $0x49] sm:$0xff] }
 0x201   : > { %v2280_v49 = vadd.f32 %v6205_v39, %v2146_v1  ;;  %v2013_v52 = vadd.f32 %v1987_v55, %v6071_v58  ;;  %v2433_v39 = vld [vmem:[%s5092_s18 + $0x6e] sm:$0xff] }
 0x202   : > { %v2566_v58 = vld [vmem:[%s5092_s18 + $0x67] sm:$0xff]  ;;  %v2440_v38 = vpack.c.bf16 %v2433_v39, %v2432_v26 }
 0x203   : > { %v2389_v28 = vpop.f32.mrf.mxu0  ;;  %v6283_v32 = vadd.f32 %v2387_v40, %v2280_v49  ;;  %v2574_v30 = vpack.c.bf16 %v2567_v34, %v2566_v58  ;;  %v2837_v40 = vld [vmem:[%s5092_s18 + $0x88] sm:$0xff]  ;;  %v2960_v58 = vld [vmem:[%s5092_s18 + $0x31] sm:$0xff] }
 0x204   : > { %v2843_v1 = vpack.c.bf16 %v2837_v40, %v6255_v44  ;;  %v3096_v40 = vld [vmem:[%s5092_s18 + $0x42] sm:$0xff] }
 0x206   : > { %v2121_v35 = vpop.f32.mrf.mxu2 }
 0x207   : > { %v2147_v17 = vadd.f32 %v2121_v35, %v2013_v52  ;;  %v2961_v35 = vld [vmem:[%s5092_s18 + $0x39] sm:$0xff] }
 0x208   : > { %v1990_v51 = vpop.f32.mrf.mxu1  ;;  %v2265_v47 = vpop.f32.mrf.mxu3  ;;  %v2972_v7 = vpack.c.bf16 %v2961_v35, %v2960_v58  ;;  %v2964_v58 = vld [vmem:[%s5092_s18 + $0x51] sm:$0xff] }
 0x209   : > { %v2281_v61 = vadd.f32 %v6226_v16, %v2147_v17  ;;  %v2014_v54 = vadd.f32 %v1990_v51, %v6086_v42  ;;  %v3095_v17 = vld [vmem:[%s5092_s18 + $0x3a] sm:$0xff] }
 0x20b   : > { %v2392_v36 = vpop.f32.mrf.mxu0  ;;  %2535 = vmatmul.bf16.gmra.mxu1 %v2440_v38  ;;  %2669 = vmatmul.bf16.gmra.mxu2 %v2574_v30  ;;  %v6296_v11 = vadd.f32 %v2389_v28, %v2281_v61  ;;  %v3362_v38 = vld [vmem:[%s5092_s18 + $0x34] sm:$0xff]  ;;  %v3363_v30 = vld [vmem:[%s5092_s18 + $0x3c] sm:$0xff] }
 0x20c   : > { %v3374_v61 = vpack.c.bf16 %v3363_v30, %v3362_v38  ;;  %v3367_v38 = vld [vmem:[%s5092_s18 + $0x5c] sm:$0xff] }
 0x20d   : > { %3319 = vmatmul.bf16.vlgmr.msrb.gmra.mxu3 %v3240_v48 }
 0x20e   : > { %2937 = vmatmul.bf16.gmra.mxu0 %v2842_v50  ;;  %v2124_v63 = vpop.f32.mrf.mxu2 }
 0x20f   : > { %v2148_v4 = vadd.f32 %v2124_v63, %v2014_v54 }
 0x210   : > { %v1992_v16 = vpop.f32.mrf.mxu1  ;;  %v2268_v45 = vpop.f32.mrf.mxu3 }
 0x211   : > { %v2282_v42 = vadd.f32 %v6242_v6, %v2148_v4  ;;  %v2015_v0 = vadd.f32 %v1992_v16, %v6118_v23  ;;  %v3230_v6 = vld [vmem:[%s5092_s18 + $0x43] sm:$0xff] }
 0x212   : > { %v3241_v52 = vpack.c.bf16 %v6004_v5, %v3230_v6  ;;  %v3094_v5 = vld [vmem:[%s5092_s18 + $0x32] sm:$0xff] }
 0x213   : > { %v2394_v27 = vpop.f32.mrf.mxu0  ;;  %v6301_v12 = vadd.f32 %v2392_v36, %v2282_v42  ;;  %v3106_v29 = vpack.c.bf16 %v3095_v17, %v3094_v5  ;;  %v2965_v5 = vld [vmem:[%s5092_s18 + $0x59] sm:$0xff] }
 0x214   : > { %v3366_v17 = vld [vmem:[%s5092_s18 + $0x54] sm:$0xff] }
 0x216   : > { %v2126_v41 = vpop.f32.mrf.mxu2 }
 0x217   : > { %v2149_v25 = vadd.f32 %v2126_v41, %v2015_v0  ;;  %v3364_v41 = vld [vmem:[%s5092_s18 + $0x44] sm:$0xff] }
 0x218   : > { %v1995_v33 = vpop.f32.mrf.mxu1  ;;  %v2270_v49 = vpop.f32.mrf.mxu3 }
 0x219   : > { %v2283_v55 = vadd.f32 %v6263_v37, %v2149_v25  ;;  %v2016_v23 = vadd.f32 %v1995_v33, %v6134_v24  ;;  %v3365_v25 = vld [vmem:[%s5092_s18 + $0x4c] sm:$0xff]  ;;  %v2973_v33 = vpack.c.bf16 %v2963_v60, %v2962_v9  ;;  %v3100_v9 = vld [vmem:[%s5092_s18 + $0x62] sm:$0xff] }
 0x21a   : > { %v3101_v60 = vld [vmem:[%s5092_s18 + $0x6a] sm:$0xff] }
 0x21b   : > { %v2397_v59 = vpop.f32.mrf.mxu0  ;;  %2540 = vmatmul.bf16.gmra.mxu1 %v2441_v2  ;;  %2674 = vmatmul.bf16.gmra.mxu2 %v2575_v13  ;;  %v6312_v28 = vadd.f32 %v2394_v27, %v2283_v55  ;;  %v3375_v55 = vpack.c.bf16 %v3365_v25, %v3364_v41 }
 0x21d   : > { %3324 = vmatmul.bf16.gmra.mxu3 %v3241_v52  ;;  %v3243_v52 = vpack.c.bf16 %v6089_v19, %v6048_v57  ;;  %v3098_v57 = vld [vmem:[%s5092_s18 + $0x52] sm:$0xff]  ;;  %v3099_v19 = vld [vmem:[%s5092_s18 + $0x5a] sm:$0xff] }
 0x21e   : > { %2942 = vmatmul.bf16.gmra.mxu0 %v2843_v1  ;;  %v2129_v44 = vpop.f32.mrf.mxu2 }
 0x21f   : > { %v2150_v46 = vadd.f32 %v2129_v44, %v2016_v23 }
 0x220   : > { %v1997_v37 = vpop.f32.mrf.mxu1  ;;  %v2273_v39 = vpop.f32.mrf.mxu3 }
 0x221   : > { %v2284_v24 = vadd.f32 %v2263_v18, %v2150_v46  ;;  %v2017_v8 = vadd.f32 %v1997_v37, %v6152_v56  ;;  %v3232_v18 = vld [vmem:[%s5092_s18 + $0x53] sm:$0xff] }
 0x222   : > { %v3242_v63 = vpack.c.bf16 %v6045_v62, %v3232_v18  ;;  %v3097_v62 = vld [vmem:[%s5092_s18 + $0x4a] sm:$0xff] }
 0x223   : > { %v2399_v26 = vpop.f32.mrf.mxu0  ;;  %v6316_v34 = vadd.f32 %v2397_v59, %v2284_v24  ;;  %v3107_v1 = vpack.c.bf16 %v3097_v62, %v3096_v40  ;;  %v3368_v40 = vld [vmem:[%s5092_s18 + $0x64] sm:$0xff]  ;;  %v3369_v62 = vld [vmem:[%s5092_s18 + $0x6c] sm:$0xff] }
 0x226   : > { %v2131_v51 = vpop.f32.mrf.mxu2 }
 0x227   : > { %v2151_v50 = vadd.f32 %v2131_v51, %v2017_v8 }
 0x228   : > { %v2000_v22 = vpop.f32.mrf.mxu1  ;;  %v2275_v48 = vpop.f32.mrf.mxu3 }
 0x229   : > { %v2285_v54 = vadd.f32 %v2265_v47, %v2151_v50  ;;  %v2018_v56 = vadd.f32 %v2000_v22, %v6171_v31  ;;  %v2974_v50 = vpack.c.bf16 %v2965_v5, %v2964_v58  ;;  %v3376_v22 = vpack.c.bf16 %v3367_v38, %v3366_v17  ;;  %v2969_v5 = vld [vmem:[%s5092_s18 + $0x79] sm:$0xff] }
 0x22a   : > { %v3370_v17 = vld [vmem:[%s5092_s18 + $0x74] sm:$0xff]  ;;  %v3371_v38 = vld [vmem:[%s5092_s18 + $0x7c] sm:$0xff] }
 0x22b   : > { %v2402_v36 = vpop.f32.mrf.mxu0  ;;  %3051 = vmatmul.bf16.vlgmr.msra.gmra.mxu1 %v2972_v7  ;;  %3185 = vmatmul.bf16.vlgmr.msra.gmra.mxu2 %v3106_v29  ;;  %v6326_v4 = vadd.f32 %v2399_v26, %v2285_v54  ;;  %v3108_v7 = vpack.c.bf16 %v3099_v19, %v3098_v57  ;;  %v3102_v57 = vld [vmem:[%s5092_s18 + $0x72] sm:$0xff]  ;;  %v3103_v19 = vld [vmem:[%s5092_s18 + $0x7a] sm:$0xff] }
 0x22d   : > { %3329 = vmatmul.bf16.gmra.mxu3 %v3242_v63 }
 0x22e   : > { %3453 = vmatmul.bf16.vlgmr.msra.gmra.mxu0 %v3374_v61  ;;  %v2134_v16 = vpop.f32.mrf.mxu2 }
 0x22f   : > { %v2152_v42 = vadd.f32 %v2134_v16, %v2018_v56 }
 0x230   : > { %v2002_v47 = vpop.f32.mrf.mxu1  ;;  %v2784_v53 = vpop.f32.mrf.mxu3 }
 0x231   : > { %v2286_v31 = vadd.f32 %v2268_v45, %v2152_v42  ;;  %v2019_v0 = vadd.f32 %v2002_v47, %v6192_v43 }
 0x233   : > { %v2404_v27 = vpop.f32.mrf.mxu0  ;;  %v6330_v10 = vadd.f32 %v2402_v36, %v2286_v31 }
 0x236   : > { %v2136_v2 = vpop.f32.mrf.mxu2 }
 0x237   : > { %v2153_v13 = vadd.f32 %v2136_v2, %v2019_v0  ;;  %v2966_v0 = vld [vmem:[%s5092_s18 + $0x61] sm:$0xff] }
 0x238   : > { %v2005_v6 = vpop.f32.mrf.mxu1  ;;  %v2786_v59 = vpop.f32.mrf.mxu3 }
 0x239   : > { %v2287_v23 = vadd.f32 %v2270_v49, %v2153_v13  ;;  %v2020_v45 = vadd.f32 %v2005_v6, %v6208_v14  ;;  %v3109_v13 = vpack.c.bf16 %v3101_v60, %v3100_v9  ;;  %v3372_v9 = vld [vmem:[%s5092_s18 + $0x84] sm:$0xff]  ;;  %v3373_v60 = vld [vmem:[%s5092_s18 + $0x8c] sm:$0xff] }
 0x23b   : > { %v2407_v43 = vpop.f32.mrf.mxu0  ;;  %3056 = vmatmul.bf16.gmra.mxu1 %v2973_v33  ;;  %3190 = vmatmul.bf16.gmra.mxu2 %v3107_v1  ;;  %v6340_v44 = vadd.f32 %v2404_v27, %v2287_v23  ;;  %v3238_v1 = vld [vmem:[%s5092_s18 + $0x83] sm:$0xff] }
 0x23d   : > { %3334 = vmatmul.bf16.gmra.mxu3 %v3243_v52 }
 0x23e   : > { %3458 = vmatmul.bf16.gmra.mxu0 %v3375_v55  ;;  %v2139_v46 = vpop.f32.mrf.mxu2 }
 0x23f   : > { %v2154_v49 = vadd.f32 %v2139_v46, %v2020_v45 }
 0x240   : > { %v2007_v14 = vpop.f32.mrf.mxu1  ;;  %v2789_v26 = vpop.f32.mrf.mxu3 }
 0x241   : > { %v2288_v37 = vadd.f32 %v2273_v39, %v2154_v49  ;;  %v2021_v24 = vadd.f32 %v2007_v14, %v6232_v15  ;;  %v3237_v39 = vld [vmem:[%s5092_s18 + $0x7b] sm:$0xff] }
 0x242   : > { %v3244_v56 = vpack.c.bf16 %v3237_v39, %v6092_v21  ;;  %v2967_v21 = vld [vmem:[%s5092_s18 + $0x69] sm:$0xff] }
 0x243   : > { %v2409_v8 = vpop.f32.mrf.mxu0  ;;  %v6344_v35 = vadd.f32 %v2407_v43, %v2288_v37  ;;  %v2975_v2 = vpack.c.bf16 %v2967_v21, %v2966_v0  ;;  %v3104_v0 = vld [vmem:[%s5092_s18 + $0x82] sm:$0xff]  ;;  %v3105_v21 = vld [vmem:[%s5092_s18 + $0x8a] sm:$0xff] }
 0x246   : > { %v2141_v30 = vpop.f32.mrf.mxu2 }
 0x247   : > { %v2155_v51 = vadd.f32 %v2141_v30, %v2021_v24 }
 0x248   : > { %v2516_v29 = vpop.f32.mrf.mxu1  ;;  %v2791_v54 = vpop.f32.mrf.mxu3 }
 0x249   : > { %v2289_v61 = vadd.f32 %v2275_v48, %v2155_v51  ;;  %v2546_v15 = vadd.f32 %v2516_v29, %v6248_v20 }
 0x24b   : > { %v2918_v18 = vpop.f32.mrf.mxu0  ;;  %3061 = vmatmul.bf16.gmra.mxu1 %v2974_v50  ;;  %3195 = vmatmul.bf16.gmra.mxu2 %v3108_v7  ;;  %v6354_v36 = vadd.f32 %v2409_v8, %v2289_v61  ;;  %v2968_v8 = vld [vmem:[%s5092_s18 + $0x71] sm:$0xff]  ;;  %v3110_v7 = vpack.c.bf16 %v3103_v19, %v3102_v57 }
 0x24c   : > { %v2976_v50 = vpack.c.bf16 %v2969_v5, %v2968_v8 }
 0x24d   : > { %3339 = vmatmul.bf16.gmra.mxu3 %v3244_v56 }
 0x24e   : > { %3463 = vmatmul.bf16.gmra.mxu0 %v3376_v22  ;;  %v2650_v63 = vpop.f32.mrf.mxu2  ;;  %v3378_v22 = vpack.c.bf16 %v3371_v38, %v3370_v17 }
 0x24f   : > { %v2680_v16 = vadd.f32 %v2650_v63, %v2546_v15 }
 0x250   : > { %v2518_v48 = vpop.f32.mrf.mxu1  ;;  %v2794_v31 = vpop.f32.mrf.mxu3 }
 0x251   : > { %v2814_v20 = vadd.f32 %v2784_v53, %v2680_v16  ;;  %v2547_v42 = vadd.f32 %v2518_v48, %v6266_v3  ;;  %v3377_v53 = vpack.c.bf16 %v3369_v62, %v3368_v40  ;;  %v3239_v3 = vld [vmem:[%s5092_s18 + $0x8b] sm:$0xff] }
 0x252   : > { %v3245_v43 = vpack.c.bf16 %v3239_v3, %v3238_v1 }
 0x253   : > { %v2920_v47 = vpop.f32.mrf.mxu0  ;;  %v6358_v27 = vadd.f32 %v2918_v18, %v2814_v20  ;;  %v2970_v20 = vld [vmem:[%s5092_s18 + $0x81] sm:$0xff] }
 0x256   : > { %v2652_v41 = vpop.f32.mrf.mxu2 }
 0x257   : > { %v2681_v25 = vadd.f32 %v2652_v41, %v2547_v42 }
 0x258   : > { %v2521_v33 = vpop.f32.mrf.mxu1  ;;  %v2796_v45 = vpop.f32.mrf.mxu3 }
 0x259   : > { %v2815_v6 = vadd.f32 %v2786_v59, %v2681_v25  ;;  %v2548_v55 = vadd.f32 %v2521_v33, %v6283_v32  ;;  %v3111_v25 = vpack.c.bf16 %v3105_v21, %v3104_v0 }
 0x25b   : > { %v2923_v23 = vpop.f32.mrf.mxu0  ;;  %3066 = vmatmul.bf16.gmra.mxu1 %v2975_v2  ;;  %3200 = vmatmul.bf16.gmra.mxu2 %v3109_v13  ;;  %v6368_v52 = vadd.f32 %v2920_v47, %v2815_v6  ;;  %v2971_v47 = vld [vmem:[%s5092_s18 + $0x89] sm:$0xff]  ;;  %v3379_v13 = vpack.c.bf16 %v3373_v60, %v3372_v9 }
 0x25c   : > { %v2977_v41 = vpack.c.bf16 %v2971_v47, %v2970_v20 }
 0x25d   : > { %3344 = vmatmul.bf16.gmra.mxu3 %v3245_v43 }
 0x25e   : > { %3468 = vmatmul.bf16.gmra.mxu0 %v3377_v53  ;;  %v2655_v46 = vpop.f32.mrf.mxu2 }
 0x25f   : > { %v2682_v49 = vadd.f32 %v2655_v46, %v2548_v55 }
 0x260   : > { %v2523_v59 = vpop.f32.mrf.mxu1  ;;  %v2799_v24 = vpop.f32.mrf.mxu3 }
 0x261   : > { %v2816_v14 = vadd.f32 %v2789_v26, %v2682_v49  ;;  %v2549_v32 = vadd.f32 %v2523_v59, %v6296_v11 }
 0x263   : > { %v2925_v37 = vpop.f32.mrf.mxu0  ;;  %v6372_v58 = vadd.f32 %v2923_v23, %v2816_v14 }
 0x266   : > { %v2657_v30 = vpop.f32.mrf.mxu2 }
 0x267   : > { %v2683_v51 = vadd.f32 %v2657_v30, %v2549_v32 }
 0x268   : > { %v2526_v29 = vpop.f32.mrf.mxu1  ;;  %v2801_v61 = vpop.f32.mrf.mxu3 }
 0x269   : > { %v2817_v26 = vadd.f32 %v2791_v54, %v2683_v51  ;;  %v2550_v11 = vadd.f32 %v2526_v29, %v6301_v12 }
 0x26b   : > { %v2928_v39 = vpop.f32.mrf.mxu0  ;;  %3071 = vmatmul.bf16.gmra.mxu1 %v2976_v50  ;;  %3205 = vmatmul.bf16.gmra.mxu2 %v3110_v7  ;;  %v6380_v15 = vadd.f32 %v2925_v37, %v2817_v26 }
 0x26e   : > { %3473 = vmatmul.bf16.gmra.mxu0 %v3378_v22  ;;  %v2660_v18 = vpop.f32.mrf.mxu2 }
 0x26f   : > { %v2684_v56 = vadd.f32 %v2660_v18, %v2550_v11 }
 0x270   : > { %v2528_v63 = vpop.f32.mrf.mxu1  ;;  %v2804_v12 = vpop.f32.mrf.mxu3 }
 0x271   : > { %v2818_v16 = vadd.f32 %v2794_v31, %v2684_v56  ;;  %v2551_v54 = vadd.f32 %v2528_v63, %v6312_v28 }
 0x273   : > { %v2930_v48 = vpop.f32.mrf.mxu0  ;;  %v6384_v42 = vadd.f32 %v2928_v39, %v2818_v16 }
 0x276   : > { %v2662_v40 = vpop.f32.mrf.mxu2 }
 0x277   : > { %v2685_v62 = vadd.f32 %v2662_v40, %v2551_v54 }
 0x278   : > { %v2531_v2 = vpop.f32.mrf.mxu1  ;;  %v2806_v1 = vpop.f32.mrf.mxu3 }
 0x279   : > { %v2819_v33 = vadd.f32 %v2796_v45, %v2685_v62  ;;  %v2552_v31 = vadd.f32 %v2531_v2, %v6316_v34 }
 0x27b   : > { %v2933_v28 = vpop.f32.mrf.mxu0  ;;  %3076 = vmatmul.bf16.gmra.mxu1 %v2977_v41  ;;  %3210 = vmatmul.bf16.gmra.mxu2 %v3111_v25  ;;  %v6392_v53 = vadd.f32 %v2930_v48, %v2819_v33 }
 0x27e   : > { %3478 = vmatmul.bf16.gmra.mxu0 %v3379_v13  ;;  %v2665_v3 = vpop.f32.mrf.mxu2 }
 0x27f   : > { %v2686_v6 = vadd.f32 %v2665_v3, %v2552_v31 }
 0x280   : > { %v2533_v55 = vpop.f32.mrf.mxu1  ;;  %v2809_v45 = vpop.f32.mrf.mxu3 }
 0x281   : > { %v2820_v23 = vadd.f32 %v2799_v24, %v2686_v6  ;;  %v2553_v43 = vadd.f32 %v2533_v55, %v6326_v4 }
 0x283   : > { %v2935_v46 = vpop.f32.mrf.mxu0  ;;  %v6395_v49 = vadd.f32 %v2933_v28, %v2820_v23 }
 0x286   : > { %v2667_v59 = vpop.f32.mrf.mxu2 }
 0x287   : > { %v2687_v14 = vadd.f32 %v2667_v59, %v2553_v43 }
 0x288   : > { %v2536_v34 = vpop.f32.mrf.mxu1  ;;  %v2811_v38 = vpop.f32.mrf.mxu3 }
 0x289   : > { %v2821_v32 = vadd.f32 %v2801_v61, %v2687_v14  ;;  %v2554_v37 = vadd.f32 %v2536_v34, %v6330_v10 }
 0x28b   : > { %v2938_v8 = vpop.f32.mrf.mxu0  ;;  %v6398_v5 = vadd.f32 %v2935_v46, %v2821_v32 }
 0x28e   : > { %v2670_v57 = vpop.f32.mrf.mxu2 }
 0x28f   : > { %v2688_v19 = vadd.f32 %v2670_v57, %v2554_v37 }
 0x290   : > { %v2538_v17 = vpop.f32.mrf.mxu1  ;;  %v3320_v11 = vpop.f32.mrf.mxu3 }
 0x291   : > { %v2822_v24 = vadd.f32 %v2804_v12, %v2688_v19  ;;  %v2555_v4 = vadd.f32 %v2538_v17, %v6340_v44 }
 0x293   : > { %v2940_v30 = vpop.f32.mrf.mxu0  ;;  %v6401_v51 = vadd.f32 %v2938_v8, %v2822_v24 }
 0x296   : > { %v2672_v50 = vpop.f32.mrf.mxu2 }
 0x297   : > { %v2689_v7 = vadd.f32 %v2672_v50, %v2555_v4 }
 0x298   : > { %v2541_v29 = vpop.f32.mrf.mxu1  ;;  %v3322_v48 = vpop.f32.mrf.mxu3 }
 0x299   : > { %v2823_v22 = vadd.f32 %v2806_v1, %v2689_v7  ;;  %v2556_v26 = vadd.f32 %v2541_v29, %v6344_v35 }
 0x29b   : > { %v2943_v10 = vpop.f32.mrf.mxu0  ;;  %v6404_v39 = vadd.f32 %v2940_v30, %v2823_v22 }
 0x29e   : > { %v2675_v61 = vpop.f32.mrf.mxu2 }
 0x29f   : > { %v2690_v18 = vadd.f32 %v2675_v61, %v2556_v26 }
 0x2a0   : > { %v2543_v56 = vpop.f32.mrf.mxu1  ;;  %v3325_v40 = vpop.f32.mrf.mxu3 }
 0x2a1   : > { %v2824_v63 = vadd.f32 %v2809_v45, %v2690_v18  ;;  %v2557_v16 = vadd.f32 %v2543_v56, %v6354_v36  ;;  %v6415_v36 = vld [vmem:[%s6463_s2] ss:$0 sm:$0xff] }
 0x2a3   : > { %v2945_v44 = vpop.f32.mrf.mxu0  ;;  %v6407_v54 = vadd.f32 %v2943_v10, %v2824_v63 }
 0x2a6   : > { %v2677_v12 = vpop.f32.mrf.mxu2 }
 0x2a7   : > { %v2691_v20 = vadd.f32 %v2677_v12, %v2557_v16 }
 0x2a8   : > { %v3052_v47 = vpop.f32.mrf.mxu1  ;;  %v3327_v6 = vpop.f32.mrf.mxu3 }
 0x2a9   : > { %v2825_v0 = vadd.f32 %v2811_v38, %v2691_v20  ;;  %v3082_v9 = vadd.f32 %v3052_v47, %v6358_v27 }
 0x2ab   : > { %v3454_v35 = vpop.f32.mrf.mxu0  ;;  %v6409_v21 = vadd.f32 %v2945_v44, %v2825_v0 }
 0x2ae   : > { %v3186_v60 = vpop.f32.mrf.mxu2 }
 0x2af   : > { %v3216_v62 = vadd.f32 %v3186_v60, %v3082_v9 }
 0x2b0   : > { %v3054_v41 = vpop.f32.mrf.mxu1  ;;  %v3330_v8 = vpop.f32.mrf.mxu3 }
 0x2b1   : > { %v3350_v25 = vadd.f32 %v3320_v11, %v3216_v62  ;;  %v3083_v31 = vadd.f32 %v3054_v41, %v6368_v52 }
 0x2b3   : > { %v3456_v2 = vpop.f32.mrf.mxu0  ;;  %v3484_v13 = vadd.f32 %v3454_v35, %v3350_v25 }
 0x2b5   : > { %v3500_v33 = vadd.f32 %v6415_v36, %v3484_v13 }
 0x2b6   : > { %v3188_v27 = vpop.f32.mrf.mxu2 }
 0x2b7   : > { %v3512_v28 = vmax.f32 %v3500_v33, 0.0  ;;  %v3217_v1 = vadd.f32 %v3188_v27, %v3083_v31 }
 0x2b8   : > { %v3057_v3 = vpop.f32.mrf.mxu1  ;;  %v3332_v29 = vpop.f32.mrf.mxu3 }
 0x2b9   : > { %3524 = vst [vmem:[%s6423_s10] sm:$0xff] %v3512_v28  ;;  %v3351_v55 = vadd.f32 %v3322_v48, %v3217_v1  ;;  %v3084_v52 = vadd.f32 %v3057_v3, %v6372_v58 }
 0x2bb   : > { %v3459_v23 = vpop.f32.mrf.mxu0  ;;  %v3485_v43 = vadd.f32 %v3456_v2, %v3351_v55 }
 0x2bd   : > { %v3501_v46 = vadd.f32 %v6415_v36, %v3485_v43 }
 0x2be   : > { %v3191_v59 = vpop.f32.mrf.mxu2 }
 0x2bf   : > { %v3513_v45 = vmax.f32 %v3501_v46, 0.0  ;;  %v3218_v14 = vadd.f32 %v3191_v59, %v3084_v52 }
 0x2c0   : > { %v3059_v34 = vpop.f32.mrf.mxu1  ;;  %v3335_v12 = vpop.f32.mrf.mxu3 }
 0x2c1   : > { %3525 = vst [vmem:[%s6423_s10 + $0x8] sm:$0xff] %v3513_v45  ;;  %v3352_v32 = vadd.f32 %v3325_v40, %v3218_v14  ;;  %v3085_v17 = vadd.f32 %v3059_v34, %v6380_v15 }
 0x2c3   : > { %v3461_v37 = vpop.f32.mrf.mxu0  ;;  %v3486_v57 = vadd.f32 %v3459_v23, %v3352_v32 }
 0x2c5   : > { %v3502_v19 = vadd.f32 %v6415_v36, %v3486_v57 }
 0x2c6   : > { %v3193_v38 = vpop.f32.mrf.mxu2 }
 0x2c7   : > { %v3514_v24 = vmax.f32 %v3502_v19, 0.0  ;;  %v3219_v4 = vadd.f32 %v3193_v38, %v3085_v17 }
 0x2c8   : > { %v3062_v30 = vpop.f32.mrf.mxu1 }
 0x2c9   : > { %3526 = vst [vmem:[%s6423_s10 + $0x10] sm:$0xff] %v3514_v24  ;;  %v3353_v58 = vadd.f32 %v3327_v6, %v3219_v4  ;;  %v3086_v26 = vadd.f32 %v3062_v30, %v6384_v42 }
 0x2cb   : > { %v3464_v50 = vpop.f32.mrf.mxu0  ;;  %v3487_v7 = vadd.f32 %v3461_v37, %v3353_v58 }
 0x2cd   : > { %v3503_v22 = vadd.f32 %v6415_v36, %v3487_v7 }
 0x2ce   : > { %v3196_v10 = vpop.f32.mrf.mxu2 }
 0x2cf   : > { %v3515_v11 = vmax.f32 %v3503_v22, 0.0  ;;  %v3220_v61 = vadd.f32 %v3196_v10, %v3086_v26 }
 0x2d0   : > { %v3064_v18 = vpop.f32.mrf.mxu1 }
 0x2d1   : > { %3527 = vst [vmem:[%s6423_s10 + $0x18] sm:$0xff] %v3515_v11  ;;  %v3354_v15 = vadd.f32 %v3330_v8, %v3220_v61  ;;  %v3087_v44 = vadd.f32 %v3064_v18, %v6392_v53  ;;  %v3337_v53 = vpop.f32.mrf.mxu3 }
 0x2d3   : > { %v3466_v56 = vpop.f32.mrf.mxu0  ;;  %v3488_v63 = vadd.f32 %v3464_v50, %v3354_v15 }
 0x2d5   : > { %v3504_v16 = vadd.f32 %v6415_v36, %v3488_v63 }
 0x2d6   : > { %v3198_v48 = vpop.f32.mrf.mxu2 }
 0x2d7   : > { %v3516_v20 = vmax.f32 %v3504_v16, 0.0  ;;  %v3221_v47 = vadd.f32 %v3198_v48, %v3087_v44 }
 0x2d8   : > { %v3067_v0 = vpop.f32.mrf.mxu1 }
 0x2d9   : > { %3528 = vst [vmem:[%s6423_s10 + $0x20] sm:$0xff] %v3516_v20  ;;  %v3355_v42 = vadd.f32 %v3332_v29, %v3221_v47  ;;  %v3088_v40 = vadd.f32 %v3067_v0, %v6395_v49  ;;  %v3340_v23 = vpop.f32.mrf.mxu3 }
 0x2db   : > { %v3469_v35 = vpop.f32.mrf.mxu0  ;;  %v3489_v9 = vadd.f32 %v3466_v56, %v3355_v42 }
 0x2dd   : > { %v3505_v60 = vadd.f32 %v6415_v36, %v3489_v9 }
 0x2de   : > { %v3201_v62 = vpop.f32.mrf.mxu2 }
 0x2df   : > { %v3517_v41 = vmax.f32 %v3505_v60, 0.0  ;;  %v3222_v25 = vadd.f32 %v3201_v62, %v3088_v40 }
 0x2e0   : > { %v3069_v2 = vpop.f32.mrf.mxu1 }
 0x2e1   : > { %3529 = vst [vmem:[%s6423_s10 + $0x28] sm:$0xff] %v3517_v41  ;;  %v3356_v13 = vadd.f32 %v3335_v12, %v3222_v25  ;;  %v3089_v28 = vadd.f32 %v3069_v2, %v6398_v5  ;;  %v3342_v8 = vpop.f32.mrf.mxu3 }
 0x2e3   : > { %v3471_v33 = vpop.f32.mrf.mxu0  ;;  %v3490_v31 = vadd.f32 %v3469_v35, %v3356_v13 }
 0x2e5   : > { %v3506_v27 = vadd.f32 %v6415_v36, %v3490_v31 }
 0x2e6   : > { %v3203_v1 = vpop.f32.mrf.mxu2 }
 0x2e7   : > { %v3518_v3 = vmax.f32 %v3506_v27, 0.0  ;;  %v3223_v6 = vadd.f32 %v3203_v1, %v3089_v28 }
 0x2e8   : > { %v3072_v55 = vpop.f32.mrf.mxu1 }
 0x2e9   : > { %3530 = vst [vmem:[%s6423_s10 + $0x30] sm:$0xff] %v3518_v3  ;;  %v3357_v49 = vadd.f32 %v3337_v53, %v3223_v6  ;;  %v3090_v59 = vadd.f32 %v3072_v55, %v6401_v51  ;;  %v3345_v29 = vpop.f32.mrf.mxu3 }
 0x2eb   : > { %v3491_v43 = vadd.f32 %v3471_v33, %v3357_v49  ;;  %v3474_v46 = vpop.f32.mrf.mxu0 }
 0x2ed   : > { %v3507_v52 = vadd.f32 %v6415_v36, %v3491_v43 }
 0x2ee   : > { %v3206_v45 = vpop.f32.mrf.mxu2 }
 0x2ef   : > { %v3519_v14 = vmax.f32 %v3507_v52, 0.0  ;;  %v3224_v34 = vadd.f32 %v3206_v45, %v3090_v59 }
 0x2f0   : > { %v3074_v32 = vpop.f32.mrf.mxu1 }
 0x2f1   : > { %3531 = vst [vmem:[%s6423_s10 + $0x38] sm:$0xff] %v3519_v14  ;;  %v3358_v5 = vadd.f32 %v3340_v23, %v3224_v34  ;;  %v3091_v19 = vadd.f32 %v3074_v32, %v6404_v39  ;;  %v3347_v48 = vpop.f32.mrf.mxu3 }
 0x2f3   : > { %v3492_v37 = vadd.f32 %v3474_v46, %v3358_v5  ;;  %v3476_v17 = vpop.f32.mrf.mxu0 }
 0x2f5   : > { %v3508_v57 = vadd.f32 %v6415_v36, %v3492_v37 }
 0x2f6   : > { %v3208_v38 = vpop.f32.mrf.mxu2 }
 0x2f7   : > { %v3520_v24 = vmax.f32 %v3508_v57, 0.0  ;;  %v3225_v4 = vadd.f32 %v3208_v38, %v3091_v19 }
 0x2f8   : > { %v3077_v30 = vpop.f32.mrf.mxu1 }
 0x2f9   : > { %3532 = vst [vmem:[%s6423_s10 + $0x40] sm:$0xff] %v3520_v24  ;;  %v3359_v51 = vadd.f32 %v3342_v8, %v3225_v4  ;;  %v3092_v7 = vadd.f32 %v3077_v30, %v6407_v54 }
 0x2fb   : > { %v3493_v58 = vadd.f32 %v3476_v17, %v3359_v51  ;;  %v3479_v11 = vpop.f32.mrf.mxu0 }
 0x2fd   : > { %v3509_v50 = vadd.f32 %v6415_v36, %v3493_v58 }
 0x2fe   : > { %v3211_v22 = vpop.f32.mrf.mxu2 }
 0x2ff   : > { %v3521_v26 = vmax.f32 %v3509_v50, 0.0  ;;  %v3226_v10 = vadd.f32 %v3211_v22, %v3092_v7 }
 0x300   : > { %v3079_v61 = vpop.f32.mrf.mxu1 }
 0x301   : > { %3533 = vst [vmem:[%s6423_s10 + $0x48] sm:$0xff] %v3521_v26  ;;  %v3360_v39 = vadd.f32 %v3345_v29, %v3226_v10  ;;  %v3093_v56 = vadd.f32 %v3079_v61, %v6409_v21 }
 0x303   : > { %v3494_v18 = vadd.f32 %v3479_v11, %v3360_v39  ;;  %v3481_v12 = vpop.f32.mrf.mxu0 }
 0x305   : > { %v3510_v15 = vadd.f32 %v6415_v36, %v3494_v18 }
 0x306   : > { %v3213_v63 = vpop.f32.mrf.mxu2 }
 0x307   : > { %v3522_v16 = vmax.f32 %v3510_v15, 0.0  ;;  %v3227_v44 = vadd.f32 %v3213_v63, %v3093_v56 }
 0x309   : > { %3534 = vst [vmem:[%s6423_s10 + $0x50] sm:$0xff] %v3522_v16  ;;  %v3361_v54 = vadd.f32 %v3347_v48, %v3227_v44 }
 0x30b   : > { %v3495_v20 = vadd.f32 %v3481_v12, %v3361_v54 }
 0x30d   : > { %v3511_v47 = vadd.f32 %v6415_v36, %v3495_v20 }
 0x30f   : > { %v3523_v0 = vmax.f32 %v3511_v47, 0.0 }
 0x311   : > { %3535 = vst [vmem:[%s6423_s10 + $0x58] sm:$0xff] %v3523_v0 }
 0x312 PF: > { %s13_s12 = sadd.s32 1, %s5017_s12  }
 0x313   : > { %p10_p4 = scmp.ge.s32.totalorder %s13_s12, 4  }
 0x315   :  { %12 = sbr.rel (!%p10_p4) target bundleno = 1 (0x1), region = 86 }

// kernel: shared_net_forward.6
= control target key start
LH: loop header
LB: loop body
LE: loop exit
PB: predicated region body
PF: predicated region fallthrough
CT: control target
= control target key end

     0   :  { %s5086_s12 = smov 0   ;;  %s6502_s0 = inlined_call_operand.vmem [shape: f32[2,148,128], index: 0, kind: input, shape index: {}]   ;;  %s6503_s1 = inlined_call_operand.vmem [shape: bf16[25,128,128], index: 1, kind: input, shape index: {}]   ;;  %s6504_s2 = inlined_call_operand.vmem [shape: f32[1,128], index: 2, kind: input, shape index: {}]   ;;  %s6505_s3 = inlined_call_operand.vmem [shape: bf16[2,96,128], index: 3, kind: output, shape index: {}]  }
   0x1 LB: > { %s3603_s13 = sadd.s32 4294967295, %s5064_s12   ;;  %p3607_p0 = scmp.ge.s32.totalorder %s5064_s12, 1  ;;  %s5064_s12 = sphi %s5086_s12, %s13_s12  }
   0x2   : > { %p137_p1 = scmp.lt.s32.totalorder %s5064_s12, 3 }
   0x4   : > { %p138_p2 = pnand %p3607_p0, %p137_p1 }
   0x5   : > { %p161_p3 = scmp.lt.s32.totalorder (!%p138_p2), %s3603_s13, 1 }
   0x6   : > { %141 = sbr.rel (%p138_p2) target bundleno = 788 (0x314), region = 32 }
   0xb   : > { %v4811_v0 = vld [vmem:[%s6503_s1 + $0x78] sm:$0xff]  ;;  %v4810_v1 = vld [vmem:[%s6503_s1 + $0x70] sm:$0xff]  ;;  %v4809_v4 = vld [vmem:[%s6503_s1 + $0x68] sm:$0xff]  ;;  %s6507_s13 = smov (!%p161_p3, %s3603_s13), 1 }
   0xc   : > { %5031 = vmatpush.bf16.msra.mxu1 %v4811_v0  ;;  %5032 = vmatpush.bf16.msra.mxu2 %v4811_v0  ;;  %v4827_v2 = vld [vmem:[%s6503_s1 + $0xf8] sm:$0xff]  ;;  %v4826_v3 = vld [vmem:[%s6503_s1 + $0xf0] sm:$0xff]  ;;  %v4825_v5 = vld [vmem:[%s6503_s1 + $0xe8] sm:$0xff]  ;;  %s5047_s9 = smul.u32 152, %s6507_s13 }
   0xd   : > { %288 = vmatpush.bf16.msra.mxu0 %v4811_v0  ;;  %631 = vmatpush.bf16.msra.mxu3 %v4827_v2  ;;  %v4808_v6 = vld [vmem:[%s6503_s1 + $0x60] sm:$0xff]  ;;  %v4807_v8 = vld [vmem:[%s6503_s1 + $0x58] sm:$0xff]  ;;  %v4806_v10 = vld [vmem:[%s6503_s1 + $0x50] sm:$0xff]  ;;  %s5048_s7 = smul.u32 48, %s6507_s13 }
   0xe   : > { %v4824_v7 = vld [vmem:[%s6503_s1 + $0xe0] sm:$0xff]  ;;  %v4823_v9 = vld [vmem:[%s6503_s1 + $0xd8] sm:$0xff]  ;;  %v4822_v11 = vld [vmem:[%s6503_s1 + $0xd0] sm:$0xff]  ;;  %s5139_s18 = scalar_lea.vmem %s6502_s0, %s5047_s9 }
   0xf   : > { %v4805_v12 = vld [vmem:[%s6503_s1 + $0x48] sm:$0xff]  ;;  %v4804_v14 = vld [vmem:[%s6503_s1 + $0x40] sm:$0xff]  ;;  %v4819_v19 = vld [vmem:[%s6503_s1 + $0xb8] sm:$0xff]  ;;  %s6472_s10 = scalar_lea.vmem %s6505_s3, %s5048_s7 }
  0x10   : > { %5033 = vmatpush.bf16.msra.mxu1 %v4810_v1  ;;  %5034 = vmatpush.bf16.msra.mxu2 %v4810_v1  ;;  %v4821_v13 = vld [vmem:[%s6503_s1 + $0xc8] sm:$0xff]  ;;  %v4803_v22 = vld [vmem:[%s6503_s1 + $0x38] sm:$0xff]  ;;  %v4820_v27 = vld [vmem:[%s6503_s1 + $0xc0] sm:$0xff] }
  0x11   : > { %289 = vmatpush.bf16.msra.mxu0 %v4810_v1  ;;  %632 = vmatpush.bf16.msra.mxu3 %v4826_v3  ;;  %v209_v15 = vld [vmem:[%s5139_s18 + $0x21] sm:$0xff]  ;;  %v210_v16 = vld [vmem:[%s5139_s18 + $0x29] sm:$0xff]  ;;  %v4835_v23 = vld [vmem:[%s6503_s1 + $0x138] sm:$0xff] }
  0x12   : > { %v213_v17 = vld [vmem:[%s5139_s18 + $0x41] sm:$0xff]  ;;  %v214_v18 = vld [vmem:[%s5139_s18 + $0x49] sm:$0xff]  ;;  %v219_v24 = vpack.c.bf16 %v210_v16, %v209_v15  ;;  %v4859_v34 = vld [vmem:[%s6503_s1 + $0x1f8] sm:$0xff] }
  0x13   : > { %v205_v20 = vld [vmem:[%s5139_s18 + $0x1] sm:$0xff]  ;;  %v206_v21 = vld [vmem:[%s5139_s18 + $0x9] sm:$0xff]  ;;  %v221_v25 = vpack.c.bf16 %v214_v18, %v213_v17  ;;  %v211_v42 = vld [vmem:[%s5139_s18 + $0x31] sm:$0xff] }
  0x14   : > { %5035 = vmatpush.bf16.msra.mxu1 %v4809_v4  ;;  %5036 = vmatpush.bf16.msra.mxu2 %v4809_v4  ;;  %v217_v26 = vpack.c.bf16 %v206_v21, %v205_v20  ;;  %v548_v28 = vld [vmem:[%s5139_s18 + $0x3] sm:$0xff]  ;;  %v549_v29 = vld [vmem:[%s5139_s18 + $0xb] sm:$0xff]  ;;  %v212_v43 = vld [vmem:[%s5139_s18 + $0x39] sm:$0xff] }
  0x15   : > { %290 = vmatpush.bf16.msra.mxu0 %v4809_v4  ;;  %633 = vmatpush.bf16.msra.mxu3 %v4825_v5  ;;  %v4818_v30 = vld [vmem:[%s6503_s1 + $0xb0] sm:$0xff]  ;;  %v560_v33 = vpack.c.bf16 %v549_v29, %v548_v28  ;;  %v4817_v35 = vld [vmem:[%s6503_s1 + $0xa8] sm:$0xff]  ;;  %v4816_v39 = vld [vmem:[%s6503_s1 + $0xa0] sm:$0xff]  ;;  %v220_v51 = vpack.c.bf16 %v212_v43, %v211_v42 }
  0x16   : > { %v4802_v31 = vld [vmem:[%s6503_s1 + $0x30] sm:$0xff]  ;;  %v4801_v36 = vld [vmem:[%s6503_s1 + $0x28] sm:$0xff]  ;;  %v4800_v40 = vld [vmem:[%s6503_s1 + $0x20] sm:$0xff] }
  0x17   : > { %v4834_v32 = vld [vmem:[%s6503_s1 + $0x130] sm:$0xff]  ;;  %v4833_v37 = vld [vmem:[%s6503_s1 + $0x128] sm:$0xff]  ;;  %v4832_v41 = vld [vmem:[%s6503_s1 + $0x120] sm:$0xff] }
  0x18   : > { %5037 = vmatpush.bf16.msra.mxu1 %v4808_v6  ;;  %5038 = vmatpush.bf16.msra.mxu2 %v4808_v6  ;;  %v4858_v38 = vld [vmem:[%s6503_s1 + $0x1f0] sm:$0xff]  ;;  %v216_v45 = vld [vmem:[%s5139_s18 + $0x59] sm:$0xff]  ;;  %v4813_v60 = vld [vmem:[%s6503_s1 + $0x88] sm:$0xff] }
  0x19   : > { %291 = vmatpush.bf16.msra.mxu0 %v4808_v6  ;;  %634 = vmatpush.bf16.msra.mxu3 %v4824_v7  ;;  %v215_v44 = vld [vmem:[%s5139_s18 + $0x51] sm:$0xff]  ;;  %v208_v48 = vld [vmem:[%s5139_s18 + $0x19] sm:$0xff]  ;;  %v4857_v61 = vld [vmem:[%s6503_s1 + $0x1e8] sm:$0xff] }
  0x1a   : > { %v4815_v46 = vld [vmem:[%s6503_s1 + $0x98] sm:$0xff]  ;;  %v222_v52 = vpack.c.bf16 %v216_v45, %v215_v44  ;;  %v4814_v56 = vld [vmem:[%s6503_s1 + $0x90] sm:$0xff]  ;;  %v4797_v62 = vld [vmem:[%s6503_s1 + $0x8] sm:$0xff] }
  0x1b   : > { %v207_v47 = vld [vmem:[%s5139_s18 + $0x11] sm:$0xff]  ;;  %v551_v55 = vld [vmem:[%s5139_s18 + $0x1b] sm:$0xff]  ;;  %v4829_v63 = vld [vmem:[%s6503_s1 + $0x108] sm:$0xff] }
  0x1c   : > { %5039 = vmatpush.bf16.msra.mxu1 %v4807_v8  ;;  %5040 = vmatpush.bf16.msra.mxu2 %v4807_v8  ;;  %v4799_v49 = vld [vmem:[%s6503_s1 + $0x18] sm:$0xff]  ;;  %v218_v53 = vpack.c.bf16 %v208_v48, %v207_v47  ;;  %v4798_v57 = vld [vmem:[%s6503_s1 + $0x10] sm:$0xff]  ;;  %v4812_v0 = vld [vmem:[%s6503_s1 + $0x80] sm:$0xff] }
  0x1d   : > { %292 = vmatpush.bf16.msra.mxu0 %v4807_v8  ;;  %635 = vmatpush.bf16.msra.mxu3 %v4823_v9  ;;  %v4831_v50 = vld [vmem:[%s6503_s1 + $0x118] sm:$0xff]  ;;  %v4830_v58 = vld [vmem:[%s6503_s1 + $0x110] sm:$0xff]  ;;  %v4796_v1 = vld [vmem:[%s6503_s1] sm:$0xff] }
  0x1e   : > { %v550_v54 = vld [vmem:[%s5139_s18 + $0x13] sm:$0xff]  ;;  %v4828_v2 = vld [vmem:[%s6503_s1 + $0x100] sm:$0xff]  ;;  %v172_v4 = vld [vmem:[%s5139_s18 + $0x8] sm:$0xff] }
  0x1f   : > { %v561_v59 = vpack.c.bf16 %v551_v55, %v550_v54  ;;  %v171_v3 = vld [vmem:[%s5139_s18] sm:$0xff]  ;;  %v4851_v5 = vld [vmem:[%s6503_s1 + $0x1b8] sm:$0xff]  ;;  %v415_v8 = vld [vmem:[%s5139_s18 + $0xa] sm:$0xff] }
  0x20   : > { %5041 = vmatpush.bf16.msra.mxu1 %v4806_v10  ;;  %5042 = vmatpush.bf16.msra.mxu2 %v4806_v10  ;;  %v4843_v6 = vld [vmem:[%s6503_s1 + $0x178] sm:$0xff]  ;;  %v414_v7 = vld [vmem:[%s5139_s18 + $0x2] sm:$0xff]  ;;  %v4850_v15 = vld [vmem:[%s6503_s1 + $0x1b0] sm:$0xff] }
  0x21   : > { %293 = vmatpush.bf16.msra.mxu0 %v4806_v10  ;;  %636 = vmatpush.bf16.msra.mxu3 %v4822_v11  ;;  %v4867_v9 = vld [vmem:[%s6503_s1 + $0x238] sm:$0xff]  ;;  %v682_v10 = vld [vmem:[%s5139_s18 + $0x4] sm:$0xff]  ;;  %v5262_v11 = vld [vmem:[%s5139_s18 + $0xc] sm:$0xff] }
  0x22   : > { %v552_v16 = vld [vmem:[%s5139_s18 + $0x23] sm:$0xff]  ;;  %v553_v17 = vld [vmem:[%s5139_s18 + $0x2b] sm:$0xff]  ;;  %v5299_v29 = vld [vmem:[%s5139_s18 + $0x18] sm:$0xff] }
  0x23   : > { %v4842_v18 = vld [vmem:[%s6503_s1 + $0x170] sm:$0xff]  ;;  %v562_v20 = vpack.c.bf16 %v553_v17, %v552_v16  ;;  %v4849_v21 = vld [vmem:[%s6503_s1 + $0x1a8] sm:$0xff]  ;;  %v4839_v42 = vld [vmem:[%s6503_s1 + $0x158] sm:$0xff] }
  0x24   : > { %5043 = vmatpush.bf16.msra.mxu1 %v4805_v12  ;;  %5044 = vmatpush.bf16.msra.mxu2 %v4805_v12  ;;  %v173_v28 = vld [vmem:[%s5139_s18 + $0x10] sm:$0xff]  ;;  %v4863_v43 = vld [vmem:[%s6503_s1 + $0x218] sm:$0xff]  ;;  %v5342_v47 = vld [vmem:[%s5139_s18 + $0x28] sm:$0xff] }
  0x25   : > { %294 = vmatpush.bf16.msra.mxu0 %v4805_v12  ;;  %637 = vmatpush.bf16.msra.mxu3 %v4821_v13  ;;  %v183_v12 = vpack.c.bf16 %v172_v4, %v171_v3  ;;  %v426_v13 = vpack.c.bf16 %v415_v8, %v414_v7  ;;  %v4846_v44 = vld [vmem:[%s6503_s1 + $0x190] sm:$0xff]  ;;  %v5345_v48 = vld [vmem:[%s5139_s18 + $0x22] sm:$0xff] }
  0x26   : > { %v4854_v45 = vld [vmem:[%s6503_s1 + $0x1d0] sm:$0xff]  ;;  %v556_v55 = vld [vmem:[%s5139_s18 + $0x43] sm:$0xff] }
  0x27   : > { %v5391_v3 = vld [vmem:[%s5139_s18 + $0x34] sm:$0xff]  ;;  %v5394_v4 = vld [vmem:[%s5139_s18 + $0x3c] sm:$0xff]  ;;  %v180_v17 = vld [vmem:[%s5139_s18 + $0x48] sm:$0xff] }
  0x28   : > { %5045 = vmatpush.bf16.msra.mxu1 %v4804_v14  ;;  %5046 = vmatpush.bf16.msra.mxu2 %v4804_v14  ;;  %v697_v7 = vpack.c.bf16 %v5394_v4, %v5391_v3  ;;  %v558_v8 = vld [vmem:[%s5139_s18 + $0x53] sm:$0xff]  ;;  %v5415_v16 = vld [vmem:[%s5139_s18 + $0x40] sm:$0xff] }
  0x29   : > { %295 = vmatpush.bf16.msra.mxu0 %v4804_v14  ;;  %638 = vmatpush.bf16.msra.mxu3 %v4820_v27  ;;  %v694_v14 = vpack.c.bf16 %v5262_v11, %v682_v10  ;;  %v4864_v27 = vld [vmem:[%s6503_s1 + $0x220] sm:$0xff] }
  0x2b   : > { %306 = vmatmul.bf16.vlgmr.msra.gmra.mxu1 %v219_v24  ;;  %316 = vmatmul.bf16.vlgmr.msra.gmra.mxu2 %v221_v25  ;;  %v4865_v24 = vld [vmem:[%s6503_s1 + $0x228] sm:$0xff]  ;;  %v4848_v25 = vld [vmem:[%s6503_s1 + $0x1a0] sm:$0xff] }
  0x2c   : > { %497 = vmatpush.bf16.msrb.mxu2 %v4819_v19  ;;  %375 = vmatpush.bf16.msrb.mxu1 %v4803_v22  ;;  %v4866_v19 = vld [vmem:[%s6503_s1 + $0x230] sm:$0xff]  ;;  %v4856_v22 = vld [vmem:[%s6503_s1 + $0x1e0] sm:$0xff] }
  0x2d   : > { %765 = vmatpush.bf16.msrb.mxu0 %v4835_v23  ;;  %639 = vmatmul.bf16.vlgmr.msra.gmra.mxu3 %v560_v33  ;;  %v4841_v23 = vld [vmem:[%s6503_s1 + $0x168] sm:$0xff]  ;;  %v5309_v33 = vld [vmem:[%s5139_s18 + $0x1c] sm:$0xff] }
  0x2e   : > { %296 = vmatmul.bf16.vlgmr.msra.gmra.mxu0 %v217_v26  ;;  %1167 = vmatpush.bf16.msrb.mxu3 %v4859_v34  ;;  %v4840_v26 = vld [vmem:[%s6503_s1 + $0x160] sm:$0xff]  ;;  %v5312_v34 = vpack.c.bf16 %v5299_v29, %v173_v28 }
  0x30   : > { %498 = vmatpush.bf16.msrb.mxu2 %v4818_v30  ;;  %376 = vmatpush.bf16.msrb.mxu1 %v4802_v31  ;;  %v416_v30 = vld [vmem:[%s5139_s18 + $0x12] sm:$0xff]  ;;  %v5303_v31 = vld [vmem:[%s5139_s18 + $0x1a] sm:$0xff] }
  0x31   : > { %766 = vmatpush.bf16.msrb.mxu0 %v4834_v32  ;;  %v5306_v32 = vld [vmem:[%s5139_s18 + $0x14] sm:$0xff] }
  0x32   : > { %1168 = vmatpush.bf16.msrb.mxu3 %v4858_v38  ;;  %v555_v38 = vld [vmem:[%s5139_s18 + $0x3b] sm:$0xff] }
  0x34   : > { %499 = vmatpush.bf16.msrb.mxu2 %v4817_v35  ;;  %377 = vmatpush.bf16.msrb.mxu1 %v4801_v36  ;;  %v427_v35 = vpack.c.bf16 %v5303_v31, %v416_v30  ;;  %v695_v36 = vpack.c.bf16 %v5309_v33, %v5306_v32  ;;  %v4883_v30 = vld [vmem:[%s6503_s1 + $0x2b8] sm:$0xff] }
  0x35   : > { %767 = vmatpush.bf16.msrb.mxu0 %v4833_v37  ;;  %v554_v37 = vld [vmem:[%s5139_s18 + $0x33] sm:$0xff] }
  0x36   : > { %1169 = vmatpush.bf16.msrb.mxu3 %v4857_v61  ;;  %v4853_v61 = vld [vmem:[%s6503_s1 + $0x1c8] sm:$0xff] }
  0x38   : > { %500 = vmatpush.bf16.msrb.mxu2 %v4816_v39  ;;  %378 = vmatpush.bf16.msrb.mxu1 %v4800_v40  ;;  %v563_v39 = vpack.c.bf16 %v555_v38, %v554_v37  ;;  %v4847_v40 = vld [vmem:[%s6503_s1 + $0x198] sm:$0xff]  ;;  %v5450_v38 = vld [vmem:[%s5139_s18 + $0x50] sm:$0xff] }
  0x39   : > { %768 = vmatpush.bf16.msrb.mxu0 %v4832_v41  ;;  %v4855_v41 = vld [vmem:[%s6503_s1 + $0x1d8] sm:$0xff] }
  0x3a   : > { %1170 = vmatpush.bf16.msrb.mxu3 %v4856_v22  ;;  %v187_v22 = vpack.c.bf16 %v180_v17, %v5415_v16  ;;  %v4899_v37 = vld [vmem:[%s6503_s1 + $0x338] sm:$0xff] }
  0x3b   : > { %311 = vmatmul.bf16.gmra.mxu1 %v220_v51  ;;  %321 = vmatmul.bf16.gmra.mxu2 %v222_v52  ;;  %v5354_v51 = vld [vmem:[%s5139_s18 + $0x2c] sm:$0xff] }
  0x3c   : > { %501 = vmatpush.bf16.msrb.mxu2 %v4815_v46  ;;  %379 = vmatpush.bf16.msrb.mxu1 %v4799_v49  ;;  %v5339_v46 = vld [vmem:[%s5139_s18 + $0x20] sm:$0xff]  ;;  %v5348_v49 = vld [vmem:[%s5139_s18 + $0x2a] sm:$0xff] }
  0x3d   : > { %769 = vmatpush.bf16.msrb.mxu0 %v4831_v50  ;;  %644 = vmatmul.bf16.gmra.mxu3 %v561_v59  ;;  %v5351_v50 = vld [vmem:[%s5139_s18 + $0x24] sm:$0xff]  ;;  %v5358_v52 = vpack.c.bf16 %v5342_v47, %v5339_v46  ;;  %v4862_v59 = vld [vmem:[%s6503_s1 + $0x210] sm:$0xff] }
  0x3e   : > { %301 = vmatmul.bf16.gmra.mxu0 %v218_v53  ;;  %1171 = vmatpush.bf16.msrb.mxu3 %v4855_v41  ;;  %v428_v53 = vpack.c.bf16 %v5348_v49, %v5345_v48  ;;  %v696_v54 = vpack.c.bf16 %v5354_v51, %v5351_v50  ;;  %v425_v41 = vld [vmem:[%s5139_s18 + $0x5a] sm:$0xff] }
  0x40   : > { %502 = vmatpush.bf16.msrb.mxu2 %v4814_v56  ;;  %380 = vmatpush.bf16.msrb.mxu1 %v4798_v57  ;;  %v557_v56 = vld [vmem:[%s5139_s18 + $0x4b] sm:$0xff] }
  0x41   : > { %770 = vmatpush.bf16.msrb.mxu0 %v4830_v58  ;;  %v564_v57 = vpack.c.bf16 %v557_v56, %v556_v55  ;;  %v4838_v58 = vld [vmem:[%s6503_s1 + $0x150] sm:$0xff]  ;;  %v1086_v55 = vld [vmem:[%s5139_s18 + $0x1e] sm:$0xff]  ;;  %v1087_v56 = vld [vmem:[%s5139_s18 + $0x26] sm:$0xff] }
  0x42   : > { %1172 = vmatpush.bf16.msrb.mxu3 %v4854_v45 }
  0x44   : > { %503 = vmatpush.bf16.msrb.mxu2 %v4813_v60  ;;  %381 = vmatpush.bf16.msrb.mxu1 %v4797_v62  ;;  %v4845_v60 = vld [vmem:[%s6503_s1 + $0x188] sm:$0xff] }
  0x45   : > { %771 = vmatpush.bf16.msrb.mxu0 %v4829_v63  ;;  %v4837_v62 = vld [vmem:[%s6503_s1 + $0x148] sm:$0xff]  ;;  %v5383_v63 = vld [vmem:[%s5139_s18 + $0x30] sm:$0xff] }
  0x46   : > { %1173 = vmatpush.bf16.msrb.mxu3 %v4853_v61  ;;  %v4881_v61 = vld [vmem:[%s6503_s1 + $0x2a8] sm:$0xff] }
  0x48   : > { %504 = vmatpush.bf16.msrb.mxu2 %v4812_v0  ;;  %382 = vmatpush.bf16.msrb.mxu1 %v4796_v1  ;;  %v178_v0 = vld [vmem:[%s5139_s18 + $0x38] sm:$0xff] }
  0x49   : > { %772 = vmatpush.bf16.msrb.mxu0 %v4828_v2  ;;  %v5387_v1 = vld [vmem:[%s5139_s18 + $0x32] sm:$0xff]  ;;  %v421_v2 = vld [vmem:[%s5139_s18 + $0x3a] sm:$0xff] }
  0x4b   : > { %383 = vmatmul.bf16.vlgmr.msrb.gmra.mxu1 %v183_v12  ;;  %505 = vmatmul.bf16.vlgmr.msrb.gmra.mxu2 %v426_v13  ;;  %v4861_v12 = vld [vmem:[%s6503_s1 + $0x208] sm:$0xff]  ;;  %v4844_v13 = vld [vmem:[%s6503_s1 + $0x180] sm:$0xff] }
  0x4c   : > { %1033 = vmatpush.bf16.msra.mxu2 %v4851_v5  ;;  %899 = vmatpush.bf16.msra.mxu1 %v4843_v6  ;;  %v186_v5 = vpack.c.bf16 %v178_v0, %v5383_v63  ;;  %v429_v6 = vpack.c.bf16 %v421_v2, %v5387_v1  ;;  %v950_v0 = vld [vmem:[%s5139_s18 + $0xd] sm:$0xff]  ;;  %v951_v2 = vld [vmem:[%s5139_s18 + $0x15] sm:$0xff] }
  0x4d   : > { %1301 = vmatpush.bf16.msra.mxu0 %v4867_v9  ;;  %649 = vmatmul.bf16.gmra.mxu3 %v562_v20  ;;  %v559_v9 = vld [vmem:[%s5139_s18 + $0x5b] sm:$0xff]  ;;  %v5423_v20 = vld [vmem:[%s5139_s18 + $0x44] sm:$0xff] }
  0x4e   : > { %773 = vmatmul.bf16.vlgmr.msrb.gmra.mxu0 %v694_v14  ;;  %v565_v10 = vpack.c.bf16 %v559_v9, %v558_v8  ;;  %v4852_v14 = vld [vmem:[%s6503_s1 + $0x1c0] sm:$0xff]  ;;  %v828_v8 = vpack.c.bf16 %v5306_v32, %v5262_v11  ;;  %v962_v9 = vpack.c.bf16 %v951_v2, %v950_v0  ;;  %v4895_v0 = vld [vmem:[%s6503_s1 + $0x318] sm:$0xff]  ;;  %v954_v2 = vld [vmem:[%s5139_s18 + $0x2d] sm:$0xff] }
  0x4f   : > { %1174 = vmatpush.bf16.msrb.mxu3 %v4852_v14  ;;  %v1089_v14 = vld [vmem:[%s5139_s18 + $0x36] sm:$0xff] }
  0x50   : > { %1034 = vmatpush.bf16.msra.mxu2 %v4850_v15  ;;  %900 = vmatpush.bf16.msra.mxu1 %v4842_v18  ;;  %v4836_v15 = vld [vmem:[%s6503_s1 + $0x140] sm:$0xff] }
  0x51   : > { %1302 = vmatpush.bf16.msra.mxu0 %v4866_v19  ;;  %v5419_v18 = vld [vmem:[%s5139_s18 + $0x42] sm:$0xff]  ;;  %v423_v19 = vld [vmem:[%s5139_s18 + $0x4a] sm:$0xff] }
  0x54   : > { %1035 = vmatpush.bf16.msra.mxu2 %v4849_v21  ;;  %901 = vmatpush.bf16.msra.mxu1 %v4841_v23  ;;  %v5426_v21 = vld [vmem:[%s5139_s18 + $0x4c] sm:$0xff]  ;;  %v430_v23 = vpack.c.bf16 %v423_v19, %v5419_v18 }
  0x55   : > { %1303 = vmatpush.bf16.msra.mxu0 %v4865_v24  ;;  %v698_v24 = vpack.c.bf16 %v5426_v21, %v5423_v20  ;;  %v4897_v19 = vld [vmem:[%s6503_s1 + $0x328] sm:$0xff] }
  0x58   : > { %1036 = vmatpush.bf16.msra.mxu2 %v4848_v25  ;;  %902 = vmatpush.bf16.msra.mxu1 %v4840_v26  ;;  %v1084_v25 = vld [vmem:[%s5139_s18 + $0xe] sm:$0xff]  ;;  %v1085_v26 = vld [vmem:[%s5139_s18 + $0x16] sm:$0xff] }
  0x59   : > { %1304 = vmatpush.bf16.msra.mxu0 %v4864_v27  ;;  %v4860_v27 = vld [vmem:[%s6503_s1 + $0x200] sm:$0xff]  ;;  %v1096_v28 = vpack.c.bf16 %v1085_v26, %v1084_v25 }
  0x5a   : > { %v4872_v25 = vld [vmem:[%s6503_s1 + $0x260] sm:$0xff] }
  0x5b   : > { %388 = vmatmul.bf16.gmra.mxu1 %v5312_v34  ;;  %510 = vmatmul.bf16.gmra.mxu2 %v427_v35  ;;  %v4891_v35 = vld [vmem:[%s6503_s1 + $0x2f8] sm:$0xff] }
  0x5c   : > { %1037 = vmatpush.bf16.msra.mxu2 %v4847_v40  ;;  %903 = vmatpush.bf16.msra.mxu1 %v4839_v42  ;;  %v5454_v40 = vld [vmem:[%s5139_s18 + $0x52] sm:$0xff] }
  0x5d   : > { %654 = vmatmul.bf16.gmra.mxu3 %v563_v39  ;;  %1305 = vmatpush.bf16.msra.mxu0 %v4863_v43  ;;  %v182_v39 = vld [vmem:[%s5139_s18 + $0x58] sm:$0xff] }
  0x5e   : > { %778 = vmatmul.bf16.gmra.mxu0 %v695_v36  ;;  %1703 = vmatpush.bf16.msra.mxu3 %v4891_v35  ;;  %v4875_v36 = vld [vmem:[%s6503_s1 + $0x278] sm:$0xff]  ;;  %v188_v45 = vpack.c.bf16 %v182_v39, %v5450_v38  ;;  %v1221_v35 = vld [vmem:[%s5139_s18 + $0x27] sm:$0xff] }
  0x5f   : > { %v5458_v42 = vld [vmem:[%s5139_s18 + $0x54] sm:$0xff]  ;;  %v5461_v43 = vld [vmem:[%s5139_s18 + $0x5c] sm:$0xff] }
  0x60   : > { %1038 = vmatpush.bf16.msra.mxu2 %v4846_v44  ;;  %904 = vmatpush.bf16.msra.mxu1 %v4838_v58  ;;  %v4882_v44 = vld [vmem:[%s6503_s1 + $0x2b0] sm:$0xff]  ;;  %v1097_v58 = vpack.c.bf16 %v1087_v56, %v1086_v55  ;;  %v4896_v55 = vld [vmem:[%s6503_s1 + $0x320] sm:$0xff] }
  0x61   : > { %1306 = vmatpush.bf16.msra.mxu0 %v4862_v59  ;;  %v4874_v59 = vld [vmem:[%s6503_s1 + $0x270] sm:$0xff] }
  0x64   : > { %1039 = vmatpush.bf16.msra.mxu2 %v4845_v60  ;;  %905 = vmatpush.bf16.msra.mxu1 %v4837_v62  ;;  %v4898_v60 = vld [vmem:[%s6503_s1 + $0x330] sm:$0xff]  ;;  %v4889_v62 = vld [vmem:[%s6503_s1 + $0x2e8] sm:$0xff] }
  0x65   : > { %1307 = vmatpush.bf16.msra.mxu0 %v4861_v12 }
  0x68   : > { %1040 = vmatpush.bf16.msra.mxu2 %v4844_v13  ;;  %906 = vmatpush.bf16.msra.mxu1 %v4836_v15  ;;  %v1088_v13 = vld [vmem:[%s5139_s18 + $0x2e] sm:$0xff] }
  0x69   : > { %1308 = vmatpush.bf16.msra.mxu0 %v4860_v27  ;;  %v1098_v17 = vpack.c.bf16 %v1089_v14, %v1088_v13  ;;  %v952_v27 = vld [vmem:[%s5139_s18 + $0x1d] sm:$0xff] }
  0x6b   : > { %393 = vmatmul.bf16.gmra.mxu1 %v5358_v52  ;;  %515 = vmatmul.bf16.gmra.mxu2 %v428_v53  ;;  %v431_v53 = vpack.c.bf16 %v425_v41, %v5454_v40 }
  0x6c   : > { %1569 = vmatpush.bf16.msrb.mxu2 %v4883_v30  ;;  %1435 = vmatpush.bf16.msrb.mxu1 %v4875_v36  ;;  %v1220_v30 = vld [vmem:[%s5139_s18 + $0x1f] sm:$0xff] }
  0x6d   : > { %659 = vmatmul.bf16.gmra.mxu3 %v564_v57  ;;  %1837 = vmatpush.bf16.msrb.mxu0 %v4899_v37  ;;  %v4890_v57 = vld [vmem:[%s6503_s1 + $0x2f0] sm:$0xff]  ;;  %v829_v37 = vpack.c.bf16 %v5351_v50, %v5309_v33  ;;  %v4879_v33 = vld [vmem:[%s6503_s1 + $0x298] sm:$0xff] }
  0x6e   : > { %783 = vmatmul.bf16.gmra.mxu0 %v696_v54  ;;  %v699_v54 = vpack.c.bf16 %v5461_v43, %v5458_v42  ;;  %1704 = vmatpush.bf16.msra.mxu3 %v4890_v57  ;;  %v4887_v50 = vld [vmem:[%s6503_s1 + $0x2d8] sm:$0xff] }
  0x70   : > { %1570 = vmatpush.bf16.msrb.mxu2 %v4882_v44  ;;  %1436 = vmatpush.bf16.msrb.mxu1 %v4874_v59  ;;  %v1231_v44 = vpack.c.bf16 %v1221_v35, %v1220_v30 }
  0x71   : > { %1838 = vmatpush.bf16.msrb.mxu0 %v4898_v60 }
  0x72   : > { %1705 = vmatpush.bf16.msra.mxu3 %v4889_v62 }
  0x74   : > { %1571 = vmatpush.bf16.msrb.mxu2 %v4881_v61  ;;  %v4871_v61 = vld [vmem:[%s6503_s1 + $0x258] sm:$0xff] }
  0x75   : > { %1839 = vmatpush.bf16.msrb.mxu0 %v4897_v19  ;;  %v1093_v19 = vld [vmem:[%s5139_s18 + $0x56] sm:$0xff] }
  0x79   : > { %1840 = vmatpush.bf16.msrb.mxu0 %v4896_v55 }
  0x7b   : > { %398 = vmatmul.bf16.gmra.mxu1 %v186_v5  ;;  %520 = vmatmul.bf16.gmra.mxu2 %v429_v6  ;;  %v1218_v5 = vld [vmem:[%s5139_s18 + $0xf] sm:$0xff]  ;;  %v1219_v6 = vld [vmem:[%s5139_s18 + $0x17] sm:$0xff] }
  0x7c   : > { %v1230_v12 = vpack.c.bf16 %v1219_v6, %v1218_v5  ;;  %v955_v5 = vld [vmem:[%s5139_s18 + $0x35] sm:$0xff] }
  0x7d   : > { %664 = vmatmul.bf16.gmra.mxu3 %v565_v10  ;;  %1841 = vmatpush.bf16.msrb.mxu0 %v4895_v0  ;;  %v1222_v6 = vld [vmem:[%s5139_s18 + $0x2f] sm:$0xff] }
  0x7e   : > { %788 = vmatmul.bf16.gmra.mxu0 %v697_v7  ;;  %v4873_v7 = vld [vmem:[%s6503_s1 + $0x268] sm:$0xff] }
  0x7f   : > { %1437 = vmatpush.bf16.msrb.mxu1 %v4873_v7  ;;  %v1223_v7 = vld [vmem:[%s5139_s18 + $0x37] sm:$0xff] }
  0x80   : > { %v1232_v14 = vpack.c.bf16 %v1223_v7, %v1222_v6 }
  0x83   : > { %1438 = vmatpush.bf16.msrb.mxu1 %v4872_v25  ;;  %v4878_v25 = vld [vmem:[%s6503_s1 + $0x290] sm:$0xff] }
  0x87   : > { %1439 = vmatpush.bf16.msrb.mxu1 %v4871_v61  ;;  %v1225_v61 = vld [vmem:[%s5139_s18 + $0x47] sm:$0xff] }
  0x8b   : > { %403 = vmatmul.bf16.gmra.mxu1 %v187_v22  ;;  %525 = vmatmul.bf16.gmra.mxu2 %v430_v23  ;;  %v4880_v23 = vld [vmem:[%s6503_s1 + $0x2a0] sm:$0xff] }
  0x8c   : > { %1572 = vmatpush.bf16.msrb.mxu2 %v4880_v23 }
  0x8d   : > { %1175 = vmatmul.bf16.vlgmr.msrb.gmra.mxu3 %v1096_v28  ;;  %v953_v28 = vld [vmem:[%s5139_s18 + $0x25] sm:$0xff] }
  0x8e   : > { %793 = vmatmul.bf16.gmra.mxu0 %v698_v24  ;;  %v4888_v24 = vld [vmem:[%s6503_s1 + $0x2e0] sm:$0xff]  ;;  %v963_v39 = vpack.c.bf16 %v953_v28, %v952_v27  ;;  %v4886_v27 = vld [vmem:[%s6503_s1 + $0x2d0] sm:$0xff] }
  0x8f   : > { %1706 = vmatpush.bf16.msra.mxu3 %v4888_v24 }
  0x90   : > { %1573 = vmatpush.bf16.msrb.mxu2 %v4879_v33  ;;  %v957_v33 = vld [vmem:[%s5139_s18 + $0x45] sm:$0xff] }
  0x93   : > { %1707 = vmatpush.bf16.msra.mxu3 %v4887_v50  ;;  %v1224_v50 = vld [vmem:[%s5139_s18 + $0x3f] sm:$0xff] }
  0x94   : > { %1574 = vmatpush.bf16.msrb.mxu2 %v4878_v25 }
  0x97   : > { %1708 = vmatpush.bf16.msra.mxu3 %v4886_v27 }
  0x9b   : > { %408 = vmatmul.bf16.gmra.mxu1 %v188_v45  ;;  %530 = vmatmul.bf16.gmra.mxu2 %v431_v53  ;;  %v1090_v45 = vld [vmem:[%s5139_s18 + $0x3e] sm:$0xff]  ;;  %v1091_v53 = vld [vmem:[%s5139_s18 + $0x46] sm:$0xff] }
  0x9c   : > { %v1099_v57 = vpack.c.bf16 %v1091_v53, %v1090_v45  ;;  %v4894_v45 = vld [vmem:[%s6503_s1 + $0x310] sm:$0xff]  ;;  %v4877_v53 = vld [vmem:[%s6503_s1 + $0x288] sm:$0xff] }
  0x9d   : > { %1180 = vmatmul.bf16.gmra.mxu3 %v1097_v58  ;;  %1842 = vmatpush.bf16.msrb.mxu0 %v4894_v45  ;;  %v1226_v45 = vld [vmem:[%s5139_s18 + $0x4f] sm:$0xff] }
  0x9e   : > { %798 = vmatmul.bf16.gmra.mxu0 %v699_v54  ;;  %1575 = vmatpush.bf16.msrb.mxu2 %v4877_v53  ;;  %v1227_v53 = vld [vmem:[%s5139_s18 + $0x57] sm:$0xff] }
  0xa8   : > { %v5496_v10 = vpop.f32.mrf.mxu1 }
  0xab   : > { %v297_v15 = vpop.f32.mrf.mxu0  ;;  %907 = vmatmul.bf16.vlgmr.msra.gmra.mxu1 %v828_v8  ;;  %1041 = vmatmul.bf16.vlgmr.msra.gmra.mxu2 %v962_v9  ;;  %v830_v9 = vpack.c.bf16 %v5391_v3, %v5354_v51  ;;  %v4870_v3 = vld [vmem:[%s6503_s1 + $0x250] sm:$0xff] }
  0xac   : > { %1440 = vmatpush.bf16.msrb.mxu1 %v4870_v3 }
  0xad   : > { %1185 = vmatmul.bf16.gmra.mxu3 %v1098_v17  ;;  %v1092_v17 = vld [vmem:[%s5139_s18 + $0x4e] sm:$0xff] }
  0xae   : > { %1309 = vmatmul.bf16.vlgmr.msra.gmra.mxu0 %v1230_v12  ;;  %v5503_v11 = vpop.f32.mrf.mxu2  ;;  %v964_v12 = vpack.c.bf16 %v955_v5, %v954_v2  ;;  %v1100_v51 = vpack.c.bf16 %v1093_v19, %v1092_v17  ;;  %v831_v5 = vpack.c.bf16 %v5423_v20, %v5394_v4  ;;  %v4893_v20 = vld [vmem:[%s6503_s1 + $0x308] sm:$0xff] }
  0xaf   : > { %1843 = vmatpush.bf16.msrb.mxu0 %v4893_v20 }
  0xb0   : > { %v5505_v32 = vpop.f32.mrf.mxu1  ;;  %v5518_v26 = vpop.f32.mrf.mxu3 }
  0xb3   : > { %v5507_v22 = vpop.f32.mrf.mxu0 }
  0xb6   : > { %v5524_v36 = vpop.f32.mrf.mxu2 }
  0xb8   : > { %v5528_v41 = vpop.f32.mrf.mxu1  ;;  %v5537_v56 = vpop.f32.mrf.mxu3 }
  0xbb   : > { %v5532_v54 = vpop.f32.mrf.mxu0  ;;  %912 = vmatmul.bf16.gmra.mxu1 %v829_v37  ;;  %1046 = vmatmul.bf16.gmra.mxu2 %v963_v39 }
  0xbd   : > { %1190 = vmatmul.bf16.gmra.mxu3 %v1099_v57  ;;  %v4885_v57 = vld [vmem:[%s6503_s1 + $0x2c8] sm:$0xff] }
  0xbe   : > { %1314 = vmatmul.bf16.gmra.mxu0 %v1231_v44  ;;  %v5545_v58 = vpop.f32.mrf.mxu2  ;;  %1709 = vmatpush.bf16.msra.mxu3 %v4885_v57 }
  0xc0   : > { %v5547_v59 = vpop.f32.mrf.mxu1  ;;  %v5554_v62 = vpop.f32.mrf.mxu3 }
  0xc3   : > { %v5549_v60 = vpop.f32.mrf.mxu0 }
  0xc6   : > { %v5563_v8 = vpop.f32.mrf.mxu2 }
  0xc8   : > { %v384_v13 = vpop.f32.mrf.mxu1  ;;  %v5575_v28 = vpop.f32.mrf.mxu3 }
  0xc9   : > { %v385_v23 = vadd.f32 %v384_v13, %v297_v15  ;;  %v1095_v13 = vld [vmem:[%s5139_s18 + $0x66] sm:$0xff] }
  0xcb   : > { %v774_v24 = vpop.f32.mrf.mxu0  ;;  %917 = vmatmul.bf16.gmra.mxu1 %v830_v9  ;;  %1051 = vmatmul.bf16.gmra.mxu2 %v964_v12  ;;  %v1233_v9 = vpack.c.bf16 %v1225_v61, %v1224_v50  ;;  %v1094_v12 = vld [vmem:[%s5139_s18 + $0x5e] sm:$0xff] }
  0xcc   : > { %v1101_v25 = vpack.c.bf16 %v1095_v13, %v1094_v12 }
  0xcd   : > { %1195 = vmatmul.bf16.gmra.mxu3 %v1100_v51  ;;  %v4884_v51 = vld [vmem:[%s6503_s1 + $0x2c0] sm:$0xff] }
  0xce   : > { %1319 = vmatmul.bf16.gmra.mxu0 %v1232_v14  ;;  %v506_v15 = vpop.f32.mrf.mxu2  ;;  %1710 = vmatpush.bf16.msra.mxu3 %v4884_v51 }
  0xcf   : > { %v536_v30 = vadd.f32 %v506_v15, %v385_v23  ;;  %v4869_v23 = vld [vmem:[%s6503_s1 + $0x248] sm:$0xff] }
  0xd0   : > { %v386_v35 = vpop.f32.mrf.mxu1  ;;  %v5588_v55 = vpop.f32.mrf.mxu3  ;;  %1441 = vmatpush.bf16.msrb.mxu1 %v4869_v23 }
  0xd1   : > { %v670_v37 = vadd.f32 %v5518_v26, %v536_v30  ;;  %v387_v39 = vadd.f32 %v386_v35, %v5507_v22  ;;  %v956_v26 = vld [vmem:[%s5139_s18 + $0x3d] sm:$0xff] }
  0xd2   : > { %v965_v6 = vpack.c.bf16 %v957_v33, %v956_v26  ;;  %v4876_v35 = vld [vmem:[%s6503_s1 + $0x280] sm:$0xff]  ;;  %v832_v33 = vpack.c.bf16 %v5458_v42, %v5426_v21  ;;  %v4915_v42 = vld [vmem:[%s6503_s1 + $0x3b8] sm:$0xff] }
  0xd3   : > { %v776_v44 = vpop.f32.mrf.mxu0  ;;  %v5593_v22 = vadd.f32 %v774_v24, %v670_v37  ;;  %v4868_v37 = vld [vmem:[%s6503_s1 + $0x240] sm:$0xff]  ;;  %1576 = vmatpush.bf16.msrb.mxu2 %v4876_v35 }
  0xd4   : > { %1442 = vmatpush.bf16.msrb.mxu1 %v4868_v37 }
  0xd6   : > { %v508_v0 = vpop.f32.mrf.mxu2 }
  0xd7   : > { %v537_v2 = vadd.f32 %v508_v0, %v387_v39  ;;  %v1234_v0 = vpack.c.bf16 %v1227_v53, %v1226_v45  ;;  %2105 = vmatpush.bf16.msra.mxu2 %v4915_v42 }
  0xd8   : > { %v389_v7 = vpop.f32.mrf.mxu1  ;;  %v5608_v24 = vpop.f32.mrf.mxu3 }
  0xd9   : > { %v671_v14 = vadd.f32 %v5537_v56, %v537_v2  ;;  %v390_v17 = vadd.f32 %v389_v7, %v5532_v54  ;;  %v1620_v2 = vld [vmem:[%s5139_s18 + $0x19] sm:$0xff] }
  0xdb   : > { %v779_v19 = vpop.f32.mrf.mxu0  ;;  %922 = vmatmul.bf16.gmra.mxu1 %v831_v5  ;;  %1056 = vmatmul.bf16.gmra.mxu2 %v965_v6  ;;  %v5610_v4 = vadd.f32 %v776_v44, %v671_v14  ;;  %v1621_v5 = vld [vmem:[%s5139_s18 + $0x21] sm:$0xff] }
  0xdc   : > { %v4892_v6 = vld [vmem:[%s6503_s1 + $0x300] sm:$0xff]  ;;  %v1632_v21 = vpack.c.bf16 %v1621_v5, %v1620_v2  ;;  %v4922_v2 = vld [vmem:[%s6503_s1 + $0x3f0] sm:$0xff] }
  0xdd   : > { %1200 = vmatmul.bf16.gmra.mxu3 %v1101_v25  ;;  %1844 = vmatpush.bf16.msrb.mxu0 %v4892_v6 }
  0xde   : > { %1324 = vmatmul.bf16.gmra.mxu0 %v1233_v9  ;;  %v511_v56 = vpop.f32.mrf.mxu2 }
  0xdf   : > { %v538_v54 = vadd.f32 %v511_v56, %v390_v17  ;;  %v4907_v56 = vld [vmem:[%s6503_s1 + $0x378] sm:$0xff] }
  0xe0   : > { %v391_v27 = vpop.f32.mrf.mxu1  ;;  %v5626_v39 = vpop.f32.mrf.mxu3  ;;  %1971 = vmatpush.bf16.msra.mxu1 %v4907_v56  ;;  %v1766_v56 = vpack.c.bf16 %v5345_v48, %v5303_v31  ;;  %v4929_v31 = vld [vmem:[%s6503_s1 + $0x428] sm:$0xff] }
  0xe1   : > { %v672_v3 = vadd.f32 %v5554_v62, %v538_v54  ;;  %v392_v15 = vadd.f32 %v391_v27, %v5549_v60  ;;  %v958_v62 = vld [vmem:[%s5139_s18 + $0x4d] sm:$0xff]  ;;  %v959_v60 = vld [vmem:[%s5139_s18 + $0x55] sm:$0xff] }
  0xe2   : > { %v966_v50 = vpack.c.bf16 %v959_v60, %v958_v62  ;;  %v4931_v27 = vld [vmem:[%s6503_s1 + $0x438] sm:$0xff] }
  0xe3   : > { %v781_v30 = vpop.f32.mrf.mxu0  ;;  %v5628_v44 = vadd.f32 %v779_v19, %v672_v3  ;;  %v827_v3 = vld [vmem:[%s5139_s18 + $0x64] sm:$0xff]  ;;  %2373 = vmatpush.bf16.msra.mxu0 %v4931_v27  ;;  %v1624_v27 = vld [vmem:[%s5139_s18 + $0x39] sm:$0xff] }
  0xe4   : > { %v833_v62 = vpack.c.bf16 %v827_v3, %v5461_v43  ;;  %v1625_v3 = vld [vmem:[%s5139_s18 + $0x41] sm:$0xff] }
  0xe6   : > { %v513_v57 = vpop.f32.mrf.mxu2 }
  0xe7   : > { %v539_v26 = vadd.f32 %v513_v57, %v392_v15  ;;  %v961_v15 = vld [vmem:[%s5139_s18 + $0x65] sm:$0xff] }
  0xe8   : > { %v394_v61 = vpop.f32.mrf.mxu1  ;;  %v5643_v13 = vpop.f32.mrf.mxu3  ;;  %v1622_v57 = vld [vmem:[%s5139_s18 + $0x29] sm:$0xff] }
  0xe9   : > { %v673_v7 = vadd.f32 %v5575_v28, %v539_v26  ;;  %v395_v9 = vadd.f32 %v394_v61, %v5496_v10  ;;  %v4923_v28 = vld [vmem:[%s6503_s1 + $0x3f8] sm:$0xff] }
  0xea   : > { %2239 = vmatpush.bf16.msrb.mxu3 %v4923_v28  ;;  %v1623_v26 = vld [vmem:[%s5139_s18 + $0x31] sm:$0xff] }
  0xeb   : > { %v784_v12 = vpop.f32.mrf.mxu0  ;;  %927 = vmatmul.bf16.gmra.mxu1 %v832_v33  ;;  %1061 = vmatmul.bf16.gmra.mxu2 %v966_v50  ;;  %v5648_v14 = vadd.f32 %v781_v30, %v673_v7  ;;  %v1229_v30 = vld [vmem:[%s5139_s18 + $0x67] sm:$0xff]  ;;  %v1633_v43 = vpack.c.bf16 %v1623_v26, %v1622_v57  ;;  %v4930_v28 = vld [vmem:[%s6503_s1 + $0x430] sm:$0xff] }
  0xec   : > { %2374 = vmatpush.bf16.msra.mxu0 %v4930_v28  ;;  %v4903_v28 = vld [vmem:[%s6503_s1 + $0x358] sm:$0xff] }
  0xed   : > { %1711 = vmatmul.bf16.vlgmr.msra.gmra.mxu3 %v1632_v21 }
  0xee   : > { %1329 = vmatmul.bf16.gmra.mxu0 %v1234_v0  ;;  %v516_v10 = vpop.f32.mrf.mxu2  ;;  %v4914_v0 = vld [vmem:[%s6503_s1 + $0x3b0] sm:$0xff]  ;;  %2240 = vmatpush.bf16.msrb.mxu3 %v4922_v2 }
  0xef   : > { %v540_v17 = vadd.f32 %v516_v10, %v395_v9  ;;  %2106 = vmatpush.bf16.msra.mxu2 %v4914_v0  ;;  %v4913_v10 = vld [vmem:[%s6503_s1 + $0x3a8] sm:$0xff]  ;;  %v1767_v0 = vpack.c.bf16 %v5387_v1, %v5348_v49 }
  0xf0   : > { %v396_v19 = vpop.f32.mrf.mxu1  ;;  %v5658_v54 = vpop.f32.mrf.mxu3  ;;  %2375 = vmatpush.bf16.msra.mxu0 %v4929_v31  ;;  %v1626_v2 = vld [vmem:[%s5139_s18 + $0x49] sm:$0xff] }
  0xf1   : > { %v674_v23 = vadd.f32 %v5588_v55, %v540_v17  ;;  %v397_v25 = vadd.f32 %v396_v19, %v5505_v32  ;;  %v960_v55 = vld [vmem:[%s5139_s18 + $0x5d] sm:$0xff]  ;;  %v4921_v19 = vld [vmem:[%s6503_s1 + $0x3e8] sm:$0xff] }
  0xf2   : > { %v1228_v32 = vld [vmem:[%s5139_s18 + $0x5f] sm:$0xff]  ;;  %v967_v60 = vpack.c.bf16 %v961_v15, %v960_v55  ;;  %2241 = vmatpush.bf16.msrb.mxu3 %v4921_v19 }
  0xf3   : > { %v786_v20 = vpop.f32.mrf.mxu0  ;;  %v5663_v51 = vadd.f32 %v784_v12, %v674_v23  ;;  %v1235_v53 = vpack.c.bf16 %v1229_v30, %v1228_v32  ;;  %2107 = vmatpush.bf16.msra.mxu2 %v4913_v10  ;;  %v4905_v32 = vld [vmem:[%s6503_s1 + $0x368] sm:$0xff] }
  0xf6   : > { %v518_v35 = vpop.f32.mrf.mxu2 }
  0xf7   : > { %v541_v37 = vadd.f32 %v518_v35, %v397_v25  ;;  %v1498_v25 = vpack.c.bf16 %v5339_v46, %v5299_v29  ;;  %v1634_v35 = vpack.c.bf16 %v1625_v3, %v1624_v27 }
  0xf8   : > { %v399_v45 = vpop.f32.mrf.mxu1  ;;  %v5681_v5 = vpop.f32.mrf.mxu3 }
  0xf9   : > { %v675_v33 = vadd.f32 %v5608_v24, %v541_v37  ;;  %v400_v50 = vadd.f32 %v399_v45, %v5528_v41  ;;  %v4906_v24 = vld [vmem:[%s6503_s1 + $0x370] sm:$0xff]  ;;  %v4920_v45 = vld [vmem:[%s6503_s1 + $0x3e0] sm:$0xff] }
  0xfa   : > { %1972 = vmatpush.bf16.msra.mxu1 %v4906_v24  ;;  %2242 = vmatpush.bf16.msrb.mxu3 %v4920_v45 }
  0xfb   : > { %v789_v61 = vpop.f32.mrf.mxu0  ;;  %932 = vmatmul.bf16.gmra.mxu1 %v833_v62  ;;  %1066 = vmatmul.bf16.gmra.mxu2 %v967_v60  ;;  %v5686_v6 = vadd.f32 %v786_v20, %v675_v33  ;;  %v4912_v60 = vld [vmem:[%s6503_s1 + $0x3a0] sm:$0xff] }
  0xfc   : > { %2108 = vmatpush.bf16.msra.mxu2 %v4912_v60 }
  0xfd   : > { %1716 = vmatmul.bf16.gmra.mxu3 %v1633_v43  ;;  %v1627_v43 = vld [vmem:[%s5139_s18 + $0x51] sm:$0xff] }
  0xfe   : > { %1334 = vmatmul.bf16.gmra.mxu0 %v1235_v53  ;;  %v521_v41 = vpop.f32.mrf.mxu2  ;;  %1973 = vmatpush.bf16.msra.mxu1 %v4905_v32  ;;  %v1628_v32 = vld [vmem:[%s5139_s18 + $0x59] sm:$0xff] }
  0xff   : > { %v542_v7 = vadd.f32 %v521_v41, %v400_v50  ;;  %v1499_v50 = vpack.c.bf16 %v5383_v63, %v5342_v47  ;;  %v4911_v47 = vld [vmem:[%s6503_s1 + $0x398] sm:$0xff] }
 0x100   : > { %v401_v9 = vpop.f32.mrf.mxu1  ;;  %v5696_v17 = vpop.f32.mrf.mxu3  ;;  %v4919_v63 = vld [vmem:[%s6503_s1 + $0x3d8] sm:$0xff]  ;;  %2109 = vmatpush.bf16.msra.mxu2 %v4911_v47  ;;  %v1630_v47 = vld [vmem:[%s5139_s18 + $0x69] sm:$0xff] }
 0x101   : > { %v676_v12 = vadd.f32 %v5626_v39, %v542_v7  ;;  %v402_v21 = vadd.f32 %v401_v9, %v5547_v59  ;;  %v4928_v7 = vld [vmem:[%s6503_s1 + $0x420] sm:$0xff]  ;;  %2243 = vmatpush.bf16.msrb.mxu3 %v4919_v63  ;;  %v1631_v63 = vld [vmem:[%s5139_s18 + $0x71] sm:$0xff] }
 0x102   : > { %2376 = vmatpush.bf16.msra.mxu0 %v4928_v7 }
 0x103   : > { %v791_v42 = vpop.f32.mrf.mxu0  ;;  %v5701_v39 = vadd.f32 %v789_v61, %v676_v12 }
 0x106   : > { %v523_v59 = vpop.f32.mrf.mxu2 }
 0x107   : > { %v543_v23 = vadd.f32 %v523_v59, %v402_v21  ;;  %v1356_v59 = vld [vmem:[%s5139_s18 + $0x30] sm:$0xff] }
 0x108   : > { %v404_v20 = vpop.f32.mrf.mxu1  ;;  %v5713_v30 = vpop.f32.mrf.mxu3 }
 0x109   : > { %v677_v55 = vadd.f32 %v5643_v13, %v543_v23  ;;  %v405_v46 = vadd.f32 %v404_v20, %v5503_v11  ;;  %v4904_v11 = vld [vmem:[%s6503_s1 + $0x360] sm:$0xff]  ;;  %v1357_v23 = vld [vmem:[%s5139_s18 + $0x38] sm:$0xff] }
 0x10a   : > { %1974 = vmatpush.bf16.msra.mxu1 %v4904_v11  ;;  %v1366_v27 = vpack.c.bf16 %v1357_v23, %v1356_v59  ;;  %v1500_v3 = vpack.c.bf16 %v5415_v16, %v1357_v23 }
 0x10b   : > { %v794_v15 = vpop.f32.mrf.mxu0  ;;  %1443 = vmatmul.bf16.vlgmr.msrb.gmra.mxu1 %v5312_v34  ;;  %1577 = vmatmul.bf16.vlgmr.msrb.gmra.mxu2 %v1498_v25  ;;  %v5716_v29 = vadd.f32 %v791_v42, %v677_v55  ;;  %v1758_v25 = vld [vmem:[%s5139_s18 + $0x3a] sm:$0xff] }
 0x10d   : > { %1721 = vmatmul.bf16.gmra.mxu3 %v1634_v35  ;;  %v1629_v35 = vld [vmem:[%s5139_s18 + $0x61] sm:$0xff] }
 0x10e   : > { %1845 = vmatmul.bf16.vlgmr.msrb.gmra.mxu0 %v1766_v56  ;;  %v526_v48 = vpop.f32.mrf.mxu2  ;;  %1975 = vmatpush.bf16.msra.mxu1 %v4903_v28  ;;  %v1636_v16 = vpack.c.bf16 %v1629_v35, %v1628_v32 }
 0x10f   : > { %v544_v13 = vadd.f32 %v526_v48, %v405_v46 }
 0x110   : > { %v406_v37 = vpop.f32.mrf.mxu1  ;;  %v5732_v53 = vpop.f32.mrf.mxu3 }
 0x111   : > { %v678_v62 = vadd.f32 %v5658_v54, %v544_v13  ;;  %v407_v57 = vadd.f32 %v406_v37, %v5524_v36  ;;  %v1635_v36 = vpack.c.bf16 %v1627_v43, %v1626_v2  ;;  %v4918_v13 = vld [vmem:[%s6503_s1 + $0x3d0] sm:$0xff] }
 0x112   : > { %2244 = vmatpush.bf16.msrb.mxu3 %v4918_v13  ;;  %v5848_v13 = vld [vmem:[%s5139_s18 + $0x24] sm:$0xff] }
 0x113   : > { %v796_v34 = vpop.f32.mrf.mxu0  ;;  %v5734_v54 = vadd.f32 %v794_v15, %v678_v62  ;;  %v1768_v15 = vpack.c.bf16 %v5419_v18, %v1758_v25  ;;  %v4902_v18 = vld [vmem:[%s6503_s1 + $0x350] sm:$0xff]  ;;  %v4908_v25 = vld [vmem:[%s6503_s1 + $0x380] sm:$0xff] }
 0x114   : > { %1976 = vmatpush.bf16.msra.mxu1 %v4902_v18  ;;  %v4924_v18 = vld [vmem:[%s6503_s1 + $0x400] sm:$0xff] }
 0x116   : > { %v528_v26 = vpop.f32.mrf.mxu2 }
 0x117   : > { %v545_v33 = vadd.f32 %v528_v26, %v407_v57  ;;  %v4926_v57 = vld [vmem:[%s6503_s1 + $0x410] sm:$0xff]  ;;  %v4909_v26 = vld [vmem:[%s6503_s1 + $0x388] sm:$0xff] }
 0x118   : > { %v409_v61 = vpop.f32.mrf.mxu1  ;;  %v5747_v9 = vpop.f32.mrf.mxu3 }
 0x119   : > { %v679_v24 = vadd.f32 %v5681_v5, %v545_v33  ;;  %v410_v1 = vadd.f32 %v409_v61, %v5545_v58  ;;  %v4927_v58 = vld [vmem:[%s6503_s1 + $0x418] sm:$0xff]  ;;  %v1359_v61 = vld [vmem:[%s5139_s18 + $0x48] sm:$0xff] }
 0x11a   : > { %2377 = vmatpush.bf16.msra.mxu0 %v4927_v58  ;;  %v4916_v58 = vld [vmem:[%s6503_s1 + $0x3c0] sm:$0xff] }
 0x11b   : > { %v799_v41 = vpop.f32.mrf.mxu0  ;;  %1448 = vmatmul.bf16.gmra.mxu1 %v5358_v52  ;;  %1582 = vmatmul.bf16.gmra.mxu2 %v1499_v50  ;;  %v5753_v49 = vadd.f32 %v796_v34, %v679_v24  ;;  %v4917_v50 = vld [vmem:[%s6503_s1 + $0x3c8] sm:$0xff] }
 0x11c   : > { %2245 = vmatpush.bf16.msrb.mxu3 %v4917_v50 }
 0x11d   : > { %1726 = vmatmul.bf16.gmra.mxu3 %v1635_v36 }
 0x11e   : > { %1850 = vmatmul.bf16.gmra.mxu0 %v1767_v0  ;;  %v531_v52 = vpop.f32.mrf.mxu2  ;;  %v1760_v0 = vld [vmem:[%s5139_s18 + $0x4a] sm:$0xff] }
 0x11f   : > { %v546_v5 = vadd.f32 %v531_v52, %v410_v1  ;;  %2378 = vmatpush.bf16.msra.mxu0 %v4926_v57  ;;  %v1769_v36 = vpack.c.bf16 %v5454_v40, %v1760_v0  ;;  %v4925_v40 = vld [vmem:[%s6503_s1 + $0x408] sm:$0xff] }
 0x120   : > { %v411_v12 = vpop.f32.mrf.mxu1  ;;  %v5763_v10 = vpop.f32.mrf.mxu3  ;;  %2246 = vmatpush.bf16.msrb.mxu3 %v4916_v58  ;;  %v4946_v58 = vld [vmem:[%s6503_s1 + $0x4b0] sm:$0xff] }
 0x121   : > { %v680_v21 = vadd.f32 %v5696_v17, %v546_v5  ;;  %v412_v17 = vadd.f32 %v411_v12, %v5563_v8  ;;  %v4910_v8 = vld [vmem:[%s6503_s1 + $0x390] sm:$0xff]  ;;  %v4901_v12 = vld [vmem:[%s6503_s1 + $0x348] sm:$0xff] }
 0x122   : > { %2110 = vmatpush.bf16.msra.mxu2 %v4910_v8  ;;  %1977 = vmatpush.bf16.msra.mxu1 %v4901_v12 }
 0x123   : > { %v801_v42 = vpop.f32.mrf.mxu0  ;;  %v5768_v19 = vadd.f32 %v799_v41, %v680_v21  ;;  %v1501_v41 = vpack.c.bf16 %v5450_v38, %v1359_v61  ;;  %2379 = vmatpush.bf16.msra.mxu0 %v4925_v40  ;;  %v5890_v40 = vld [vmem:[%s5139_s18 + $0x3c] sm:$0xff] }
 0x126   : > { %v533_v20 = vpop.f32.mrf.mxu2  ;;  %2111 = vmatpush.bf16.msra.mxu2 %v4909_v26 }
 0x127   : > { %v547_v56 = vadd.f32 %v533_v20, %v412_v17  ;;  %v4900_v20 = vld [vmem:[%s6503_s1 + $0x340] sm:$0xff]  ;;  %2380 = vmatpush.bf16.msra.mxu0 %v4924_v18  ;;  %v2291_v18 = vld [vmem:[%s5139_s18 + $0x2d] sm:$0xff] }
 0x128   : > { %v908_v55 = vpop.f32.mrf.mxu1  ;;  %v5786_v37 = vpop.f32.mrf.mxu3  ;;  %1978 = vmatpush.bf16.msra.mxu1 %v4900_v20 }
 0x129   : > { %v681_v31 = vadd.f32 %v5713_v30, %v547_v56  ;;  %v938_v46 = vadd.f32 %v908_v55, %v5593_v22  ;;  %v1762_v55 = vld [vmem:[%s5139_s18 + $0x5a] sm:$0xff] }
 0x12a   : > { %2112 = vmatpush.bf16.msra.mxu2 %v4908_v25 }
 0x12b   : > { %v1310_v48 = vpop.f32.mrf.mxu0  ;;  %1453 = vmatmul.bf16.gmra.mxu1 %v1366_v27  ;;  %1587 = vmatmul.bf16.gmra.mxu2 %v1500_v3  ;;  %v5791_v30 = vadd.f32 %v801_v42, %v681_v31  ;;  %v1637_v42 = vpack.c.bf16 %v1631_v63, %v1630_v47  ;;  %v1495_v3 = vld [vmem:[%s5139_s18 + $0x60] sm:$0xff] }
 0x12d   : > { %1731 = vmatmul.bf16.gmra.mxu3 %v1636_v16  ;;  %v5851_v16 = vld [vmem:[%s5139_s18 + $0x2c] sm:$0xff] }
 0x12e   : > { %1855 = vmatmul.bf16.gmra.mxu0 %v1768_v15  ;;  %v1042_v22 = vpop.f32.mrf.mxu2  ;;  %v1763_v15 = vld [vmem:[%s5139_s18 + $0x62] sm:$0xff] }
 0x12f   : > { %v1072_v62 = vadd.f32 %v1042_v22, %v938_v46  ;;  %v1770_v8 = vpack.c.bf16 %v1763_v15, %v1762_v55  ;;  %v4962_v15 = vld [vmem:[%s6503_s1 + $0x530] sm:$0xff] }
 0x130   : > { %v910_v34 = vpop.f32.mrf.mxu1  ;;  %v5801_v33 = vpop.f32.mrf.mxu3 }
 0x131   : > { %v1206_v60 = vadd.f32 %v5732_v53, %v1072_v62  ;;  %v939_v45 = vadd.f32 %v910_v34, %v5610_v4  ;;  %v1358_v53 = vld [vmem:[%s5139_s18 + $0x40] sm:$0xff] }
 0x132   : > { %v1367_v24 = vpack.c.bf16 %v1359_v61, %v1358_v53 }
 0x133   : > { %v1312_v11 = vpop.f32.mrf.mxu0  ;;  %v5806_v4 = vadd.f32 %v1310_v48, %v1206_v60 }
 0x136   : > { %v1044_v2 = vpop.f32.mrf.mxu2 }
 0x137   : > { %v1073_v43 = vadd.f32 %v1044_v2, %v939_v45  ;;  %v2168_v45 = vpack.c.bf16 %v5851_v16, %v5848_v13  ;;  %v4939_v2 = vld [vmem:[%s6503_s1 + $0x478] sm:$0xff] }
 0x138   : > { %v913_v7 = vpop.f32.mrf.mxu1  ;;  %v5820_v21 = vpop.f32.mrf.mxu3  ;;  %2507 = vmatpush.bf16.msrb.mxu1 %v4939_v2 }
 0x139   : > { %v1207_v1 = vadd.f32 %v5747_v9, %v1073_v43  ;;  %v940_v52 = vadd.f32 %v913_v7, %v5628_v44  ;;  %v1363_v7 = vld [vmem:[%s5139_s18 + $0x68] sm:$0xff] }
 0x13b   : > { %v1315_v5 = vpop.f32.mrf.mxu0  ;;  %1458 = vmatmul.bf16.gmra.mxu1 %v1367_v24  ;;  %1592 = vmatmul.bf16.gmra.mxu2 %v1501_v41  ;;  %v5822_v38 = vadd.f32 %v1312_v11, %v1207_v1  ;;  %v4947_v11 = vld [vmem:[%s6503_s1 + $0x4b8] sm:$0xff]  ;;  %v1369_v1 = vpack.c.bf16 %v1363_v7, %v1495_v3 }
 0x13c   : > { %2641 = vmatpush.bf16.msrb.mxu2 %v4947_v11  ;;  %v4963_v24 = vld [vmem:[%s6503_s1 + $0x538] sm:$0xff] }
 0x13d   : > { %1736 = vmatmul.bf16.gmra.mxu3 %v1637_v42  ;;  %2909 = vmatpush.bf16.msrb.mxu0 %v4963_v24  ;;  %v5887_v42 = vld [vmem:[%s5139_s18 + $0x34] sm:$0xff] }
 0x13e   : > { %1860 = vmatmul.bf16.gmra.mxu0 %v1769_v36  ;;  %v1047_v9 = vpop.f32.mrf.mxu2  ;;  %v1765_v36 = vld [vmem:[%s5139_s18 + $0x72] sm:$0xff] }
 0x13f   : > { %v1074_v44 = vadd.f32 %v1047_v9, %v940_v52 }
 0x140   : > { %v915_v28 = vpop.f32.mrf.mxu1  ;;  %v5838_v56 = vpop.f32.mrf.mxu3  ;;  %2642 = vmatpush.bf16.msrb.mxu2 %v4946_v58 }
 0x141   : > { %v1208_v59 = vadd.f32 %v5763_v10, %v1074_v44  ;;  %v941_v23 = vadd.f32 %v915_v28, %v5648_v14  ;;  %v1360_v10 = vld [vmem:[%s5139_s18 + $0x50] sm:$0xff]  ;;  %v1361_v14 = vld [vmem:[%s5139_s18 + $0x58] sm:$0xff]  ;;  %2910 = vmatpush.bf16.msrb.mxu0 %v4962_v15  ;;  %v4960_v15 = vld [vmem:[%s6503_s1 + $0x520] sm:$0xff] }
 0x142   : > { %v1368_v31 = vpack.c.bf16 %v1361_v14, %v1360_v10  ;;  %v1502_v46 = vpack.c.bf16 %v1495_v3, %v1361_v14 }
 0x143   : > { %v1317_v17 = vpop.f32.mrf.mxu0  ;;  %v5840_v27 = vadd.f32 %v1315_v5, %v1208_v59  ;;  %v4954_v59 = vld [vmem:[%s6503_s1 + $0x4f0] sm:$0xff] }
 0x146   : > { %v1049_v32 = vpop.f32.mrf.mxu2 }
 0x147   : > { %v1075_v35 = vadd.f32 %v1049_v32, %v941_v23  ;;  %v4945_v32 = vld [vmem:[%s6503_s1 + $0x4a8] sm:$0xff] }
 0x148   : > { %v918_v48 = vpop.f32.mrf.mxu1  ;;  %v5858_v60 = vpop.f32.mrf.mxu3  ;;  %2643 = vmatpush.bf16.msrb.mxu2 %v4945_v32 }
 0x149   : > { %v1209_v22 = vadd.f32 %v5786_v37, %v1075_v35  ;;  %v942_v62 = vadd.f32 %v918_v48, %v5663_v51  ;;  %v4955_v51 = vld [vmem:[%s6503_s1 + $0x4f8] sm:$0xff] }
 0x14a   : > { %2775 = vmatpush.bf16.msra.mxu3 %v4955_v51  ;;  %v2022_v48 = vld [vmem:[%s5139_s18 + $0x1c] sm:$0xff] }
 0x14b   : > { %v1320_v34 = vpop.f32.mrf.mxu0  ;;  %1463 = vmatmul.bf16.gmra.mxu1 %v1368_v31  ;;  %1597 = vmatmul.bf16.gmra.mxu2 %v1502_v46  ;;  %v5865_v57 = vadd.f32 %v1317_v17, %v1209_v22  ;;  %v2169_v17 = vpack.c.bf16 %v5890_v40, %v5887_v42  ;;  %v4953_v31 = vld [vmem:[%s6503_s1 + $0x4e8] sm:$0xff] }
 0x14c   : > { %v1889_v46 = vld [vmem:[%s5139_s18 + $0x23] sm:$0xff] }
 0x14d   : > { %2247 = vmatmul.bf16.vlgmr.msrb.gmra.mxu3 %v2168_v45  ;;  %v2034_v45 = vpack.c.bf16 %v5848_v13, %v2022_v48 }
 0x14e   : > { %1865 = vmatmul.bf16.gmra.mxu0 %v1770_v8  ;;  %v1052_v37 = vpop.f32.mrf.mxu2  ;;  %2776 = vmatpush.bf16.msra.mxu3 %v4954_v59  ;;  %v2290_v8 = vld [vmem:[%s5139_s18 + $0x25] sm:$0xff] }
 0x14f   : > { %v1076_v26 = vadd.f32 %v1052_v37, %v942_v62  ;;  %v2302_v51 = vpack.c.bf16 %v2291_v18, %v2290_v8  ;;  %v5931_v37 = vld [vmem:[%s5139_s18 + $0x44] sm:$0xff] }
 0x150   : > { %v920_v50 = vpop.f32.mrf.mxu1  ;;  %v5875_v43 = vpop.f32.mrf.mxu3 }
 0x151   : > { %v1210_v53 = vadd.f32 %v5801_v33, %v1076_v26  ;;  %v943_v61 = vadd.f32 %v920_v50, %v5686_v6  ;;  %v1497_v33 = vld [vmem:[%s5139_s18 + $0x70] sm:$0xff] }
 0x152   : > { %v1764_v6 = vld [vmem:[%s5139_s18 + $0x6a] sm:$0xff]  ;;  %v1503_v52 = vpack.c.bf16 %v1497_v33, %v1363_v7  ;;  %2777 = vmatpush.bf16.msra.mxu3 %v4953_v31 }
 0x153   : > { %v1322_v0 = vpop.f32.mrf.mxu0  ;;  %v5880_v41 = vadd.f32 %v1320_v34, %v1210_v53  ;;  %v1771_v12 = vpack.c.bf16 %v1765_v36, %v1764_v6  ;;  %v5934_v26 = vld [vmem:[%s5139_s18 + $0x4c] sm:$0xff] }
 0x154   : > { %v2170_v13 = vpack.c.bf16 %v5934_v26, %v5931_v37 }
 0x156   : > { %v1054_v47 = vpop.f32.mrf.mxu2 }
 0x157   : > { %v1077_v63 = vadd.f32 %v1054_v47, %v943_v61 }
 0x158   : > { %v923_v5 = vpop.f32.mrf.mxu1  ;;  %v5900_v23 = vpop.f32.mrf.mxu3 }
 0x159   : > { %v1211_v9 = vadd.f32 %v5820_v21, %v1077_v63  ;;  %v944_v44 = vadd.f32 %v923_v5, %v5701_v39  ;;  %v4938_v39 = vld [vmem:[%s6503_s1 + $0x470] sm:$0xff]  ;;  %v4944_v63 = vld [vmem:[%s6503_s1 + $0x4a0] sm:$0xff] }
 0x15a   : > { %2508 = vmatpush.bf16.msrb.mxu1 %v4938_v39  ;;  %2644 = vmatpush.bf16.msrb.mxu2 %v4944_v63  ;;  %v4950_v63 = vld [vmem:[%s6503_s1 + $0x4d0] sm:$0xff] }
 0x15b   : > { %v1325_v28 = vpop.f32.mrf.mxu0  ;;  %1468 = vmatmul.bf16.gmra.mxu1 %v1369_v1  ;;  %1602 = vmatmul.bf16.gmra.mxu2 %v1503_v52  ;;  %v5907_v21 = vadd.f32 %v1322_v0, %v1211_v9  ;;  %v4937_v0 = vld [vmem:[%s6503_s1 + $0x468] sm:$0xff]  ;;  %v4952_v1 = vld [vmem:[%s6503_s1 + $0x4e0] sm:$0xff]  ;;  %v2292_v9 = vld [vmem:[%s5139_s18 + $0x35] sm:$0xff] }
 0x15c   : > { %v4936_v52 = vld [vmem:[%s6503_s1 + $0x460] sm:$0xff]  ;;  %2778 = vmatpush.bf16.msra.mxu3 %v4952_v1 }
 0x15d   : > { %2252 = vmatmul.bf16.gmra.mxu3 %v2169_v17  ;;  %v2035_v17 = vpack.c.bf16 %v5887_v42, %v5851_v16  ;;  %v4943_v42 = vld [vmem:[%s6503_s1 + $0x498] sm:$0xff] }
 0x15e   : > { %1870 = vmatmul.bf16.gmra.mxu0 %v1771_v12  ;;  %v1057_v25 = vpop.f32.mrf.mxu2  ;;  %2509 = vmatpush.bf16.msrb.mxu1 %v4937_v0  ;;  %v1891_v12 = vld [vmem:[%s5139_s18 + $0x33] sm:$0xff]  ;;  %v2036_v0 = vpack.c.bf16 %v5931_v37, %v5890_v40 }
 0x15f   : > { %v1078_v20 = vadd.f32 %v1057_v25, %v944_v44  ;;  %v2293_v44 = vld [vmem:[%s5139_s18 + $0x3d] sm:$0xff]  ;;  %2645 = vmatpush.bf16.msrb.mxu2 %v4943_v42 }
 0x160   : > { %v925_v10 = vpop.f32.mrf.mxu1  ;;  %v5917_v35 = vpop.f32.mrf.mxu3  ;;  %v2303_v25 = vpack.c.bf16 %v2293_v44, %v2292_v9 }
 0x161   : > { %v1212_v14 = vadd.f32 %v5838_v56, %v1078_v20  ;;  %v945_v3 = vadd.f32 %v925_v10, %v5716_v29  ;;  %v1888_v56 = vld [vmem:[%s5139_s18 + $0x1b] sm:$0xff] }
 0x162   : > { %v1900_v34 = vpack.c.bf16 %v1889_v46, %v1888_v56  ;;  %2510 = vmatpush.bf16.msrb.mxu1 %v4936_v52  ;;  %v5972_v20 = vld [vmem:[%s5139_s18 + $0x54] sm:$0xff]  ;;  %v5975_v10 = vld [vmem:[%s5139_s18 + $0x5c] sm:$0xff] }
 0x163   : > { %v1327_v55 = vpop.f32.mrf.mxu0  ;;  %v5922_v29 = vadd.f32 %v1325_v28, %v1212_v14  ;;  %v2171_v16 = vpack.c.bf16 %v5975_v10, %v5972_v20 }
 0x166   : > { %v1059_v22 = vpop.f32.mrf.mxu2 }
 0x167   : > { %v1079_v62 = vadd.f32 %v1059_v22, %v945_v3  ;;  %v4935_v22 = vld [vmem:[%s6503_s1 + $0x458] sm:$0xff] }
 0x168   : > { %v928_v11 = vpop.f32.mrf.mxu1  ;;  %v5941_v2 = vpop.f32.mrf.mxu3  ;;  %2511 = vmatpush.bf16.msrb.mxu1 %v4935_v22 }
 0x169   : > { %v1213_v50 = vadd.f32 %v5858_v60, %v1079_v62  ;;  %v946_v53 = vadd.f32 %v928_v11, %v5734_v54  ;;  %v4961_v54 = vld [vmem:[%s6503_s1 + $0x528] sm:$0xff]  ;;  %v1892_v11 = vld [vmem:[%s5139_s18 + $0x3b] sm:$0xff] }
 0x16a   : > { %2911 = vmatpush.bf16.msrb.mxu0 %v4961_v54 }
 0x16b   : > { %v1330_v61 = vpop.f32.mrf.mxu0  ;;  %1979 = vmatmul.bf16.vlgmr.msra.gmra.mxu1 %v1900_v34  ;;  %2113 = vmatmul.bf16.vlgmr.msra.gmra.mxu2 %v2034_v45  ;;  %v5945_v24 = vadd.f32 %v1327_v55, %v1213_v50  ;;  %v4959_v34 = vld [vmem:[%s6503_s1 + $0x518] sm:$0xff] }
 0x16d   : > { %2257 = vmatmul.bf16.gmra.mxu3 %v2170_v13 }
 0x16e   : > { %2381 = vmatmul.bf16.vlgmr.msra.gmra.mxu0 %v2302_v51  ;;  %v1062_v60 = vpop.f32.mrf.mxu2  ;;  %v2295_v51 = vld [vmem:[%s5139_s18 + $0x4d] sm:$0xff] }
 0x16f   : > { %v1080_v7 = vadd.f32 %v1062_v60, %v946_v53  ;;  %2912 = vmatpush.bf16.msrb.mxu0 %v4960_v15  ;;  %v6013_v60 = vld [vmem:[%s5139_s18 + $0x64] sm:$0xff] }
 0x170   : > { %v930_v33 = vpop.f32.mrf.mxu1  ;;  %v5961_v5 = vpop.f32.mrf.mxu3 }
 0x171   : > { %v1214_v6 = vadd.f32 %v5875_v43, %v1080_v7  ;;  %v947_v36 = vadd.f32 %v930_v33, %v5753_v49  ;;  %v1890_v43 = vld [vmem:[%s5139_s18 + $0x2b] sm:$0xff] }
 0x172   : > { %v1901_v59 = vpack.c.bf16 %v1891_v12, %v1890_v43  ;;  %v6016_v7 = vld [vmem:[%s5139_s18 + $0x6c] sm:$0xff] }
 0x173   : > { %v1332_v47 = vpop.f32.mrf.mxu0  ;;  %v5963_v49 = vadd.f32 %v1330_v61, %v1214_v6  ;;  %2913 = vmatpush.bf16.msrb.mxu0 %v4959_v34  ;;  %v2172_v37 = vpack.c.bf16 %v6016_v7, %v6013_v60 }
 0x176   : > { %v1064_v28 = vpop.f32.mrf.mxu2 }
 0x177   : > { %v1081_v58 = vadd.f32 %v1064_v28, %v947_v36  ;;  %v4958_v28 = vld [vmem:[%s6503_s1 + $0x510] sm:$0xff] }
 0x178   : > { %v933_v39 = vpop.f32.mrf.mxu1  ;;  %v5982_v32 = vpop.f32.mrf.mxu3  ;;  %2914 = vmatpush.bf16.msrb.mxu0 %v4958_v28 }
 0x179   : > { %v1215_v14 = vadd.f32 %v5900_v23, %v1081_v58  ;;  %v948_v3 = vadd.f32 %v933_v39, %v5768_v19  ;;  %v4951_v19 = vld [vmem:[%s6503_s1 + $0x4d8] sm:$0xff]  ;;  %v4941_v58 = vld [vmem:[%s6503_s1 + $0x488] sm:$0xff] }
 0x17a   : > { %2779 = vmatpush.bf16.msra.mxu3 %v4951_v19  ;;  %v1895_v39 = vld [vmem:[%s5139_s18 + $0x53] sm:$0xff] }
 0x17b   : > { %v1335_v55 = vpop.f32.mrf.mxu0  ;;  %1984 = vmatmul.bf16.gmra.mxu1 %v1901_v59  ;;  %2118 = vmatmul.bf16.gmra.mxu2 %v2035_v17  ;;  %v5989_v31 = vadd.f32 %v1332_v47, %v1215_v14  ;;  %v4942_v47 = vld [vmem:[%s6503_s1 + $0x490] sm:$0xff]  ;;  %v4949_v17 = vld [vmem:[%s6503_s1 + $0x4c8] sm:$0xff]  ;;  %v2297_v14 = vld [vmem:[%s5139_s18 + $0x5d] sm:$0xff] }
 0x17c   : > { %2646 = vmatpush.bf16.msrb.mxu2 %v4942_v47 }
 0x17d   : > { %2262 = vmatmul.bf16.gmra.mxu3 %v2171_v16  ;;  %v2037_v16 = vpack.c.bf16 %v5972_v20, %v5934_v26 }
 0x17e   : > { %2386 = vmatmul.bf16.gmra.mxu0 %v2303_v25  ;;  %v1067_v23 = vpop.f32.mrf.mxu2  ;;  %2780 = vmatpush.bf16.msra.mxu3 %v4950_v63  ;;  %v2296_v25 = vld [vmem:[%s5139_s18 + $0x55] sm:$0xff]  ;;  %v2038_v63 = vpack.c.bf16 %v6013_v60, %v5975_v10 }
 0x17f   : > { %v1082_v56 = vadd.f32 %v1067_v23, %v948_v3  ;;  %v2305_v19 = vpack.c.bf16 %v2297_v14, %v2296_v25  ;;  %v6060_v23 = vld [vmem:[%s5139_s18 + $0x74] sm:$0xff] }
 0x180   : > { %v935_v46 = vpop.f32.mrf.mxu1  ;;  %v5999_v62 = vpop.f32.mrf.mxu3  ;;  %2647 = vmatpush.bf16.msrb.mxu2 %v4941_v58  ;;  %v4979_v60 = vld [vmem:[%s6503_s1 + $0x5b8] sm:$0xff] }
 0x181   : > { %v1216_v48 = vadd.f32 %v5917_v35, %v1082_v56  ;;  %v949_v8 = vadd.f32 %v935_v46, %v5791_v30  ;;  %v1893_v35 = vld [vmem:[%s5139_s18 + $0x43] sm:$0xff] }
 0x182   : > { %v2294_v30 = vld [vmem:[%s5139_s18 + $0x45] sm:$0xff]  ;;  %v1902_v61 = vpack.c.bf16 %v1893_v35, %v1892_v11  ;;  %2781 = vmatpush.bf16.msra.mxu3 %v4949_v17  ;;  %v2167_v56 = vld [vmem:[%s5139_s18 + $0x7c] sm:$0xff] }
 0x183   : > { %v1337_v18 = vpop.f32.mrf.mxu0  ;;  %v6004_v45 = vadd.f32 %v1335_v55, %v1216_v48  ;;  %v2304_v54 = vpack.c.bf16 %v2295_v51, %v2294_v30  ;;  %v2173_v26 = vpack.c.bf16 %v2167_v56, %v6060_v23  ;;  %v4948_v35 = vld [vmem:[%s6503_s1 + $0x4c0] sm:$0xff] }
 0x184   : > { %v2301_v56 = vld [vmem:[%s5139_s18 + $0x7d] sm:$0xff] }
 0x186   : > { %v1069_v50 = vpop.f32.mrf.mxu2  ;;  %2782 = vmatpush.bf16.msra.mxu3 %v4948_v35 }
 0x187   : > { %v1083_v53 = vadd.f32 %v1069_v50, %v949_v8 }
 0x188   : > { %v1444_v13 = vpop.f32.mrf.mxu1  ;;  %v6026_v40 = vpop.f32.mrf.mxu3 }
 0x189   : > { %v1217_v33 = vadd.f32 %v5941_v2, %v1083_v53  ;;  %v1474_v6 = vadd.f32 %v1444_v13, %v5806_v4  ;;  %v4934_v4 = vld [vmem:[%s6503_s1 + $0x450] sm:$0xff]  ;;  %v4940_v53 = vld [vmem:[%s6503_s1 + $0x480] sm:$0xff] }
 0x18a   : > { %2512 = vmatpush.bf16.msrb.mxu1 %v4934_v4  ;;  %2648 = vmatpush.bf16.msrb.mxu2 %v4940_v53 }
 0x18b   : > { %v1846_v36 = vpop.f32.mrf.mxu0  ;;  %1989 = vmatmul.bf16.gmra.mxu1 %v1902_v61  ;;  %2123 = vmatmul.bf16.gmra.mxu2 %v2036_v0  ;;  %v6033_v2 = vadd.f32 %v1337_v18, %v1217_v33  ;;  %v4933_v18 = vld [vmem:[%s6503_s1 + $0x448] sm:$0xff]  ;;  %v4932_v61 = vld [vmem:[%s6503_s1 + $0x440] sm:$0xff] }
 0x18c   : > { %v2299_v33 = vld [vmem:[%s5139_s18 + $0x6d] sm:$0xff] }
 0x18d   : > { %2267 = vmatmul.bf16.gmra.mxu3 %v2172_v37 }
 0x18e   : > { %2391 = vmatmul.bf16.gmra.mxu0 %v2304_v54  ;;  %v1578_v1 = vpop.f32.mrf.mxu2  ;;  %2513 = vmatpush.bf16.msrb.mxu1 %v4933_v18  ;;  %v2298_v54 = vld [vmem:[%s5139_s18 + $0x65] sm:$0xff]  ;;  %v2039_v18 = vpack.c.bf16 %v6060_v23, %v6016_v7 }
 0x18f   : > { %v1608_v52 = vadd.f32 %v1578_v1, %v1474_v6  ;;  %v2306_v4 = vpack.c.bf16 %v2299_v33, %v2298_v54  ;;  %v2692_v1 = vld [vmem:[%s5139_s18 + $0x28] sm:$0xff]  ;;  %3177 = vmatpush.bf16.msra.mxu2 %v4979_v60 }
 0x190   : > { %v1446_v43 = vpop.f32.mrf.mxu1  ;;  %v6043_v59 = vpop.f32.mrf.mxu3 }
 0x191   : > { %v1742_v12 = vadd.f32 %v5961_v5, %v1608_v52  ;;  %v1475_v9 = vadd.f32 %v1446_v43, %v5822_v38  ;;  %v6051_v5 = vld [vmem:[%s5139_s18 + $0x4b] sm:$0xff]  ;;  %v4956_v43 = vld [vmem:[%s6503_s1 + $0x500] sm:$0xff] }
 0x192   : > { %v1903_v15 = vpack.c.bf16 %v1895_v39, %v6051_v5  ;;  %2514 = vmatpush.bf16.msrb.mxu1 %v4932_v61  ;;  %v6105_v52 = vld [vmem:[%s5139_s18 + $0x30] sm:$0xff] }
 0x193   : > { %v1848_v44 = vpop.f32.mrf.mxu0  ;;  %v6048_v38 = vadd.f32 %v1846_v36, %v1742_v12  ;;  %v2704_v10 = vpack.c.bf16 %v6105_v52, %v2692_v1  ;;  %v2424_v1 = vld [vmem:[%s5139_s18 + $0x26] sm:$0xff] }
 0x196   : > { %v1580_v3 = vpop.f32.mrf.mxu2 }
 0x197   : > { %v1609_v55 = vadd.f32 %v1580_v3, %v1475_v9 }
 0x198   : > { %v1449_v42 = vpop.f32.mrf.mxu1  ;;  %v6068_v22 = vpop.f32.mrf.mxu3 }
 0x199   : > { %v1743_v46 = vadd.f32 %v5982_v32, %v1609_v55  ;;  %v1476_v48 = vadd.f32 %v1449_v42, %v5840_v27  ;;  %v4957_v32 = vld [vmem:[%s6503_s1 + $0x508] sm:$0xff]  ;;  %v4971_v55 = vld [vmem:[%s6503_s1 + $0x578] sm:$0xff] }
 0x19a   : > { %2915 = vmatpush.bf16.msrb.mxu0 %v4957_v32  ;;  %3043 = vmatpush.bf16.msra.mxu1 %v4971_v55  ;;  %v2829_v55 = vld [vmem:[%s5139_s18 + $0x48] sm:$0xff] }
 0x19b   : > { %v1851_v8 = vpop.f32.mrf.mxu0  ;;  %1994 = vmatmul.bf16.gmra.mxu1 %v1903_v15  ;;  %2128 = vmatmul.bf16.gmra.mxu2 %v2037_v16  ;;  %v6071_v20 = vadd.f32 %v1848_v44, %v1743_v46  ;;  %v4995_v15 = vld [vmem:[%s6503_s1 + $0x638] sm:$0xff] }
 0x19d   : > { %2272 = vmatmul.bf16.gmra.mxu3 %v2173_v26 }
 0x19e   : > { %2396 = vmatmul.bf16.gmra.mxu0 %v2305_v19  ;;  %v1583_v27 = vpop.f32.mrf.mxu2  ;;  %v6136_v19 = vld [vmem:[%s5139_s18 + $0x6b] sm:$0xff] }
 0x19f   : > { %v1610_v34 = vadd.f32 %v1583_v27, %v1476_v48  ;;  %2916 = vmatpush.bf16.msrb.mxu0 %v4956_v43  ;;  %v6148_v27 = vld [vmem:[%s5139_s18 + $0x40] sm:$0xff] }
 0x1a0   : > { %v1451_v11 = vpop.f32.mrf.mxu1  ;;  %v6087_v0 = vpop.f32.mrf.mxu3  ;;  %v2558_v43 = vld [vmem:[%s5139_s18 + $0x27] sm:$0xff] }
 0x1a1   : > { %v1744_v30 = vadd.f32 %v5999_v62, %v1610_v34  ;;  %v1477_v51 = vadd.f32 %v1451_v11, %v5865_v57  ;;  %v6092_v62 = vld [vmem:[%s5139_s18 + $0x5b] sm:$0xff]  ;;  %v6095_v57 = vld [vmem:[%s5139_s18 + $0x63] sm:$0xff] }
 0x1a2   : > { %v1904_v47 = vpack.c.bf16 %v6095_v57, %v6092_v62 }
 0x1a3   : > { %v1853_v50 = vpop.f32.mrf.mxu0  ;;  %v6089_v13 = vadd.f32 %v1851_v8, %v1744_v30  ;;  %3445 = vmatpush.bf16.msra.mxu0 %v4995_v15  ;;  %v4978_v30 = vld [vmem:[%s6503_s1 + $0x5b0] sm:$0xff] }
 0x1a4   : > { %3178 = vmatpush.bf16.msra.mxu2 %v4978_v30  ;;  %v2560_v30 = vld [vmem:[%s5139_s18 + $0x37] sm:$0xff] }
 0x1a6   : > { %v1585_v6 = vpop.f32.mrf.mxu2 }
 0x1a7   : > { %v1611_v36 = vadd.f32 %v1585_v6, %v1477_v51  ;;  %v4986_v51 = vld [vmem:[%s6503_s1 + $0x5f0] sm:$0xff] }
 0x1a8   : > { %v1454_v37 = vpop.f32.mrf.mxu1  ;;  %v6112_v28 = vpop.f32.mrf.mxu3 }
 0x1a9   : > { %v1745_v12 = vadd.f32 %v6026_v40, %v1611_v36  ;;  %v1478_v9 = vadd.f32 %v1454_v37, %v5880_v41  ;;  %v4987_v40 = vld [vmem:[%s6503_s1 + $0x5f8] sm:$0xff] }
 0x1aa   : > { %3311 = vmatpush.bf16.msrb.mxu3 %v4987_v40 }
 0x1ab   : > { %v1856_v44 = vpop.f32.mrf.mxu0  ;;  %1999 = vmatmul.bf16.gmra.mxu1 %v1904_v47  ;;  %2133 = vmatmul.bf16.gmra.mxu2 %v2038_v63  ;;  %v6118_v58 = vadd.f32 %v1853_v50, %v1745_v12  ;;  %v2827_v50 = vld [vmem:[%s5139_s18 + $0x38] sm:$0xff]  ;;  %v4994_v47 = vld [vmem:[%s6503_s1 + $0x630] sm:$0xff]  ;;  %v4977_v63 = vld [vmem:[%s6503_s1 + $0x5a8] sm:$0xff] }
 0x1ac   : > { %v2705_v7 = vpack.c.bf16 %v6148_v27, %v2827_v50  ;;  %3446 = vmatpush.bf16.msra.mxu0 %v4994_v47  ;;  %3179 = vmatpush.bf16.msra.mxu2 %v4977_v63  ;;  %v2559_v12 = vld [vmem:[%s5139_s18 + $0x2f] sm:$0xff]  ;;  %v4992_v63 = vld [vmem:[%s6503_s1 + $0x620] sm:$0xff] }
 0x1ad   : > { %2783 = vmatmul.bf16.vlgmr.msra.gmra.mxu3 %v2704_v10  ;;  %v2570_v60 = vpack.c.bf16 %v2559_v12, %v2558_v43 }
 0x1ae   : > { %2401 = vmatmul.bf16.gmra.mxu0 %v2306_v4  ;;  %v1588_v41 = vpop.f32.mrf.mxu2  ;;  %3312 = vmatpush.bf16.msrb.mxu3 %v4986_v51  ;;  %v4985_v4 = vld [vmem:[%s6503_s1 + $0x5e8] sm:$0xff]  ;;  %v2561_v51 = vld [vmem:[%s5139_s18 + $0x3f] sm:$0xff] }
 0x1af   : > { %v1612_v17 = vadd.f32 %v1588_v41, %v1478_v9  ;;  %v2838_v41 = vpack.c.bf16 %v2827_v50, %v6105_v52 }
 0x1b0   : > { %v1456_v39 = vpop.f32.mrf.mxu1  ;;  %v6131_v16 = vpop.f32.mrf.mxu3 }
 0x1b1   : > { %v1746_v25 = vadd.f32 %v6043_v59, %v1612_v17  ;;  %v1479_v14 = vadd.f32 %v1456_v39, %v5907_v21  ;;  %v6139_v21 = vld [vmem:[%s5139_s18 + $0x73] sm:$0xff] }
 0x1b2   : > { %v2300_v59 = vld [vmem:[%s5139_s18 + $0x75] sm:$0xff]  ;;  %v1905_v8 = vpack.c.bf16 %v6139_v21, %v6136_v19  ;;  %3313 = vmatpush.bf16.msrb.mxu3 %v4985_v4 }
 0x1b3   : > { %v1858_v3 = vpop.f32.mrf.mxu0  ;;  %v6133_v42 = vadd.f32 %v1856_v44, %v1746_v25  ;;  %v2307_v32 = vpack.c.bf16 %v2301_v56, %v2300_v59  ;;  %v6188_v17 = vld [vmem:[%s5139_s18 + $0x50] sm:$0xff]  ;;  %v2831_v4 = vld [vmem:[%s5139_s18 + $0x58] sm:$0xff] }
 0x1b4   : > { %v2706_v59 = vpack.c.bf16 %v6188_v17, %v2829_v55 }
 0x1b6   : > { %v1590_v46 = vpop.f32.mrf.mxu2 }
 0x1b7   : > { %v1613_v48 = vadd.f32 %v1590_v46, %v1479_v14 }
 0x1b8   : > { %v1459_v26 = vpop.f32.mrf.mxu1  ;;  %v6159_v53 = vpop.f32.mrf.mxu3 }
 0x1b9   : > { %v1747_v34 = vadd.f32 %v6068_v22, %v1613_v48  ;;  %v1480_v11 = vadd.f32 %v1459_v26, %v5922_v29  ;;  %v4970_v29 = vld [vmem:[%s6503_s1 + $0x570] sm:$0xff]  ;;  %v4976_v26 = vld [vmem:[%s6503_s1 + $0x5a0] sm:$0xff] }
 0x1ba   : > { %3044 = vmatpush.bf16.msra.mxu1 %v4970_v29  ;;  %3180 = vmatpush.bf16.msra.mxu2 %v4976_v26 }
 0x1bb   : > { %v1861_v35 = vpop.f32.mrf.mxu0  ;;  %2004 = vmatmul.bf16.gmra.mxu1 %v1905_v8  ;;  %2138 = vmatmul.bf16.gmra.mxu2 %v2039_v18  ;;  %v6165_v23 = vadd.f32 %v1858_v3, %v1747_v34  ;;  %v4969_v3 = vld [vmem:[%s6503_s1 + $0x568] sm:$0xff]  ;;  %v4968_v34 = vld [vmem:[%s6503_s1 + $0x560] sm:$0xff] }
 0x1bd   : > { %2788 = vmatmul.bf16.gmra.mxu3 %v2705_v7 }
 0x1be   : > { %2406 = vmatmul.bf16.gmra.mxu0 %v2307_v32  ;;  %v1593_v22 = vpop.f32.mrf.mxu2  ;;  %3045 = vmatpush.bf16.msra.mxu1 %v4969_v3  ;;  %v4984_v32 = vld [vmem:[%s6503_s1 + $0x5e0] sm:$0xff]  ;;  %v2563_v3 = vld [vmem:[%s5139_s18 + $0x4f] sm:$0xff] }
 0x1bf   : > { %v1614_v61 = vadd.f32 %v1593_v22, %v1480_v11  ;;  %3314 = vmatpush.bf16.msrb.mxu3 %v4984_v32  ;;  %v2571_v22 = vpack.c.bf16 %v2561_v51, %v2560_v30  ;;  %v4974_v32 = vld [vmem:[%s6503_s1 + $0x590] sm:$0xff] }
 0x1c0   : > { %v1461_v54 = vpop.f32.mrf.mxu1  ;;  %v6175_v37 = vpop.f32.mrf.mxu3 }
 0x1c1   : > { %v1748_v33 = vadd.f32 %v6087_v0, %v1614_v61  ;;  %v1481_v6 = vadd.f32 %v1461_v54, %v5945_v24  ;;  %v2425_v0 = vld [vmem:[%s5139_s18 + $0x2e] sm:$0xff]  ;;  %v2839_v54 = vpack.c.bf16 %v2829_v55, %v6148_v27  ;;  %v4975_v27 = vld [vmem:[%s6503_s1 + $0x598] sm:$0xff] }
 0x1c2   : > { %v2436_v10 = vpack.c.bf16 %v2425_v0, %v2424_v1  ;;  %3046 = vmatpush.bf16.msra.mxu1 %v4968_v34  ;;  %3181 = vmatpush.bf16.msra.mxu2 %v4975_v27  ;;  %v4982_v34 = vld [vmem:[%s6503_s1 + $0x5d0] sm:$0xff] }
 0x1c3   : > { %v1863_v36 = vpop.f32.mrf.mxu0  ;;  %v6181_v24 = vadd.f32 %v1861_v35, %v1748_v33  ;;  %v2426_v35 = vld [vmem:[%s5139_s18 + $0x36] sm:$0xff]  ;;  %v6225_v33 = vld [vmem:[%s5139_s18 + $0x60] sm:$0xff] }
 0x1c4   : > { %v2707_v0 = vpack.c.bf16 %v6225_v33, %v2831_v4 }
 0x1c6   : > { %v1595_v9 = vpop.f32.mrf.mxu2  ;;  %3182 = vmatpush.bf16.msra.mxu2 %v4974_v32 }
 0x1c7   : > { %v1615_v44 = vadd.f32 %v1595_v9, %v1481_v6 }
 0x1c8   : > { %v1464_v40 = vpop.f32.mrf.mxu1  ;;  %v6196_v15 = vpop.f32.mrf.mxu3 }
 0x1c9   : > { %v1749_v39 = vadd.f32 %v6112_v28, %v1615_v44  ;;  %v1482_v25 = vadd.f32 %v1464_v40, %v5963_v49  ;;  %v4993_v49 = vld [vmem:[%s6503_s1 + $0x628] sm:$0xff]  ;;  %v4967_v40 = vld [vmem:[%s6503_s1 + $0x558] sm:$0xff] }
 0x1ca   : > { %3447 = vmatpush.bf16.msra.mxu0 %v4993_v49  ;;  %3047 = vmatpush.bf16.msra.mxu1 %v4967_v40 }
 0x1cb   : > { %v1866_v14 = vpop.f32.mrf.mxu0  ;;  %2515 = vmatmul.bf16.vlgmr.msrb.gmra.mxu1 %v2436_v10  ;;  %2649 = vmatmul.bf16.vlgmr.msrb.gmra.mxu2 %v2570_v60  ;;  %v6199_v56 = vadd.f32 %v1863_v36, %v1749_v39 }
 0x1cd   : > { %2793 = vmatmul.bf16.gmra.mxu3 %v2706_v59 }
 0x1ce   : > { %2917 = vmatmul.bf16.vlgmr.msrb.gmra.mxu0 %v2838_v41  ;;  %v1598_v52 = vpop.f32.mrf.mxu2  ;;  %v4991_v41 = vld [vmem:[%s6503_s1 + $0x618] sm:$0xff] }
 0x1cf   : > { %v1616_v28 = vadd.f32 %v1598_v52, %v1482_v25  ;;  %3448 = vmatpush.bf16.msra.mxu0 %v4992_v63  ;;  %v2428_v25 = vld [vmem:[%s5139_s18 + $0x46] sm:$0xff]  ;;  %v2564_v63 = vld [vmem:[%s5139_s18 + $0x57] sm:$0xff] }
 0x1d0   : > { %v1466_v46 = vpop.f32.mrf.mxu1  ;;  %v6215_v11 = vpop.f32.mrf.mxu3 }
 0x1d1   : > { %v1750_v48 = vadd.f32 %v6131_v16, %v1616_v28  ;;  %v1483_v8 = vadd.f32 %v1466_v46, %v5989_v31  ;;  %v2427_v16 = vld [vmem:[%s5139_s18 + $0x3e] sm:$0xff]  ;;  %v2840_v46 = vpack.c.bf16 %v2831_v4, %v6188_v17 }
 0x1d2   : > { %v2437_v29 = vpack.c.bf16 %v2427_v16, %v2426_v35  ;;  %v2833_v35 = vld [vmem:[%s5139_s18 + $0x68] sm:$0xff]  ;;  %v2565_v4 = vld [vmem:[%s5139_s18 + $0x5f] sm:$0xff] }
 0x1d3   : > { %v1868_v18 = vpop.f32.mrf.mxu0  ;;  %v6218_v31 = vadd.f32 %v1866_v14, %v1750_v48  ;;  %3449 = vmatpush.bf16.msra.mxu0 %v4991_v41  ;;  %v6262_v48 = vld [vmem:[%s5139_s18 + $0x70] sm:$0xff]  ;;  %v4965_v41 = vld [vmem:[%s6503_s1 + $0x548] sm:$0xff] }
 0x1d4   : > { %v2708_v17 = vpack.c.bf16 %v6262_v48, %v2833_v35 }
 0x1d6   : > { %v1600_v50 = vpop.f32.mrf.mxu2 }
 0x1d7   : > { %v1617_v7 = vadd.f32 %v1600_v50, %v1483_v8 }
 0x1d8   : > { %v1469_v61 = vpop.f32.mrf.mxu1  ;;  %v6233_v1 = vpop.f32.mrf.mxu3 }
 0x1d9   : > { %v1751_v6 = vadd.f32 %v6159_v53, %v1617_v7  ;;  %v1484_v36 = vadd.f32 %v1469_v61, %v6004_v45  ;;  %v4983_v45 = vld [vmem:[%s6503_s1 + $0x5d8] sm:$0xff]  ;;  %v4990_v61 = vld [vmem:[%s6503_s1 + $0x610] sm:$0xff] }
 0x1da   : > { %3315 = vmatpush.bf16.msrb.mxu3 %v4983_v45  ;;  %3450 = vmatpush.bf16.msra.mxu0 %v4990_v61 }
 0x1db   : > { %v1871_v47 = vpop.f32.mrf.mxu0  ;;  %2520 = vmatmul.bf16.gmra.mxu1 %v2437_v29  ;;  %2654 = vmatmul.bf16.gmra.mxu2 %v2571_v22  ;;  %v6239_v43 = vadd.f32 %v1868_v18, %v1751_v6 }
 0x1dd   : > { %2798 = vmatmul.bf16.gmra.mxu3 %v2707_v0 }
 0x1de   : > { %2922 = vmatmul.bf16.gmra.mxu0 %v2839_v54  ;;  %v1603_v53 = vpop.f32.mrf.mxu2  ;;  %3316 = vmatpush.bf16.msrb.mxu3 %v4982_v34  ;;  %v4973_v54 = vld [vmem:[%s6503_s1 + $0x588] sm:$0xff] }
 0x1df   : > { %v1618_v12 = vadd.f32 %v1603_v53, %v1484_v36  ;;  %v4981_v36 = vld [vmem:[%s6503_s1 + $0x5c8] sm:$0xff]  ;;  %3183 = vmatpush.bf16.msra.mxu2 %v4973_v54  ;;  %v2573_v53 = vpack.c.bf16 %v2565_v4, %v2564_v63 }
 0x1e0   : > { %v1471_v9 = vpop.f32.mrf.mxu1  ;;  %v6252_v39 = vpop.f32.mrf.mxu3  ;;  %v2567_v34 = vld [vmem:[%s5139_s18 + $0x6f] sm:$0xff] }
 0x1e1   : > { %v1752_v44 = vadd.f32 %v6175_v37, %v1618_v12  ;;  %v1485_v10 = vadd.f32 %v1471_v9, %v6033_v2  ;;  %v2429_v37 = vld [vmem:[%s5139_s18 + $0x4e] sm:$0xff]  ;;  %v2841_v9 = vpack.c.bf16 %v2833_v35, %v6225_v33 }
 0x1e2   : > { %v2562_v2 = vld [vmem:[%s5139_s18 + $0x47] sm:$0xff]  ;;  %v2438_v49 = vpack.c.bf16 %v2429_v37, %v2428_v25  ;;  %3317 = vmatpush.bf16.msrb.mxu3 %v4981_v36  ;;  %v2835_v25 = vld [vmem:[%s5139_s18 + $0x78] sm:$0xff] }
 0x1e3   : > { %v1873_v60 = vpop.f32.mrf.mxu0  ;;  %v6255_v14 = vadd.f32 %v1871_v47, %v1752_v44  ;;  %v2572_v52 = vpack.c.bf16 %v2563_v3, %v2562_v2  ;;  %v2430_v47 = vld [vmem:[%s5139_s18 + $0x56] sm:$0xff]  ;;  %v6302_v44 = vld [vmem:[%s5139_s18 + $0x80] sm:$0xff] }
 0x1e4   : > { %v2709_v2 = vpack.c.bf16 %v6302_v44, %v2835_v25 }
 0x1e6   : > { %v1605_v55 = vpop.f32.mrf.mxu2 }
 0x1e7   : > { %v1619_v59 = vadd.f32 %v1605_v55, %v1485_v10 }
 0x1e8   : > { %v1980_v28 = vpop.f32.mrf.mxu1  ;;  %v6273_v16 = vpop.f32.mrf.mxu3 }
 0x1e9   : > { %v1753_v8 = vadd.f32 %v6196_v15, %v1619_v59  ;;  %v2010_v18 = vadd.f32 %v1980_v28, %v6048_v38  ;;  %v4966_v38 = vld [vmem:[%s6503_s1 + $0x550] sm:$0xff]  ;;  %v4980_v59 = vld [vmem:[%s6503_s1 + $0x5c0] sm:$0xff] }
 0x1ea   : > { %3048 = vmatpush.bf16.msra.mxu1 %v4966_v38  ;;  %3318 = vmatpush.bf16.msrb.mxu3 %v4980_v59 }
 0x1eb   : > { %v2382_v26 = vpop.f32.mrf.mxu0  ;;  %2525 = vmatmul.bf16.gmra.mxu1 %v2438_v49  ;;  %2659 = vmatmul.bf16.gmra.mxu2 %v2572_v52  ;;  %v6279_v15 = vadd.f32 %v1873_v60, %v1753_v8  ;;  %v4964_v8 = vld [vmem:[%s6503_s1 + $0x540] sm:$0xff] }
 0x1ed   : > { %2803 = vmatmul.bf16.gmra.mxu3 %v2708_v17 }
 0x1ee   : > { %2927 = vmatmul.bf16.gmra.mxu0 %v2840_v46  ;;  %v2114_v30 = vpop.f32.mrf.mxu2  ;;  %3049 = vmatpush.bf16.msra.mxu1 %v4965_v41  ;;  %v4972_v46 = vld [vmem:[%s6503_s1 + $0x580] sm:$0xff] }
 0x1ef   : > { %v2144_v51 = vadd.f32 %v2114_v30, %v2010_v18  ;;  %3184 = vmatpush.bf16.msra.mxu2 %v4972_v46 }
 0x1f0   : > { %v1982_v50 = vpop.f32.mrf.mxu1  ;;  %v6289_v6 = vpop.f32.mrf.mxu3 }
 0x1f1   : > { %v2278_v7 = vadd.f32 %v6215_v11, %v2144_v51  ;;  %v2011_v29 = vadd.f32 %v1982_v50, %v6071_v20  ;;  %v2431_v11 = vld [vmem:[%s5139_s18 + $0x5e] sm:$0xff]  ;;  %v2842_v50 = vpack.c.bf16 %v2835_v25, %v6262_v48 }
 0x1f2   : > { %v2439_v45 = vpack.c.bf16 %v2431_v11, %v2430_v47  ;;  %3050 = vmatpush.bf16.msra.mxu1 %v4964_v8 }
 0x1f3   : > { %v2384_v22 = vpop.f32.mrf.mxu0  ;;  %v6295_v20 = vadd.f32 %v2382_v26, %v2278_v7  ;;  %v2432_v26 = vld [vmem:[%s5139_s18 + $0x66] sm:$0xff]  ;;  %v3228_v7 = vld [vmem:[%s5139_s18 + $0x33] sm:$0xff] }
 0x1f6   : > { %v2116_v0 = vpop.f32.mrf.mxu2 }
 0x1f7   : > { %v2145_v27 = vadd.f32 %v2116_v0, %v2011_v29  ;;  %v3229_v29 = vld [vmem:[%s5139_s18 + $0x3b] sm:$0xff] }
 0x1f8   : > { %v1985_v12 = vpop.f32.mrf.mxu1  ;;  %v6310_v37 = vpop.f32.mrf.mxu3  ;;  %v3240_v48 = vpack.c.bf16 %v3229_v29, %v3228_v7 }
 0x1f9   : > { %v2279_v10 = vadd.f32 %v6233_v1, %v2145_v27  ;;  %v2012_v60 = vadd.f32 %v1985_v12, %v6089_v13  ;;  %v4989_v13 = vld [vmem:[%s6503_s1 + $0x608] sm:$0xff] }
 0x1fa   : > { %3451 = vmatpush.bf16.msra.mxu0 %v4989_v13 }
 0x1fb   : > { %v2387_v40 = vpop.f32.mrf.mxu0  ;;  %2530 = vmatmul.bf16.gmra.mxu1 %v2439_v45  ;;  %2664 = vmatmul.bf16.gmra.mxu2 %v2573_v53  ;;  %v6313_v3 = vadd.f32 %v2384_v22, %v2279_v10  ;;  %v4988_v22 = vld [vmem:[%s6503_s1 + $0x600] sm:$0xff]  ;;  %v2434_v53 = vld [vmem:[%s5139_s18 + $0x76] sm:$0xff] }
 0x1fc   : > { %v2568_v10 = vld [vmem:[%s5139_s18 + $0x77] sm:$0xff] }
 0x1fd   : > { %2808 = vmatmul.bf16.gmra.mxu3 %v2709_v2 }
 0x1fe   : > { %2932 = vmatmul.bf16.gmra.mxu0 %v2841_v9  ;;  %v2119_v33 = vpop.f32.mrf.mxu2  ;;  %v2435_v9 = vld [vmem:[%s5139_s18 + $0x7e] sm:$0xff] }
 0x1ff   : > { %v2146_v1 = vadd.f32 %v2119_v33, %v2012_v60  ;;  %3452 = vmatpush.bf16.msra.mxu0 %v4988_v22  ;;  %v2569_v60 = vld [vmem:[%s5139_s18 + $0x7f] sm:$0xff]  ;;  %v2441_v2 = vpack.c.bf16 %v2435_v9, %v2434_v53 }
 0x200   : > { %v1987_v55 = vpop.f32.mrf.mxu1  ;;  %v2263_v18 = vpop.f32.mrf.mxu3  ;;  %v2575_v13 = vpack.c.bf16 %v2569_v60, %v2568_v10  ;;  %v2962_v9 = vld [vmem:[%s5139_s18 + $0x41] sm:$0xff]  ;;  %v2963_v60 = vld [vmem:[%s5139_s18 + $0x49] sm:$0xff] }
 0x201   : > { %v2280_v49 = vadd.f32 %v6252_v39, %v2146_v1  ;;  %v2013_v52 = vadd.f32 %v1987_v55, %v6118_v58  ;;  %v2433_v39 = vld [vmem:[%s5139_s18 + $0x6e] sm:$0xff] }
 0x202   : > { %v2566_v58 = vld [vmem:[%s5139_s18 + $0x67] sm:$0xff]  ;;  %v2440_v38 = vpack.c.bf16 %v2433_v39, %v2432_v26 }
 0x203   : > { %v2389_v28 = vpop.f32.mrf.mxu0  ;;  %v6330_v32 = vadd.f32 %v2387_v40, %v2280_v49  ;;  %v2574_v30 = vpack.c.bf16 %v2567_v34, %v2566_v58  ;;  %v2837_v40 = vld [vmem:[%s5139_s18 + $0x88] sm:$0xff]  ;;  %v2960_v58 = vld [vmem:[%s5139_s18 + $0x31] sm:$0xff] }
 0x204   : > { %v2843_v1 = vpack.c.bf16 %v2837_v40, %v6302_v44  ;;  %v3096_v40 = vld [vmem:[%s5139_s18 + $0x42] sm:$0xff] }
 0x206   : > { %v2121_v35 = vpop.f32.mrf.mxu2 }
 0x207   : > { %v2147_v17 = vadd.f32 %v2121_v35, %v2013_v52  ;;  %v2961_v35 = vld [vmem:[%s5139_s18 + $0x39] sm:$0xff] }
 0x208   : > { %v1990_v51 = vpop.f32.mrf.mxu1  ;;  %v2265_v47 = vpop.f32.mrf.mxu3  ;;  %v2972_v7 = vpack.c.bf16 %v2961_v35, %v2960_v58  ;;  %v2964_v58 = vld [vmem:[%s5139_s18 + $0x51] sm:$0xff] }
 0x209   : > { %v2281_v61 = vadd.f32 %v6273_v16, %v2147_v17  ;;  %v2014_v54 = vadd.f32 %v1990_v51, %v6133_v42  ;;  %v3095_v17 = vld [vmem:[%s5139_s18 + $0x3a] sm:$0xff] }
 0x20b   : > { %v2392_v36 = vpop.f32.mrf.mxu0  ;;  %2535 = vmatmul.bf16.gmra.mxu1 %v2440_v38  ;;  %2669 = vmatmul.bf16.gmra.mxu2 %v2574_v30  ;;  %v6343_v11 = vadd.f32 %v2389_v28, %v2281_v61  ;;  %v3362_v38 = vld [vmem:[%s5139_s18 + $0x34] sm:$0xff]  ;;  %v3363_v30 = vld [vmem:[%s5139_s18 + $0x3c] sm:$0xff] }
 0x20c   : > { %v3374_v61 = vpack.c.bf16 %v3363_v30, %v3362_v38  ;;  %v3367_v38 = vld [vmem:[%s5139_s18 + $0x5c] sm:$0xff] }
 0x20d   : > { %3319 = vmatmul.bf16.vlgmr.msrb.gmra.mxu3 %v3240_v48 }
 0x20e   : > { %2937 = vmatmul.bf16.gmra.mxu0 %v2842_v50  ;;  %v2124_v63 = vpop.f32.mrf.mxu2 }
 0x20f   : > { %v2148_v4 = vadd.f32 %v2124_v63, %v2014_v54 }
 0x210   : > { %v1992_v16 = vpop.f32.mrf.mxu1  ;;  %v2268_v45 = vpop.f32.mrf.mxu3 }
 0x211   : > { %v2282_v42 = vadd.f32 %v6289_v6, %v2148_v4  ;;  %v2015_v0 = vadd.f32 %v1992_v16, %v6165_v23  ;;  %v3230_v6 = vld [vmem:[%s5139_s18 + $0x43] sm:$0xff] }
 0x212   : > { %v3241_v52 = vpack.c.bf16 %v6051_v5, %v3230_v6  ;;  %v3094_v5 = vld [vmem:[%s5139_s18 + $0x32] sm:$0xff] }
 0x213   : > { %v2394_v27 = vpop.f32.mrf.mxu0  ;;  %v6348_v12 = vadd.f32 %v2392_v36, %v2282_v42  ;;  %v3106_v29 = vpack.c.bf16 %v3095_v17, %v3094_v5  ;;  %v2965_v5 = vld [vmem:[%s5139_s18 + $0x59] sm:$0xff] }
 0x214   : > { %v3366_v17 = vld [vmem:[%s5139_s18 + $0x54] sm:$0xff] }
 0x216   : > { %v2126_v41 = vpop.f32.mrf.mxu2 }
 0x217   : > { %v2149_v25 = vadd.f32 %v2126_v41, %v2015_v0  ;;  %v3364_v41 = vld [vmem:[%s5139_s18 + $0x44] sm:$0xff] }
 0x218   : > { %v1995_v33 = vpop.f32.mrf.mxu1  ;;  %v2270_v49 = vpop.f32.mrf.mxu3 }
 0x219   : > { %v2283_v55 = vadd.f32 %v6310_v37, %v2149_v25  ;;  %v2016_v23 = vadd.f32 %v1995_v33, %v6181_v24  ;;  %v3365_v25 = vld [vmem:[%s5139_s18 + $0x4c] sm:$0xff]  ;;  %v2973_v33 = vpack.c.bf16 %v2963_v60, %v2962_v9  ;;  %v3100_v9 = vld [vmem:[%s5139_s18 + $0x62] sm:$0xff] }
 0x21a   : > { %v3101_v60 = vld [vmem:[%s5139_s18 + $0x6a] sm:$0xff] }
 0x21b   : > { %v2397_v59 = vpop.f32.mrf.mxu0  ;;  %2540 = vmatmul.bf16.gmra.mxu1 %v2441_v2  ;;  %2674 = vmatmul.bf16.gmra.mxu2 %v2575_v13  ;;  %v6359_v28 = vadd.f32 %v2394_v27, %v2283_v55  ;;  %v3375_v55 = vpack.c.bf16 %v3365_v25, %v3364_v41 }
 0x21d   : > { %3324 = vmatmul.bf16.gmra.mxu3 %v3241_v52  ;;  %v3243_v52 = vpack.c.bf16 %v6136_v19, %v6095_v57  ;;  %v3098_v57 = vld [vmem:[%s5139_s18 + $0x52] sm:$0xff]  ;;  %v3099_v19 = vld [vmem:[%s5139_s18 + $0x5a] sm:$0xff] }
 0x21e   : > { %2942 = vmatmul.bf16.gmra.mxu0 %v2843_v1  ;;  %v2129_v44 = vpop.f32.mrf.mxu2 }
 0x21f   : > { %v2150_v46 = vadd.f32 %v2129_v44, %v2016_v23 }
 0x220   : > { %v1997_v37 = vpop.f32.mrf.mxu1  ;;  %v2273_v39 = vpop.f32.mrf.mxu3 }
 0x221   : > { %v2284_v24 = vadd.f32 %v2263_v18, %v2150_v46  ;;  %v2017_v8 = vadd.f32 %v1997_v37, %v6199_v56  ;;  %v3232_v18 = vld [vmem:[%s5139_s18 + $0x53] sm:$0xff] }
 0x222   : > { %v3242_v63 = vpack.c.bf16 %v6092_v62, %v3232_v18  ;;  %v3097_v62 = vld [vmem:[%s5139_s18 + $0x4a] sm:$0xff] }
 0x223   : > { %v2399_v26 = vpop.f32.mrf.mxu0  ;;  %v6363_v34 = vadd.f32 %v2397_v59, %v2284_v24  ;;  %v3107_v1 = vpack.c.bf16 %v3097_v62, %v3096_v40  ;;  %v3368_v40 = vld [vmem:[%s5139_s18 + $0x64] sm:$0xff]  ;;  %v3369_v62 = vld [vmem:[%s5139_s18 + $0x6c] sm:$0xff] }
 0x226   : > { %v2131_v51 = vpop.f32.mrf.mxu2 }
 0x227   : > { %v2151_v50 = vadd.f32 %v2131_v51, %v2017_v8 }
 0x228   : > { %v2000_v22 = vpop.f32.mrf.mxu1  ;;  %v2275_v48 = vpop.f32.mrf.mxu3 }
 0x229   : > { %v2285_v54 = vadd.f32 %v2265_v47, %v2151_v50  ;;  %v2018_v56 = vadd.f32 %v2000_v22, %v6218_v31  ;;  %v2974_v50 = vpack.c.bf16 %v2965_v5, %v2964_v58  ;;  %v3376_v22 = vpack.c.bf16 %v3367_v38, %v3366_v17  ;;  %v2969_v5 = vld [vmem:[%s5139_s18 + $0x79] sm:$0xff] }
 0x22a   : > { %v3370_v17 = vld [vmem:[%s5139_s18 + $0x74] sm:$0xff]  ;;  %v3371_v38 = vld [vmem:[%s5139_s18 + $0x7c] sm:$0xff] }
 0x22b   : > { %v2402_v36 = vpop.f32.mrf.mxu0  ;;  %3051 = vmatmul.bf16.vlgmr.msra.gmra.mxu1 %v2972_v7  ;;  %3185 = vmatmul.bf16.vlgmr.msra.gmra.mxu2 %v3106_v29  ;;  %v6373_v4 = vadd.f32 %v2399_v26, %v2285_v54  ;;  %v3108_v7 = vpack.c.bf16 %v3099_v19, %v3098_v57  ;;  %v3102_v57 = vld [vmem:[%s5139_s18 + $0x72] sm:$0xff]  ;;  %v3103_v19 = vld [vmem:[%s5139_s18 + $0x7a] sm:$0xff] }
 0x22d   : > { %3329 = vmatmul.bf16.gmra.mxu3 %v3242_v63 }
 0x22e   : > { %3453 = vmatmul.bf16.vlgmr.msra.gmra.mxu0 %v3374_v61  ;;  %v2134_v16 = vpop.f32.mrf.mxu2 }
 0x22f   : > { %v2152_v42 = vadd.f32 %v2134_v16, %v2018_v56 }
 0x230   : > { %v2002_v47 = vpop.f32.mrf.mxu1  ;;  %v2784_v53 = vpop.f32.mrf.mxu3 }
 0x231   : > { %v2286_v31 = vadd.f32 %v2268_v45, %v2152_v42  ;;  %v2019_v0 = vadd.f32 %v2002_v47, %v6239_v43 }
 0x233   : > { %v2404_v27 = vpop.f32.mrf.mxu0  ;;  %v6377_v10 = vadd.f32 %v2402_v36, %v2286_v31 }
 0x236   : > { %v2136_v2 = vpop.f32.mrf.mxu2 }
 0x237   : > { %v2153_v13 = vadd.f32 %v2136_v2, %v2019_v0  ;;  %v2966_v0 = vld [vmem:[%s5139_s18 + $0x61] sm:$0xff] }
 0x238   : > { %v2005_v6 = vpop.f32.mrf.mxu1  ;;  %v2786_v59 = vpop.f32.mrf.mxu3 }
 0x239   : > { %v2287_v23 = vadd.f32 %v2270_v49, %v2153_v13  ;;  %v2020_v45 = vadd.f32 %v2005_v6, %v6255_v14  ;;  %v3109_v13 = vpack.c.bf16 %v3101_v60, %v3100_v9  ;;  %v3372_v9 = vld [vmem:[%s5139_s18 + $0x84] sm:$0xff]  ;;  %v3373_v60 = vld [vmem:[%s5139_s18 + $0x8c] sm:$0xff] }
 0x23b   : > { %v2407_v43 = vpop.f32.mrf.mxu0  ;;  %3056 = vmatmul.bf16.gmra.mxu1 %v2973_v33  ;;  %3190 = vmatmul.bf16.gmra.mxu2 %v3107_v1  ;;  %v6387_v44 = vadd.f32 %v2404_v27, %v2287_v23  ;;  %v3238_v1 = vld [vmem:[%s5139_s18 + $0x83] sm:$0xff] }
 0x23d   : > { %3334 = vmatmul.bf16.gmra.mxu3 %v3243_v52 }
 0x23e   : > { %3458 = vmatmul.bf16.gmra.mxu0 %v3375_v55  ;;  %v2139_v46 = vpop.f32.mrf.mxu2 }
 0x23f   : > { %v2154_v49 = vadd.f32 %v2139_v46, %v2020_v45 }
 0x240   : > { %v2007_v14 = vpop.f32.mrf.mxu1  ;;  %v2789_v26 = vpop.f32.mrf.mxu3 }
 0x241   : > { %v2288_v37 = vadd.f32 %v2273_v39, %v2154_v49  ;;  %v2021_v24 = vadd.f32 %v2007_v14, %v6279_v15  ;;  %v3237_v39 = vld [vmem:[%s5139_s18 + $0x7b] sm:$0xff] }
 0x242   : > { %v3244_v56 = vpack.c.bf16 %v3237_v39, %v6139_v21  ;;  %v2967_v21 = vld [vmem:[%s5139_s18 + $0x69] sm:$0xff] }
 0x243   : > { %v2409_v8 = vpop.f32.mrf.mxu0  ;;  %v6391_v35 = vadd.f32 %v2407_v43, %v2288_v37  ;;  %v2975_v2 = vpack.c.bf16 %v2967_v21, %v2966_v0  ;;  %v3104_v0 = vld [vmem:[%s5139_s18 + $0x82] sm:$0xff]  ;;  %v3105_v21 = vld [vmem:[%s5139_s18 + $0x8a] sm:$0xff] }
 0x246   : > { %v2141_v30 = vpop.f32.mrf.mxu2 }
 0x247   : > { %v2155_v51 = vadd.f32 %v2141_v30, %v2021_v24 }
 0x248   : > { %v2516_v29 = vpop.f32.mrf.mxu1  ;;  %v2791_v54 = vpop.f32.mrf.mxu3 }
 0x249   : > { %v2289_v61 = vadd.f32 %v2275_v48, %v2155_v51  ;;  %v2546_v15 = vadd.f32 %v2516_v29, %v6295_v20 }
 0x24b   : > { %v2918_v18 = vpop.f32.mrf.mxu0  ;;  %3061 = vmatmul.bf16.gmra.mxu1 %v2974_v50  ;;  %3195 = vmatmul.bf16.gmra.mxu2 %v3108_v7  ;;  %v6401_v36 = vadd.f32 %v2409_v8, %v2289_v61  ;;  %v2968_v8 = vld [vmem:[%s5139_s18 + $0x71] sm:$0xff]  ;;  %v3110_v7 = vpack.c.bf16 %v3103_v19, %v3102_v57 }
 0x24c   : > { %v2976_v50 = vpack.c.bf16 %v2969_v5, %v2968_v8 }
 0x24d   : > { %3339 = vmatmul.bf16.gmra.mxu3 %v3244_v56 }
 0x24e   : > { %3463 = vmatmul.bf16.gmra.mxu0 %v3376_v22  ;;  %v2650_v63 = vpop.f32.mrf.mxu2  ;;  %v3378_v22 = vpack.c.bf16 %v3371_v38, %v3370_v17 }
 0x24f   : > { %v2680_v16 = vadd.f32 %v2650_v63, %v2546_v15 }
 0x250   : > { %v2518_v48 = vpop.f32.mrf.mxu1  ;;  %v2794_v31 = vpop.f32.mrf.mxu3 }
 0x251   : > { %v2814_v20 = vadd.f32 %v2784_v53, %v2680_v16  ;;  %v2547_v42 = vadd.f32 %v2518_v48, %v6313_v3  ;;  %v3377_v53 = vpack.c.bf16 %v3369_v62, %v3368_v40  ;;  %v3239_v3 = vld [vmem:[%s5139_s18 + $0x8b] sm:$0xff] }
 0x252   : > { %v3245_v43 = vpack.c.bf16 %v3239_v3, %v3238_v1 }
 0x253   : > { %v2920_v47 = vpop.f32.mrf.mxu0  ;;  %v6405_v27 = vadd.f32 %v2918_v18, %v2814_v20  ;;  %v2970_v20 = vld [vmem:[%s5139_s18 + $0x81] sm:$0xff] }
 0x256   : > { %v2652_v41 = vpop.f32.mrf.mxu2 }
 0x257   : > { %v2681_v25 = vadd.f32 %v2652_v41, %v2547_v42 }
 0x258   : > { %v2521_v33 = vpop.f32.mrf.mxu1  ;;  %v2796_v45 = vpop.f32.mrf.mxu3 }
 0x259   : > { %v2815_v6 = vadd.f32 %v2786_v59, %v2681_v25  ;;  %v2548_v55 = vadd.f32 %v2521_v33, %v6330_v32  ;;  %v3111_v25 = vpack.c.bf16 %v3105_v21, %v3104_v0 }
 0x25b   : > { %v2923_v23 = vpop.f32.mrf.mxu0  ;;  %3066 = vmatmul.bf16.gmra.mxu1 %v2975_v2  ;;  %3200 = vmatmul.bf16.gmra.mxu2 %v3109_v13  ;;  %v6415_v52 = vadd.f32 %v2920_v47, %v2815_v6  ;;  %v2971_v47 = vld [vmem:[%s5139_s18 + $0x89] sm:$0xff]  ;;  %v3379_v13 = vpack.c.bf16 %v3373_v60, %v3372_v9 }
 0x25c   : > { %v2977_v41 = vpack.c.bf16 %v2971_v47, %v2970_v20 }
 0x25d   : > { %3344 = vmatmul.bf16.gmra.mxu3 %v3245_v43 }
 0x25e   : > { %3468 = vmatmul.bf16.gmra.mxu0 %v3377_v53  ;;  %v2655_v46 = vpop.f32.mrf.mxu2 }
 0x25f   : > { %v2682_v49 = vadd.f32 %v2655_v46, %v2548_v55 }
 0x260   : > { %v2523_v59 = vpop.f32.mrf.mxu1  ;;  %v2799_v24 = vpop.f32.mrf.mxu3 }
 0x261   : > { %v2816_v14 = vadd.f32 %v2789_v26, %v2682_v49  ;;  %v2549_v32 = vadd.f32 %v2523_v59, %v6343_v11 }
 0x263   : > { %v2925_v37 = vpop.f32.mrf.mxu0  ;;  %v6419_v58 = vadd.f32 %v2923_v23, %v2816_v14 }
 0x266   : > { %v2657_v30 = vpop.f32.mrf.mxu2 }
 0x267   : > { %v2683_v51 = vadd.f32 %v2657_v30, %v2549_v32 }
 0x268   : > { %v2526_v29 = vpop.f32.mrf.mxu1  ;;  %v2801_v61 = vpop.f32.mrf.mxu3 }
 0x269   : > { %v2817_v26 = vadd.f32 %v2791_v54, %v2683_v51  ;;  %v2550_v11 = vadd.f32 %v2526_v29, %v6348_v12 }
 0x26b   : > { %v2928_v39 = vpop.f32.mrf.mxu0  ;;  %3071 = vmatmul.bf16.gmra.mxu1 %v2976_v50  ;;  %3205 = vmatmul.bf16.gmra.mxu2 %v3110_v7  ;;  %v6427_v15 = vadd.f32 %v2925_v37, %v2817_v26 }
 0x26e   : > { %3473 = vmatmul.bf16.gmra.mxu0 %v3378_v22  ;;  %v2660_v18 = vpop.f32.mrf.mxu2 }
 0x26f   : > { %v2684_v56 = vadd.f32 %v2660_v18, %v2550_v11 }
 0x270   : > { %v2528_v63 = vpop.f32.mrf.mxu1  ;;  %v2804_v12 = vpop.f32.mrf.mxu3 }
 0x271   : > { %v2818_v16 = vadd.f32 %v2794_v31, %v2684_v56  ;;  %v2551_v54 = vadd.f32 %v2528_v63, %v6359_v28 }
 0x273   : > { %v2930_v48 = vpop.f32.mrf.mxu0  ;;  %v6431_v42 = vadd.f32 %v2928_v39, %v2818_v16 }
 0x276   : > { %v2662_v40 = vpop.f32.mrf.mxu2 }
 0x277   : > { %v2685_v62 = vadd.f32 %v2662_v40, %v2551_v54 }
 0x278   : > { %v2531_v2 = vpop.f32.mrf.mxu1  ;;  %v2806_v1 = vpop.f32.mrf.mxu3 }
 0x279   : > { %v2819_v33 = vadd.f32 %v2796_v45, %v2685_v62  ;;  %v2552_v31 = vadd.f32 %v2531_v2, %v6363_v34 }
 0x27b   : > { %v2933_v28 = vpop.f32.mrf.mxu0  ;;  %3076 = vmatmul.bf16.gmra.mxu1 %v2977_v41  ;;  %3210 = vmatmul.bf16.gmra.mxu2 %v3111_v25  ;;  %v6439_v53 = vadd.f32 %v2930_v48, %v2819_v33 }
 0x27e   : > { %3478 = vmatmul.bf16.gmra.mxu0 %v3379_v13  ;;  %v2665_v3 = vpop.f32.mrf.mxu2 }
 0x27f   : > { %v2686_v6 = vadd.f32 %v2665_v3, %v2552_v31  ;;  %v6463_v31 = vld [vmem:[%s6504_s2] ss:$0 sm:$0xff] }
 0x280   : > { %v2533_v55 = vpop.f32.mrf.mxu1  ;;  %v2809_v45 = vpop.f32.mrf.mxu3 }
 0x281   : > { %v2820_v23 = vadd.f32 %v2799_v24, %v2686_v6  ;;  %v2553_v43 = vadd.f32 %v2533_v55, %v6373_v4 }
 0x283   : > { %v2935_v46 = vpop.f32.mrf.mxu0  ;;  %v6442_v49 = vadd.f32 %v2933_v28, %v2820_v23 }
 0x286   : > { %v2667_v59 = vpop.f32.mrf.mxu2 }
 0x287   : > { %v2687_v14 = vadd.f32 %v2667_v59, %v2553_v43 }
 0x288   : > { %v2536_v34 = vpop.f32.mrf.mxu1  ;;  %v2811_v38 = vpop.f32.mrf.mxu3 }
 0x289   : > { %v2821_v32 = vadd.f32 %v2801_v61, %v2687_v14  ;;  %v2554_v37 = vadd.f32 %v2536_v34, %v6377_v10 }
 0x28b   : > { %v2938_v8 = vpop.f32.mrf.mxu0  ;;  %v6445_v5 = vadd.f32 %v2935_v46, %v2821_v32 }
 0x28e   : > { %v2670_v57 = vpop.f32.mrf.mxu2 }
 0x28f   : > { %v2688_v19 = vadd.f32 %v2670_v57, %v2554_v37 }
 0x290   : > { %v2538_v17 = vpop.f32.mrf.mxu1  ;;  %v3320_v11 = vpop.f32.mrf.mxu3 }
 0x291   : > { %v2822_v24 = vadd.f32 %v2804_v12, %v2688_v19  ;;  %v2555_v4 = vadd.f32 %v2538_v17, %v6387_v44 }
 0x293   : > { %v2940_v30 = vpop.f32.mrf.mxu0  ;;  %v6448_v51 = vadd.f32 %v2938_v8, %v2822_v24 }
 0x296   : > { %v2672_v50 = vpop.f32.mrf.mxu2 }
 0x297   : > { %v2689_v7 = vadd.f32 %v2672_v50, %v2555_v4 }
 0x298   : > { %v2541_v29 = vpop.f32.mrf.mxu1  ;;  %v3322_v48 = vpop.f32.mrf.mxu3 }
 0x299   : > { %v2823_v22 = vadd.f32 %v2806_v1, %v2689_v7  ;;  %v2556_v26 = vadd.f32 %v2541_v29, %v6391_v35 }
 0x29b   : > { %v2943_v10 = vpop.f32.mrf.mxu0  ;;  %v6451_v39 = vadd.f32 %v2940_v30, %v2823_v22 }
 0x29e   : > { %v2675_v61 = vpop.f32.mrf.mxu2 }
 0x29f   : > { %v2690_v18 = vadd.f32 %v2675_v61, %v2556_v26 }
 0x2a0   : > { %v2543_v56 = vpop.f32.mrf.mxu1  ;;  %v3325_v40 = vpop.f32.mrf.mxu3 }
 0x2a1   : > { %v2824_v63 = vadd.f32 %v2809_v45, %v2690_v18  ;;  %v2557_v16 = vadd.f32 %v2543_v56, %v6401_v36 }
 0x2a3   : > { %v2945_v44 = vpop.f32.mrf.mxu0  ;;  %v6454_v54 = vadd.f32 %v2943_v10, %v2824_v63 }
 0x2a6   : > { %v2677_v12 = vpop.f32.mrf.mxu2 }
 0x2a7   : > { %v2691_v20 = vadd.f32 %v2677_v12, %v2557_v16 }
 0x2a8   : > { %v3052_v47 = vpop.f32.mrf.mxu1  ;;  %v3327_v3 = vpop.f32.mrf.mxu3 }
 0x2a9   : > { %v2825_v0 = vadd.f32 %v2811_v38, %v2691_v20  ;;  %v3082_v9 = vadd.f32 %v3052_v47, %v6405_v27 }
 0x2ab   : > { %v3454_v21 = vpop.f32.mrf.mxu0  ;;  %v6456_v35 = vadd.f32 %v2945_v44, %v2825_v0 }
 0x2ae   : > { %v3186_v60 = vpop.f32.mrf.mxu2 }
 0x2af   : > { %v3216_v62 = vadd.f32 %v3186_v60, %v3082_v9 }
 0x2b0   : > { %v3054_v41 = vpop.f32.mrf.mxu1  ;;  %v3330_v8 = vpop.f32.mrf.mxu3 }
 0x2b1   : > { %v3350_v36 = vadd.f32 %v3320_v11, %v3216_v62  ;;  %v3083_v2 = vadd.f32 %v3054_v41, %v6415_v52 }
 0x2b3   : > { %v3456_v25 = vpop.f32.mrf.mxu0  ;;  %v3484_v33 = vadd.f32 %v3454_v21, %v3350_v36 }
 0x2b5   : > { %v3500_v55 = vadd.f32 %v6463_v31, %v3484_v33 }
 0x2b6   : > { %v3188_v13 = vpop.f32.mrf.mxu2 }
 0x2b7   : > { %v3217_v28 = vadd.f32 %v3188_v13, %v3083_v2  ;;  %v3512_v59 = vmax.f32 %v3500_v55, 0.0 }
 0x2b8   : > { %v3057_v1 = vpop.f32.mrf.mxu1  ;;  %v3332_v29 = vpop.f32.mrf.mxu3 }
 0x2b9   : > { %v3351_v27 = vadd.f32 %v3322_v48, %v3217_v28  ;;  %v3084_v52 = vadd.f32 %v3057_v1, %v6419_v58 }
 0x2bb   : > { %v3459_v6 = vpop.f32.mrf.mxu0  ;;  %v3485_v23 = vadd.f32 %v3456_v25, %v3351_v27 }
 0x2bd   : > { %v3501_v43 = vadd.f32 %v6463_v31, %v3485_v23 }
 0x2be   : > { %v3191_v46 = vpop.f32.mrf.mxu2 }
 0x2bf   : > { %v3513_v45 = vmax.f32 %v3501_v43, 0.0  ;;  %v3218_v14 = vadd.f32 %v3191_v46, %v3084_v52 }
 0x2c0   : > { %v3059_v34 = vpop.f32.mrf.mxu1  ;;  %v3335_v12 = vpop.f32.mrf.mxu3 }
 0x2c1   : > { %v4999_v32 = vpack.c.bf16 %v3513_v45, %v3512_v59  ;;  %v3352_v57 = vadd.f32 %v3325_v40, %v3218_v14  ;;  %v3085_v19 = vadd.f32 %v3059_v34, %v6427_v15 }
 0x2c3   : > { %v3461_v37 = vpop.f32.mrf.mxu0  ;;  %5000 = vst [vmem:[%s6472_s10] sm:$0xff] %v4999_v32   ;;  %v3486_v58 = vadd.f32 %v3459_v6, %v3352_v57 }
 0x2c5   : > { %v3502_v50 = vadd.f32 %v6463_v31, %v3486_v58 }
 0x2c6   : > { %v3193_v17 = vpop.f32.mrf.mxu2 }
 0x2c7   : > { %v3219_v38 = vadd.f32 %v3193_v17, %v3085_v19  ;;  %v3514_v11 = vmax.f32 %v3502_v50, 0.0 }
 0x2c8   : > { %v3062_v24 = vpop.f32.mrf.mxu1  ;;  %v3337_v13 = vpop.f32.mrf.mxu3 }
 0x2c9   : > { %v3353_v4 = vadd.f32 %v3327_v3, %v3219_v38  ;;  %v3086_v26 = vadd.f32 %v3062_v24, %v6431_v42 }
 0x2cb   : > { %v3464_v30 = vpop.f32.mrf.mxu0  ;;  %v3487_v7 = vadd.f32 %v3461_v37, %v3353_v4 }
 0x2cd   : > { %v3503_v22 = vadd.f32 %v6463_v31, %v3487_v7 }
 0x2ce   : > { %v3196_v10 = vpop.f32.mrf.mxu2 }
 0x2cf   : > { %v3515_v61 = vmax.f32 %v3503_v22, 0.0  ;;  %v3220_v18 = vadd.f32 %v3196_v10, %v3086_v26 }
 0x2d0   : > { %v3064_v15 = vpop.f32.mrf.mxu1  ;;  %v3340_v52 = vpop.f32.mrf.mxu3 }
 0x2d1   : > { %v5004_v56 = vpack.c.bf16 %v3515_v61, %v3514_v11  ;;  %v3354_v16 = vadd.f32 %v3330_v8, %v3220_v18  ;;  %v3087_v44 = vadd.f32 %v3064_v15, %v6439_v53 }
 0x2d3   : > { %v3466_v63 = vpop.f32.mrf.mxu0  ;;  %5026 = vst [vmem:[%s6472_s10 + $0x8] sm:$0xff] %v5004_v56   ;;  %v3488_v20 = vadd.f32 %v3464_v30, %v3354_v16 }
 0x2d5   : > { %v3504_v42 = vadd.f32 %v6463_v31, %v3488_v20 }
 0x2d6   : > { %v3198_v48 = vpop.f32.mrf.mxu2 }
 0x2d7   : > { %v3221_v47 = vadd.f32 %v3198_v48, %v3087_v44  ;;  %v3516_v25 = vmax.f32 %v3504_v42, 0.0 }
 0x2d8   : > { %v3067_v0 = vpop.f32.mrf.mxu1  ;;  %v3342_v17 = vpop.f32.mrf.mxu3 }
 0x2d9   : > { %v3355_v21 = vadd.f32 %v3332_v29, %v3221_v47  ;;  %v3088_v62 = vadd.f32 %v3067_v0, %v6442_v49 }
 0x2db   : > { %v3469_v9 = vpop.f32.mrf.mxu0  ;;  %v3489_v60 = vadd.f32 %v3466_v63, %v3355_v21 }
 0x2dd   : > { %v3505_v40 = vadd.f32 %v6463_v31, %v3489_v60 }
 0x2de   : > { %v3201_v41 = vpop.f32.mrf.mxu2 }
 0x2df   : > { %v3517_v36 = vmax.f32 %v3505_v40, 0.0  ;;  %v3222_v2 = vadd.f32 %v3201_v41, %v3088_v62 }
 0x2e0   : > { %v3069_v53 = vpop.f32.mrf.mxu1  ;;  %v3345_v10 = vpop.f32.mrf.mxu3 }
 0x2e1   : > { %v5009_v33 = vpack.c.bf16 %v3517_v36, %v3516_v25  ;;  %v3356_v1 = vadd.f32 %v3335_v12, %v3222_v2  ;;  %v3089_v3 = vadd.f32 %v3069_v53, %v6445_v5 }
 0x2e3   : > { %v3471_v28 = vpop.f32.mrf.mxu0  ;;  %5027 = vst [vmem:[%s6472_s10 + $0x10] sm:$0xff] %v5009_v33   ;;  %v3490_v6 = vadd.f32 %v3469_v9, %v3356_v1 }
 0x2e5   : > { %v3506_v49 = vadd.f32 %v6463_v31, %v3490_v6 }
 0x2e6   : > { %v3203_v27 = vpop.f32.mrf.mxu2 }
 0x2e7   : > { %v3223_v55 = vadd.f32 %v3203_v27, %v3089_v3  ;;  %v3518_v32 = vmax.f32 %v3506_v49, 0.0 }
 0x2e8   : > { %v3072_v23 = vpop.f32.mrf.mxu1  ;;  %v3347_v47 = vpop.f32.mrf.mxu3 }
 0x2e9   : > { %v3357_v43 = vadd.f32 %v3337_v13, %v3223_v55  ;;  %v3090_v14 = vadd.f32 %v3072_v23, %v6448_v51 }
 0x2eb   : > { %v3491_v46 = vadd.f32 %v3471_v28, %v3357_v43  ;;  %v3474_v59 = vpop.f32.mrf.mxu0 }
 0x2ed   : > { %v3507_v45 = vadd.f32 %v6463_v31, %v3491_v46 }
 0x2ee   : > { %v3206_v34 = vpop.f32.mrf.mxu2 }
 0x2ef   : > { %v3519_v37 = vmax.f32 %v3507_v45, 0.0  ;;  %v3224_v8 = vadd.f32 %v3206_v34, %v3090_v14 }
 0x2f0   : > { %v3074_v5 = vpop.f32.mrf.mxu1 }
 0x2f1   : > { %v5014_v57 = vpack.c.bf16 %v3519_v37, %v3518_v32  ;;  %v3358_v19 = vadd.f32 %v3340_v52, %v3224_v8  ;;  %v3091_v58 = vadd.f32 %v3074_v5, %v6451_v39 }
 0x2f3   : > { %5028 = vst [vmem:[%s6472_s10 + $0x18] sm:$0xff] %v5014_v57   ;;  %v3476_v38 = vpop.f32.mrf.mxu0  ;;  %v3492_v4 = vadd.f32 %v3474_v59, %v3358_v19 }
 0x2f5   : > { %v3508_v51 = vadd.f32 %v6463_v31, %v3492_v4 }
 0x2f6   : > { %v3208_v24 = vpop.f32.mrf.mxu2 }
 0x2f7   : > { %v3225_v30 = vadd.f32 %v3208_v24, %v3091_v58  ;;  %v3520_v61 = vmax.f32 %v3508_v51, 0.0 }
 0x2f8   : > { %v3077_v50 = vpop.f32.mrf.mxu1 }
 0x2f9   : > { %v3359_v7 = vadd.f32 %v3342_v17, %v3225_v30  ;;  %v3092_v26 = vadd.f32 %v3077_v50, %v6454_v54 }
 0x2fb   : > { %v3493_v29 = vadd.f32 %v3476_v38, %v3359_v7  ;;  %v3479_v39 = vpop.f32.mrf.mxu0 }
 0x2fd   : > { %v3509_v22 = vadd.f32 %v6463_v31, %v3493_v29 }
 0x2fe   : > { %v3211_v11 = vpop.f32.mrf.mxu2 }
 0x2ff   : > { %v3521_v18 = vmax.f32 %v3509_v22, 0.0  ;;  %v3226_v15 = vadd.f32 %v3211_v11, %v3092_v26 }
 0x300   : > { %v3079_v63 = vpop.f32.mrf.mxu1 }
 0x301   : > { %v5019_v56 = vpack.c.bf16 %v3521_v18, %v3520_v61  ;;  %v3360_v16 = vadd.f32 %v3345_v10, %v3226_v15  ;;  %v3093_v44 = vadd.f32 %v3079_v63, %v6456_v35 }
 0x303   : > { %5029 = vst [vmem:[%s6472_s10 + $0x20] sm:$0xff] %v5019_v56   ;;  %v3494_v12 = vadd.f32 %v3479_v39, %v3360_v16  ;;  %v3481_v21 = vpop.f32.mrf.mxu0 }
 0x305   : > { %v3510_v54 = vadd.f32 %v6463_v31, %v3494_v12 }
 0x306   : > { %v3213_v48 = vpop.f32.mrf.mxu2 }
 0x307   : > { %v3227_v20 = vadd.f32 %v3213_v48, %v3093_v44  ;;  %v3522_v60 = vmax.f32 %v3510_v54, 0.0 }
 0x309   : > { %v3361_v0 = vadd.f32 %v3347_v47, %v3227_v20 }
 0x30b   : > { %v3495_v9 = vadd.f32 %v3481_v21, %v3361_v0 }
 0x30d   : > { %v3511_v42 = vadd.f32 %v6463_v31, %v3495_v9 }
 0x30f   : > { %v3523_v40 = vmax.f32 %v3511_v42, 0.0 }
 0x311   : > { %v5024_v62 = vpack.c.bf16 %v3523_v40, %v3522_v60 }
 0x313   : > { %5030 = vst [vmem:[%s6472_s10 + $0x28] sm:$0xff] %v5024_v62  }
 0x314 PF: > { %s13_s12 = sadd.s32 1, %s5064_s12  }
 0x315   : > { %p10_p4 = scmp.ge.s32.totalorder %s13_s12, 4  }
 0x317   :  { %12 = sbr.rel (!%p10_p4) target bundleno = 1 (0x1), region = 86 }

</bundles_post_ra>
